<compile_context>
chip_gen: v5e
topology: v5e:2x2
jax: 0.10.0
libtpu: 0.0.40
codegen_flags: <defaults>
</compile_context>

<pallas_src>
import functools

import jax
import jax.numpy as jnp
from jax.experimental import pallas as pl
from jax.experimental.pallas import tpu as pltpu


QPAD = 128                      # lane-dense padded width of the head output
ROW_ALIGN = 16                  # bf16 sublane pack -> keep all row spans 16-aligned
VMEM_LIMIT = 32 * 1024 * 1024   # comfortably under v7x's 64 MiB physical VMEM


def _round_up(x, m):
    return ((x + m - 1) // m) * m


def _nbytes(a):
    return int(a.size) * a.dtype.itemsize


# ----------------------------- Geometry -------------------------------------
#
# Activations are row-flattened NHWC with a fixed physical row pitch wp
# (= W//2 after the 2x2 space-to-depth of the stride-2 first layer):
# row index r = h*wp + w.  A VALID KxK stride-1 conv is then
#   out[r] = sum_t x[r + off_t] @ W_t,   off_t = kh*wp + kw,
# realized as ONE matmul x @ concat_t(W_t) followed by T sublane-shifted
# lane-slice adds.  Columns w >= valid_width hold junk that is never read for
# valid outputs and is zero-weighted in the (permuted) fc weight.

def _conv_geometry(hp, wp, num_layers):
    """Row spans / tap offsets for the fused conv stack (all spans 16-aligned)."""
    oh, ow = hp - 1, wp - 1                      # 3x3 stride-2 on even H,W
    dims = [(oh, ow)]
    for _ in range(num_layers - 1):              # 3x3 stride-1 layers
        oh, ow = oh - 2, ow - 2
        dims.append((oh, ow))
    assert dims[-1][0] >= 1 and dims[-1][1] >= 1, "input too small for conv stack"

    out_rows = [(h - 1) * wp + w for (h, w) in dims]
    offsets = [tuple(dh * wp + dw for dh in range(2) for dw in range(2))]
    for _ in range(num_layers - 1):
        offsets.append(tuple(kh * wp + kw for kh in range(3) for kw in range(3)))

    keep = [0] * num_layers
    keep[-1] = _round_up(out_rows[-1], ROW_ALIGN)
    for l in range(num_layers - 2, -1, -1):
        keep[l] = _round_up(max(out_rows[l], keep[l + 1] + max(offsets[l + 1])),
                            ROW_ALIGN)
    r0_pad = _round_up(max(hp * wp, keep[0] + max(offsets[0])), ROW_ALIGN)

    # Static bound checks (pl/VMEM slices have no runtime bounds check).
    spans = [r0_pad] + keep
    for l in range(num_layers):
        assert max(offsets[l]) + keep[l] <= spans[l], (l, offsets[l], keep[l], spans[l])
        assert keep[l] >= out_rows[l]

    conv_meta = tuple(zip(offsets, keep))
    return r0_pad, conv_meta, dims, out_rows


# ------------------------ Kernel A: fused conv stack -------------------------

def _conv_stack_kernel(*refs, b_blk, conv_meta):
    nl = len(conv_meta)
    x_ref = refs[0]
    conv_refs = refs[1:1 + 2 * nl]
    o_ref = refs[-1]

    x = x_ref[...]                                     # (b_blk*rows_in, Cin) bf16
    rows_in = x.shape[0] // b_blk
    for l, (offsets, keep) in enumerate(conv_meta):
        w_all = conv_refs[2 * l][...]                  # (Cin, T*F) bf16
        bias = conv_refs[2 * l + 1][...]               # (1, 1, F) f32
        t = len(offsets)
        f = w_all.shape[1] // t
        # One MXU matmul per layer per block (tap-folded weights).
        y = jnp.dot(x, w_all, preferred_element_type=jnp.float32)
        y = y.reshape(b_blk, rows_in, t * f)           # leading-dim split (free)
        # Tap accumulation: f32 sublane shifts + lane slices (VPU/XLU slots).
        acc = y[:, offsets[0]:offsets[0] + keep, 0:f]
        for ti in range(1, t):
            off = offsets[ti]
            acc = acc + y[:, off:off + keep, ti * f:(ti + 1) * f]
        act = jnp.maximum(acc + bias, 0.0)
        x = act.astype(jnp.bfloat16).reshape(b_blk * keep, f)
        rows_in = keep
    o_ref[...] = x                                     # (b_blk*keep_last, F) bf16


# ------------------- Kernel B: fused fc + LayerNorm + Q1/Q2 ------------------

def _head_kernel(h_ref, a_ref, fcw_ref, fcb_ref, g_ref, beta_ref,
                 w1f_ref, w1a_ref, b1_ref, w2_ref, b2_ref, w3_ref, b3_ref,
                 o_ref):
    # Encoder fc (bf16 MXU) + LayerNorm (f32 stats; output_logits=True -> no tanh).
    z = jnp.dot(h_ref[...], fcw_ref[...], preferred_element_type=jnp.float32)
    z = z + fcb_ref[...]
    mu = jnp.mean(z, axis=-1, keepdims=True)
    var = jnp.mean((z - mu) * (z - mu), axis=-1, keepdims=True)
    feat = (z - mu) * jax.lax.rsqrt(var + 1e-5) * g_ref[...] + beta_ref[...]
    # Fused Q1/Q2 trunk, all f32 (no bf16 round trips): layer-1 weights are the
    # two critics concatenated, layer-2 block-diagonal, layer-3 mapped into
    # lanes 0 (q1) and 1 (q2) of a zero-padded 128-wide lane-dense output.
    h1 = (jnp.dot(feat, w1f_ref[...], preferred_element_type=jnp.float32)
          + jnp.dot(a_ref[...], w1a_ref[...], preferred_element_type=jnp.float32)
          + b1_ref[...])
    h1 = jnp.maximum(h1, 0.0)
    h2 = jnp.dot(h1, w2_ref[...], preferred_element_type=jnp.float32) + b2_ref[...]
    h2 = jnp.maximum(h2, 0.0)
    o_ref[...] = (jnp.dot(h2, w3_ref[...], preferred_element_type=jnp.float32)
                  + b3_ref[...])


# --------------------------- Parameter preparation ---------------------------

def _stride1_wall(w):
    """(F, Cin, 3, 3) torch conv weight -> tap-folded (Cin, 9*F) matrix."""
    return jnp.concatenate([w[:, :, kh, kw].T for kh in range(3) for kw in range(3)],
                           axis=1)


def _stride2_wall(w, cin):
    """Exact remap of a 3x3 stride-2 conv into a tap-folded 2x2 stride-1 conv
    over the 2x2 space-to-depth input (channels ordered (p, q, c))."""
    f = w.shape[0]
    taps = []
    for dh in range(2):
        for dw in range(2):
            m = jnp.zeros((4 * cin, f), jnp.float32)
            for p in range(2):
                for q in range(2):
                    kh, kw = 2 * dh + p, 2 * dw + q
                    if kh < 3 and kw < 3:
                        m = m.at[(2 * p + q) * cin:(2 * p + q + 1) * cin, :].set(
                            w[:, :, kh, kw].T)
            taps.append(m)
    return jnp.concatenate(taps, axis=1)                 # (4*cin, 4*F)


def init_critic_params(key, obs_shape, action_dim, hidden_dim,
                       num_layers, num_filters, feature_dim):
    c, h_in, w_in = obs_shape
    assert h_in % 2 == 0 and w_in % 2 == 0, "space-to-depth needs even H, W"
    hp, wp = h_in // 2, w_in // 2
    r0_pad, conv_meta, dims, out_rows = _conv_geometry(hp, wp, num_layers)
    keep_last = conv_meta[-1][1]

    keys = iter(jax.random.split(key, num_layers + 8))
    relu_gain = 2.0 ** 0.5
    orth = jax.nn.initializers.orthogonal()

    params = {"conv_w": [], "conv_b": []}

    # Conv stack.  torch weight_init: zero the 3x3 kernel, orthogonal
    # (gain=sqrt(2)) at the center tap, zero bias.  Layer 0 also folds /255.
    in_c, f = c, num_filters
    for layer in range(num_layers):
        w = jnp.zeros((f, in_c, 3, 3), jnp.float32)
        w = w.at[:, :, 1, 1].set(relu_gain * orth(next(keys), (f, in_c), jnp.float32))
        if layer == 0:
            w = w / 255.0                            # fold obs/255 into the weights
            w_all = _stride2_wall(w, in_c)           # (4*in_c, 4*F)
        else:
            w_all = _stride1_wall(w)                 # (F, 9*F)
        params["conv_w"].append(w_all.astype(jnp.bfloat16))
        params["conv_b"].append(jnp.zeros((1, 1, f), jnp.float32))
        in_c = f

    # Encoder fc (orthogonal W, zero bias) + LayerNorm.  fc weight rows are
    # permuted from torch's NCHW-flatten order into our (row-pitch wp, NHWC,
    # 16-aligned) layout; rows for junk positions are zero.
    oh, ow = dims[-1]
    fc_w_t = orth(next(keys), (feature_dim, f * oh * ow), jnp.float32)
    w4 = fc_w_t.reshape(feature_dim, f, oh, ow)
    dest = jnp.zeros((oh, wp, f, feature_dim), jnp.float32)
    dest = dest.at[:, :ow].set(jnp.transpose(w4, (2, 3, 1, 0)))
    dest = dest.reshape(oh * wp, f, feature_dim)
    if keep_last >= oh * wp:
        dest = jnp.pad(dest, ((0, keep_last - oh * wp), (0, 0), (0, 0)))
    else:
        assert keep_last >= out_rows[-1]
        dest = dest[:keep_last]
    params["fc_w"] = dest.reshape(keep_last * f, feature_dim).astype(jnp.bfloat16)
    params["fc_b"] = jnp.zeros((1, feature_dim), jnp.float32)
    params["ln_g"] = jnp.ones((1, feature_dim), jnp.float32)
    params["ln_b"] = jnp.zeros((1, feature_dim), jnp.float32)

    # Fused Q1/Q2 head (orthogonal W, zero bias per torch weight_init), all f32.
    hd = hidden_dim

    def q_weights():
        w1 = orth(next(keys), (hd, feature_dim + action_dim), jnp.float32)
        w2 = orth(next(keys), (hd, hd), jnp.float32)
        w3 = orth(next(keys), (1, hd), jnp.float32)
        return w1, w2, w3

    q1w1, q1w2, q1w3 = q_weights()
    q2w1, q2w2, q2w3 = q_weights()
    w1f = jnp.concatenate([q1w1[:, :feature_dim].T, q2w1[:, :feature_dim].T], 1)
    w1a = jnp.concatenate([q1w1[:, feature_dim:].T, q2w1[:, feature_dim:].T], 1)
    w2c = jnp.zeros((2 * hd, 2 * hd), jnp.float32)
    w2c = w2c.at[:hd, :hd].set(q1w2.T).at[hd:, hd:].set(q2w2.T)
    w3c = jnp.zeros((2 * hd, QPAD), jnp.float32)
    w3c = w3c.at[:hd, 0].set(q1w3[0]).at[hd:, 1].set(q2w3[0])
    params["q_w1f"] = w1f
    params["q_w1a"] = w1a
    params["q_b1"] = jnp.zeros((1, 2 * hd), jnp.float32)
    params["q_w2"] = w2c
    params["q_b2"] = jnp.zeros((1, 2 * hd), jnp.float32)
    params["q_w3"] = w3c
    params["q_b3"] = jnp.zeros((1, QPAD), jnp.float32)
    return params


# --------------------------------- Forward -----------------------------------

def critic_forward(params, obs, action, *, conv_block=8, head_block=128):
    """Returns (q1, q2), each (N, 1) f32.  All geometry is static (from shapes)."""
    n, c, h_in, w_in = obs.shape
    hp, wp = h_in // 2, w_in // 2
    nl = len(params["conv_w"])
    r0_pad, conv_meta, _, _ = _conv_geometry(hp, wp, nl)
    keep_last = conv_meta[-1][1]
    c0 = 4 * c
    f = params["conv_b"][0].shape[-1]
    a_dim = action.shape[1]

    hb = head_block if n >= head_block else conv_block
    assert hb % conv_block == 0
    n_pad = _round_up(n, hb)

    # One-time input prep: bf16 cast + 2x2 space-to-depth (makes the stride-2
    # first conv a stride-1 conv), row/batch padding.  /255 is folded into the
    # layer-0 weights.
    x = obs.astype(jnp.bfloat16).reshape(n, c, hp, 2, wp, 2)
    x = x.transpose(0, 2, 4, 3, 5, 1).reshape(n, hp * wp, c0)
    x = jnp.pad(x, ((0, n_pad - n), (0, r0_pad - hp * wp), (0, 0)))
    x = x.reshape(n_pad * r0_pad, c0)
    act = jnp.pad(action.astype(jnp.float32), ((0, n_pad - n), (0, 0)))

    # ---------------- kernel A: fused conv stack, batch-blocked ----------------
    conv_inputs, conv_specs = [], []
    for wl, bl in zip(params["conv_w"], params["conv_b"]):
        conv_inputs += [wl, bl]
        conv_specs.append(pl.BlockSpec(wl.shape, lambda i: (0, 0)))
        conv_specs.append(pl.BlockSpec(bl.shape, lambda i: (0, 0, 0)))

    conv_grid = n_pad // conv_block
    x_spec_kwargs = {}
    if conv_grid >= 3:
        # Deeper pipelining of the activation stream once there is something
        # to pipeline (review: hide the exposed HBM fetch of the next block).
        x_spec_kwargs["pipeline_mode"] = pl.Buffered(3)
    x_spec = pl.BlockSpec((conv_block * r0_pad, c0), lambda i: (i, 0),
                          **x_spec_kwargs)

    conv_flops, rows_in = 0, r0_pad
    for (offs, keep), wl in zip(conv_meta, params["conv_w"]):
        conv_flops += 2 * n_pad * rows_in * int(wl.shape[0]) * int(wl.shape[1])
        rows_in = keep
    conv_bytes = (n_pad * r0_pad * c0 * 2
                  + sum(_nbytes(a) for a in conv_inputs)
                  + n_pad * keep_last * f * 2)

    conv_out = pl.pallas_call(
        functools.partial(_conv_stack_kernel, b_blk=conv_block, conv_meta=conv_meta),
        out_shape=jax.ShapeDtypeStruct((n_pad * keep_last, f), jnp.bfloat16),
        grid=(conv_grid,),
        in_specs=[x_spec] + conv_specs,
        out_specs=pl.BlockSpec((conv_block * keep_last, f), lambda i: (i, 0)),
        compiler_params=pltpu.CompilerParams(
            dimension_semantics=("parallel",), vmem_limit_bytes=VMEM_LIMIT),
        cost_estimate=pl.CostEstimate(flops=conv_flops, transcendentals=0,
                                      bytes_accessed=conv_bytes),
    )(x, *conv_inputs)

    # Free row-major HBM reshape: (N, keep_last, F) -> (N, keep_last*F); avoids an
    # in-kernel sublane->lane relayout and gives the head a lane-dense load.
    h = conv_out.reshape(n_pad, keep_last * f)

    # ---------------- kernel B: fused fc + LayerNorm + Q1 + Q2 -----------------
    head_inputs = (h, act,
                   params["fc_w"], params["fc_b"], params["ln_g"], params["ln_b"],
                   params["q_w1f"], params["q_w1a"], params["q_b1"],
                   params["q_w2"], params["q_b2"], params["q_w3"], params["q_b3"])
    head_specs = ([pl.BlockSpec((hb, keep_last * f), lambda i: (i, 0)),
                   pl.BlockSpec((hb, a_dim), lambda i: (i, 0))]
                  + [pl.BlockSpec(a.shape, lambda i: (0, 0)) for a in head_inputs[2:]])

    feat = int(params["fc_w"].shape[1])
    hd2 = int(params["q_w2"].shape[0])
    head_flops = 2 * n_pad * (keep_last * f * feat + feat * hd2 + a_dim * hd2
                              + hd2 * hd2 + hd2 * QPAD)
    head_bytes = (n_pad * keep_last * f * 2 + n_pad * a_dim * 4
                  + sum(_nbytes(a) for a in head_inputs[2:]) + n_pad * QPAD * 4)

    out = pl.pallas_call(
        _head_kernel,
        out_shape=jax.ShapeDtypeStruct((n_pad, QPAD), jnp.float32),
        grid=(n_pad // hb,),
        in_specs=head_specs,
        out_specs=pl.BlockSpec((hb, QPAD), lambda i: (i, 0)),
        compiler_params=pltpu.CompilerParams(
            dimension_semantics=("parallel",), vmem_limit_bytes=VMEM_LIMIT),
        cost_estimate=pl.CostEstimate(flops=head_flops, transcendentals=n_pad,
                                      bytes_accessed=head_bytes),
    )(*head_inputs)

    return out[:n, 0:1], out[:n, 1:2]


# ----------------------------------- Main ------------------------------------

if __name__ == "__main__":
    obs_shape = (4, 16, 16)        # (C, H, W)
    action_dim = 6
    hidden_dim = 32
    num_layers = 2
    num_filters = 8
    encoder_feature_dim = 32
    batch = 2

    key = jax.random.PRNGKey(0)
    k_params, k_obs, k_act = jax.random.split(key, 3)

    params = init_critic_params(k_params, obs_shape, action_dim, hidden_dim,
                                num_layers, num_filters, encoder_feature_dim)

    obs = jax.random.uniform(k_obs, (batch,) + obs_shape,
                             minval=0.0, maxval=255.0, dtype=jnp.float32)
    action = jax.random.uniform(k_act, (batch, action_dim),
                                minval=-1.0, maxval=1.0, dtype=jnp.float32)

    q1, q2 = jax.jit(critic_forward)(params, obs, action)
    jax.block_until_ready((q1, q2))

    assert q1.shape == (batch, 1) and q2.shape == (batch, 1)
    assert q1.dtype == jnp.float32 and q2.dtype == jnp.float32
    assert bool(jnp.all(jnp.isfinite(q1))) and bool(jnp.all(jnp.isfinite(q2)))
    print("KERNEL_OK")
</pallas_src>

<mosaic_0001>
module attributes {stable_mosaic.version = 11 : i64} {
  func.func @_conv_stack_kernel(%arg0: i32, %arg1: memref<768x16xbf16, #tpu.memory_space<vmem>>, %arg2: memref<16x32xbf16, #tpu.memory_space<vmem>>, %arg3: memref<1x1x8xf32, #tpu.memory_space<vmem>>, %arg4: memref<8x72xbf16, #tpu.memory_space<vmem>>, %arg5: memref<1x1x8xf32, #tpu.memory_space<vmem>>, %arg6: memref<384x8xbf16, #tpu.memory_space<vmem>>) attributes {dimension_semantics = [#tpu.dimension_semantics<parallel>], iteration_bounds = array<i64: 1>, scalar_prefetch = 0 : i64, scratch_operands = 0 : i64, tpu.core_type = #tpu.core_type<tc>, window_params = [{transform_indices = @transform_0, window_bounds = array<i64: 768, 16>}, {pipeline_mode = #tpu.pipeline_mode<synchronous>, transform_indices = @transform_1, window_bounds = array<i64: 16, 32>}, {pipeline_mode = #tpu.pipeline_mode<synchronous>, transform_indices = @transform_2, window_bounds = array<i64: 1, 1, 8>}, {pipeline_mode = #tpu.pipeline_mode<synchronous>, transform_indices = @transform_3, window_bounds = array<i64: 8, 72>}, {pipeline_mode = #tpu.pipeline_mode<synchronous>, transform_indices = @transform_4, window_bounds = array<i64: 1, 1, 8>}, {transform_indices = @transform_5, window_bounds = array<i64: 384, 8>}]} {
    %c0 = arith.constant 0 : index
    %c0_0 = arith.constant 0 : index
    %0 = vector.load %arg1[%c0, %c0_0] : memref<768x16xbf16, #tpu.memory_space<vmem>>, vector<768x16xbf16>
    %c0_1 = arith.constant 0 : index
    %c0_2 = arith.constant 0 : index
    %1 = vector.load %arg2[%c0_1, %c0_2] : memref<16x32xbf16, #tpu.memory_space<vmem>>, vector<16x32xbf16>
    %c0_3 = arith.constant 0 : index
    %c0_4 = arith.constant 0 : index
    %c0_5 = arith.constant 0 : index
    %2 = vector.load %arg3[%c0_3, %c0_4, %c0_5] : memref<1x1x8xf32, #tpu.memory_space<vmem>>, vector<1x1x8xf32>
    %cst = arith.constant dense<0.000000e+00> : vector<768x32xf32>
    %3 = tpu.matmul %0, %1, %cst {dimension_numbers = #tpu.dot_dimension_numbers<[1], [0], [0], [1], [0, 0, 1, 1], [], []>} : vector<768x16xbf16>, vector<16x32xbf16>, vector<768x32xf32> -> vector<768x32xf32>
    %4 = vector.shape_cast %3 : vector<768x32xf32> to vector<8x96x32xf32>
    %5 = vector.extract_strided_slice %4 {offsets = [0, 0, 0], sizes = [8, 80, 8], strides = [1, 1, 1]} : vector<8x96x32xf32> to vector<8x80x8xf32>
    %6 = vector.extract_strided_slice %4 {offsets = [0, 1, 8], sizes = [8, 80, 8], strides = [1, 1, 1]} : vector<8x96x32xf32> to vector<8x80x8xf32>
    %7 = arith.addf %5, %6 : vector<8x80x8xf32>
    %8 = vector.extract_strided_slice %4 {offsets = [0, 8, 16], sizes = [8, 80, 8], strides = [1, 1, 1]} : vector<8x96x32xf32> to vector<8x80x8xf32>
    %9 = arith.addf %7, %8 : vector<8x80x8xf32>
    %10 = vector.extract_strided_slice %4 {offsets = [0, 9, 24], sizes = [8, 80, 8], strides = [1, 1, 1]} : vector<8x96x32xf32> to vector<8x80x8xf32>
    %11 = arith.addf %9, %10 : vector<8x80x8xf32>
    %12 = vector.broadcast %2 : vector<1x1x8xf32> to vector<8x80x8xf32>
    %13 = arith.addf %11, %12 : vector<8x80x8xf32>
    %cst_6 = arith.constant 0.000000e+00 : f32
    %14 = vector.broadcast %cst_6 : f32 to vector<8x80x8xf32>
    %15 = arith.maximumf %13, %14 : vector<8x80x8xf32>
    %16 = arith.truncf %15 : vector<8x80x8xf32> to vector<8x80x8xbf16>
    %17 = vector.shape_cast %16 : vector<8x80x8xbf16> to vector<640x8xbf16>
    %c0_7 = arith.constant 0 : index
    %c0_8 = arith.constant 0 : index
    %18 = vector.load %arg4[%c0_7, %c0_8] : memref<8x72xbf16, #tpu.memory_space<vmem>>, vector<8x72xbf16>
    %c0_9 = arith.constant 0 : index
    %c0_10 = arith.constant 0 : index
    %c0_11 = arith.constant 0 : index
    %19 = vector.load %arg5[%c0_9, %c0_10, %c0_11] : memref<1x1x8xf32, #tpu.memory_space<vmem>>, vector<1x1x8xf32>
    %cst_12 = arith.constant dense<0.000000e+00> : vector<640x72xf32>
    %20 = tpu.matmul %17, %18, %cst_12 {dimension_numbers = #tpu.dot_dimension_numbers<[1], [0], [0], [1], [0, 0, 1, 1], [], []>} : vector<640x8xbf16>, vector<8x72xbf16>, vector<640x72xf32> -> vector<640x72xf32>
    %21 = vector.shape_cast %20 : vector<640x72xf32> to vector<8x80x72xf32>
    %22 = vector.extract_strided_slice %21 {offsets = [0, 0, 0], sizes = [8, 48, 8], strides = [1, 1, 1]} : vector<8x80x72xf32> to vector<8x48x8xf32>
    %23 = vector.extract_strided_slice %21 {offsets = [0, 1, 8], sizes = [8, 48, 8], strides = [1, 1, 1]} : vector<8x80x72xf32> to vector<8x48x8xf32>
    %24 = arith.addf %22, %23 : vector<8x48x8xf32>
    %25 = vector.extract_strided_slice %21 {offsets = [0, 2, 16], sizes = [8, 48, 8], strides = [1, 1, 1]} : vector<8x80x72xf32> to vector<8x48x8xf32>
    %26 = arith.addf %24, %25 : vector<8x48x8xf32>
    %27 = vector.extract_strided_slice %21 {offsets = [0, 8, 24], sizes = [8, 48, 8], strides = [1, 1, 1]} : vector<8x80x72xf32> to vector<8x48x8xf32>
    %28 = arith.addf %26, %27 : vector<8x48x8xf32>
    %29 = vector.extract_strided_slice %21 {offsets = [0, 9, 32], sizes = [8, 48, 8], strides = [1, 1, 1]} : vector<8x80x72xf32> to vector<8x48x8xf32>
    %30 = arith.addf %28, %29 : vector<8x48x8xf32>
    %31 = vector.extract_strided_slice %21 {offsets = [0, 10, 40], sizes = [8, 48, 8], strides = [1, 1, 1]} : vector<8x80x72xf32> to vector<8x48x8xf32>
    %32 = arith.addf %30, %31 : vector<8x48x8xf32>
    %33 = vector.extract_strided_slice %21 {offsets = [0, 16, 48], sizes = [8, 48, 8], strides = [1, 1, 1]} : vector<8x80x72xf32> to vector<8x48x8xf32>
    %34 = arith.addf %32, %33 : vector<8x48x8xf32>
    %35 = vector.extract_strided_slice %21 {offsets = [0, 17, 56], sizes = [8, 48, 8], strides = [1, 1, 1]} : vector<8x80x72xf32> to vector<8x48x8xf32>
    %36 = arith.addf %34, %35 : vector<8x48x8xf32>
    %37 = vector.extract_strided_slice %21 {offsets = [0, 18, 64], sizes = [8, 48, 8], strides = [1, 1, 1]} : vector<8x80x72xf32> to vector<8x48x8xf32>
    %38 = arith.addf %36, %37 : vector<8x48x8xf32>
    %39 = vector.broadcast %19 : vector<1x1x8xf32> to vector<8x48x8xf32>
    %40 = arith.addf %38, %39 : vector<8x48x8xf32>
    %cst_13 = arith.constant 0.000000e+00 : f32
    %41 = vector.broadcast %cst_13 : f32 to vector<8x48x8xf32>
    %42 = arith.maximumf %40, %41 : vector<8x48x8xf32>
    %43 = arith.truncf %42 : vector<8x48x8xf32> to vector<8x48x8xbf16>
    %44 = vector.shape_cast %43 : vector<8x48x8xbf16> to vector<384x8xbf16>
    %c0_14 = arith.constant 0 : index
    %c0_15 = arith.constant 0 : index
    %45 = vector.load %arg6[%c0_14, %c0_15] : memref<384x8xbf16, #tpu.memory_space<vmem>>, vector<384x8xbf16>
    tpu.vector_store %arg6[%c0_14, %c0_15], %44 {strides = array<i32>} : memref<384x8xbf16, #tpu.memory_space<vmem>>, vector<384x8xbf16>,
    return
  }
  func.func @transform_0(%arg0: i32) -> (i32, i32) {
    %c0_i32 = arith.constant 0 : i32
    %c0_i32_0 = arith.constant 0 : i32
    return %arg0, %c0_i32 : i32, i32
  }
  func.func @transform_1(%arg0: i32) -> (i32, i32) {
    %c0_i32 = arith.constant 0 : i32
    %c0_i32_0 = arith.constant 0 : i32
    %c0_i32_1 = arith.constant 0 : i32
    return %c0_i32, %c0_i32_0 : i32, i32
  }
  func.func @transform_2(%arg0: i32) -> (i32, i32, i32) {
    %c0_i32 = arith.constant 0 : i32
    %c0_i32_0 = arith.constant 0 : i32
    %c0_i32_1 = arith.constant 0 : i32
    %c0_i32_2 = arith.constant 0 : i32
    return %c0_i32, %c0_i32_0, %c0_i32_1 : i32, i32, i32
  }
  func.func @transform_3(%arg0: i32) -> (i32, i32) {
    %c0_i32 = arith.constant 0 : i32
    %c0_i32_0 = arith.constant 0 : i32
    %c0_i32_1 = arith.constant 0 : i32
    return %c0_i32, %c0_i32_0 : i32, i32
  }
  func.func @transform_4(%arg0: i32) -> (i32, i32, i32) {
    %c0_i32 = arith.constant 0 : i32
    %c0_i32_0 = arith.constant 0 : i32
    %c0_i32_1 = arith.constant 0 : i32
    %c0_i32_2 = arith.constant 0 : i32
    return %c0_i32, %c0_i32_0, %c0_i32_1 : i32, i32, i32
  }
  func.func @transform_5(%arg0: i32) -> (i32, i32) {
    %c0_i32 = arith.constant 0 : i32
    %c0_i32_0 = arith.constant 0 : i32
    return %arg0, %c0_i32 : i32, i32
  }
}

module attributes {stable_mosaic.version = 11 : i64} {
  func.func @_head_kernel(%arg0: i32, %arg1: memref<8x384xbf16, #tpu.memory_space<vmem>>, %arg2: memref<8x6xf32, #tpu.memory_space<vmem>>, %arg3: memref<384x32xbf16, #tpu.memory_space<vmem>>, %arg4: memref<1x32xf32, #tpu.memory_space<vmem>>, %arg5: memref<1x32xf32, #tpu.memory_space<vmem>>, %arg6: memref<1x32xf32, #tpu.memory_space<vmem>>, %arg7: memref<32x64xf32, #tpu.memory_space<vmem>>, %arg8: memref<6x64xf32, #tpu.memory_space<vmem>>, %arg9: memref<1x64xf32, #tpu.memory_space<vmem>>, %arg10: memref<64x64xf32, #tpu.memory_space<vmem>>, %arg11: memref<1x64xf32, #tpu.memory_space<vmem>>, %arg12: memref<64x128xf32, #tpu.memory_space<vmem>>, %arg13: memref<1x128xf32, #tpu.memory_space<vmem>>, %arg14: memref<8x128xf32, #tpu.memory_space<vmem>>) attributes {dimension_semantics = [#tpu.dimension_semantics<parallel>], iteration_bounds = array<i64: 1>, scalar_prefetch = 0 : i64, scratch_operands = 0 : i64, tpu.core_type = #tpu.core_type<tc>, window_params = [{transform_indices = @transform_0, window_bounds = array<i64: 8, 384>}, {transform_indices = @transform_1, window_bounds = array<i64: 8, 6>}, {pipeline_mode = #tpu.pipeline_mode<synchronous>, transform_indices = @transform_2, window_bounds = array<i64: 384, 32>}, {pipeline_mode = #tpu.pipeline_mode<synchronous>, transform_indices = @transform_3, window_bounds = array<i64: 1, 32>}, {pipeline_mode = #tpu.pipeline_mode<synchronous>, transform_indices = @transform_4, window_bounds = array<i64: 1, 32>}, {pipeline_mode = #tpu.pipeline_mode<synchronous>, transform_indices = @transform_5, window_bounds = array<i64: 1, 32>}, {pipeline_mode = #tpu.pipeline_mode<synchronous>, transform_indices = @transform_6, window_bounds = array<i64: 32, 64>}, {pipeline_mode = #tpu.pipeline_mode<synchronous>, transform_indices = @transform_7, window_bounds = array<i64: 6, 64>}, {pipeline_mode = #tpu.pipeline_mode<synchronous>, transform_indices = @transform_8, window_bounds = array<i64: 1, 64>}, {pipeline_mode = #tpu.pipeline_mode<synchronous>, transform_indices = @transform_9, window_bounds = array<i64: 64, 64>}, {pipeline_mode = #tpu.pipeline_mode<synchronous>, transform_indices = @transform_10, window_bounds = array<i64: 1, 64>}, {pipeline_mode = #tpu.pipeline_mode<synchronous>, transform_indices = @transform_11, window_bounds = array<i64: 64, 128>}, {pipeline_mode = #tpu.pipeline_mode<synchronous>, transform_indices = @transform_12, window_bounds = array<i64: 1, 128>}, {transform_indices = @transform_13, window_bounds = array<i64: 8, 128>}]} {
    %c0 = arith.constant 0 : index
    %c0_0 = arith.constant 0 : index
    %0 = vector.load %arg1[%c0, %c0_0] : memref<8x384xbf16, #tpu.memory_space<vmem>>, vector<8x384xbf16>
    %c0_1 = arith.constant 0 : index
    %c0_2 = arith.constant 0 : index
    %1 = vector.load %arg3[%c0_1, %c0_2] : memref<384x32xbf16, #tpu.memory_space<vmem>>, vector<384x32xbf16>
    %cst = arith.constant dense<0.000000e+00> : vector<8x32xf32>
    %2 = tpu.matmul %0, %1, %cst {dimension_numbers = #tpu.dot_dimension_numbers<[1], [0], [0], [1], [0, 0, 1, 1], [], []>} : vector<8x384xbf16>, vector<384x32xbf16>, vector<8x32xf32> -> vector<8x32xf32>
    %c0_3 = arith.constant 0 : index
    %c0_4 = arith.constant 0 : index
    %3 = vector.load %arg4[%c0_3, %c0_4] : memref<1x32xf32, #tpu.memory_space<vmem>>, vector<1x32xf32>
    %4 = vector.broadcast %3 : vector<1x32xf32> to vector<8x32xf32>
    %5 = arith.addf %2, %4 : vector<8x32xf32>
    %cst_5 = arith.constant dense<0.000000e+00> : vector<8xf32>
    %6 = vector.multi_reduction <add>, %5, %cst_5 [1] : vector<8x32xf32> to vector<8xf32>
    %7 = vector.shape_cast %6 : vector<8xf32> to vector<8x1xf32>
    %cst_6 = arith.constant 3.200000e+01 : f32
    %8 = vector.broadcast %cst_6 : f32 to vector<8x1xf32>
    %9 = arith.divf %7, %8 : vector<8x1xf32>
    %10 = vector.broadcast %9 : vector<8x1xf32> to vector<8x32xf32>
    %11 = arith.subf %5, %10 : vector<8x32xf32>
    %12 = vector.broadcast %9 : vector<8x1xf32> to vector<8x32xf32>
    %13 = arith.subf %5, %12 : vector<8x32xf32>
    %14 = arith.mulf %11, %13 : vector<8x32xf32>
    %cst_7 = arith.constant dense<0.000000e+00> : vector<8xf32>
    %15 = vector.multi_reduction <add>, %14, %cst_7 [1] : vector<8x32xf32> to vector<8xf32>
    %16 = vector.shape_cast %15 : vector<8xf32> to vector<8x1xf32>
    %cst_8 = arith.constant 3.200000e+01 : f32
    %17 = vector.broadcast %cst_8 : f32 to vector<8x1xf32>
    %18 = arith.divf %16, %17 : vector<8x1xf32>
    %19 = vector.broadcast %9 : vector<8x1xf32> to vector<8x32xf32>
    %20 = arith.subf %5, %19 : vector<8x32xf32>
    %cst_9 = arith.constant 9.99999974E-6 : f32
    %21 = vector.broadcast %cst_9 : f32 to vector<8x1xf32>
    %22 = arith.addf %18, %21 : vector<8x1xf32>
    %23 = math.rsqrt %22 : vector<8x1xf32>
    %24 = vector.broadcast %23 : vector<8x1xf32> to vector<8x32xf32>
    %25 = arith.mulf %20, %24 : vector<8x32xf32>
    %c0_10 = arith.constant 0 : index
    %c0_11 = arith.constant 0 : index
    %26 = vector.load %arg5[%c0_10, %c0_11] : memref<1x32xf32, #tpu.memory_space<vmem>>, vector<1x32xf32>
    %27 = vector.broadcast %26 : vector<1x32xf32> to vector<8x32xf32>
    %28 = arith.mulf %25, %27 : vector<8x32xf32>
    %c0_12 = arith.constant 0 : index
    %c0_13 = arith.constant 0 : index
    %29 = vector.load %arg6[%c0_12, %c0_13] : memref<1x32xf32, #tpu.memory_space<vmem>>, vector<1x32xf32>
    %30 = vector.broadcast %29 : vector<1x32xf32> to vector<8x32xf32>
    %31 = arith.addf %28, %30 : vector<8x32xf32>
    %c0_14 = arith.constant 0 : index
    %c0_15 = arith.constant 0 : index
    %32 = vector.load %arg7[%c0_14, %c0_15] : memref<32x64xf32, #tpu.memory_space<vmem>>, vector<32x64xf32>
    %cst_16 = arith.constant dense<0.000000e+00> : vector<8x64xf32>
    %33 = tpu.matmul %31, %32, %cst_16 {dimension_numbers = #tpu.dot_dimension_numbers<[1], [0], [0], [1], [0, 0, 1, 1], [], []>} : vector<8x32xf32>, vector<32x64xf32>, vector<8x64xf32> -> vector<8x64xf32>
    %c0_17 = arith.constant 0 : index
    %c0_18 = arith.constant 0 : index
    %34 = vector.load %arg2[%c0_17, %c0_18] : memref<8x6xf32, #tpu.memory_space<vmem>>, vector<8x6xf32>
    %c0_19 = arith.constant 0 : index
    %c0_20 = arith.constant 0 : index
    %35 = vector.load %arg8[%c0_19, %c0_20] : memref<6x64xf32, #tpu.memory_space<vmem>>, vector<6x64xf32>
    %cst_21 = arith.constant dense<0.000000e+00> : vector<8x64xf32>
    %36 = tpu.matmul %34, %35, %cst_21 {dimension_numbers = #tpu.dot_dimension_numbers<[1], [0], [0], [1], [0, 0, 1, 1], [], []>} : vector<8x6xf32>, vector<6x64xf32>, vector<8x64xf32> -> vector<8x64xf32>
    %37 = arith.addf %33, %36 : vector<8x64xf32>
    %c0_22 = arith.constant 0 : index
    %c0_23 = arith.constant 0 : index
    %38 = vector.load %arg9[%c0_22, %c0_23] : memref<1x64xf32, #tpu.memory_space<vmem>>, vector<1x64xf32>
    %39 = vector.broadcast %38 : vector<1x64xf32> to vector<8x64xf32>
    %40 = arith.addf %37, %39 : vector<8x64xf32>
    %cst_24 = arith.constant 0.000000e+00 : f32
    %41 = vector.broadcast %cst_24 : f32 to vector<8x64xf32>
    %42 = arith.maximumf %40, %41 : vector<8x64xf32>
    %c0_25 = arith.constant 0 : index
    %c0_26 = arith.constant 0 : index
    %43 = vector.load %arg10[%c0_25, %c0_26] : memref<64x64xf32, #tpu.memory_space<vmem>>, vector<64x64xf32>
    %cst_27 = arith.constant dense<0.000000e+00> : vector<8x64xf32>
    %44 = tpu.matmul %42, %43, %cst_27 {dimension_numbers = #tpu.dot_dimension_numbers<[1], [0], [0], [1], [0, 0, 1, 1], [], []>} : vector<8x64xf32>, vector<64x64xf32>, vector<8x64xf32> -> vector<8x64xf32>
    %c0_28 = arith.constant 0 : index
    %c0_29 = arith.constant 0 : index
    %45 = vector.load %arg11[%c0_28, %c0_29] : memref<1x64xf32, #tpu.memory_space<vmem>>, vector<1x64xf32>
    %46 = vector.broadcast %45 : vector<1x64xf32> to vector<8x64xf32>
    %47 = arith.addf %44, %46 : vector<8x64xf32>
    %cst_30 = arith.constant 0.000000e+00 : f32
    %48 = vector.broadcast %cst_30 : f32 to vector<8x64xf32>
    %49 = arith.maximumf %47, %48 : vector<8x64xf32>
    %c0_31 = arith.constant 0 : index
    %c0_32 = arith.constant 0 : index
    %50 = vector.load %arg12[%c0_31, %c0_32] : memref<64x128xf32, #tpu.memory_space<vmem>>, vector<64x128xf32>
    %cst_33 = arith.constant dense<0.000000e+00> : vector<8x128xf32>
    %51 = tpu.matmul %49, %50, %cst_33 {dimension_numbers = #tpu.dot_dimension_numbers<[1], [0], [0], [1], [0, 0, 1, 1], [], []>} : vector<8x64xf32>, vector<64x128xf32>, vector<8x128xf32> -> vector<8x128xf32>
    %c0_34 = arith.constant 0 : index
    %c0_35 = arith.constant 0 : index
    %52 = vector.load %arg13[%c0_34, %c0_35] : memref<1x128xf32, #tpu.memory_space<vmem>>, vector<1x128xf32>
    %53 = vector.broadcast %52 : vector<1x128xf32> to vector<8x128xf32>
    %54 = arith.addf %51, %53 : vector<8x128xf32>
    %c0_36 = arith.constant 0 : index
    %c0_37 = arith.constant 0 : index
    %55 = vector.load %arg14[%c0_36, %c0_37] : memref<8x128xf32, #tpu.memory_space<vmem>>, vector<8x128xf32>
    tpu.vector_store %arg14[%c0_36, %c0_37], %54 {strides = array<i32>} : memref<8x128xf32, #tpu.memory_space<vmem>>, vector<8x128xf32>,
    return
  }
  func.func @transform_0(%arg0: i32) -> (i32, i32) {
    %c0_i32 = arith.constant 0 : i32
    %c0_i32_0 = arith.constant 0 : i32
    return %arg0, %c0_i32 : i32, i32
  }
  func.func @transform_1(%arg0: i32) -> (i32, i32) {
    %c0_i32 = arith.constant 0 : i32
    %c0_i32_0 = arith.constant 0 : i32
    return %arg0, %c0_i32 : i32, i32
  }
  func.func @transform_2(%arg0: i32) -> (i32, i32) {
    %c0_i32 = arith.constant 0 : i32
    %c0_i32_0 = arith.constant 0 : i32
    %c0_i32_1 = arith.constant 0 : i32
    return %c0_i32, %c0_i32_0 : i32, i32
  }
  func.func @transform_3(%arg0: i32) -> (i32, i32) {
    %c0_i32 = arith.constant 0 : i32
    %c0_i32_0 = arith.constant 0 : i32
    %c0_i32_1 = arith.constant 0 : i32
    return %c0_i32, %c0_i32_0 : i32, i32
  }
  func.func @transform_4(%arg0: i32) -> (i32, i32) {
    %c0_i32 = arith.constant 0 : i32
    %c0_i32_0 = arith.constant 0 : i32
    %c0_i32_1 = arith.constant 0 : i32
    return %c0_i32, %c0_i32_0 : i32, i32
  }
  func.func @transform_5(%arg0: i32) -> (i32, i32) {
    %c0_i32 = arith.constant 0 : i32
    %c0_i32_0 = arith.constant 0 : i32
    %c0_i32_1 = arith.constant 0 : i32
    return %c0_i32, %c0_i32_0 : i32, i32
  }
  func.func @transform_6(%arg0: i32) -> (i32, i32) {
    %c0_i32 = arith.constant 0 : i32
    %c0_i32_0 = arith.constant 0 : i32
    %c0_i32_1 = arith.constant 0 : i32
    return %c0_i32, %c0_i32_0 : i32, i32
  }
  func.func @transform_7(%arg0: i32) -> (i32, i32) {
    %c0_i32 = arith.constant 0 : i32
    %c0_i32_0 = arith.constant 0 : i32
    %c0_i32_1 = arith.constant 0 : i32
    return %c0_i32, %c0_i32_0 : i32, i32
  }
  func.func @transform_8(%arg0: i32) -> (i32, i32) {
    %c0_i32 = arith.constant 0 : i32
    %c0_i32_0 = arith.constant 0 : i32
    %c0_i32_1 = arith.constant 0 : i32
    return %c0_i32, %c0_i32_0 : i32, i32
  }
  func.func @transform_9(%arg0: i32) -> (i32, i32) {
    %c0_i32 = arith.constant 0 : i32
    %c0_i32_0 = arith.constant 0 : i32
    %c0_i32_1 = arith.constant 0 : i32
    return %c0_i32, %c0_i32_0 : i32, i32
  }
  func.func @transform_10(%arg0: i32) -> (i32, i32) {
    %c0_i32 = arith.constant 0 : i32
    %c0_i32_0 = arith.constant 0 : i32
    %c0_i32_1 = arith.constant 0 : i32
    return %c0_i32, %c0_i32_0 : i32, i32
  }
  func.func @transform_11(%arg0: i32) -> (i32, i32) {
    %c0_i32 = arith.constant 0 : i32
    %c0_i32_0 = arith.constant 0 : i32
    %c0_i32_1 = arith.constant 0 : i32
    return %c0_i32, %c0_i32_0 : i32, i32
  }
  func.func @transform_12(%arg0: i32) -> (i32, i32) {
    %c0_i32 = arith.constant 0 : i32
    %c0_i32_0 = arith.constant 0 : i32
    %c0_i32_1 = arith.constant 0 : i32
    return %c0_i32, %c0_i32_0 : i32, i32
  }
  func.func @transform_13(%arg0: i32) -> (i32, i32) {
    %c0_i32 = arith.constant 0 : i32
    %c0_i32_0 = arith.constant 0 : i32
    return %arg0, %c0_i32 : i32, i32
  }
}

</mosaic_0001>

<bundles_post_ra>
// kernel: critic_forward.3
= control target key start
LH: loop header
LB: loop body
LE: loop exit
PB: predicated region body
PF: predicated region fallthrough
CT: control target
= control target key end

     0   :  { %vm292_vm0 = vcmask 261120   ;;  %v608_v43 = vmov 32.0   ;;  %vm342_vm2 = vcmask 1045504   ;;  %vm338_vm3 = vcmask 48128   ;;  %s847_s2 = inlined_call_operand.vmem [shape: bf16[384,32], index: 2, kind: input, shape index: {}]   ;;  %s848_s3 = inlined_call_operand.vmem [shape: f32[1,32], index: 3, kind: input, shape index: {}]   ;;  %s849_s0 = inlined_call_operand.vmem [shape: bf16[8,384], index: 0, kind: input, shape index: {}]   ;;  %s850_s4 = inlined_call_operand.vmem [shape: f32[1,32], index: 4, kind: input, shape index: {}]   ;;  %s851_s5 = inlined_call_operand.vmem [shape: f32[1,32], index: 5, kind: input, shape index: {}]   ;;  %s852_s7 = inlined_call_operand.vmem [shape: f32[6,64], index: 7, kind: input, shape index: {}]   ;;  %s853_s1 = inlined_call_operand.vmem [shape: f32[8,6], index: 1, kind: input, shape index: {}]   ;;  %s854_s6 = inlined_call_operand.vmem [shape: f32[32,64], index: 6, kind: input, shape index: {}]   ;;  %s855_s8 = inlined_call_operand.vmem [shape: f32[1,64], index: 8, kind: input, shape index: {}]   ;;  %s856_s10 = inlined_call_operand.vmem [shape: f32[1,64], index: 10, kind: input, shape index: {}]   ;;  %s857_s9 = inlined_call_operand.vmem [shape: f32[64,64], index: 9, kind: input, shape index: {}]   ;;  %s858_s11 = inlined_call_operand.vmem [shape: f32[64,128], index: 11, kind: input, shape index: {}]   ;;  %s859_s12 = inlined_call_operand.vmem [shape: f32[1,128], index: 12, kind: input, shape index: {}]   ;;  %s860_s13 = inlined_call_operand.vmem [shape: f32[8,128], index: 13, kind: output, shape index: {}]  }
   0x1   :  { %v580_v0 = vld [vmem:[%s847_s2 + $0x38] sm:$0xff]  ;;  %v579_v3 = vld [vmem:[%s847_s2 + $0x30] sm:$0xff]  ;;  %v578_v6 = vld [vmem:[%s847_s2 + $0x28] sm:$0xff]  ;;  %604 = vrcp.f32 %v608_v43  ;;  %vm407_vm7 = vcmask 523264  }
   0x2   :  { %v588_v1 = vld [vmem:[%s847_s2 + $0x78] sm:$0xff]  ;;  %253 = vmatpush.bf16.msra.mxu0 %v580_v0  ;;  %v587_v4 = vld [vmem:[%s847_s2 + $0x70] sm:$0xff]  ;;  %v586_v7 = vld [vmem:[%s847_s2 + $0x68] sm:$0xff] }
   0x3   :  { %v596_v2 = vld [vmem:[%s847_s2 + $0xb8] sm:$0xff]  ;;  %266 = vmatpush.bf16.msra.mxu1 %v588_v1  ;;  %v595_v5 = vld [vmem:[%s847_s2 + $0xb0] sm:$0xff]  ;;  %v594_v8 = vld [vmem:[%s847_s2 + $0xa8] sm:$0xff] }
   0x4   :  { %279 = vmatpush.bf16.msra.mxu2 %v596_v2  ;;  %v577_v9 = vld [vmem:[%s847_s2 + $0x20] sm:$0xff]  ;;  %v576_v12 = vld [vmem:[%s847_s2 + $0x18] sm:$0xff]  ;;  %v575_v15 = vld [vmem:[%s847_s2 + $0x10] sm:$0xff] }
   0x5   :  { %v585_v10 = vld [vmem:[%s847_s2 + $0x60] sm:$0xff]  ;;  %v584_v13 = vld [vmem:[%s847_s2 + $0x58] sm:$0xff]  ;;  %v583_v16 = vld [vmem:[%s847_s2 + $0x50] sm:$0xff] }
   0x6   :  { %254 = vmatpush.bf16.msra.mxu0 %v579_v3  ;;  %v593_v11 = vld [vmem:[%s847_s2 + $0xa0] sm:$0xff]  ;;  %v592_v14 = vld [vmem:[%s847_s2 + $0x98] sm:$0xff]  ;;  %v591_v17 = vld [vmem:[%s847_s2 + $0x90] sm:$0xff] }
   0x7   :  { %267 = vmatpush.bf16.msra.mxu1 %v587_v4  ;;  %v574_v18 = vld [vmem:[%s847_s2 + $0x8] sm:$0xff]  ;;  %v44_v20 = vld [vmem:[%s849_s0] sm:$0xff]  ;;  %v605_v44 = vpop.eup %604  ;;  %v335_v57 = vld [vmem:[%s854_s6 + $0x18] sm:$0xff] }
   0x8   :  { %280 = vmatpush.bf16.msra.mxu2 %v595_v5  ;;  %v582_v19 = vld [vmem:[%s847_s2 + $0x48] sm:$0xff]  ;;  %v100_v23 = vunpack.c.l.b16 %v44_v20  ;;  %v101_v24 = vunpack.c.h.b16 %v44_v20  ;;  %v573_v25 = vld [vmem:[%s847_s2] sm:$0xff]  ;;  %v297_v45 = vmul.f32 32.0, %v605_v44  ;;  %vm301_vm1 = vweird.f32 %v605_v44  ;;  %v334_v58 = vld [vmem:[%s854_s6 + $0x10] sm:$0xff] }
   0x9   :  { %v590_v21 = vld [vmem:[%s847_s2 + $0x88] sm:$0xff]  ;;  %v581_v26 = vld [vmem:[%s847_s2 + $0x40] sm:$0xff]  ;;  %v439_v20 = vld [vmem:[%s858_s11 + $0x38] sm:$0xff] }
   0xa   :  { %255 = vmatpush.bf16.msra.mxu0 %v578_v6  ;;  %v45_v22 = vld [vmem:[%s849_s0 + $0x8] sm:$0xf]  ;;  %v589_v28 = vld [vmem:[%s847_s2 + $0x80] sm:$0xff]  ;;  %v103_v29 = vpack.c.b16 %v100_v23, %v100_v23  ;;  %v104_v30 = vpack.c.b16 %v101_v24, %v101_v24  ;;  %v298_v46 = vsub.f32 1.0, %v297_v45  ;;  %v435_v24 = vld [vmem:[%s858_s11 + $0x18] sm:$0xff] }
   0xb   :  { %268 = vmatpush.bf16.msra.mxu1 %v586_v7  ;;  %v102_v27 = vunpack.c.l.b16 %v45_v22  ;;  %v598_v32 = vld [vmem:[%s848_s3] ss:$0 sm:$0xff]  ;;  %v333_v59 = vld [vmem:[%s854_s6 + $0x8] sm:$0xff] }
   0xc   :  { %281 = vmatpush.bf16.msra.mxu2 %v594_v8  ;;  %v299_v47 = vmul.f32 %v605_v44, %v298_v46  ;;  %v337_v55 = vld [vmem:[%s852_s7] sm:$0x3f]  ;;  %v437_v22 = vld [vmem:[%s858_s11 + $0x28] sm:$0xff] }
   0xd   :  { %v105_v31 = vpack.c.b16 %v102_v27, %v102_v27  ;;  %568 = vmatpush.msk.msra.mxu3 %vm342_vm2, %v337_v55  ;;  %v336_v56 = vld [vmem:[%s853_s1] sm:$0xff] }
   0xe   :  { %256 = vmatpush.bf16.msra.mxu0 %v577_v9  ;;  %v300_v48 = vadd.f32 %v605_v44, %v299_v47  ;;  %569 = vmatmul.msk.f32.vlgmr.msra.gmra.mxu3 %vm338_vm3, %v336_v56  ;;  %v332_v60 = vld [vmem:[%s854_s6] sm:$0xff] }
   0xf   :  { %269 = vmatpush.bf16.msra.mxu1 %v585_v10  ;;  %381 = vmatpush.msrb.mxu3 %v335_v57  ;;  %v599_v6 = vld [vmem:[%s850_s4] ss:$0 sm:$0xff] }
  0x10   :  { %282 = vmatpush.bf16.msra.mxu2 %v593_v11  ;;  %v302_v49 = vsel %vm301_vm1, %v605_v44, %v300_v48  ;;  %v600_v9 = vld [vmem:[%s851_s5] ss:$0 sm:$0xff] }
  0x11   :  { %382 = vmatpush.msrb.mxu3 %v334_v58  ;;  %v436_v23 = vld [vmem:[%s858_s11 + $0x20] sm:$0xff] }
  0x12   :  { %257 = vmatpush.bf16.msra.mxu0 %v576_v12  ;;  %v402_v12 = vld [vmem:[%s857_s9 + $0x38] sm:$0xff] }
  0x13   :  { %270 = vmatpush.bf16.msra.mxu1 %v584_v13  ;;  %383 = vmatpush.msrb.mxu3 %v333_v59  ;;  %v401_v13 = vld [vmem:[%s857_s9 + $0x30] sm:$0xff] }
  0x14   :  { %283 = vmatpush.bf16.msra.mxu2 %v592_v14  ;;  %v400_v14 = vld [vmem:[%s857_s9 + $0x28] sm:$0xff] }
  0x15   :  { %384 = vmatpush.msrb.mxu3 %v332_v60 }
  0x16   :  { %258 = vmatpush.bf16.msra.mxu0 %v575_v15  ;;  %v399_v15 = vld [vmem:[%s857_s9 + $0x20] sm:$0xff] }
  0x17   :  { %271 = vmatpush.bf16.msra.mxu1 %v583_v16  ;;  %419 = vmatpush.msra.mxu3 %v402_v12  ;;  %v398_v16 = vld [vmem:[%s857_s9 + $0x18] sm:$0xff] }
  0x18   :  { %284 = vmatpush.bf16.msra.mxu2 %v591_v17  ;;  %v397_v17 = vld [vmem:[%s857_s9 + $0x10] sm:$0xff] }
  0x19   :  { %420 = vmatpush.msra.mxu3 %v401_v13 }
  0x1a   :  { %259 = vmatpush.bf16.msra.mxu0 %v574_v18  ;;  %v396_v18 = vld [vmem:[%s857_s9 + $0x8] sm:$0xff] }
  0x1b   :  { %272 = vmatpush.bf16.msra.mxu1 %v582_v19  ;;  %421 = vmatpush.msra.mxu3 %v400_v14  ;;  %v395_v19 = vld [vmem:[%s857_s9] sm:$0xff] }
  0x1c   :  { %285 = vmatpush.bf16.msra.mxu2 %v590_v21  ;;  %v438_v21 = vld [vmem:[%s858_s11 + $0x30] sm:$0xff] }
  0x1d   :  { %422 = vmatpush.msra.mxu3 %v399_v15 }
  0x1e   :  { %260 = vmatpush.bf16.msra.mxu0 %v573_v25 }
  0x1f   :  { %273 = vmatpush.bf16.msra.mxu1 %v581_v26  ;;  %423 = vmatpush.msra.mxu3 %v398_v16  ;;  %v601_v26 = vld [vmem:[%s855_s8] ss:$0 sm:$0xff] }
  0x20   :  { %286 = vmatpush.bf16.msra.mxu2 %v589_v28 }
  0x21   :  { %261 = vmatmul.bf16.vlgmr.msra.gmra.mxu0 %v103_v29  ;;  %424 = vmatpush.msra.mxu3 %v397_v17 }
  0x22   :  { %274 = vmatmul.bf16.vlgmr.msra.gmra.mxu1 %v104_v30 }
  0x23   :  { %287 = vmatmul.bf16.vlgmr.msra.gmra.mxu2 %v105_v31  ;;  %425 = vmatpush.msra.mxu3 %v396_v18  ;;  %v434_v31 = vld [vmem:[%s858_s11 + $0x10] sm:$0xff] }
  0x25   :  { %426 = vmatpush.msra.mxu3 %v395_v19 }
  0x91   :  { %v363_v25 = vpop.f32.mrf.mxu3 }
  0x9e   :  { %v262_v33 = vpop.f32.mrf.mxu0 }
  0x9f   :  { %v275_v34 = vpop.f32.mrf.mxu1  ;;  %v263_v35 = vadd.f32 %v598_v32, %v262_v33  ;;  %v433_v32 = vld [vmem:[%s858_s11 + $0x8] sm:$0xff]  ;;  %v432_v33 = vld [vmem:[%s858_s11] sm:$0xff] }
  0xa1   :  { %v276_v36 = vadd.f32 %v275_v34, %v263_v35  ;;  %v602_v34 = vld [vmem:[%s856_s10] ss:$0 sm:$0xff] }
  0xa6   :  { %v288_v37 = vpop.f32.mrf.mxu2  ;;  %v264_v39 = vpop.f32.mrf.mxu0 }
  0xa7   :  { %v289_v38 = vadd.f32 %v288_v37, %v276_v36  ;;  %v277_v40 = vpop.f32.mrf.mxu1 }
  0xa9   :  { %v293_v41 = vsel %vm292_vm0, %v289_v38, 0.0 }
  0xaa   :  { %294 = vadd.xlane.f32.xlu0 %v293_v41 }
  0xae   :  { %v290_v42 = vpop.f32.mrf.mxu2 }
 0x11d   :  { %v295_v50 = vpop.xlane.xlu0 %294 }
 0x11e   :  { %v303_v51 = vmul.f32 %v302_v49, %v295_v50 }
 0x120   :  { %v304_v52 = vsub.f32 %v289_v38, %v303_v51  ;;  %v603_v38 = vld [vmem:[%s859_s12] ss:$0 sm:$0xff] }
 0x122   :  { %v305_v53 = vmul.f32 %v304_v52, %v304_v52 }
 0x124   :  { %v306_v54 = vsel %vm292_vm0, %v305_v53, 0.0 }
 0x125   :  { %307 = vadd.xlane.f32.xlu0 %v306_v54 }
 0x198   :  { %v308_v61 = vpop.xlane.xlu0 %307 }
 0x199   :  { %v309_v62 = vmul.f32 %v308_v61, %v302_v49 }
 0x19b   :  { %v310_v63 = vadd.f32 1e-05, %v309_v62 }
 0x19d   :  { %606 = vrsqrt.f32 %v310_v63  ;;  %vm317_vm5 = vweird.f32 %v310_v63 }
 0x1a3   :  { %v607_v0 = vpop.eup %606 }
 0x1a4   :  { %v312_v1 = vmul.f32 %v607_v0, %v310_v63  ;;  %vm318_vm4 = vweird.f32 %v607_v0 }
 0x1a5   :  { %vm319_vm6 = vmor %vm317_vm5, %vm318_vm4 }
 0x1a6   :  { %v313_v2 = vmul.f32 %v607_v0, %v312_v1 }
 0x1a8   :  { %v314_v3 = vmul.f32 0.5, %v313_v2 }
 0x1aa   :  { %v315_v4 = vsub.f32 1.5, %v314_v3 }
 0x1ac   :  { %v316_v5 = vmul.f32 %v607_v0, %v315_v4 }
 0x1ae   :  { %v320_v7 = vsel %vm319_vm6, %v607_v0, %v316_v5 }
 0x1af   :  { %v321_v8 = vmul.f32 %v320_v7, %v304_v52 }
 0x1b1   :  { %v326_v10 = vmul.f32 %v599_v6, %v321_v8 }
 0x1b3   :  { %v331_v11 = vadd.f32 %v600_v9, %v326_v10 }
 0x1b5   :  { %570 = vmatmul.msk.f32.vlgmr.msrb.gmra.mxu3 %vm292_vm0, %v331_v11 }
 0x1b6   :  { %455 = vmatpush.msrb.mxu3 %v439_v20 }
 0x1b8   :  { %456 = vmatpush.msrb.mxu3 %v438_v21 }
 0x1ba   :  { %457 = vmatpush.msrb.mxu3 %v437_v22 }
 0x1bc   :  { %458 = vmatpush.msrb.mxu3 %v436_v23 }
 0x1be   :  { %459 = vmatpush.msrb.mxu3 %v435_v24 }
 0x1c0   :  { %460 = vmatpush.msrb.mxu3 %v434_v31 }
 0x1c2   :  { %461 = vmatpush.msrb.mxu3 %v433_v32 }
 0x1c4   :  { %462 = vmatpush.msrb.mxu3 %v432_v33 }
 0x238   :  { %v386_v27 = vpop.f32.mrf.mxu3 }
 0x239   :  { %v387_v28 = vadd.f32 %v386_v27, %v363_v25 }
 0x23b   :  { %v393_v29 = vadd.f32 %v601_v26, %v387_v28 }
 0x23d   :  { %v394_v30 = vmax.f32 %v393_v29, 0.0 }
 0x23f   :  { %571 = vmatmul.msk.f32.vlgmr.msra.gmra.mxu3 %vm407_vm7, %v394_v30 }
 0x2c2   :  { %v428_v35 = vpop.f32.mrf.mxu3 }
 0x2c3   :  { %v429_v36 = vadd.f32 %v602_v34, %v428_v35 }
 0x2c5   :  { %v431_v37 = vmax.f32 %v429_v36, 0.0 }
 0x2c7   :  { %572 = vmatmul.msk.f32.vlgmr.msrb.gmra.mxu3 %vm407_vm7, %v431_v37 }
 0x34a   :  { %v464_v39 = vpop.f32.mrf.mxu3 }
 0x34b   :  { %v465_v40 = vadd.f32 %v603_v38, %v464_v39 }
 0x34d   :  { %467 = vst [vmem:[%s860_s13] sm:$0xff] %v465_v40 }

// kernel: critic_forward.2
= control target key start
LH: loop header
LB: loop body
LE: loop exit
PB: predicated region body
PF: predicated region fallthrough
CT: control target
= control target key end

     0   :  { %vm366_vm0 = vcmask 130048   ;;  %s5201_s12 = smov 112   ;;  %vm848_vm1 = vcmask 1046528   ;;  %s5202_s17 = smov 120   ;;  %vm2567_vm2 = vcmask 1043456   ;;  %vm2446_vm3 = vcmask 64512   ;;  %s9807_s1 = inlined_call_operand.vmem [shape: bf16[16,32], index: 1, kind: input, shape index: {}]   ;;  %s9808_s0 = inlined_call_operand.vmem [shape: bf16[768,16], index: 0, kind: input, shape index: {}]   ;;  %s9809_s2 = inlined_call_operand.vmem [shape: f32[1,1,8], index: 2, kind: input, shape index: {}]   ;;  %s9810_s3 = inlined_call_operand.vmem [shape: bf16[8,72], index: 3, kind: input, shape index: {}]   ;;  %s9811_s4 = inlined_call_operand.vmem [shape: f32[1,1,8], index: 4, kind: input, shape index: {}]   ;;  %s9812_s5 = inlined_call_operand.vmem [shape: bf16[384,8], index: 5, kind: output, shape index: {}]  }
   0x1   :  { %v5185_v0 = vld [vmem:[%s9807_s1] sm:$0xff]  ;;  %v5159_v2 = vld [vmem:[%s9808_s0 + $0xb0] sm:$0xff]  ;;  %v5138_v4 = vld [vmem:[%s9808_s0 + $0x8] sm:$0xff]  ;;  %s5203_s18 = smov 104   ;;  %vm3124_vm4 = vcmask 1045504   ;;  %s5208_s1 = smov 64  }
   0x2   :  { %v5137_v1 = vld [vmem:[%s9808_s0] sm:$0xff]  ;;  %518 = vmatpush.bf16.msra.mxu0 %v5185_v0  ;;  %5186 = vmatpush.bf16.msra.mxu2 %v5185_v0  ;;  %v5160_v5 = vld [vmem:[%s9808_s0 + $0xb8] sm:$0xff]  ;;  %v5182_v6 = vld [vmem:[%s9808_s0 + $0x168] sm:$0xff]  ;;  %vm4800_vm5 = vcmask 60416  }
   0x3   :  { %v5181_v3 = vld [vmem:[%s9808_s0 + $0x160] sm:$0xff]  ;;  %5187 = vmatpush.bf16.msra.mxu3 %v5185_v0  ;;  %v5139_v7 = vld [vmem:[%s9808_s0 + $0x10] sm:$0xff]  ;;  %v5140_v10 = vld [vmem:[%s9808_s0 + $0x18] sm:$0xff] }
   0x4   :  { %v5161_v8 = vld [vmem:[%s9808_s0 + $0xc0] sm:$0xff]  ;;  %v5183_v9 = vld [vmem:[%s9808_s0 + $0x170] sm:$0xff]  ;;  %v5162_v11 = vld [vmem:[%s9808_s0 + $0xc8] sm:$0xff] }
   0x5   :  { %5049 = vmatmul.msk.bf16.vlgmr.msra.gmra.mxu0 %vm366_vm0, %v5137_v1  ;;  %5071 = vmatmul.msk.bf16.vlgmr.msra.gmra.mxu2 %vm366_vm0, %v5159_v2  ;;  %v5184_v12 = vld [vmem:[%s9808_s0 + $0x178] sm:$0xff]  ;;  %v5141_v13 = vld [vmem:[%s9808_s0 + $0x20] sm:$0xff]  ;;  %v5163_v14 = vld [vmem:[%s9808_s0 + $0xd0] sm:$0xff] }
   0x6   :  { %5093 = vmatmul.msk.bf16.vlgmr.msra.gmra.mxu3 %vm366_vm0, %v5181_v3  ;;  %v5142_v15 = vld [vmem:[%s9808_s0 + $0x28] sm:$0xff]  ;;  %v5164_v16 = vld [vmem:[%s9808_s0 + $0xd8] sm:$0xff]  ;;  %v5143_v17 = vld [vmem:[%s9808_s0 + $0x30] sm:$0xff] }
   0x7   :  { %v5165_v18 = vld [vmem:[%s9808_s0 + $0xe0] sm:$0xff]  ;;  %v5144_v19 = vld [vmem:[%s9808_s0 + $0x38] sm:$0xff]  ;;  %v5166_v20 = vld [vmem:[%s9808_s0 + $0xe8] sm:$0xff] }
   0x8   :  { %v5145_v21 = vld [vmem:[%s9808_s0 + $0x40] sm:$0xff]  ;;  %v5167_v22 = vld [vmem:[%s9808_s0 + $0xf0] sm:$0xff]  ;;  %v5146_v30 = vld [vmem:[%s9808_s0 + $0x48] sm:$0xff] }
   0x9   :  { %v5168_v31 = vld [vmem:[%s9808_s0 + $0xf8] sm:$0xff]  ;;  %v5147_v47 = vld [vmem:[%s9808_s0 + $0x50] sm:$0xff]  ;;  %v5169_v48 = vld [vmem:[%s9808_s0 + $0x100] sm:$0xff] }
   0xa   :  { %v5148_v55 = vld [vmem:[%s9808_s0 + $0x58] sm:$0xff]  ;;  %v5170_v56 = vld [vmem:[%s9808_s0 + $0x108] sm:$0xff] }
  0x15   :  { %5050 = vmatmul.msk.bf16.gmra.mxu0 %vm366_vm0, %v5138_v4  ;;  %5072 = vmatmul.msk.bf16.gmra.mxu2 %vm366_vm0, %v5160_v5 }
  0x16   :  { %5094 = vmatmul.msk.bf16.gmra.mxu3 %vm366_vm0, %v5182_v6  ;;  %v5149_v6 = vld [vmem:[%s9808_s0 + $0x60] sm:$0xff] }
  0x25   :  { %5051 = vmatmul.msk.bf16.gmra.mxu0 %vm366_vm0, %v5139_v7  ;;  %5073 = vmatmul.msk.bf16.gmra.mxu2 %vm366_vm0, %v5161_v8  ;;  %v5171_v7 = vld [vmem:[%s9808_s0 + $0x110] sm:$0xff] }
  0x26   :  { %5095 = vmatmul.msk.bf16.gmra.mxu3 %vm366_vm0, %v5183_v9 }
  0x35   :  { %5052 = vmatmul.msk.bf16.gmra.mxu0 %vm366_vm0, %v5140_v10  ;;  %5074 = vmatmul.msk.bf16.gmra.mxu2 %vm366_vm0, %v5162_v11 }
  0x36   :  { %5096 = vmatmul.msk.bf16.gmra.mxu3 %vm366_vm0, %v5184_v12 }
  0x45   :  { %5053 = vmatmul.msk.bf16.gmra.mxu0 %vm366_vm0, %v5141_v13  ;;  %5075 = vmatmul.msk.bf16.gmra.mxu2 %vm366_vm0, %v5163_v14  ;;  %v5150_v13 = vld [vmem:[%s9808_s0 + $0x68] sm:$0xff]  ;;  %v5172_v14 = vld [vmem:[%s9808_s0 + $0x118] sm:$0xff] }
  0x55   :  { %5054 = vmatmul.msk.bf16.gmra.mxu0 %vm366_vm0, %v5142_v15  ;;  %5076 = vmatmul.msk.bf16.gmra.mxu2 %vm366_vm0, %v5164_v16 }
  0x65   :  { %5055 = vmatmul.msk.bf16.gmra.mxu0 %vm366_vm0, %v5143_v17  ;;  %5077 = vmatmul.msk.bf16.gmra.mxu2 %vm366_vm0, %v5165_v18 }
  0x75   :  { %5056 = vmatmul.msk.bf16.gmra.mxu0 %vm366_vm0, %v5144_v19  ;;  %5078 = vmatmul.msk.bf16.gmra.mxu2 %vm366_vm0, %v5166_v20 }
  0x82   :  { %v5328_v23 = vpop.f32.mrf.mxu0 }
  0x83   :  { %v849_v33 = vrot.slane %v5328_v23, 1 }
  0x85   :  { %5057 = vmatmul.msk.bf16.gmra.mxu0 %vm366_vm0, %v5145_v21  ;;  %5079 = vmatmul.msk.bf16.gmra.mxu2 %vm366_vm0, %v5167_v22 }
  0x88   :  { %v5332_v24 = vpop.f32.mrf.mxu2 }
  0x89   :  { %10139 = vst [vmem:[#allocation2_spill] sm:$0xff] %v5332_v24  ;;  %1411 = vrot.lane.b32.xlu0 %v5332_v24, %s5201_s12  ;;  %v5336_v25 = vpop.f32.mrf.mxu3  ;;  %v9815_v28 = vrot.slane %v5332_v24, 1 }
  0x8a   :  { %10140 = vst [vmem:[#allocation3_spill] sm:$0xff] %v5336_v25  ;;  %v5338_v26 = vpop.f32.mrf.mxu0  ;;  %v9814_v36 = vrot.slane %v5336_v25, 1 }
  0x8b   :  { %1337 = vrot.lane.b32.xlu2 %v5338_v26, %s5201_s12  ;;  %v850_v34 = vrot.slane %v5338_v26, 1 }
  0x8d   :  { %v851_v39 = vsel %vm848_vm1, %v849_v33, %v850_v34 }
  0x90   :  { %v5342_v27 = vpop.f32.mrf.mxu2 }
  0x91   :  { %10141 = vst [vmem:[#allocation4_spill] sm:$0xff] %v5342_v27  ;;  %v929_v29 = vrot.slane %v5342_v27, 1  ;;  %1483 = vrot.lane.b32.xlu0 %v5336_v25, %s5201_s12  ;;  %1413 = vrot.lane.b32.xlu1 %v5342_v27, %s5201_s12  ;;  %v5363_v35 = vpop.f32.mrf.mxu3 }
  0x92   :  { %10142 = vst [vmem:[#allocation5_spill] sm:$0xff] %v5363_v35  ;;  %v1005_v37 = vrot.slane %v5363_v35, 1  ;;  %v5372_v40 = vpop.f32.mrf.mxu0 }
  0x93   :  { %v5359_v32 = vsel %vm848_vm1, %v9815_v28, %v929_v29  ;;  %v852_v42 = vrot.slane %v5372_v40, 1 }
  0x94   :  { %1093 = vrot.lane.b32.xlu2 %v5359_v32, %s5202_s17  ;;  %v5380_v41 = vsel %vm848_vm1, %v9814_v36, %v1005_v37 }
  0x95   :  { %5058 = vmatmul.msk.bf16.gmra.mxu0 %vm366_vm0, %v5146_v30  ;;  %5080 = vmatmul.msk.bf16.gmra.mxu2 %vm366_vm0, %v5168_v31  ;;  %10143 = vst [vmem:[#allocation6_spill] sm:$0xff] %v5380_v41  ;;  %v853_v44 = vsel %vm848_vm1, %v850_v34, %v852_v42  ;;  %v5151_v34 = vld [vmem:[%s9808_s0 + $0x70] sm:$0xff] }
  0x98   :  { %v635_v38 = vpop.f32.mrf.mxu2 }
  0x99   :  { %1485 = vrot.lane.b32.xlu1 %v5363_v35, %s5201_s12  ;;  %1017 = vrot.lane.b32.xlu0 %v851_v39, %s5202_s17  ;;  %v931_v45 = vrot.slane %v635_v38, 1  ;;  %v5406_v51 = vpop.f32.mrf.mxu3 }
  0x9a   :  { %v5401_v50 = vpop.f32.mrf.mxu0  ;;  %10144 = vst [vmem:[#allocation7_spill] sm:$0xff] %v5406_v51  ;;  %v1007_v58 = vrot.slane %v5406_v51, 1 }
  0x9b   :  { %v854_v52 = vrot.slane %v5401_v50, 1  ;;  %v5412_v53 = vsel %vm848_vm1, %v929_v29, %v931_v45 }
  0x9c   :  { %1165 = vrot.lane.b32.xlu2 %v5380_v41, %s5202_s17  ;;  %v5436_v62 = vsel %vm848_vm1, %v1005_v37, %v1007_v58  ;;  %v5173_v37 = vld [vmem:[%s9808_s0 + $0x120] sm:$0xff] }
  0x9d   :  { %v855_v54 = vsel %vm848_vm1, %v852_v42, %v854_v52  ;;  %10147 = vst [vmem:[#allocation10_spill] sm:$0xff] %v5436_v62 }
  0xa0   :  { %v637_v43 = vpop.f32.mrf.mxu2 }
  0xa1   :  { %v1671_v46 = vrot.slane %v637_v43, 1  ;;  %1339 = vrot.lane.b32.xlu0 %v5372_v40, %s5201_s12  ;;  %1681 = vrot.lane.b32.xlu1 %v853_v44, %s5203_s18  ;;  %v5424_v57 = vpop.f32.mrf.mxu3 }
  0xa2   :  { %10145 = vst [vmem:[#allocation8_spill] sm:$0xff] %v5424_v57  ;;  %v1009_v59 = vrot.slane %v5424_v57, 1  ;;  %v5429_v60 = vpop.f32.mrf.mxu0 }
  0xa3   :  { %v5396_v49 = vsel %vm848_vm1, %v931_v45, %v1671_v46  ;;  %v856_v0 = vrot.slane %v5429_v60, 1 }
  0xa4   :  { %1415 = vrot.lane.b32.xlu2 %v635_v38, %s5201_s12  ;;  %v5439_v63 = vsel %vm848_vm1, %v1007_v58, %v1009_v59 }
  0xa5   :  { %5059 = vmatmul.msk.bf16.gmra.mxu0 %vm366_vm0, %v5147_v47  ;;  %5081 = vmatmul.msk.bf16.gmra.mxu2 %vm366_vm0, %v5169_v48  ;;  %10148 = vst [vmem:[#allocation11_spill] sm:$0xff] %v5439_v63  ;;  %v857_v5 = vsel %vm848_vm1, %v854_v52, %v856_v0 }
  0xa8   :  { %v5433_v61 = vpop.f32.mrf.mxu2 }
  0xa9   :  { %1019 = vrot.lane.b32.xlu0 %v853_v44, %s5202_s17  ;;  %1341 = vrot.lane.b32.xlu1 %v5401_v50, %s5201_s12  ;;  %10146 = vst [vmem:[#allocation9_spill] sm:$0xff] %v5433_v61  ;;  %v5446_v1 = vpop.f32.mrf.mxu3  ;;  %v933_v20 = vrot.slane %v5433_v61, 1 }
  0xaa   :  { %10149 = vst [vmem:[#allocation12_spill] sm:$0xff] %v5446_v1  ;;  %v5450_v2 = vpop.f32.mrf.mxu0  ;;  %v1011_v3 = vrot.slane %v5446_v1, 1 }
  0xab   :  { %v858_v9 = vrot.slane %v5450_v2, 1 }
  0xac   :  { %1487 = vrot.lane.b32.xlu2 %v5406_v51, %s5201_s12  ;;  %v5466_v8 = vsel %vm848_vm1, %v1009_v59, %v1011_v3 }
  0xad   :  { %10151 = vst [vmem:[#allocation14_spill] sm:$0xff] %v5466_v8  ;;  %v859_v12 = vsel %vm848_vm1, %v856_v0, %v858_v9 }
  0xb0   :  { %v5453_v4 = vpop.f32.mrf.mxu2 }
  0xb1   :  { %1095 = vrot.lane.b32.xlu0 %v5412_v53, %s5202_s17  ;;  %1021 = vrot.lane.b32.xlu1 %v855_v54, %s5202_s17  ;;  %10150 = vst [vmem:[#allocation13_spill] sm:$0xff] %v5453_v4  ;;  %v5493_v16 = vpop.f32.mrf.mxu3  ;;  %v934_v21 = vrot.slane %v5453_v4, 1 }
  0xb2   :  { %v5473_v10 = vpop.f32.mrf.mxu0  ;;  %10153 = vst [vmem:[#allocation16_spill] sm:$0xff] %v5493_v16  ;;  %v1013_v22 = vrot.slane %v5493_v16, 1 }
  0xb3   :  { %v860_v18 = vrot.slane %v5473_v10, 1  ;;  %v935_v33 = vsel %vm848_vm1, %v933_v20, %v934_v21 }
  0xb4   :  { %1683 = vrot.lane.b32.xlu2 %v855_v54, %s5203_s18  ;;  %v5516_v31 = vsel %vm848_vm1, %v1011_v3, %v1013_v22 }
  0xb5   :  { %5060 = vmatmul.msk.bf16.gmra.mxu0 %vm366_vm0, %v5148_v55  ;;  %5082 = vmatmul.msk.bf16.gmra.mxu2 %vm366_vm0, %v5170_v56  ;;  %v861_v19 = vsel %vm848_vm1, %v858_v9, %v860_v18  ;;  %10156 = vst [vmem:[#allocation19_spill] sm:$0xff] %v5516_v31  ;;  %v5152_v55 = vld [vmem:[%s9808_s0 + $0x78] sm:$0xff]  ;;  %v5174_v56 = vld [vmem:[%s9808_s0 + $0x128] sm:$0xff] }
  0xb8   :  { %v5478_v11 = vpop.f32.mrf.mxu2 }
  0xb9   :  { %1167 = vrot.lane.b32.xlu0 %v5436_v62, %s5202_s17  ;;  %1169 = vrot.lane.b32.xlu1 %v5439_v63, %s5202_s17  ;;  %10152 = vst [vmem:[#allocation15_spill] sm:$0xff] %v5478_v11  ;;  %v5535_v42 = vpop.f32.mrf.mxu3  ;;  %v936_v47 = vrot.slane %v5478_v11, 1 }
  0xba   :  { %v5491_v15 = vpop.f32.mrf.mxu0  ;;  %10157 = vst [vmem:[#allocation20_spill] sm:$0xff] %v5535_v42  ;;  %v9813_v45 = vrot.slane %v5535_v42, 1 }
  0xbb   :  { %v862_v44 = vrot.slane %v5491_v15, 1  ;;  %v5570_v59 = vsel %vm848_vm1, %v934_v21, %v936_v47 }
  0xbc   :  { %1343 = vrot.lane.b32.xlu2 %v5429_v60, %s5201_s12  ;;  %v5553_v48 = vsel %vm848_vm1, %v1013_v22, %v9813_v45 }
  0xbd   :  { %10160 = vst [vmem:[#allocation23_spill] sm:$0xff] %v5553_v48  ;;  %v863_v52 = vsel %vm848_vm1, %v860_v18, %v862_v44  ;;  %v5175_v18 = vld [vmem:[%s9808_s0 + $0x130] sm:$0xff] }
  0xc0   :  { %v5495_v17 = vpop.f32.mrf.mxu2 }
  0xc1   :  { %1489 = vrot.lane.b32.xlu0 %v5424_v57, %s5201_s12  ;;  %1023 = vrot.lane.b32.xlu1 %v857_v5, %s5202_s17  ;;  %10154 = vst [vmem:[#allocation17_spill] sm:$0xff] %v5495_v17  ;;  %v938_v22 = vrot.slane %v5495_v17, 1 }
  0xc2   :  { %v5511_v29 = vpop.f32.mrf.mxu0 }
  0xc3   :  { %v864_v0 = vrot.slane %v5511_v29, 1 }
  0xc4   :  { %1171 = vrot.lane.b32.xlu2 %v5466_v8, %s5202_s17 }
  0xc5   :  { %5061 = vmatmul.msk.bf16.gmra.mxu0 %vm366_vm0, %v5149_v6  ;;  %5083 = vmatmul.msk.bf16.gmra.mxu2 %vm366_vm0, %v5171_v7 }
  0xc8   :  { %v5513_v30 = vpop.f32.mrf.mxu2 }
  0xc9   :  { %1685 = vrot.lane.b32.xlu0 %v857_v5, %s5203_s18  ;;  %1491 = vrot.lane.b32.xlu1 %v5446_v1, %s5201_s12  ;;  %10155 = vst [vmem:[#allocation18_spill] sm:$0xff] %v5513_v30  ;;  %v865_v5 = vsel %vm848_vm1, %v862_v44, %v864_v0  ;;  %v5618_v44 = vsel %vm848_vm1, %v936_v47, %v938_v22  ;;  %v940_v47 = vrot.slane %v5513_v30, 1 }
  0xca   :  { %v5533_v39 = vpop.f32.mrf.mxu0 }
  0xcb   :  { %v5636_v45 = vsel %vm848_vm1, %v938_v22, %v940_v47 }
  0xcc   :  { %1025 = vrot.lane.b32.xlu2 %v859_v12, %s5202_s17 }
  0xd0   :  { %v5537_v43 = vpop.f32.mrf.mxu2 }
  0xd1   :  { %1345 = vrot.lane.b32.xlu0 %v5450_v2, %s5201_s12  ;;  %1687 = vrot.lane.b32.xlu1 %v859_v12, %s5203_s18  ;;  %10158 = vst [vmem:[#allocation21_spill] sm:$0xff] %v5537_v43  ;;  %v942_v51 = vrot.slane %v5537_v43, 1 }
  0xd2   :  { %v5556_v54 = vpop.f32.mrf.mxu0 }
  0xd3   :  { %v868_v22 = vrot.slane %v5556_v54, 1 }
  0xd4   :  { %1493 = vrot.lane.b32.xlu2 %v5493_v16, %s5201_s12 }
  0xd5   :  { %5062 = vmatmul.msk.bf16.gmra.mxu0 %vm366_vm0, %v5150_v13  ;;  %5084 = vmatmul.msk.bf16.gmra.mxu2 %vm366_vm0, %v5172_v14  ;;  %v866_v13 = vrot.slane %v5533_v39, 1  ;;  %v5153_v14 = vld [vmem:[%s9808_s0 + $0x80] sm:$0xff] }
  0xd7   :  { %v867_v21 = vsel %vm848_vm1, %v864_v0, %v866_v13  ;;  %v869_v57 = vsel %vm848_vm1, %v866_v13, %v868_v22 }
  0xd8   :  { %v5567_v58 = vpop.f32.mrf.mxu2 }
  0xd9   :  { %1417 = vrot.lane.b32.xlu0 %v5453_v4, %s5201_s12  ;;  %1347 = vrot.lane.b32.xlu1 %v5473_v10, %s5201_s12  ;;  %10161 = vst [vmem:[#allocation24_spill] sm:$0xff] %v5567_v58 }
  0xda   :  { %v5582_v6 = vpop.f32.mrf.mxu0 }
  0xdc   :  { %1027 = vrot.lane.b32.xlu2 %v861_v19, %s5202_s17 }
  0xe0   :  { %v5586_v9 = vpop.f32.mrf.mxu2 }
  0xe1   :  { %1173 = vrot.lane.b32.xlu0 %v5516_v31, %s5202_s17  ;;  %1097 = vrot.lane.b32.xlu1 %v935_v33, %s5202_s17  ;;  %10164 = vst [vmem:[#allocation27_spill] sm:$0xff] %v5586_v9 }
  0xe2   :  { %v5609_v33 = vpop.f32.mrf.mxu0 }
  0xe4   :  { %1689 = vrot.lane.b32.xlu2 %v861_v19, %s5203_s18 }
  0xe5   :  { %5063 = vmatmul.msk.bf16.gmra.mxu0 %vm366_vm0, %v5151_v34  ;;  %5085 = vmatmul.msk.bf16.gmra.mxu2 %vm366_vm0, %v5173_v37  ;;  %v5531_v38 = vpop.permute.xlu2 %1337 }
  0xe8   :  { %v5613_v34 = vpop.f32.mrf.mxu2 }
  0xe9   :  { %1495 = vrot.lane.b32.xlu0 %v5535_v42, %s5201_s12  ;;  %1419 = vrot.lane.b32.xlu1 %v5478_v11, %s5201_s12  ;;  %10168 = vst [vmem:[#allocation31_spill] sm:$0xff] %v5613_v34 }
  0xec   :  { %1349 = vrot.lane.b32.xlu2 %v5491_v15, %s5201_s12 }
  0xee   :  { %v5547_v46 = vpop.permute.xlu2 %1093 }
  0xef   :  { %10159 = vst [vmem:[#allocation22_spill] sm:$0xff] %v5547_v46 }
  0xf1   :  { %1175 = vrot.lane.b32.xlu1 %v5553_v48, %s5202_s17  ;;  %1029 = vrot.lane.b32.xlu0 %v863_v52, %s5202_s17 }
  0xf4   :  { %1099 = vrot.lane.b32.xlu2 %v5570_v59, %s5202_s17 }
  0xf5   :  { %5064 = vmatmul.msk.bf16.gmra.mxu0 %vm366_vm0, %v5152_v55  ;;  %5086 = vmatmul.msk.bf16.gmra.mxu2 %vm366_vm0, %v5174_v56 }
  0xf6   :  { %v5577_v3 = vpop.permute.xlu2 %1165 }
  0xf7   :  { %10162 = vst [vmem:[#allocation25_spill] sm:$0xff] %v5577_v3 }
  0xf9   :  { %1691 = vrot.lane.b32.xlu0 %v863_v52, %s5203_s18  ;;  %1031 = vrot.lane.b32.xlu1 %v865_v5, %s5202_s17  ;;  %v2244_v52 = vld [vmem:[%s9810_s3] sm:$0xf] }
  0xfa   :  { %v2569_v55 = vsel %vm2567_vm2, %v2244_v52, 0  ;;  %v5154_v52 = vld [vmem:[%s9808_s0 + $0x88] sm:$0xff] }
  0xfb   :  { %v5584_v7 = vpop.permute.xlu0 %1411  ;;  %2578 = vmatpush.bf16.msra.mxu1 %v2569_v55  ;;  %5188 = vmatpush.bf16.msrb.mxu3 %v2569_v55 }
  0xfc   :  { %10163 = vst [vmem:[#allocation26_spill] sm:$0xff] %v5584_v7  ;;  %1421 = vrot.lane.b32.xlu2 %v5495_v17, %s5201_s12 }
  0xfe   :  { %v5590_v12 = vpop.permute.xlu2 %1415 }
  0xff   :  { %10165 = vst [vmem:[#allocation28_spill] sm:$0xff] %v5590_v12 }
 0x101   :  { %1351 = vrot.lane.b32.xlu0 %v5511_v29, %s5201_s12  ;;  %1693 = vrot.lane.b32.xlu1 %v865_v5, %s5203_s18 }
 0x103   :  { %v5602_v19 = vpop.permute.xlu0 %1483  ;;  %v5604_v20 = vpop.permute.xlu1 %1413 }
 0x104   :  { %10166 = vst [vmem:[#allocation29_spill] sm:$0xff] %v5602_v19  ;;  %1033 = vrot.lane.b32.xlu2 %v867_v21, %s5202_s17 }
 0x105   :  { %10167 = vst [vmem:[#allocation30_spill] sm:$0xff] %v5604_v20  ;;  %5065 = vmatmul.msk.bf16.gmra.mxu0 %vm366_vm0, %v5153_v14  ;;  %5087 = vmatmul.msk.bf16.gmra.mxu2 %vm366_vm0, %v5175_v18  ;;  %v5631_v14 = vpop.f32.mrf.mxu0  ;;  %v5633_v18 = vpop.f32.mrf.mxu2 }
 0x106   :  { %v5615_v37 = vpop.permute.xlu2 %1487  ;;  %10171 = vst [vmem:[#allocation34_spill] sm:$0xff] %v5633_v18 }
 0x107   :  { %10169 = vst [vmem:[#allocation32_spill] sm:$0xff] %v5615_v37 }
 0x109   :  { %1101 = vrot.lane.b32.xlu0 %v5618_v44, %s5202_s17  ;;  %1353 = vrot.lane.b32.xlu1 %v5533_v39, %s5201_s12 }
 0x10b   :  { %v5627_v56 = vpop.permute.xlu1 %1485  ;;  %v1018_v0 = vpop.permute.xlu0 %1017 }
 0x10c   :  { %10170 = vst [vmem:[#allocation33_spill] sm:$0xff] %v5627_v56  ;;  %1695 = vrot.lane.b32.xlu2 %v867_v21, %s5203_s18  ;;  %v5176_v21 = vld [vmem:[%s9808_s0 + $0x138] sm:$0xff]  ;;  %v1257_v55 = vadd.f32 %v1018_v0, %v5328_v23  ;;  %v5661_v23 = vld [vmem:[%s9809_s2] ss:$0 sm:$0xff]  ;;  %v1665_v56 = vrot.slane %v5582_v6, 1  ;;  %v5155_v6 = vld [vmem:[%s9808_s0 + $0x90] sm:$0xff] }
 0x10e   :  { %v1684_v5 = vpop.permute.xlu2 %1683  ;;  %v1577_v16 = vadd.f32 %v5531_v38, %v1257_v55  ;;  %v5669_v38 = vpop.f32.mrf.mxu2  ;;  %v5674_v55 = vsel %vm848_vm1, %v940_v47, %v942_v51  ;;  %v1666_v19 = vsel %vm848_vm1, %v868_v22, %v1665_v56  ;;  %v946_v56 = vrot.slane %v5586_v9, 1 }
 0x111   :  { %1423 = vrot.lane.b32.xlu0 %v5513_v30, %s5201_s12  ;;  %1103 = vrot.lane.b32.xlu1 %v5636_v45, %s5202_s17 }
 0x113   :  { %v1340_v36 = vpop.permute.xlu0 %1339  ;;  %v1682_v28 = vpop.permute.xlu1 %1681 }
 0x114   :  { %1355 = vrot.lane.b32.xlu2 %v5556_v54, %s5201_s12  ;;  %v1921_v0 = vadd.f32 %v1682_v28, %v1577_v16  ;;  %v5667_v54 = vpop.f32.mrf.mxu0 }
 0x115   :  { %5066 = vmatmul.msk.bf16.gmra.mxu0 %vm366_vm0, %v5154_v52  ;;  %5088 = vmatmul.msk.bf16.gmra.mxu2 %vm366_vm0, %v5176_v21 }
 0x116   :  { %v5655_v1 = vpop.permute.xlu2 %1343  ;;  %v2004_v28 = vadd.f32 %v5661_v23, %v1921_v0 }
 0x118   :  { %v2084_v3 = vmax.f32 %v2004_v28, 0.0 }
 0x119   :  { %1425 = vrot.lane.b32.xlu1 %v5537_v43, %s5201_s12  ;;  %1035 = vrot.lane.b32.xlu0 %v869_v57, %s5202_s17 }
 0x11a   :  { %v2164_v22 = vpack.c.bf16 %v2084_v3, %v2084_v3 }
 0x11b   :  { %v1020_v52 = vpop.permute.xlu0 %1019  ;;  %v5671_v21 = vpop.permute.xlu1 %1341 }
 0x11c   :  { %v1258_v16 = vadd.f32 %v1020_v52, %v5338_v26  ;;  %1105 = vrot.lane.b32.xlu2 %v5674_v55, %s5202_s17  ;;  %v5177_v26 = vld [vmem:[%s9808_s0 + $0x140] sm:$0xff]  ;;  %v2326_v17 = vunpack.c.l.b16 %v2164_v22 }
 0x11e   :  { %v1578_v13 = vadd.f32 %v1340_v36, %v1258_v16  ;;  %v5681_v37 = vpop.permute.xlu2 %1171 }
 0x11f   :  { %10172 = vst [vmem:[#allocation35_spill] sm:$0xff] %v5681_v37  ;;  %v9823_v37 = vrot.slane %v5669_v38, 1 }
 0x120   :  { %v1922_v35 = vadd.f32 %v1684_v5, %v1578_v13  ;;  %v944_v5 = vrot.slane %v5567_v58, 1  ;;  %v948_v13 = vrot.slane %v5613_v34, 1 }
 0x121   :  { %1697 = vrot.lane.b32.xlu0 %v869_v57, %s5203_s18  ;;  %1699 = vrot.lane.b32.xlu1 %v1666_v19, %s5203_s18  ;;  %v5697_v57 = vpop.f32.mrf.mxu0  ;;  %v667_v19 = vpop.f32.mrf.mxu2 }
 0x122   :  { %v2005_v36 = vadd.f32 %v5661_v23, %v1922_v35  ;;  %v1673_v28 = vrot.slane %v667_v19, 1  ;;  %v5708_v11 = vsel %vm848_vm1, %v942_v51, %v944_v5  ;;  %v5711_v3 = vsel %vm848_vm1, %v944_v5, %v946_v56 }
 0x123   :  { %v5693_v47 = vpop.permute.xlu0 %1095  ;;  %v1022_v0 = vpop.permute.xlu1 %1021  ;;  %v5727_v5 = vsel %vm848_vm1, %v946_v56, %v948_v13  ;;  %v5178_v56 = vld [vmem:[%s9808_s0 + $0x148] sm:$0xff] }
 0x124   :  { %10173 = vst [vmem:[#allocation36_spill] sm:$0xff] %v5693_v47  ;;  %1427 = vrot.lane.b32.xlu2 %v5567_v58, %s5201_s12  ;;  %v2085_v52 = vmax.f32 %v2005_v36, 0.0 }
 0x125   :  { %5067 = vmatmul.msk.bf16.gmra.mxu0 %vm366_vm0, %v5155_v6  ;;  %5089 = vmatmul.msk.bf16.gmra.mxu2 %vm366_vm0, %v5177_v26  ;;  %v5720_v6 = vsel %vm848_vm1, %v9823_v37, %v1673_v28 }
 0x126   :  { %v5703_v35 = vpop.permute.xlu2 %1025  ;;  %v2165_v16 = vpack.c.bf16 %v2085_v52, %v2085_v52 }
 0x128   :  { %v2327_v36 = vunpack.c.l.b16 %v2165_v16 }
 0x129   :  { %1107 = vrot.lane.b32.xlu0 %v5708_v11, %s5202_s17  ;;  %1109 = vrot.lane.b32.xlu1 %v5711_v3, %s5202_s17  ;;  %v5732_v22 = vpop.f32.mrf.mxu0  ;;  %v5754_v37 = vpop.f32.mrf.mxu2 }
 0x12a   :  { %v2406_v26 = vpack.c.b16 %v2327_v36, %v2326_v17  ;;  %v5156_v17 = vld [vmem:[%s9808_s0 + $0x98] sm:$0xff]  ;;  %v870_v36 = vrot.slane %v5609_v33, 1  ;;  %10178 = vst [vmem:[#allocation41_spill] sm:$0xff] %v5754_v37 }
 0x12b   :  { %v5722_v19 = vpop.permute.xlu0 %1167  ;;  %v5724_v51 = vpop.permute.xlu1 %1169 }
 0x12c   :  { %10174 = vst [vmem:[#allocation37_spill] sm:$0xff] %v5722_v19  ;;  %5097 = vmatmul.msk.bf16.vlgmr.msra.gmra.mxu1 %vm2446_vm3, %v2406_v26  ;;  %1111 = vrot.lane.b32.xlu2 %v5727_v5, %s5202_s17  ;;  %v871_v26 = vrot.slane %v5631_v14, 1 }
 0x12d   :  { %10175 = vst [vmem:[#allocation38_spill] sm:$0xff] %v5724_v51 }
 0x12e   :  { %v5734_v52 = vpop.permute.xlu2 %1493  ;;  %v872_v61 = vsel %vm848_vm1, %v870_v36, %v871_v26 }
 0x12f   :  { %10176 = vst [vmem:[#allocation39_spill] sm:$0xff] %v5734_v52  ;;  %v1259_v52 = vadd.f32 %v1022_v0, %v5372_v40  ;;  %v950_v0 = vrot.slane %v5633_v18, 1 }
 0x131   :  { %1429 = vrot.lane.b32.xlu0 %v5586_v9, %s5201_s12  ;;  %1431 = vrot.lane.b32.xlu1 %v5613_v34, %s5201_s12  ;;  %v5760_v19 = vpop.f32.mrf.mxu0  ;;  %v5775_v46 = vpop.f32.mrf.mxu2 }
 0x132   :  { %10180 = vst [vmem:[#allocation43_spill] sm:$0xff] %v5775_v46 }
 0x133   :  { %v5746_v28 = vpop.permute.xlu0 %1489  ;;  %v1024_v16 = vpop.permute.xlu1 %1023 }
 0x134   :  { %10177 = vst [vmem:[#allocation40_spill] sm:$0xff] %v5746_v28  ;;  %1433 = vrot.lane.b32.xlu2 %v5633_v18, %s5201_s12  ;;  %v873_v28 = vrot.slane %v5667_v54, 1  ;;  %v1260_v12 = vadd.f32 %v1024_v16, %v5401_v50  ;;  %v5179_v50 = vld [vmem:[%s9808_s0 + $0x150] sm:$0xff]  ;;  %v10181_v18 = vrot.slane %v5669_v38, 1 }
 0x135   :  { %5068 = vmatmul.msk.bf16.gmra.mxu0 %vm366_vm0, %v5156_v17  ;;  %5090 = vmatmul.msk.bf16.gmra.mxu2 %vm366_vm0, %v5178_v56  ;;  %v1579_v17 = vadd.f32 %v5671_v21, %v1259_v52  ;;  %v5779_v21 = vsel %vm848_vm1, %v948_v13, %v950_v0  ;;  %v5157_v52 = vld [vmem:[%s9808_s0 + $0xa0] sm:$0xff] }
 0x136   :  { %v5757_v51 = vpop.permute.xlu2 %1027  ;;  %v874_v40 = vsel %vm848_vm1, %v871_v26, %v873_v28 }
 0x139   :  { %1357 = vrot.lane.b32.xlu0 %v5631_v14, %s5201_s12  ;;  %1037 = vrot.lane.b32.xlu1 %v872_v61, %s5202_s17  ;;  %v5791_v16 = vpop.f32.mrf.mxu0 }
 0x13b   :  { %v1686_v56 = vpop.permute.xlu0 %1685  ;;  %v5767_v4 = vpop.permute.xlu1 %1491 }
 0x13c   :  { %10179 = vst [vmem:[#allocation42_spill] sm:$0xff] %v5767_v4  ;;  %v1923_v20 = vadd.f32 %v1686_v56, %v1579_v17  ;;  %1039 = vrot.lane.b32.xlu2 %v874_v40, %s5202_s17 }
 0x13e   :  { %v5773_v36 = vpop.permute.xlu2 %1689  ;;  %v2006_v61 = vadd.f32 %v5661_v23, %v1923_v20  ;;  %v1580_v20 = vadd.f32 %v5655_v1, %v1260_v12  ;;  %v5803_v1 = vsel %vm848_vm1, %v950_v0, %v10181_v18  ;;  %v5809_v12 = vpop.f32.mrf.mxu2 }
 0x13f   :  { %10182 = vst [vmem:[#allocation44_spill] sm:$0xff] %v5809_v12 }
 0x140   :  { %v2086_v17 = vmax.f32 %v2006_v61, 0.0 }
 0x141   :  { %1113 = vrot.lane.b32.xlu0 %v5779_v21, %s5202_s17  ;;  %1359 = vrot.lane.b32.xlu1 %v5667_v54, %s5201_s12 }
 0x142   :  { %v2166_v27 = vpack.c.bf16 %v2086_v17, %v2086_v17  ;;  %v879_v17 = vrot.slane %v5760_v19, 1 }
 0x143   :  { %v1346_v13 = vpop.permute.xlu0 %1345  ;;  %v1688_v26 = vpop.permute.xlu1 %1687 }
 0x144   :  { %v1924_v56 = vadd.f32 %v1688_v26, %v1580_v20  ;;  %1701 = vrot.lane.b32.xlu2 %v874_v40, %s5203_s18  ;;  %v5815_v20 = vpop.f32.mrf.mxu0  ;;  %v2328_v18 = vunpack.c.l.b16 %v2166_v27  ;;  %v5158_v27 = vld [vmem:[%s9808_s0 + $0xa8] sm:$0xff] }
 0x145   :  { %5069 = vmatmul.msk.bf16.gmra.mxu0 %vm366_vm0, %v5157_v52  ;;  %5091 = vmatmul.msk.bf16.gmra.mxu2 %vm366_vm0, %v5179_v50  ;;  %v875_v50 = vrot.slane %v5697_v57, 1  ;;  %v883_v43 = vrot.slane %v5815_v20, 1 }
 0x146   :  { %v2007_v4 = vadd.f32 %v5661_v23, %v1924_v56  ;;  %v5798_v47 = vpop.permute.xlu2 %1349 }
 0x148   :  { %v2087_v7 = vmax.f32 %v2007_v4, 0.0  ;;  %v877_v4 = vrot.slane %v5732_v22, 1 }
 0x149   :  { %1435 = vrot.lane.b32.xlu0 %v5669_v38, %s5201_s12  ;;  %1115 = vrot.lane.b32.xlu1 %v5803_v1, %s5202_s17 }
 0x14a   :  { %v2167_v40 = vpack.c.bf16 %v2087_v7, %v2087_v7  ;;  %v876_v7 = vsel %vm848_vm1, %v873_v28, %v875_v50  ;;  %v878_v56 = vsel %vm848_vm1, %v875_v50, %v877_v4  ;;  %v880_v28 = vsel %vm848_vm1, %v877_v4, %v879_v17 }
 0x14b   :  { %v5811_v61 = vpop.permute.xlu0 %1417  ;;  %v1348_v52 = vpop.permute.xlu1 %1347  ;;  %v1261_v4 = vadd.f32 %v5703_v35, %v5429_v60 }
 0x14c   :  { %10183 = vst [vmem:[#allocation45_spill] sm:$0xff] %v5811_v61  ;;  %v2329_v0 = vunpack.c.l.b16 %v2167_v40  ;;  %1361 = vrot.lane.b32.xlu2 %v5697_v57, %s5201_s12  ;;  %v5180_v40 = vld [vmem:[%s9808_s0 + $0x158] sm:$0xff]  ;;  %v5843_v50 = vpop.f32.mrf.mxu0 }
 0x14e   :  { %v5819_v38 = vpop.permute.xlu2 %1099  ;;  %v2407_v26 = vpack.c.b16 %v2329_v0, %v2328_v18 }
 0x14f   :  { %10184 = vst [vmem:[#allocation46_spill] sm:$0xff] %v5819_v38 }
 0x150   :  { %5098 = vmatmul.msk.bf16.gmra.mxu1 %vm2446_vm3, %v2407_v26  ;;  %v5838_v26 = vpop.f32.mrf.mxu2 }
 0x151   :  { %1041 = vrot.lane.b32.xlu0 %v876_v7, %s5202_s17  ;;  %1043 = vrot.lane.b32.xlu1 %v878_v56, %s5202_s17  ;;  %10187 = vst [vmem:[#allocation49_spill] sm:$0xff] %v5838_v26 }
 0x153   :  { %v5833_v18 = vpop.permute.xlu0 %1173  ;;  %v5835_v0 = vpop.permute.xlu1 %1097 }
 0x154   :  { %10185 = vst [vmem:[#allocation47_spill] sm:$0xff] %v5833_v18  ;;  %1045 = vrot.lane.b32.xlu2 %v880_v28, %s5202_s17  ;;  %v5860_v38 = vpop.f32.mrf.mxu0 }
 0x155   :  { %10186 = vst [vmem:[#allocation48_spill] sm:$0xff] %v5835_v0  ;;  %5070 = vmatmul.msk.bf16.gmra.mxu0 %vm366_vm0, %v5158_v27  ;;  %5092 = vmatmul.msk.bf16.gmra.mxu2 %vm366_vm0, %v5180_v40 }
 0x156   :  { %v5845_v61 = vpop.permute.xlu2 %1421 }
 0x157   :  { %10188 = vst [vmem:[#allocation50_spill] sm:$0xff] %v5845_v61  ;;  %v1581_v61 = vadd.f32 %v1346_v13, %v1261_v4  ;;  %v955_v13 = vrot.slane %v5775_v46, 1 }
 0x158   :  { %v5856_v27 = vpop.f32.mrf.mxu2 }
 0x159   :  { %1703 = vrot.lane.b32.xlu0 %v876_v7, %s5203_s18  ;;  %1705 = vrot.lane.b32.xlu1 %v878_v56, %s5203_s18  ;;  %10191 = vst [vmem:[#allocation53_spill] sm:$0xff] %v5856_v27  ;;  %v1925_v60 = vadd.f32 %v5773_v36, %v1581_v61 }
 0x15b   :  { %v5849_v18 = vpop.permute.xlu0 %1495  ;;  %v5851_v0 = vpop.permute.xlu1 %1419 }
 0x15c   :  { %10189 = vst [vmem:[#allocation51_spill] sm:$0xff] %v5849_v18  ;;  %1707 = vrot.lane.b32.xlu2 %v880_v28, %s5203_s18  ;;  %v881_v28 = vrot.slane %v5791_v16, 1  ;;  %v954_v18 = vrot.slane %v5754_v37, 1  ;;  %v5883_v36 = vpop.f32.mrf.mxu0 }
 0x15d   :  { %10190 = vst [vmem:[#allocation52_spill] sm:$0xff] %v5851_v0  ;;  %v1262_v0 = vadd.f32 %v5757_v51, %v5450_v2 }
 0x15e   :  { %v5858_v40 = vpop.permute.xlu2 %1033  ;;  %v882_v34 = vsel %vm848_vm1, %v879_v17, %v881_v28  ;;  %v956_v9 = vsel %vm848_vm1, %v954_v18, %v955_v13  ;;  %v884_v48 = vsel %vm848_vm1, %v881_v28, %v883_v43 }
 0x15f   :  { %v1582_v61 = vadd.f32 %v1348_v52, %v1262_v0 }
 0x160   :  { %v5874_v4 = vpop.f32.mrf.mxu2 }
 0x161   :  { %1363 = vrot.lane.b32.xlu0 %v5732_v22, %s5201_s12  ;;  %1365 = vrot.lane.b32.xlu1 %v5760_v19, %s5201_s12  ;;  %10193 = vst [vmem:[#allocation55_spill] sm:$0xff] %v5874_v4 }
 0x163   :  { %v5866_v7 = vpop.permute.xlu1 %1175  ;;  %v1030_v56 = vpop.permute.xlu0 %1029 }
 0x164   :  { %10192 = vst [vmem:[#allocation54_spill] sm:$0xff] %v5866_v7  ;;  %1367 = vrot.lane.b32.xlu2 %v5791_v16, %s5201_s12  ;;  %v2008_v7 = vadd.f32 %v5661_v23, %v1925_v60  ;;  %v1263_v51 = vadd.f32 %v1030_v56, %v5473_v10  ;;  %v5899_v56 = vpop.f32.mrf.mxu0 }
 0x166   :  { %v1696_v35 = vpop.permute.xlu2 %1695  ;;  %v2088_v30 = vmax.f32 %v2008_v7, 0.0 }
 0x168   :  { %v2168_v52 = vpack.c.bf16 %v2088_v30, %v2088_v30  ;;  %v5895_v18 = vpop.f32.mrf.mxu2 }
 0x169   :  { %1437 = vrot.lane.b32.xlu1 %v5775_v46, %s5201_s12  ;;  %1047 = vrot.lane.b32.xlu0 %v882_v34, %s5202_s17  ;;  %10194 = vst [vmem:[#allocation56_spill] sm:$0xff] %v5895_v18 }
 0x16a   :  { %v2330_v30 = vunpack.c.l.b16 %v2168_v52 }
 0x16b   :  { %v1692_v37 = vpop.permute.xlu0 %1691  ;;  %v1032_v58 = vpop.permute.xlu1 %1031 }
 0x16c   :  { %v1926_v2 = vadd.f32 %v1692_v37, %v1582_v61  ;;  %1117 = vrot.lane.b32.xlu2 %v956_v9, %s5202_s17  ;;  %v1264_v37 = vadd.f32 %v1032_v58, %v5491_v15  ;;  %v1583_v9 = vadd.f32 %v5798_v47, %v1263_v51 }
 0x16e   :  { %v2009_v17 = vadd.f32 %v5661_v23, %v1926_v2  ;;  %v5890_v60 = vpop.permute.xlu2 %1355 }
 0x170   :  { %v2089_v46 = vmax.f32 %v2009_v17, 0.0 }
 0x171   :  { %1709 = vrot.lane.b32.xlu0 %v882_v34, %s5203_s18  ;;  %1049 = vrot.lane.b32.xlu1 %v884_v48, %s5202_s17 }
 0x172   :  { %v2169_v0 = vpack.c.bf16 %v2089_v46, %v2089_v46  ;;  %v885_v46 = vrot.slane %v5843_v50, 1 }
 0x173   :  { %v1352_v10 = vpop.permute.xlu0 %1351  ;;  %v1694_v7 = vpop.permute.xlu1 %1693 }
 0x174   :  { %v2331_v61 = vunpack.c.l.b16 %v2169_v0  ;;  %v1584_v2 = vadd.f32 %v1352_v10, %v1264_v37  ;;  %v1927_v17 = vadd.f32 %v1694_v7, %v1583_v9  ;;  %1439 = vrot.lane.b32.xlu2 %v5809_v12, %s5201_s12  ;;  %v886_v52 = vsel %vm848_vm1, %v883_v43, %v885_v46  ;;  %v5916_v37 = vpop.f32.mrf.mxu2  ;;  %v5919_v10 = vpop.f32.mrf.mxu0 }
 0x175   :  { %v957_v0 = vrot.slane %v5809_v12, 1  ;;  %10197 = vst [vmem:[#allocation59_spill] sm:$0xff] %v5916_v37 }
 0x176   :  { %v1928_v34 = vadd.f32 %v1696_v35, %v1584_v2  ;;  %v5903_v28 = vpop.permute.xlu2 %1105  ;;  %v2408_v42 = vpack.c.b16 %v2331_v61, %v2330_v30  ;;  %v2010_v58 = vadd.f32 %v5661_v23, %v1927_v17  ;;  %v959_v30 = vrot.slane %v5838_v26, 1 }
 0x177   :  { %10195 = vst [vmem:[#allocation57_spill] sm:$0xff] %v5903_v28 }
 0x178   :  { %v2011_v15 = vadd.f32 %v5661_v23, %v1928_v34  ;;  %5099 = vmatmul.msk.bf16.gmra.mxu1 %vm2446_vm3, %v2408_v42  ;;  %v2090_v9 = vmax.f32 %v2010_v58, 0.0 }
 0x179   :  { %1369 = vrot.lane.b32.xlu0 %v5815_v20, %s5201_s12  ;;  %1711 = vrot.lane.b32.xlu1 %v884_v48, %s5203_s18  ;;  %v5924_v48 = vsel %vm848_vm1, %v955_v13, %v957_v0 }
 0x17a   :  { %v2091_v47 = vmax.f32 %v2011_v15, 0.0  ;;  %v2170_v61 = vpack.c.bf16 %v2090_v9, %v2090_v9  ;;  %v5944_v9 = vsel %vm848_vm1, %v957_v0, %v959_v30  ;;  %v961_v0 = vrot.slane %v5856_v27, 1 }
 0x17b   :  { %v5912_v51 = vpop.permute.xlu0 %1101  ;;  %v1354_v35 = vpop.permute.xlu1 %1353 }
 0x17c   :  { %10196 = vst [vmem:[#allocation58_spill] sm:$0xff] %v5912_v51  ;;  %1051 = vrot.lane.b32.xlu2 %v886_v52, %s5202_s17  ;;  %v2171_v7 = vpack.c.bf16 %v2091_v47, %v2091_v47  ;;  %v2332_v34 = vunpack.c.l.b16 %v2170_v61  ;;  %v5936_v15 = vpop.f32.mrf.mxu2  ;;  %v5940_v47 = vpop.f32.mrf.mxu0  ;;  %v887_v61 = vrot.slane %v5860_v38, 1 }
 0x17d   :  { %10201 = vst [vmem:[#allocation63_spill] sm:$0xff] %v5936_v15  ;;  %v892_v28 = vrot.slane %v5940_v47, 1 }
 0x17e   :  { %v5921_v42 = vpop.permute.xlu2 %1427  ;;  %v2333_v43 = vunpack.c.l.b16 %v2171_v7 }
 0x17f   :  { %10198 = vst [vmem:[#allocation60_spill] sm:$0xff] %v5921_v42 }
 0x180   :  { %v2409_v58 = vpack.c.b16 %v2333_v43, %v2332_v34 }
 0x181   :  { %1119 = vrot.lane.b32.xlu0 %v5924_v48, %s5202_s17  ;;  %1371 = vrot.lane.b32.xlu1 %v5843_v50, %s5201_s12 }
 0x183   :  { %v5930_v2 = vpop.permute.xlu0 %1423  ;;  %v5932_v17 = vpop.permute.xlu1 %1103 }
 0x184   :  { %10199 = vst [vmem:[#allocation61_spill] sm:$0xff] %v5930_v2  ;;  %1713 = vrot.lane.b32.xlu2 %v886_v52, %s5203_s18  ;;  %v1265_v2 = vadd.f32 %v5858_v40, %v5511_v29  ;;  %v5967_v51 = vpop.f32.mrf.mxu0 }
 0x185   :  { %10200 = vst [vmem:[#allocation62_spill] sm:$0xff] %v5932_v17  ;;  %v888_v17 = vsel %vm848_vm1, %v885_v46, %v887_v61 }
 0x186   :  { %v5938_v13 = vpop.permute.xlu2 %1111  ;;  %10206 = vst [vmem:[#allocation68_spill] sm:$0xff] %v5967_v51 }
 0x187   :  { %10202 = vst [vmem:[#allocation64_spill] sm:$0xff] %v5938_v13  ;;  %v889_v13 = vrot.slane %v5883_v36, 1 }
 0x188   :  { %5100 = vmatmul.msk.bf16.gmra.mxu1 %vm2446_vm3, %v2409_v58  ;;  %v5959_v58 = vpop.f32.mrf.mxu2 }
 0x189   :  { %1441 = vrot.lane.b32.xlu0 %v5838_v26, %s5201_s12  ;;  %1121 = vrot.lane.b32.xlu1 %v5944_v9, %s5202_s17  ;;  %10205 = vst [vmem:[#allocation67_spill] sm:$0xff] %v5959_v58  ;;  %v1585_v26 = vadd.f32 %v1354_v35, %v1265_v2  ;;  %v890_v2 = vsel %vm848_vm1, %v887_v61, %v889_v13  ;;  %v971_v8 = vrot.slane %v5959_v58, 1 }
 0x18b   :  { %v5950_v7 = vpop.permute.xlu1 %1425  ;;  %v1036_v52 = vpop.permute.xlu0 %1035 }
 0x18c   :  { %10203 = vst [vmem:[#allocation65_spill] sm:$0xff] %v5950_v7  ;;  %1373 = vrot.lane.b32.xlu2 %v5860_v38, %s5201_s12  ;;  %v1266_v43 = vadd.f32 %v1036_v52, %v5533_v39  ;;  %v891_v7 = vrot.slane %v5919_v10, 1 }
 0x18e   :  { %v5956_v34 = vpop.permute.xlu2 %1433  ;;  %v1586_v39 = vadd.f32 %v5890_v60, %v1266_v43  ;;  %v893_v63 = vsel %vm848_vm1, %v891_v7, %v892_v28 }
 0x18f   :  { %10204 = vst [vmem:[#allocation66_spill] sm:$0xff] %v5956_v34  ;;  %v5971_v34 = vsel %vm848_vm1, %v959_v30, %v961_v0 }
 0x190   :  { %v5983_v30 = vpop.f32.mrf.mxu2 }
 0x191   :  { %1443 = vrot.lane.b32.xlu1 %v5856_v27, %s5201_s12  ;;  %1053 = vrot.lane.b32.xlu0 %v888_v17, %s5202_s17 }
 0x193   :  { %v1698_v52 = vpop.permute.xlu0 %1697  ;;  %v1700_v12 = vpop.permute.xlu1 %1699 }
 0x194   :  { %v1929_v29 = vadd.f32 %v1698_v52, %v1585_v26  ;;  %v1930_v40 = vadd.f32 %v1700_v12, %v1586_v39  ;;  %1123 = vrot.lane.b32.xlu2 %v5971_v34, %s5202_s17  ;;  %v5989_v52 = vpop.f32.mrf.mxu0 }
 0x196   :  { %v2012_v46 = vadd.f32 %v5661_v23, %v1929_v29  ;;  %v2013_v27 = vadd.f32 %v5661_v23, %v1930_v40  ;;  %v5978_v42 = vpop.permute.xlu2 %1039 }
 0x198   :  { %v2092_v35 = vmax.f32 %v2012_v46, 0.0  ;;  %v2093_v60 = vmax.f32 %v2013_v27, 0.0 }
 0x199   :  { %1715 = vrot.lane.b32.xlu0 %v888_v17, %s5203_s18  ;;  %1055 = vrot.lane.b32.xlu1 %v890_v2, %s5202_s17  ;;  %v1667_v17 = vrot.slane %v5899_v56, 1 }
 0x19a   :  { %v2172_v12 = vpack.c.bf16 %v2092_v35, %v2092_v35  ;;  %v2173_v26 = vpack.c.bf16 %v2093_v60, %v2093_v60 }
 0x19b   :  { %v5985_v43 = vpop.permute.xlu0 %1107  ;;  %v5987_v39 = vpop.permute.xlu1 %1109  ;;  %v1668_v60 = vsel %vm848_vm1, %v889_v13, %v1667_v17  ;;  %v973_v13 = vrot.slane %v5983_v30, 1 }
 0x19c   :  { %10207 = vst [vmem:[#allocation69_spill] sm:$0xff] %v5985_v43  ;;  %v2334_v29 = vunpack.c.l.b16 %v2172_v12  ;;  %v2335_v40 = vunpack.c.l.b16 %v2173_v26  ;;  %1445 = vrot.lane.b32.xlu2 %v5874_v4, %s5201_s12  ;;  %v963_v12 = vrot.slane %v5874_v4, 1  ;;  %v965_v26 = vrot.slane %v5895_v18, 1  ;;  %v6006_v56 = vpop.f32.mrf.mxu0 }
 0x19d   :  { %10208 = vst [vmem:[#allocation70_spill] sm:$0xff] %v5987_v39  ;;  %v969_v43 = vrot.slane %v5936_v15, 1 }
 0x19e   :  { %v1702_v27 = vpop.permute.xlu2 %1701  ;;  %v2410_v61 = vpack.c.b16 %v2335_v40, %v2334_v29  ;;  %v697_v29 = vpop.f32.mrf.mxu2 }
 0x1a0   :  { %5101 = vmatmul.msk.bf16.gmra.mxu1 %vm2446_vm3, %v2410_v61  ;;  %v6012_v61 = vsel %vm848_vm1, %v961_v0, %v963_v12 }
 0x1a1   :  { %1375 = vrot.lane.b32.xlu0 %v5883_v36, %s5201_s12  ;;  %1717 = vrot.lane.b32.xlu1 %v890_v2, %s5203_s18  ;;  %v967_v36 = vrot.slane %v5916_v37, 1  ;;  %v1675_v2 = vrot.slane %v697_v29, 1 }
 0x1a3   :  { %v5998_v46 = vpop.permute.xlu0 %1429  ;;  %v6000_v35 = vpop.permute.xlu1 %1431  ;;  %v6023_v4 = vsel %vm848_vm1, %v965_v26, %v967_v36  ;;  %v6028_v0 = vsel %vm848_vm1, %v973_v13, %v1675_v2 }
 0x1a4   :  { %10209 = vst [vmem:[#allocation71_spill] sm:$0xff] %v5998_v46  ;;  %1719 = vrot.lane.b32.xlu2 %v1668_v60, %s5203_s18  ;;  %v6015_v46 = vsel %vm848_vm1, %v963_v12, %v965_v26 }
 0x1a5   :  { %10210 = vst [vmem:[#allocation72_spill] sm:$0xff] %v6000_v35  ;;  %v6034_v35 = vpop.f32.mrf.mxu0 }
 0x1a6   :  { %v6008_v40 = vpop.permute.xlu2 %1361  ;;  %10211 = vst [vmem:[#allocation73_spill] sm:$0xff] %v6015_v46  ;;  %v6030_v12 = vpop.f32.mrf.mxu2 }
 0x1a7   :  { %10212 = vst [vmem:[#allocation74_spill] sm:$0xff] %v6023_v4 }
 0x1a8   :  { %10213 = vst [vmem:[#allocation75_spill] sm:$0xff] %v6028_v0  ;;  %v6071_v0 = vsel %vm848_vm1, %v969_v43, %v971_v8 }
 0x1a9   :  { %1125 = vrot.lane.b32.xlu0 %v6012_v61, %s5202_s17  ;;  %1127 = vrot.lane.b32.xlu1 %v6015_v46, %s5202_s17  ;;  %10214 = vst [vmem:[#allocation76_spill] sm:$0xff] %v6030_v12 }
 0x1aa   :  { %10221 = vst [vmem:[#allocation83_spill] sm:$0xff] %v6071_v0 }
 0x1ab   :  { %v1358_v17 = vpop.permute.xlu0 %1357  ;;  %v1038_v60 = vpop.permute.xlu1 %1037 }
 0x1ac   :  { %1129 = vrot.lane.b32.xlu2 %v6023_v4, %s5202_s17  ;;  %v1267_v62 = vadd.f32 %v1038_v60, %v5609_v33  ;;  %v894_v33 = vrot.slane %v5967_v51, 1 }
 0x1ae   :  { %v6032_v29 = vpop.permute.xlu2 %1045  ;;  %v6049_v31 = vpop.f32.mrf.mxu2  ;;  %v1587_v41 = vadd.f32 %v1358_v17, %v1267_v62  ;;  %v895_v17 = vsel %vm848_vm1, %v892_v28, %v894_v33 }
 0x1af   :  { %10216 = vst [vmem:[#allocation78_spill] sm:$0xff] %v6049_v31 }
 0x1b1   :  { %1447 = vrot.lane.b32.xlu0 %v5895_v18, %s5201_s12  ;;  %1449 = vrot.lane.b32.xlu1 %v5916_v37, %s5201_s12  ;;  %v6052_v18 = vsel %vm848_vm1, %v967_v36, %v969_v43  ;;  %v6058_v37 = vpop.f32.mrf.mxu0  ;;  %v1268_v43 = vadd.f32 %v5978_v42, %v5631_v14 }
 0x1b2   :  { %10217 = vst [vmem:[#allocation79_spill] sm:$0xff] %v6052_v18 }
 0x1b3   :  { %v6040_v26 = vpop.permute.xlu0 %1113  ;;  %v1360_v39 = vpop.permute.xlu1 %1359  ;;  %10218 = vst [vmem:[#allocation80_spill] sm:$0xff] %v6058_v37 }
 0x1b4   :  { %10215 = vst [vmem:[#allocation77_spill] sm:$0xff] %v6040_v26  ;;  %1451 = vrot.lane.b32.xlu2 %v5936_v15, %s5201_s12 }
 0x1b6   :  { %v6045_v2 = vpop.permute.xlu2 %1707 }
 0x1b9   :  { %1131 = vrot.lane.b32.xlu0 %v6052_v18, %s5202_s17  ;;  %1377 = vrot.lane.b32.xlu1 %v5940_v47, %s5201_s12  ;;  %v6080_v60 = vpop.f32.mrf.mxu0 }
 0x1ba   :  { %10223 = vst [vmem:[#allocation85_spill] sm:$0xff] %v6080_v60 }
 0x1bb   :  { %v6060_v15 = vpop.permute.xlu0 %1435  ;;  %v6062_v26 = vpop.permute.xlu1 %1115 }
 0x1bc   :  { %10219 = vst [vmem:[#allocation81_spill] sm:$0xff] %v6060_v15  ;;  %1057 = vrot.lane.b32.xlu2 %v893_v63, %s5202_s17  ;;  %v6077_v15 = vpop.f32.mrf.mxu2  ;;  %v1931_v63 = vadd.f32 %v1702_v27, %v1587_v41  ;;  %v6094_v27 = vsel %vm848_vm1, %v971_v8, %v973_v13  ;;  %v898_v8 = vrot.slane %v6006_v56, 1 }
 0x1bd   :  { %10220 = vst [vmem:[#allocation82_spill] sm:$0xff] %v6062_v26 }
 0x1be   :  { %v6068_v36 = vpop.permute.xlu2 %1367  ;;  %10222 = vst [vmem:[#allocation84_spill] sm:$0xff] %v6077_v15 }
 0x1bf   :  { %10225 = vst [vmem:[#allocation87_spill] sm:$0xff] %v6094_v27 }
 0x1c1   :  { %1453 = vrot.lane.b32.xlu0 %v5959_v58, %s5201_s12  ;;  %1133 = vrot.lane.b32.xlu1 %v6071_v0, %s5202_s17  ;;  %v2014_v58 = vadd.f32 %v5661_v23, %v1931_v63  ;;  %v1588_v0 = vadd.f32 %v1360_v39, %v1268_v43  ;;  %v6101_v42 = vpop.f32.mrf.mxu0 }
 0x1c2   :  { %10227 = vst [vmem:[#allocation89_spill] sm:$0xff] %v6101_v42 }
 0x1c3   :  { %v1042_v7 = vpop.permute.xlu0 %1041  ;;  %v1044_v26 = vpop.permute.xlu1 %1043  ;;  %v2094_v28 = vmax.f32 %v2014_v58, 0.0 }
 0x1c4   :  { %1379 = vrot.lane.b32.xlu2 %v5967_v51, %s5201_s12  ;;  %v6097_v51 = vpop.f32.mrf.mxu2  ;;  %v1270_v58 = vadd.f32 %v1044_v26, %v5697_v57 }
 0x1c5   :  { %10226 = vst [vmem:[#allocation88_spill] sm:$0xff] %v6097_v51  ;;  %v2174_v46 = vpack.c.bf16 %v2094_v28, %v2094_v28 }
 0x1c6   :  { %v6084_v62 = vpop.permute.xlu2 %1117 }
 0x1c7   :  { %10224 = vst [vmem:[#allocation86_spill] sm:$0xff] %v6084_v62  ;;  %v896_v62 = vrot.slane %v5989_v52, 1 }
 0x1c9   :  { %1455 = vrot.lane.b32.xlu1 %v5983_v30, %s5201_s12  ;;  %1059 = vrot.lane.b32.xlu0 %v895_v17, %s5202_s17  ;;  %v1269_v30 = vadd.f32 %v1042_v7, %v5667_v54  ;;  %v897_v43 = vsel %vm848_vm1, %v894_v33, %v896_v62  ;;  %v2336_v33 = vunpack.c.l.b16 %v2174_v46  ;;  %v6122_v26 = vpop.f32.mrf.mxu0 }
 0x1ca   :  { %10231 = vst [vmem:[#allocation93_spill] sm:$0xff] %v6122_v26 }
 0x1cb   :  { %v1704_v18 = vpop.permute.xlu0 %1703  ;;  %v1706_v41 = vpop.permute.xlu1 %1705  ;;  %v1589_v54 = vadd.f32 %v6008_v40, %v1269_v30 }
 0x1cc   :  { %v1932_v14 = vadd.f32 %v1704_v18, %v1588_v0  ;;  %1135 = vrot.lane.b32.xlu2 %v6094_v27, %s5202_s17  ;;  %v6111_v18 = vpop.f32.mrf.mxu1 }
 0x1cd   :  { %10229 = vst [vmem:[#allocation91_spill] sm:$0xff] %v6111_v18 }
 0x1ce   :  { %v2015_v39 = vadd.f32 %v5661_v23, %v1932_v14  ;;  %v6105_v63 = vpop.permute.xlu2 %1439 }
 0x1cf   :  { %10228 = vst [vmem:[#allocation90_spill] sm:$0xff] %v6105_v63  ;;  %v899_v63 = vsel %vm848_vm1, %v896_v62, %v898_v8 }
 0x1d0   :  { %v2095_v13 = vmax.f32 %v2015_v39, 0.0  ;;  %v1933_v39 = vadd.f32 %v1706_v41, %v1589_v54  ;;  %v1271_v54 = vadd.f32 %v6032_v29, %v5732_v22 }
 0x1d1   :  { %1721 = vrot.lane.b32.xlu0 %v895_v17, %s5203_s18  ;;  %1061 = vrot.lane.b32.xlu1 %v897_v43, %s5202_s17  ;;  %v6117_v17 = vpop.f32.mrf.mxu2 }
 0x1d2   :  { %v2175_v0 = vpack.c.bf16 %v2095_v13, %v2095_v13  ;;  %10230 = vst [vmem:[#allocation92_spill] sm:$0xff] %v6117_v17  ;;  %v2016_v40 = vadd.f32 %v5661_v23, %v1933_v39  ;;  %v6149_v39 = vpop.f32.mrf.mxu0 }
 0x1d3   :  { %v1364_v7 = vpop.permute.xlu0 %1363  ;;  %v1366_v14 = vpop.permute.xlu1 %1365 }
 0x1d4   :  { %v2337_v27 = vunpack.c.l.b16 %v2175_v0  ;;  %v1590_v4 = vadd.f32 %v1364_v7, %v1270_v58  ;;  %1063 = vrot.lane.b32.xlu2 %v899_v63, %s5202_s17  ;;  %v6133_v41 = vpop.f32.mrf.mxu1 }
 0x1d5   :  { %10233 = vst [vmem:[#allocation95_spill] sm:$0xff] %v6133_v41 }
 0x1d6   :  { %v1934_v28 = vadd.f32 %v6045_v2, %v1590_v4  ;;  %v6120_v18 = vpop.permute.xlu2 %1051  ;;  %v2411_v57 = vpack.c.b16 %v2337_v27, %v2336_v33  ;;  %v900_v2 = vrot.slane %v6034_v35, 1  ;;  %v2096_v27 = vmax.f32 %v2016_v40, 0.0 }
 0x1d7   :  { %v902_v40 = vrot.slane %v6058_v37, 1 }
 0x1d8   :  { %v2017_v30 = vadd.f32 %v5661_v23, %v1934_v28  ;;  %5102 = vmatmul.msk.bf16.gmra.mxu1 %vm2446_vm3, %v2411_v57  ;;  %v6143_v7 = vsel %vm848_vm1, %v898_v8, %v900_v2 }
 0x1d9   :  { %1381 = vrot.lane.b32.xlu0 %v5989_v52, %s5201_s12  ;;  %1723 = vrot.lane.b32.xlu1 %v897_v43, %s5203_s18  ;;  %v6138_v0 = vpop.f32.mrf.mxu2  ;;  %v2176_v43 = vpack.c.bf16 %v2096_v27, %v2096_v27 }
 0x1da   :  { %v2097_v46 = vmax.f32 %v2017_v30, 0.0  ;;  %10234 = vst [vmem:[#allocation96_spill] sm:$0xff] %v6138_v0 }
 0x1db   :  { %v6130_v62 = vpop.permute.xlu1 %1437  ;;  %v1048_v4 = vpop.permute.xlu0 %1047  ;;  %v2338_v30 = vunpack.c.l.b16 %v2176_v43  ;;  %v975_v43 = vrot.slane %v6030_v12, 1 }
 0x1dc   :  { %10232 = vst [vmem:[#allocation94_spill] sm:$0xff] %v6130_v62  ;;  %1725 = vrot.lane.b32.xlu2 %v899_v63, %s5203_s18  ;;  %v2177_v58 = vpack.c.bf16 %v2097_v46, %v2097_v46  ;;  %v1591_v63 = vadd.f32 %v1366_v14, %v1271_v54  ;;  %v6152_v22 = vpop.f32.mrf.mxu1  ;;  %v1272_v8 = vadd.f32 %v1048_v4, %v5760_v19 }
 0x1dd   :  { %10235 = vst [vmem:[#allocation97_spill] sm:$0xff] %v6152_v22  ;;  %v6162_v14 = vsel %vm848_vm1, %v900_v2, %v902_v40 }
 0x1de   :  { %v6136_v13 = vpop.permute.xlu2 %1713  ;;  %v2339_v33 = vunpack.c.l.b16 %v2177_v58  ;;  %v1592_v19 = vadd.f32 %v6068_v36, %v1272_v8  ;;  %v904_v36 = vrot.slane %v6080_v60, 1  ;;  %v9862_v8 = vrot.slane %v6149_v39, 1 }
 0x1e0   :  { %v2412_v27 = vpack.c.b16 %v2339_v33, %v2338_v30  ;;  %v607_v33 = vpop.f32.mrf.mxu0 }
 0x1e1   :  { %1383 = vrot.lane.b32.xlu1 %v6006_v56, %s5201_s12  ;;  %1065 = vrot.lane.b32.xlu0 %v6143_v7, %s5202_s17  ;;  %v6168_v58 = vpop.f32.mrf.mxu2  ;;  %v1669_v30 = vrot.slane %v607_v33, 1 }
 0x1e2   :  { %10236 = vst [vmem:[#allocation98_spill] sm:$0xff] %v6168_v58 }
 0x1e3   :  { %v1710_v28 = vpop.permute.xlu0 %1709  ;;  %v1050_v57 = vpop.permute.xlu1 %1049 }
 0x1e4   :  { %v1935_v29 = vadd.f32 %v1710_v28, %v1591_v63  ;;  %1385 = vrot.lane.b32.xlu2 %v6034_v35, %s5201_s12  ;;  %v976_v63 = vrot.slane %v6049_v31, 1 }
 0x1e6   :  { %v6157_v46 = vpop.permute.xlu2 %1373  ;;  %v2018_v62 = vadd.f32 %v5661_v23, %v1935_v29  ;;  %v6175_v29 = vpop.f32.mrf.mxu1 }
 0x1e7   :  { %10237 = vst [vmem:[#allocation99_spill] sm:$0xff] %v6175_v29 }
 0x1e8   :  { %5103 = vmatmul.msk.bf16.gmra.mxu1 %vm2446_vm3, %v2412_v27  ;;  %v2098_v28 = vmax.f32 %v2018_v62, 0.0  ;;  %v6189_v62 = vsel %vm848_vm1, %v9862_v8, %v1669_v30  ;;  %v6265_v29 = vpop.f32.mrf.mxu0 }
 0x1e9   :  { %1387 = vrot.lane.b32.xlu0 %v6058_v37, %s5201_s12  ;;  %1067 = vrot.lane.b32.xlu1 %v6162_v14, %s5202_s17  ;;  %v977_v37 = vsel %vm848_vm1, %v975_v43, %v976_v63  ;;  %v6197_v43 = vpop.f32.mrf.mxu2  ;;  %10252 = vst [vmem:[#allocation114_spill] sm:$0xff] %v6265_v29 }
 0x1ea   :  { %v2178_v12 = vpack.c.bf16 %v2098_v28, %v2098_v28  ;;  %v978_v28 = vrot.slane %v6077_v15, 1  ;;  %10240 = vst [vmem:[#allocation102_spill] sm:$0xff] %v6197_v43 }
 0x1eb   :  { %v1370_v4 = vpop.permute.xlu0 %1369  ;;  %v1712_v54 = vpop.permute.xlu1 %1711 }
 0x1ec   :  { %v1936_v2 = vadd.f32 %v1712_v54, %v1592_v19  ;;  %1457 = vrot.lane.b32.xlu2 %v6049_v31, %s5201_s12  ;;  %v6207_v8 = vsel %vm848_vm1, %v976_v63, %v978_v28  ;;  %v1273_v63 = vadd.f32 %v1050_v57, %v5791_v16  ;;  %v908_v57 = vrot.slane %v6122_v26, 1 }
 0x1ee   :  { %v2019_v27 = vadd.f32 %v5661_v23, %v1936_v2  ;;  %v6178_v22 = vpop.permute.xlu2 %1123  ;;  %v6194_v2 = vsel %vm848_vm1, %v902_v40, %v904_v36 }
 0x1ef   :  { %10238 = vst [vmem:[#allocation100_spill] sm:$0xff] %v6178_v22 }
 0x1f0   :  { %v2099_v41 = vmax.f32 %v2019_v27, 0.0 }
 0x1f1   :  { %1137 = vrot.lane.b32.xlu0 %v977_v37, %s5202_s17  ;;  %1389 = vrot.lane.b32.xlu1 %v6080_v60, %s5201_s12  ;;  %v2340_v37 = vunpack.c.l.b16 %v2178_v12 }
 0x1f2   :  { %v2179_v19 = vpack.c.bf16 %v2099_v41, %v2099_v41 }
 0x1f3   :  { %v6191_v54 = vpop.permute.xlu0 %1119  ;;  %v1372_v33 = vpop.permute.xlu1 %1371 }
 0x1f4   :  { %10239 = vst [vmem:[#allocation101_spill] sm:$0xff] %v6191_v54  ;;  %v2341_v27 = vunpack.c.l.b16 %v2179_v19  ;;  %1069 = vrot.lane.b32.xlu2 %v6194_v2, %s5202_s17  ;;  %v906_v19 = vrot.slane %v6101_v42, 1 }
 0x1f5   :  { %v6201_v31 = vpop.f32.mrf.mxu1 }
 0x1f6   :  { %10241 = vst [vmem:[#allocation103_spill] sm:$0xff] %v6201_v31  ;;  %v6203_v30 = vpop.permute.xlu2 %1445  ;;  %v2413_v41 = vpack.c.b16 %v2341_v27, %v2340_v37  ;;  %v6220_v37 = vpop.f32.mrf.mxu2  ;;  %v6227_v22 = vsel %vm848_vm1, %v904_v36, %v906_v19  ;;  %v6250_v54 = vsel %vm848_vm1, %v906_v19, %v908_v57 }
 0x1f7   :  { %10242 = vst [vmem:[#allocation104_spill] sm:$0xff] %v6203_v30 }
 0x1f8   :  { %5104 = vmatmul.msk.bf16.gmra.mxu1 %vm2446_vm3, %v2413_v41  ;;  %10245 = vst [vmem:[#allocation107_spill] sm:$0xff] %v6220_v37  ;;  %v980_v41 = vrot.slane %v6097_v51, 1 }
 0x1f9   :  { %1459 = vrot.lane.b32.xlu0 %v6077_v15, %s5201_s12  ;;  %1139 = vrot.lane.b32.xlu1 %v6207_v8, %s5202_s17  ;;  %v1593_v15 = vadd.f32 %v1370_v4, %v1273_v63 }
 0x1fa   :  { %v6236_v16 = vsel %vm848_vm1, %v978_v28, %v980_v41 }
 0x1fb   :  { %v6213_v12 = vpop.permute.xlu0 %1441  ;;  %v6215_v40 = vpop.permute.xlu1 %1121  ;;  %v1937_v4 = vadd.f32 %v6136_v13, %v1593_v15 }
 0x1fc   :  { %10243 = vst [vmem:[#allocation105_spill] sm:$0xff] %v6213_v12  ;;  %1391 = vrot.lane.b32.xlu2 %v6101_v42, %s5201_s12 }
 0x1fd   :  { %10244 = vst [vmem:[#allocation106_spill] sm:$0xff] %v6215_v40  ;;  %v6224_v30 = vpop.f32.mrf.mxu1 }
 0x1fe   :  { %v1720_v27 = vpop.permute.xlu2 %1719  ;;  %10246 = vst [vmem:[#allocation108_spill] sm:$0xff] %v6224_v30  ;;  %v6244_v63 = vpop.f32.mrf.mxu2  ;;  %v982_v30 = vrot.slane %v6117_v17, 1 }
 0x1ff   :  { %10249 = vst [vmem:[#allocation111_spill] sm:$0xff] %v6244_v63 }
 0x201   :  { %1461 = vrot.lane.b32.xlu1 %v6097_v51, %s5201_s12  ;;  %1071 = vrot.lane.b32.xlu0 %v6227_v22, %s5202_s17  ;;  %v1274_v51 = vadd.f32 %v6120_v18, %v5815_v20 }
 0x203   :  { %v6233_v12 = vpop.permute.xlu1 %1443  ;;  %v1054_v40 = vpop.permute.xlu0 %1053  ;;  %v1594_v15 = vadd.f32 %v1372_v33, %v1274_v51  ;;  %v6268_v33 = vsel %vm848_vm1, %v980_v41, %v982_v30  ;;  %v10253_v41 = vrot.slane %v6149_v39, 1 }
 0x204   :  { %10247 = vst [vmem:[#allocation109_spill] sm:$0xff] %v6233_v12  ;;  %1141 = vrot.lane.b32.xlu2 %v6236_v16, %s5202_s17  ;;  %v2020_v12 = vadd.f32 %v5661_v23, %v1937_v4  ;;  %v1275_v18 = vadd.f32 %v1054_v40, %v5843_v50 }
 0x205   :  { %v6256_v13 = vpop.f32.mrf.mxu1 }
 0x206   :  { %v6242_v36 = vpop.permute.xlu2 %1129  ;;  %10250 = vst [vmem:[#allocation112_spill] sm:$0xff] %v6256_v13  ;;  %v2100_v31 = vmax.f32 %v2020_v12, 0.0  ;;  %v6274_v12 = vpop.f32.mrf.mxu2 }
 0x207   :  { %10248 = vst [vmem:[#allocation110_spill] sm:$0xff] %v6242_v36 }
 0x208   :  { %v2180_v13 = vpack.c.bf16 %v2100_v31, %v2100_v31  ;;  %v6282_v31 = vsel %vm848_vm1, %v908_v57, %v10253_v41 }
 0x209   :  { %1393 = vrot.lane.b32.xlu0 %v6122_v26, %s5201_s12  ;;  %1073 = vrot.lane.b32.xlu1 %v6250_v54, %s5202_s17 }
 0x20b   :  { %v1716_v28 = vpop.permute.xlu0 %1715  ;;  %v1056_v36 = vpop.permute.xlu1 %1055 }
 0x20c   :  { %v1938_v20 = vadd.f32 %v1716_v28, %v1594_v15  ;;  %1463 = vrot.lane.b32.xlu2 %v6117_v17, %s5201_s12  ;;  %v1276_v40 = vadd.f32 %v1056_v36, %v5860_v38  ;;  %v1595_v15 = vadd.f32 %v6157_v46, %v1275_v18  ;;  %v984_v28 = vrot.slane %v6138_v0, 1 }
 0x20d   :  { %v6286_v26 = vpop.f32.mrf.mxu1  ;;  %v986_v18 = vrot.slane %v6168_v58, 1 }
 0x20e   :  { %v2021_v19 = vadd.f32 %v5661_v23, %v1938_v20  ;;  %v6263_v4 = vpop.permute.xlu2 %1451  ;;  %10254 = vst [vmem:[#allocation115_spill] sm:$0xff] %v6286_v26  ;;  %v9874_v41 = vrot.slane %v6286_v26, 2 }
 0x20f   :  { %10251 = vst [vmem:[#allocation113_spill] sm:$0xff] %v6263_v4 }
 0x210   :  { %v2101_v51 = vmax.f32 %v2021_v19, 0.0 }
 0x211   :  { %1143 = vrot.lane.b32.xlu0 %v6268_v33, %s5202_s17  ;;  %1395 = vrot.lane.b32.xlu1 %v6149_v39, %s5201_s12 }
 0x212   :  { %v2181_v50 = vpack.c.bf16 %v2101_v51, %v2101_v51  ;;  %v2342_v51 = vunpack.c.l.b16 %v2180_v13 }
 0x213   :  { %v1376_v20 = vpop.permute.xlu0 %1375  ;;  %v1718_v19 = vpop.permute.xlu1 %1717 }
 0x214   :  { %v2343_v17 = vunpack.c.l.b16 %v2181_v50  ;;  %v1596_v4 = vadd.f32 %v1376_v20, %v1276_v40  ;;  %v1939_v42 = vadd.f32 %v1718_v19, %v1595_v15  ;;  %1075 = vrot.lane.b32.xlu2 %v6282_v31, %s5202_s17  ;;  %v6295_v50 = vsel %vm848_vm1, %v982_v30, %v984_v28  ;;  %v727_v30 = vpop.f32.mrf.mxu2 }
 0x215   :  { %v1677_v15 = vrot.slane %v727_v30, 1  ;;  %v9873_v20 = vrot.slane %v6286_v26, 1  ;;  %v912_v26 = vrot.slane %v6265_v29, 1 }
 0x216   :  { %v1940_v38 = vadd.f32 %v1720_v27, %v1596_v4  ;;  %v6288_v46 = vpop.permute.xlu2 %1057  ;;  %v2414_v36 = vpack.c.b16 %v2343_v17, %v2342_v51  ;;  %v2022_v57 = vadd.f32 %v5661_v23, %v1939_v42  ;;  %v6301_v27 = vpop.f32.mrf.mxu0  ;;  %v988_v42 = vrot.slane %v6197_v43, 1 }
 0x217   :  { %10255 = vst [vmem:[#allocation116_spill] sm:$0xff] %v6301_v27 }
 0x218   :  { %v2023_v39 = vadd.f32 %v5661_v23, %v1940_v38  ;;  %5105 = vmatmul.msk.bf16.gmra.mxu1 %vm2446_vm3, %v2414_v36  ;;  %v6308_v23 = vsel %vm848_vm1, %v984_v28, %v986_v18  ;;  %v2102_v40 = vmax.f32 %v2022_v57, 0.0  ;;  %v994_v28 = vrot.slane %v6274_v12, 1 }
 0x219   :  { %1465 = vrot.lane.b32.xlu0 %v6138_v0, %s5201_s12  ;;  %1145 = vrot.lane.b32.xlu1 %v6295_v50, %s5202_s17  ;;  %v6319_v57 = vsel %vm848_vm1, %v986_v18, %v988_v42 }
 0x21a   :  { %v2103_v17 = vmax.f32 %v2023_v39, 0.0  ;;  %v2182_v0 = vpack.c.bf16 %v2102_v40, %v2102_v40 }
 0x21b   :  { %v6303_v13 = vpop.permute.xlu0 %1125  ;;  %v6305_v4 = vpop.permute.xlu1 %1127 }
 0x21c   :  { %10256 = vst [vmem:[#allocation117_spill] sm:$0xff] %v6303_v13  ;;  %1147 = vrot.lane.b32.xlu2 %v6308_v23, %s5202_s17  ;;  %v2183_v39 = vpack.c.bf16 %v2103_v17, %v2103_v17  ;;  %v6336_v17 = vsel %vm848_vm1, %v994_v28, %v1677_v15 }
 0x21d   :  { %10257 = vst [vmem:[#allocation118_spill] sm:$0xff] %v6305_v4  ;;  %v2600_v19 = vpop.f32.mrf.mxu1 }
 0x21e   :  { %v4237_v51 = vrot.slane %v2600_v19, 1  ;;  %v4445_v38 = vrot.slane %v2600_v19, 2  ;;  %v6315_v36 = vpop.permute.xlu2 %1379  ;;  %10260 = vst [vmem:[#allocation121_spill] sm:$0xff] %v6336_v17  ;;  %v2345_v18 = vunpack.c.l.b16 %v2183_v39 }
 0x220   :  { %v6324_v30 = vsel %vm848_vm1, %v9873_v20, %v4237_v51  ;;  %v6329_v4 = vsel %vm3124_vm4, %v9874_v41, %v4445_v38  ;;  %v990_v51 = vrot.slane %v6220_v37, 1  ;;  %v6343_v20 = vpop.f32.mrf.mxu0  ;;  %v2344_v38 = vunpack.c.l.b16 %v2182_v0 }
 0x221   :  { %10258 = vst [vmem:[#allocation119_spill] sm:$0xff] %v6324_v30  ;;  %1149 = vrot.lane.b32.xlu0 %v6319_v57, %s5202_s17  ;;  %1467 = vrot.lane.b32.xlu1 %v6168_v58, %s5201_s12 }
 0x222   :  { %10259 = vst [vmem:[#allocation120_spill] sm:$0xff] %v6329_v4  ;;  %v2415_v30 = vpack.c.b16 %v2345_v18, %v2344_v38  ;;  %v6351_v15 = vsel %vm848_vm1, %v988_v42, %v990_v51  ;;  %v992_v18 = vrot.slane %v6244_v63, 1 }
 0x223   :  { %v6338_v40 = vpop.permute.xlu0 %1447  ;;  %v6340_v19 = vpop.permute.xlu1 %1449  ;;  %10263 = vst [vmem:[#allocation124_spill] sm:$0xff] %v6343_v20 }
 0x224   :  { %10261 = vst [vmem:[#allocation122_spill] sm:$0xff] %v6338_v40  ;;  %1469 = vrot.lane.b32.xlu2 %v6197_v43, %s5201_s12  ;;  %v6377_v58 = vsel %vm848_vm1, %v990_v51, %v992_v18 }
 0x225   :  { %10262 = vst [vmem:[#allocation123_spill] sm:$0xff] %v6340_v19  ;;  %v2602_v41 = vpop.f32.mrf.mxu1 }
 0x226   :  { %v6347_v4 = vpop.permute.xlu2 %1135  ;;  %v913_v41 = vrot.slane %v6301_v27, 1 }
 0x227   :  { %10264 = vst [vmem:[#allocation125_spill] sm:$0xff] %v6347_v4  ;;  %v915_v4 = vrot.slane %v6343_v20, 1 }
 0x228   :  { %5106 = vmatmul.msk.bf16.gmra.mxu1 %vm2446_vm3, %v2415_v30  ;;  %v6363_v30 = vpop.f32.mrf.mxu0  ;;  %v914_v38 = vsel %vm848_vm1, %v912_v26, %v913_v41 }
 0x229   :  { %1471 = vrot.lane.b32.xlu0 %v6220_v37, %s5201_s12  ;;  %1151 = vrot.lane.b32.xlu1 %v6351_v15, %s5202_s17  ;;  %10266 = vst [vmem:[#allocation127_spill] sm:$0xff] %v6363_v30 }
 0x22b   :  { %v6357_v39 = vpop.permute.xlu0 %1131  ;;  %v1378_v0 = vpop.permute.xlu1 %1377 }
 0x22c   :  { %10265 = vst [vmem:[#allocation126_spill] sm:$0xff] %v6357_v39  ;;  %1397 = vrot.lane.b32.xlu2 %v6301_v27, %s5201_s12  ;;  %v6403_v39 = vsel %vm848_vm1, %v992_v18, %v994_v28 }
 0x22e   :  { %v6365_v42 = vpop.permute.xlu2 %1063 }
 0x230   :  { %v6384_v26 = vpop.f32.mrf.mxu0 }
 0x231   :  { %1473 = vrot.lane.b32.xlu1 %v6244_v63, %s5201_s12  ;;  %1077 = vrot.lane.b32.xlu0 %v914_v38, %s5202_s17  ;;  %10269 = vst [vmem:[#allocation130_spill] sm:$0xff] %v6384_v26  ;;  %v6387_v63 = vsel %vm848_vm1, %v913_v41, %v915_v4  ;;  %v1277_v41 = vadd.f32 %v6288_v46, %v5919_v10  ;;  %v919_v10 = vrot.slane %v6384_v26, 1 }
 0x233   :  { %v6372_v37 = vpop.permute.xlu0 %1453  ;;  %v6374_v43 = vpop.permute.xlu1 %1133 }
 0x234   :  { %10267 = vst [vmem:[#allocation128_spill] sm:$0xff] %v6372_v37  ;;  %1153 = vrot.lane.b32.xlu2 %v6377_v58, %s5202_s17 }
 0x235   :  { %10268 = vst [vmem:[#allocation129_spill] sm:$0xff] %v6374_v43  ;;  %v917_v43 = vrot.slane %v6363_v30, 1 }
 0x236   :  { %v6382_v19 = vpop.permute.xlu2 %1725 }
 0x237   :  { %v6416_v27 = vsel %vm848_vm1, %v915_v4, %v917_v43 }
 0x238   :  { %v6411_v40 = vpop.f32.mrf.mxu0 }
 0x239   :  { %1399 = vrot.lane.b32.xlu0 %v6343_v20, %s5201_s12  ;;  %1079 = vrot.lane.b32.xlu1 %v6387_v63, %s5202_s17  ;;  %10273 = vst [vmem:[#allocation134_spill] sm:$0xff] %v6411_v40  ;;  %v921_v46 = vrot.slane %v6411_v40, 1 }
 0x23b   :  { %v6393_v51 = vpop.permute.xlu1 %1455  ;;  %v1060_v38 = vpop.permute.xlu0 %1059  ;;  %v6435_v29 = vsel %vm848_vm1, %v919_v10, %v921_v46 }
 0x23c   :  { %10270 = vst [vmem:[#allocation131_spill] sm:$0xff] %v6393_v51  ;;  %1475 = vrot.lane.b32.xlu2 %v6274_v12, %s5201_s12  ;;  %v6409_v51 = vpop.f32.mrf.mxu2  ;;  %v1597_v12 = vadd.f32 %v1378_v0, %v1277_v41  ;;  %v1278_v18 = vadd.f32 %v1060_v38, %v5940_v47  ;;  %v6428_v0 = vld [vmem:[%s9809_s2] ss:$0 sm:$0xff]  ;;  %v6432_v41 = vsel %vm848_vm1, %v917_v43, %v919_v10 }
 0x23d   :  { %10272 = vst [vmem:[#allocation133_spill] sm:$0xff] %v6409_v51 }
 0x23e   :  { %v6397_v37 = vpop.permute.xlu2 %1385  ;;  %v1598_v47 = vadd.f32 %v6315_v36, %v1278_v18 }
 0x23f   :  { %10271 = vst [vmem:[#allocation132_spill] sm:$0xff] %v6397_v37 }
 0x240   :  { %v6448_v10 = vpop.f32.mrf.mxu0 }
 0x241   :  { %1155 = vrot.lane.b32.xlu0 %v6403_v39, %s5202_s17  ;;  %1401 = vrot.lane.b32.xlu1 %v6363_v30, %s5201_s12  ;;  %10276 = vst [vmem:[#allocation137_spill] sm:$0xff] %v6448_v10  ;;  %v923_v17 = vrot.slane %v6448_v10, 1 }
 0x243   :  { %v1722_v13 = vpop.permute.xlu0 %1721  ;;  %v6413_v20 = vpop.permute.xlu1 %1061 }
 0x244   :  { %v1941_v28 = vadd.f32 %v1722_v13, %v1597_v12  ;;  %1081 = vrot.lane.b32.xlu2 %v6416_v27, %s5202_s17  ;;  %v6446_v43 = vpop.f32.mrf.mxu2 }
 0x245   :  { %10275 = vst [vmem:[#allocation136_spill] sm:$0xff] %v6446_v43 }
 0x246   :  { %v6423_v30 = vpop.permute.xlu2 %1457  ;;  %v2024_v4 = vadd.f32 %v6428_v0, %v1941_v28 }
 0x247   :  { %10274 = vst [vmem:[#allocation135_spill] sm:$0xff] %v6423_v30 }
 0x248   :  { %v2104_v12 = vmax.f32 %v2024_v4, 0.0 }
 0x249   :  { %1083 = vrot.lane.b32.xlu0 %v6432_v41, %s5202_s17  ;;  %1085 = vrot.lane.b32.xlu1 %v6435_v29, %s5202_s17 }
 0x24a   :  { %v2184_v37 = vpack.c.bf16 %v2104_v12, %v2104_v12 }
 0x24b   :  { %v6442_v13 = vpop.permute.xlu0 %1381  ;;  %v1724_v38 = vpop.permute.xlu1 %1723 }
 0x24c   :  { %v1942_v30 = vadd.f32 %v1724_v38, %v1598_v47  ;;  %1403 = vrot.lane.b32.xlu2 %v6384_v26, %s5201_s12  ;;  %v6463_v38 = vsel %vm848_vm1, %v921_v46, %v923_v17  ;;  %v997_v26 = vrot.slane %v6446_v43, 1  ;;  %v2346_v12 = vunpack.c.l.b16 %v2184_v37  ;;  %v6478_v46 = vpop.f32.mrf.mxu0 }
 0x24d   :  { %10280 = vst [vmem:[#allocation141_spill] sm:$0xff] %v6478_v46 }
 0x24e   :  { %v2025_v28 = vadd.f32 %v6428_v0, %v1942_v30  ;;  %v6451_v60 = vpop.permute.xlu2 %1069  ;;  %v996_v30 = vrot.slane %v6409_v51, 1 }
 0x24f   :  { %10277 = vst [vmem:[#allocation138_spill] sm:$0xff] %v6451_v60 }
 0x250   :  { %v2105_v36 = vmax.f32 %v2025_v28, 0.0  ;;  %v998_v60 = vsel %vm848_vm1, %v996_v30, %v997_v26 }
 0x251   :  { %1405 = vrot.lane.b32.xlu0 %v6411_v40, %s5201_s12  ;;  %1407 = vrot.lane.b32.xlu1 %v6448_v10, %s5201_s12 }
 0x252   :  { %v2185_v18 = vpack.c.bf16 %v2105_v36, %v2105_v36  ;;  %v6471_v36 = vpop.f32.mrf.mxu2 }
 0x253   :  { %v6458_v4 = vpop.permute.xlu1 %1383  ;;  %v6460_v47 = vpop.permute.xlu0 %1065  ;;  %10279 = vst [vmem:[#allocation140_spill] sm:$0xff] %v6471_v36  ;;  %v999_v30 = vrot.slane %v6471_v36, 1 }
 0x254   :  { %v2347_v28 = vunpack.c.l.b16 %v2185_v18  ;;  %1087 = vrot.lane.b32.xlu2 %v6463_v38, %s5202_s17 }
 0x255   :  { %v6480_v37 = vpop.f32.mrf.mxu1 }
 0x256   :  { %v6469_v40 = vpop.permute.xlu2 %1391  ;;  %v2416_v10 = vpack.c.b16 %v2347_v28, %v2346_v12  ;;  %10281 = vst [vmem:[#allocation142_spill] sm:$0xff] %v6480_v37 }
 0x257   :  { %10278 = vst [vmem:[#allocation139_spill] sm:$0xff] %v6469_v40  ;;  %v6503_v40 = vsel %vm848_vm1, %v997_v26, %v999_v30 }
 0x258   :  { %5107 = vmatmul.msk.bf16.gmra.mxu1 %vm2446_vm3, %v2416_v10  ;;  %v925_v10 = vrot.slane %v6478_v46, 1 }
 0x259   :  { %1477 = vrot.lane.b32.xlu0 %v6446_v43, %s5201_s12  ;;  %1157 = vrot.lane.b32.xlu1 %v998_v60, %s5202_s17 }
 0x25a   :  { %v926_v28 = vsel %vm848_vm1, %v923_v17, %v925_v10  ;;  %v6496_v60 = vpop.f32.mrf.mxu2 }
 0x25b   :  { %v6482_v18 = vpop.permute.xlu0 %1387  ;;  %v6484_v51 = vpop.permute.xlu1 %1067  ;;  %10284 = vst [vmem:[#allocation145_spill] sm:$0xff] %v6496_v60  ;;  %v1001_v17 = vrot.slane %v6496_v60, 1 }
 0x25c   :  { %10282 = vst [vmem:[#allocation143_spill] sm:$0xff] %v6482_v18  ;;  %1409 = vrot.lane.b32.xlu2 %v6478_v46, %s5201_s12 }
 0x25d   :  { %v6505_v46 = vpop.f32.mrf.mxu1 }
 0x25e   :  { %v6489_v12 = vpop.permute.xlu2 %1141  ;;  %10286 = vst [vmem:[#allocation147_spill] sm:$0xff] %v6505_v46 }
 0x25f   :  { %10283 = vst [vmem:[#allocation144_spill] sm:$0xff] %v6489_v12 }
 0x261   :  { %1479 = vrot.lane.b32.xlu1 %v6471_v36, %s5201_s12  ;;  %1089 = vrot.lane.b32.xlu0 %v926_v28, %s5202_s17  ;;  %v10288_v36 = vrot.slane %v5332_v24, 1 }
 0x263   :  { %v6498_v43 = vpop.permute.xlu0 %1137  ;;  %v6500_v37 = vpop.permute.xlu1 %1389  ;;  %v928_v18 = vsel %vm848_vm1, %v925_v10, %v10288_v36  ;;  %v10291_v36 = vrot.slane %v5336_v25, 1 }
 0x264   :  { %10285 = vst [vmem:[#allocation146_spill] sm:$0xff] %v6498_v43  ;;  %1159 = vrot.lane.b32.xlu2 %v6503_v40, %s5202_s17  ;;  %v6516_v43 = vsel %vm848_vm1, %v999_v30, %v1001_v17 }
 0x265   :  { %v6534_v10 = vsel %vm848_vm1, %v1001_v17, %v10291_v36 }
 0x266   :  { %v6510_v12 = vpop.permute.xlu2 %1463 }
 0x267   :  { %10287 = vst [vmem:[#allocation148_spill] sm:$0xff] %v6510_v12  ;;  %v6527_v12 = vpop.f32.mrf.mxu1 }
 0x269   :  { %1091 = vrot.lane.b32.xlu1 %v928_v18, %s5202_s17  ;;  %1161 = vrot.lane.b32.xlu0 %v6516_v43, %s5202_s17 }
 0x26b   :  { %v6521_v26 = vpop.permute.xlu0 %1459  ;;  %v6523_v46 = vpop.permute.xlu1 %1139 }
 0x26c   :  { %10289 = vst [vmem:[#allocation149_spill] sm:$0xff] %v6521_v26  ;;  %1481 = vrot.lane.b32.xlu2 %v6496_v60, %s5201_s12 }
 0x26d   :  { %10290 = vst [vmem:[#allocation150_spill] sm:$0xff] %v6523_v46 }
 0x26e   :  { %v6529_v24 = vpop.permute.xlu2 %1075 }
 0x26f   :  { %v6548_v46 = vpop.f32.mrf.mxu1 }
 0x271   :  { %1163 = vrot.lane.b32.xlu1 %v6534_v10, %s5202_s17  ;;  %1727 = vrot.lane.b32.xlu0 %v6143_v7, %s5203_s18 }
 0x273   :  { %v6540_v30 = vpop.permute.xlu1 %1461  ;;  %v6542_v26 = vpop.permute.xlu0 %1071 }
 0x274   :  { %1731 = vrot.lane.b32.xlu2 %v6194_v2, %s5203_s18 }
 0x276   :  { %v6546_v60 = vpop.permute.xlu2 %1147 }
 0x277   :  { %v6566_v2 = vpop.f32.mrf.mxu1 }
 0x278   :  { %10293 = vst [vmem:[#allocation152_spill] sm:$0xff] %v6566_v2 }
 0x279   :  { %1729 = vrot.lane.b32.xlu1 %v6162_v14, %s5203_s18  ;;  %1733 = vrot.lane.b32.xlu0 %v6227_v22, %s5203_s18 }
 0x27b   :  { %v6554_v17 = vpop.permute.xlu0 %1393  ;;  %v6556_v7 = vpop.permute.xlu1 %1073 }
 0x27c   :  { %1737 = vrot.lane.b32.xlu2 %v6282_v31, %s5203_s18 }
 0x27e   :  { %v6560_v36 = vpop.permute.xlu2 %1469 }
 0x27f   :  { %10292 = vst [vmem:[#allocation151_spill] sm:$0xff] %v6560_v36  ;;  %v6586_v31 = vpop.f32.mrf.mxu1 }
 0x280   :  { %10294 = vst [vmem:[#allocation153_spill] sm:$0xff] %v6586_v31 }
 0x281   :  { %1735 = vrot.lane.b32.xlu1 %v6250_v54, %s5203_s18  ;;  %1739 = vrot.lane.b32.xlu0 %v6189_v62, %s5203_s18 }
 0x283   :  { %v6568_v14 = vpop.permute.xlu0 %1143  ;;  %v6570_v22 = vpop.permute.xlu1 %1395 }
 0x284   :  { %1743 = vrot.lane.b32.xlu2 %v6416_v27, %s5203_s18 }
 0x286   :  { %v6574_v25 = vpop.permute.xlu2 %1397 }
 0x289   :  { %1741 = vrot.lane.b32.xlu1 %v6387_v63, %s5203_s18  ;;  %1745 = vrot.lane.b32.xlu0 %v6432_v41, %s5203_s18 }
 0x28b   :  { %v6580_v54 = vpop.permute.xlu0 %1465  ;;  %v6582_v62 = vpop.permute.xlu1 %1145 }
 0x28c   :  { %1749 = vrot.lane.b32.xlu2 %v6463_v38, %s5203_s18 }
 0x28e   :  { %v6591_v27 = vpop.permute.xlu2 %1153 }
 0x28f   :  { %10295 = vst [vmem:[#allocation154_spill] sm:$0xff] %v6591_v27 }
 0x291   :  { %1747 = vrot.lane.b32.xlu1 %v6435_v29, %s5203_s18  ;;  %1751 = vrot.lane.b32.xlu0 %v926_v28, %s5203_s18 }
 0x293   :  { %v6593_v63 = vpop.permute.xlu0 %1149  ;;  %v6595_v36 = vpop.permute.xlu1 %1467 }
 0x294   :  { %10296 = vst [vmem:[#allocation155_spill] sm:$0xff] %v6593_v63  ;;  %1755 = vrot.lane.b32.xlu2 %v5359_v32, %s5203_s18 }
 0x295   :  { %v6599_v41 = vpop.f32.mrf.mxu1 }
 0x296   :  { %10297 = vst [vmem:[#allocation156_spill] sm:$0xff] %v6599_v41  ;;  %v6608_v28 = vpop.permute.xlu2 %1475 }
 0x297   :  { %10300 = vst [vmem:[#allocation159_spill] sm:$0xff] %v6608_v28 }
 0x299   :  { %1753 = vrot.lane.b32.xlu1 %v928_v18, %s5203_s18  ;;  %1757 = vrot.lane.b32.xlu0 %v5412_v53, %s5203_s18 }
 0x29b   :  { %v6604_v38 = vpop.permute.xlu0 %1471  ;;  %v6606_v29 = vpop.permute.xlu1 %1151 }
 0x29c   :  { %10298 = vst [vmem:[#allocation157_spill] sm:$0xff] %v6604_v38  ;;  %1761 = vrot.lane.b32.xlu2 %v5570_v59, %s5203_s18 }
 0x29d   :  { %10299 = vst [vmem:[#allocation158_spill] sm:$0xff] %v6606_v29  ;;  %v6612_v27 = vpop.f32.mrf.mxu1 }
 0x29e   :  { %10301 = vst [vmem:[#allocation160_spill] sm:$0xff] %v6612_v27  ;;  %v9899_v28 = vrot.slane %v6612_v27, 1  ;;  %v9898_v59 = vrot.slane %v6612_v27, 2  ;;  %v6626_v38 = vpop.permute.xlu2 %1081 }
 0x2a1   :  { %1759 = vrot.lane.b32.xlu1 %v5396_v49, %s5203_s18  ;;  %1763 = vrot.lane.b32.xlu0 %v5618_v44, %s5203_s18 }
 0x2a3   :  { %v6618_v32 = vpop.permute.xlu1 %1473  ;;  %v6620_v53 = vpop.permute.xlu0 %1077 }
 0x2a4   :  { %10302 = vst [vmem:[#allocation161_spill] sm:$0xff] %v6618_v32  ;;  %1767 = vrot.lane.b32.xlu2 %v5674_v55, %s5203_s18 }
 0x2a5   :  { %v2624_v18 = vpop.f32.mrf.mxu1 }
 0x2a6   :  { %v4239_v29 = vrot.slane %v2624_v18, 1  ;;  %v4447_v63 = vrot.slane %v2624_v18, 2  ;;  %v6648_v18 = vpop.permute.xlu2 %1403 }
 0x2a8   :  { %v6631_v49 = vsel %vm848_vm1, %v9899_v28, %v4239_v29  ;;  %v6636_v44 = vsel %vm3124_vm4, %v9898_v59, %v4447_v63 }
 0x2a9   :  { %10303 = vst [vmem:[#allocation162_spill] sm:$0xff] %v6631_v49  ;;  %1765 = vrot.lane.b32.xlu1 %v5636_v45, %s5203_s18  ;;  %1769 = vrot.lane.b32.xlu0 %v5708_v11, %s5203_s18 }
 0x2aa   :  { %10304 = vst [vmem:[#allocation163_spill] sm:$0xff] %v6636_v44  ;;  %v10310_v44 = vld [vmem:[#allocation83_spill] sm:$0xff] }
 0x2ab   :  { %v6642_v55 = vpop.permute.xlu0 %1399  ;;  %v6644_v32 = vpop.permute.xlu1 %1079 }
 0x2ac   :  { %1773 = vrot.lane.b32.xlu2 %v5727_v5, %s5203_s18 }
 0x2ad   :  { %v2626_v29 = vpop.f32.mrf.mxu1 }
 0x2ae   :  { %v6664_v11 = vpop.permute.xlu2 %1087  ;;  %v10306_v29 = vld [vmem:[#allocation73_spill] sm:$0xff] }
 0x2b1   :  { %1771 = vrot.lane.b32.xlu1 %v5711_v3, %s5203_s18  ;;  %1775 = vrot.lane.b32.xlu0 %v5779_v21, %s5203_s18 }
 0x2b3   :  { %v6654_v45 = vpop.permute.xlu0 %1155  ;;  %v6656_v63 = vpop.permute.xlu1 %1401 }
 0x2b4   :  { %1779 = vrot.lane.b32.xlu2 %v5720_v6, %s5203_s18 }
 0x2b9   :  { %1777 = vrot.lane.b32.xlu1 %v5803_v1, %s5203_s18  ;;  %1781 = vrot.lane.b32.xlu0 %v5924_v48, %s5203_s18  ;;  %v6680_v1 = vpop.permute.xlu2 %1409  ;;  %v10305_v48 = vld [vmem:[#allocation74_spill] sm:$0xff] }
 0x2bb   :  { %v6666_v5 = vpop.permute.xlu0 %1083  ;;  %v6668_v3 = vpop.permute.xlu1 %1085 }
 0x2bc   :  { %1785 = vrot.lane.b32.xlu2 %v5971_v34, %s5203_s18  ;;  %v10307_v34 = vld [vmem:[#allocation79_spill] sm:$0xff] }
 0x2c1   :  { %1783 = vrot.lane.b32.xlu1 %v5944_v9, %s5203_s18  ;;  %1787 = vrot.lane.b32.xlu0 %v6012_v61, %s5203_s18  ;;  %v10309_v61 = vld [vmem:[#allocation87_spill] sm:$0xff]  ;;  %v6694_v28 = vpop.permute.xlu2 %1159 }
 0x2c3   :  { %v6676_v6 = vpop.permute.xlu0 %1405  ;;  %v6678_v21 = vpop.permute.xlu1 %1407 }
 0x2c4   :  { %1791 = vrot.lane.b32.xlu2 %v10305_v48, %s5203_s18  ;;  %v10311_v48 = vld [vmem:[#allocation75_spill] sm:$0xff] }
 0x2c9   :  { %1789 = vrot.lane.b32.xlu1 %v10306_v29, %s5203_s18  ;;  %1793 = vrot.lane.b32.xlu0 %v10307_v34, %s5203_s18  ;;  %v10313_v34 = vld [vmem:[#allocation68_spill] sm:$0xff] }
 0x2ca   :  { %v1279_v27 = vadd.f32 %v6413_v20, %v10313_v34 }
 0x2cb   :  { %v6688_v59 = vpop.permute.xlu0 %1477  ;;  %v6690_v9 = vpop.permute.xlu1 %1157 }
 0x2cc   :  { %10308 = vst [vmem:[#allocation74_spill] sm:$0xff] %v6688_v59  ;;  %1797 = vrot.lane.b32.xlu2 %v10309_v61, %s5203_s18  ;;  %v1599_v61 = vadd.f32 %v6442_v13, %v1279_v27  ;;  %v6709_v59 = vpop.permute.xlu2 %1481 }
 0x2d1   :  { %1795 = vrot.lane.b32.xlu1 %v10310_v44, %s5203_s18  ;;  %1799 = vrot.lane.b32.xlu0 %v10311_v48, %s5203_s18 }
 0x2d3   :  { %v6700_v49 = vpop.permute.xlu1 %1479  ;;  %v6702_v29 = vpop.permute.xlu0 %1089 }
 0x2d4   :  { %10312 = vst [vmem:[#allocation73_spill] sm:$0xff] %v6700_v49  ;;  %1803 = vrot.lane.b32.xlu2 %v6236_v16, %s5203_s18  ;;  %v1943_v49 = vadd.f32 %v6382_v19, %v1599_v61  ;;  %v1280_v16 = vadd.f32 %v6365_v42, %v5989_v52  ;;  %v1281_v52 = vadd.f32 %v6460_v47, %v6006_v56 }
 0x2d6   :  { %v2026_v20 = vadd.f32 %v6428_v0, %v1943_v49 }
 0x2d8   :  { %v2106_v27 = vmax.f32 %v2026_v20, 0.0 }
 0x2d9   :  { %1801 = vrot.lane.b32.xlu1 %v6207_v8, %s5203_s18  ;;  %1805 = vrot.lane.b32.xlu0 %v6268_v33, %s5203_s18  ;;  %v1600_v8 = vadd.f32 %v6458_v4, %v1280_v16  ;;  %v1732_v33 = vpop.permute.xlu2 %1731  ;;  %v10314_v4 = vld [vmem:[#allocation143_spill] sm:$0xff] }
 0x2da   :  { %v2186_v42 = vpack.c.bf16 %v2106_v27, %v2106_v27 }
 0x2db   :  { %v6715_v44 = vpop.permute.xlu1 %1091  ;;  %v6717_v48 = vpop.permute.xlu0 %1161 }
 0x2dc   :  { %1809 = vrot.lane.b32.xlu2 %v6308_v23, %s5203_s18 }
 0x2e1   :  { %1807 = vrot.lane.b32.xlu1 %v6295_v50, %s5203_s18  ;;  %1811 = vrot.lane.b32.xlu0 %v6319_v57, %s5203_s18  ;;  %v1282_v50 = vadd.f32 %v6484_v51, %v6034_v35 }
 0x2e3   :  { %v6730_v13 = vpop.permute.xlu1 %1163  ;;  %v1728_v19 = vpop.permute.xlu0 %1727  ;;  %v1602_v49 = vadd.f32 %v10314_v4, %v1282_v50 }
 0x2e4   :  { %v1944_v34 = vadd.f32 %v1728_v19, %v1600_v8  ;;  %1815 = vrot.lane.b32.xlu2 %v6377_v58, %s5203_s18  ;;  %v10315_v58 = vld [vmem:[#allocation132_spill] sm:$0xff]  ;;  %v6745_v8 = vpop.permute.xlu2 %1737  ;;  %v2348_v19 = vunpack.c.l.b16 %v2186_v42  ;;  %v10318_v42 = vld [vmem:[#allocation6_spill] sm:$0xff] }
 0x2e5   :  { %v1601_v16 = vadd.f32 %v10315_v58, %v1281_v52  ;;  %v1946_v47 = vadd.f32 %v1732_v33, %v1602_v49  ;;  %v10320_v58 = vld [vmem:[#allocation138_spill] sm:$0xff] }
 0x2e6   :  { %v2027_v23 = vadd.f32 %v6428_v0, %v1944_v34  ;;  %v10316_v34 = vld [vmem:[#allocation121_spill] sm:$0xff] }
 0x2e8   :  { %v2107_v57 = vmax.f32 %v2027_v23, 0.0  ;;  %v10317_v23 = vld [vmem:[#allocation85_spill] sm:$0xff] }
 0x2e9   :  { %1813 = vrot.lane.b32.xlu1 %v6351_v15, %s5203_s18  ;;  %1817 = vrot.lane.b32.xlu0 %v6403_v39, %s5203_s18  ;;  %v2029_v39 = vadd.f32 %v6428_v0, %v1946_v47  ;;  %v10321_v47 = vld [vmem:[#allocation139_spill] sm:$0xff] }
 0x2ea   :  { %v2187_v61 = vpack.c.bf16 %v2107_v57, %v2107_v57 }
 0x2eb   :  { %v1730_v20 = vpop.permute.xlu1 %1729  ;;  %v1734_v56 = vpop.permute.xlu0 %1733  ;;  %v2109_v57 = vmax.f32 %v2029_v39, 0.0 }
 0x2ec   :  { %v2349_v35 = vunpack.c.l.b16 %v2187_v61  ;;  %v1945_v51 = vadd.f32 %v1730_v20, %v1601_v16  ;;  %1821 = vrot.lane.b32.xlu2 %v6503_v40, %s5203_s18  ;;  %v1284_v40 = vadd.f32 %v6542_v26, %v10317_v23  ;;  %v6760_v4 = vpop.permute.xlu2 %1743  ;;  %v10319_v61 = vld [vmem:[#allocation80_spill] sm:$0xff]  ;;  %v757_v39 = vpop.f32.mrf.mxu3  ;;  %v10323_v23 = vld [vmem:[#allocation14_spill] sm:$0xff] }
 0x2ed   :  { %v1283_v16 = vadd.f32 %v10320_v58, %v10319_v61  ;;  %v2189_v20 = vpack.c.bf16 %v2109_v57, %v2109_v57  ;;  %v1679_v57 = vrot.slane %v757_v39, 1  ;;  %v10330_v39 = vld [vmem:[#allocation93_spill] sm:$0xff] }
 0x2ee   :  { %v2028_v15 = vadd.f32 %v6428_v0, %v1945_v51  ;;  %v2417_v27 = vpack.c.b16 %v2349_v35, %v2348_v19  ;;  %v1604_v35 = vadd.f32 %v10321_v47, %v1284_v40 }
 0x2ef   :  { %v1603_v26 = vadd.f32 %v6500_v37, %v1283_v16  ;;  %v10326_v16 = vld [vmem:[#allocation20_spill] sm:$0xff] }
 0x2f0   :  { %5108 = vmatmul.msk.bf16.gmra.mxu1 %vm2446_vm3, %v2417_v27  ;;  %v2108_v33 = vmax.f32 %v2028_v15, 0.0 }
 0x2f1   :  { %1819 = vrot.lane.b32.xlu1 %v10316_v34, %s5203_s18  ;;  %1823 = vrot.lane.b32.xlu0 %v6516_v43, %s5203_s18  ;;  %v10322_v43 = vld [vmem:[#allocation10_spill] sm:$0xff]  ;;  %v2351_v34 = vunpack.c.l.b16 %v2189_v20  ;;  %v10327_v20 = vrot.slane %v10326_v16, 1 }
 0x2f2   :  { %v2188_v49 = vpack.c.bf16 %v2108_v33, %v2108_v33  ;;  %v1947_v33 = vadd.f32 %v1734_v56, %v1603_v26 }
 0x2f3   :  { %v1736_v52 = vpop.permute.xlu1 %1735  ;;  %v1740_v50 = vpop.permute.xlu0 %1739  ;;  %v1680_v47 = vsel %vm848_vm1, %v10327_v20, %v1679_v57  ;;  %v10334_v20 = vld [vmem:[#allocation97_spill] sm:$0xff] }
 0x2f4   :  { %1827 = vrot.lane.b32.xlu2 %v10318_v42, %s5203_s18  ;;  %v2350_v51 = vunpack.c.l.b16 %v2188_v49  ;;  %v1948_v19 = vadd.f32 %v1736_v52, %v1604_v35  ;;  %v6777_v42 = vpop.permute.xlu2 %1749  ;;  %v2030_v37 = vadd.f32 %v6428_v0, %v1947_v33  ;;  %v10324_v52 = vld [vmem:[#allocation11_spill] sm:$0xff]  ;;  %v10331_v33 = vld [vmem:[#allocation89_spill] sm:$0xff] }
 0x2f5   :  { %v10325_v49 = vld [vmem:[#allocation19_spill] sm:$0xff] }
 0x2f6   :  { %v2418_v40 = vpack.c.b16 %v2351_v34, %v2350_v51  ;;  %v2110_v35 = vmax.f32 %v2030_v37, 0.0  ;;  %v10329_v51 = vld [vmem:[#allocation91_spill] sm:$0xff]  ;;  %v1286_v34 = vadd.f32 %v6529_v24, %v10330_v39 }
 0x2f7   :  { %v10333_v37 = vld [vmem:[#allocation23_spill] sm:$0xff] }
 0x2f8   :  { %v2190_v16 = vpack.c.bf16 %v2110_v35, %v2110_v35 }
 0x2f9   :  { %1825 = vrot.lane.b32.xlu1 %v6534_v10, %s5203_s18  ;;  %1829 = vrot.lane.b32.xlu0 %v10322_v43, %s5203_s18  ;;  %v2031_v10 = vadd.f32 %v6428_v0, %v1948_v19  ;;  %v10328_v43 = vld [vmem:[#allocation95_spill] sm:$0xff]  ;;  %v2828_v19 = vrot.slane %v10329_v51, 1 }
 0x2fa   :  { %v2829_v26 = vrot.slane %v10328_v43, 1  ;;  %v6856_v43 = vpop.f32.mrf.mxu1 }
 0x2fb   :  { %v6770_v15 = vpop.permute.xlu1 %1741  ;;  %v6772_v27 = vpop.permute.xlu0 %1745  ;;  %v2111_v56 = vmax.f32 %v2031_v10, 0.0  ;;  %v10332_v10 = vld [vmem:[#allocation99_spill] sm:$0xff]  ;;  %10348 = vst [vmem:[#allocation68_spill] sm:$0xff] %v6856_v43 }
 0x2fc   :  { %1833 = vrot.lane.b32.xlu2 %v10323_v23, %s5203_s18  ;;  %v1285_v23 = vadd.f32 %v6556_v7, %v10331_v33  ;;  %v2830_v57 = vsel %vm848_vm1, %v2828_v19, %v2829_v26  ;;  %v6807_v39 = vpop.permute.xlu2 %1755  ;;  %v2352_v19 = vunpack.c.l.b16 %v2190_v16  ;;  %v10340_v16 = vld [vmem:[#allocation108_spill] sm:$0xff] }
 0x2fe   :  { %v1605_v24 = vadd.f32 %v6554_v17, %v1285_v23 }
 0x300   :  { %5109 = vmatmul.msk.bf16.gmra.mxu1 %vm2446_vm3, %v2418_v40  ;;  %v2191_v40 = vpack.c.bf16 %v2111_v56, %v2111_v56  ;;  %v1949_v35 = vadd.f32 %v6745_v8, %v1605_v24  ;;  %v2837_v24 = vrot.slane %v10340_v16, 1  ;;  %v10345_v16 = vld [vmem:[#allocation142_spill] sm:$0xff] }
 0x301   :  { %1831 = vrot.lane.b32.xlu1 %v10324_v52, %s5203_s18  ;;  %1835 = vrot.lane.b32.xlu0 %v10325_v49, %s5203_s18  ;;  %v2833_v52 = vrot.slane %v10332_v10, 1  ;;  %v1606_v49 = vadd.f32 %v6570_v22, %v1286_v34  ;;  %v10336_v34 = vld [vmem:[#allocation103_spill] sm:$0xff] }
 0x302   :  { %v2353_v7 = vunpack.c.l.b16 %v2191_v40  ;;  %v10337_v40 = vld [vmem:[#allocation112_spill] sm:$0xff] }
 0x303   :  { %v6785_v61 = vpop.permute.xlu1 %1747  ;;  %v6787_v58 = vpop.permute.xlu0 %1751  ;;  %v1950_v56 = vadd.f32 %v1740_v50, %v1606_v49  ;;  %v9908_v50 = vrot.slane %v10337_v40, 1  ;;  %v2032_v49 = vadd.f32 %v6428_v0, %v1949_v35 }
 0x304   :  { %1839 = vrot.lane.b32.xlu2 %v1680_v47, %s5203_s18  ;;  %v2831_v47 = vrot.slane %v10334_v20, 1  ;;  %v2419_v17 = vpack.c.b16 %v2353_v7, %v2352_v19  ;;  %v10346_v20 = vld [vmem:[#allocation18_spill] sm:$0xff] }
 0x305   :  { %v2033_v23 = vadd.f32 %v6428_v0, %v1950_v56  ;;  %v2112_v19 = vmax.f32 %v2032_v49, 0.0 }
 0x306   :  { %v6814_v22 = vsel %vm848_vm1, %v2831_v47, %v2833_v52 }
 0x307   :  { %10335 = vst [vmem:[#allocation79_spill] sm:$0xff] %v6814_v22  ;;  %v2113_v7 = vmax.f32 %v2033_v23, 0.0  ;;  %v2192_v49 = vpack.c.bf16 %v2112_v19, %v2112_v19 }
 0x309   :  { %1837 = vrot.lane.b32.xlu1 %v10333_v37, %s5203_s18  ;;  %2932 = vrot.lane.b32.xlu0 %v2830_v57, %s5202_s17  ;;  %v2835_v57 = vrot.slane %v10336_v34, 1  ;;  %v6825_v37 = vsel %vm848_vm1, %v2829_v26, %v2831_v47  ;;  %v6842_v26 = vsel %vm848_vm1, %v2837_v24, %v9908_v50  ;;  %v2841_v34 = vrot.slane %v10345_v16, 1  ;;  %v10347_v50 = vld [vmem:[#allocation57_spill] sm:$0xff] }
 0x30a   :  { %10338 = vst [vmem:[#allocation87_spill] sm:$0xff] %v6825_v37  ;;  %v2193_v40 = vpack.c.bf16 %v2113_v7, %v2113_v7  ;;  %v1301_v51 = vadd.f32 %v10347_v50, %v10346_v20  ;;  %v2844_v20 = vrot.slane %v6527_v12, 1  ;;  %v10350_v50 = vld [vmem:[#allocation65_spill] sm:$0xff] }
 0x30b   :  { %v6809_v33 = vpop.permute.xlu1 %1753  ;;  %v6811_v10 = vpop.permute.xlu0 %1757  ;;  %v6828_v8 = vsel %vm848_vm1, %v2833_v52, %v2835_v57  ;;  %10341 = vst [vmem:[#allocation75_spill] sm:$0xff] %v6842_v26  ;;  %v10342_v52 = vld [vmem:[#allocation114_spill] sm:$0xff] }
 0x30c   :  { %2936 = vrot.lane.b32.xlu2 %v6814_v22, %s5202_s17  ;;  %10339 = vst [vmem:[#allocation83_spill] sm:$0xff] %v6828_v8  ;;  %v1287_v47 = vadd.f32 %v6620_v53, %v10342_v52  ;;  %v6851_v22 = vpop.permute.xlu2 %1761  ;;  %v2846_v53 = vrot.slane %v6548_v46, 1  ;;  %v1621_v7 = vadd.f32 %v10350_v50, %v1301_v51  ;;  %v2355_v16 = vunpack.c.l.b16 %v2193_v40  ;;  %v10353_v51 = vld [vmem:[#allocation69_spill] sm:$0xff] }
 0x30e   :  { %v1607_v52 = vadd.f32 %v6574_v25, %v1287_v47 }
 0x310   :  { %5110 = vmatmul.msk.bf16.gmra.mxu1 %vm2446_vm3, %v2419_v17  ;;  %v10343_v17 = vld [vmem:[#allocation147_spill] sm:$0xff]  ;;  %v1951_v19 = vadd.f32 %v6770_v15, %v1607_v52 }
 0x311   :  { %2934 = vrot.lane.b32.xlu1 %v6825_v37, %s5202_s17  ;;  %2938 = vrot.lane.b32.xlu0 %v6828_v8, %s5202_s17  ;;  %v2842_v8 = vrot.slane %v10343_v17, 1  ;;  %v10344_v37 = vld [vmem:[#allocation116_spill] sm:$0xff] }
 0x312   :  { %v1288_v23 = vadd.f32 %v6644_v32, %v10344_v37  ;;  %v2034_v15 = vadd.f32 %v6428_v0, %v1951_v19 }
 0x313   :  { %v6835_v56 = vpop.permute.xlu1 %1759  ;;  %v6837_v35 = vpop.permute.xlu0 %1763  ;;  %v2843_v32 = vsel %vm848_vm1, %v2841_v34, %v2842_v8  ;;  %v6875_v34 = vsel %vm848_vm1, %v2844_v20, %v2846_v53 }
 0x314   :  { %2942 = vrot.lane.b32.xlu2 %v6842_v26, %s5202_s17  ;;  %v6861_v26 = vsel %vm848_vm1, %v2835_v57, %v2837_v24  ;;  %v1608_v37 = vadd.f32 %v6642_v55, %v1288_v23  ;;  %10351 = vst [vmem:[#allocation132_spill] sm:$0xff] %v6875_v34  ;;  %v2354_v55 = vunpack.c.l.b16 %v2192_v49  ;;  %v2848_v23 = vrot.slane %v6566_v2, 1  ;;  %v10364_v2 = vld [vmem:[#allocation72_spill] sm:$0xff] }
 0x315   :  { %10349 = vst [vmem:[#allocation143_spill] sm:$0xff] %v6861_v26  ;;  %v2114_v19 = vmax.f32 %v2034_v15, 0.0  ;;  %v10360_v15 = vld [vmem:[#allocation27_spill] sm:$0xff] }
 0x316   :  { %v1952_v25 = vadd.f32 %v6760_v4, %v1608_v37  ;;  %v2420_v50 = vpack.c.b16 %v2355_v16, %v2354_v55  ;;  %v9920_v4 = vrot.slane %v6599_v41, 1  ;;  %v6885_v37 = vpop.permute.xlu2 %1767  ;;  %v2850_v16 = vrot.slane %v6586_v31, 1 }
 0x317   :  { %v2854_v41 = vrot.slane %v6856_v43, 1 }
 0x318   :  { %v2035_v52 = vadd.f32 %v6428_v0, %v1952_v25  ;;  %v10357_v25 = vld [vmem:[#allocation60_spill] sm:$0xff] }
 0x319   :  { %2940 = vrot.lane.b32.xlu1 %v6861_v26, %s5202_s17  ;;  %2944 = vrot.lane.b32.xlu0 %v2843_v32, %s5202_s17  ;;  %v10352_v32 = vld [vmem:[#allocation21_spill] sm:$0xff] }
 0x31a   :  { %v1302_v40 = vadd.f32 %v10353_v51, %v10352_v32  ;;  %v6895_v32 = vpop.f32.mrf.mxu1 }
 0x31b   :  { %v6872_v57 = vpop.permute.xlu1 %1765  ;;  %v1770_v24 = vpop.permute.xlu0 %1769  ;;  %10356 = vst [vmem:[#allocation6_spill] sm:$0xff] %v6895_v32 }
 0x31c   :  { %v1965_v47 = vadd.f32 %v1770_v24, %v1621_v7  ;;  %2948 = vrot.lane.b32.xlu2 %v6875_v34, %s5202_s17  ;;  %v6890_v7 = vsel %vm848_vm1, %v2842_v8, %v2844_v20  ;;  %v6893_v24 = vsel %vm848_vm1, %v2846_v53, %v2848_v23  ;;  %v1622_v55 = vadd.f32 %v10357_v25, %v1302_v40  ;;  %v10359_v53 = vld [vmem:[#allocation127_spill] sm:$0xff]  ;;  %v10363_v25 = vld [vmem:[#allocation70_spill] sm:$0xff] }
 0x31d   :  { %10354 = vst [vmem:[#allocation121_spill] sm:$0xff] %v6890_v7  ;;  %v6906_v8 = vsel %vm848_vm1, %v2850_v16, %v9920_v4  ;;  %v1290_v20 = vadd.f32 %v6666_v5, %v10359_v53  ;;  %v2194_v4 = vpack.c.bf16 %v2114_v19, %v2114_v19  ;;  %v10365_v53 = vld [vmem:[#allocation124_spill] sm:$0xff] }
 0x31e   :  { %v2048_v49 = vadd.f32 %v6428_v0, %v1965_v47  ;;  %10355 = vst [vmem:[#allocation85_spill] sm:$0xff] %v6893_v24  ;;  %v2115_v47 = vmax.f32 %v2035_v52, 0.0  ;;  %v10362_v52 = vld [vmem:[#allocation24_spill] sm:$0xff] }
 0x31f   :  { %10358 = vst [vmem:[#allocation80_spill] sm:$0xff] %v6906_v8  ;;  %v1303_v26 = vadd.f32 %v10363_v25, %v10362_v52  ;;  %v10367_v52 = vrot.slane %v6895_v32, 1  ;;  %v10368_v25 = vld [vmem:[#allocation71_spill] sm:$0xff] }
 0x320   :  { %5111 = vmatmul.msk.bf16.gmra.mxu1 %vm2446_vm3, %v2420_v50  ;;  %v6923_v50 = vsel %vm848_vm1, %v2848_v23, %v2850_v16 }
 0x321   :  { %2946 = vrot.lane.b32.xlu1 %v6890_v7, %s5202_s17  ;;  %2950 = vrot.lane.b32.xlu0 %v6893_v24, %s5202_s17  ;;  %v2128_v7 = vmax.f32 %v2048_v49, 0.0  ;;  %v10361_v24 = vld [vmem:[#allocation64_spill] sm:$0xff]  ;;  %v1289_v49 = vadd.f32 %v6626_v38, %v10365_v53  ;;  %10366 = vst [vmem:[#allocation138_spill] sm:$0xff] %v6923_v50  ;;  %v2856_v19 = vsel %vm848_vm1, %v2854_v41, %v10367_v52  ;;  %v2356_v38 = vunpack.c.l.b16 %v2194_v4 }
 0x322   :  { %v1304_v40 = vadd.f32 %v10361_v24, %v10360_v15  ;;  %v1610_v24 = vadd.f32 %v6648_v18, %v1290_v20 }
 0x323   :  { %v1772_v51 = vpop.permute.xlu1 %1771  ;;  %v2208_v15 = vpack.c.bf16 %v2128_v7, %v2128_v7 }
 0x324   :  { %v1966_v34 = vadd.f32 %v1772_v51, %v1622_v55  ;;  %2954 = vrot.lane.b32.xlu2 %v6906_v8, %s5202_s17  ;;  %v1624_v5 = vadd.f32 %v10364_v2, %v1304_v40  ;;  %v2195_v55 = vpack.c.bf16 %v2115_v47, %v2115_v47  ;;  %v1776_v51 = vpop.permute.xlu0 %1775  ;;  %v1609_v2 = vadd.f32 %v6656_v63, %v1289_v49  ;;  %v1774_v40 = vpop.permute.xlu2 %1773 }
 0x325   :  { %v1954_v23 = vadd.f32 %v6785_v61, %v1610_v24  ;;  %v2370_v41 = vunpack.c.l.b16 %v2208_v15  ;;  %v10371_v15 = vld [vmem:[#allocation34_spill] sm:$0xff] }
 0x326   :  { %v2049_v31 = vadd.f32 %v6428_v0, %v1966_v34  ;;  %v1623_v34 = vadd.f32 %v10368_v25, %v1303_v26  ;;  %v1968_v7 = vadd.f32 %v1776_v51, %v1624_v5  ;;  %v1953_v16 = vadd.f32 %v6772_v27, %v1609_v2  ;;  %v10369_v27 = vld [vmem:[#allocation31_spill] sm:$0xff]  ;;  %v10370_v5 = vld [vmem:[#allocation77_spill] sm:$0xff] }
 0x327   :  { %v2037_v63 = vadd.f32 %v6428_v0, %v1954_v23  ;;  %v10374_v23 = vld [vmem:[#allocation130_spill] sm:$0xff] }
 0x328   :  { %v2129_v8 = vmax.f32 %v2049_v31, 0.0  ;;  %v2357_v31 = vunpack.c.l.b16 %v2195_v55  ;;  %v1967_v47 = vadd.f32 %v1774_v40, %v1623_v34  ;;  %v2051_v49 = vadd.f32 %v6428_v0, %v1968_v7  ;;  %v10373_v34 = vld [vmem:[#allocation134_spill] sm:$0xff] }
 0x329   :  { %2952 = vrot.lane.b32.xlu1 %v6923_v50, %s5202_s17  ;;  %2956 = vrot.lane.b32.xlu0 %v2856_v19, %s5202_s17  ;;  %v2036_v52 = vadd.f32 %v6428_v0, %v1953_v16  ;;  %v2117_v61 = vmax.f32 %v2037_v63, 0.0  ;;  %v1305_v55 = vadd.f32 %v10370_v5, %v10369_v27  ;;  %v10372_v19 = vld [vmem:[#allocation82_spill] sm:$0xff]  ;;  %v1292_v2 = vadd.f32 %v6664_v11, %v10373_v34  ;;  %v10376_v63 = vld [vmem:[#allocation81_spill] sm:$0xff] }
 0x32a   :  { %v2209_v18 = vpack.c.bf16 %v2129_v8, %v2129_v8  ;;  %v2421_v26 = vpack.c.b16 %v2357_v31, %v2356_v38  ;;  %v2050_v4 = vadd.f32 %v6428_v0, %v1967_v47  ;;  %v2131_v8 = vmax.f32 %v2051_v49, 0.0 }
 0x32b   :  { %v2116_v51 = vmax.f32 %v2036_v52, 0.0  ;;  %v1306_v25 = vadd.f32 %v10372_v19, %v10371_v15  ;;  %v2197_v40 = vpack.c.bf16 %v2117_v61, %v2117_v61  ;;  %v1778_v7 = vpop.permute.xlu1 %1777  ;;  %v1612_v31 = vadd.f32 %v6678_v21, %v1292_v2  ;;  %v10379_v2 = vld [vmem:[#allocation137_spill] sm:$0xff] }
 0x32c   :  { %v2371_v20 = vunpack.c.l.b16 %v2209_v18  ;;  %v2130_v24 = vmax.f32 %v2050_v4, 0.0  ;;  %v2211_v38 = vpack.c.bf16 %v2131_v8, %v2131_v8  ;;  %v1291_v18 = vadd.f32 %v6668_v3, %v10374_v23  ;;  %v1780_v49 = vpop.permute.xlu2 %1779 }
 0x32d   :  { %v2196_v16 = vpack.c.bf16 %v2116_v51, %v2116_v51  ;;  %v2359_v52 = vunpack.c.l.b16 %v2197_v40  ;;  %v1956_v11 = vadd.f32 %v6787_v58, %v1612_v31  ;;  %v1293_v40 = vadd.f32 %v6702_v29, %v10379_v2  ;;  %v10385_v29 = vld [vmem:[#allocation26_spill] sm:$0xff]  ;;  %v10386_v2 = vld [vmem:[#allocation4_spill] sm:$0xff] }
 0x32e   :  { %v2428_v53 = vpack.c.b16 %v2371_v20, %v2370_v41  ;;  %v2210_v47 = vpack.c.bf16 %v2130_v24, %v2130_v24  ;;  %v10375_v41 = vld [vmem:[#allocation66_spill] sm:$0xff]  ;;  %v2373_v4 = vunpack.c.l.b16 %v2211_v38 }
 0x32f   :  { %v1625_v20 = vadd.f32 %v10375_v41, %v1305_v55  ;;  %v2358_v3 = vunpack.c.l.b16 %v2196_v16  ;;  %v2039_v51 = vadd.f32 %v6428_v0, %v1956_v11  ;;  %v10382_v41 = vld [vmem:[#allocation86_spill] sm:$0xff] }
 0x330   :  { %5112 = vmatmul.msk.bf16.gmra.mxu1 %vm2446_vm3, %v2421_v26  ;;  %5119 = vmatmul.msk.bf16.vlgmr.msrb.gmra.mxu3 %vm2446_vm3, %v2428_v53  ;;  %v1611_v26 = vadd.f32 %v6676_v6, %v1291_v18  ;;  %v1626_v53 = vadd.f32 %v10376_v63, %v1306_v25  ;;  %v2372_v27 = vunpack.c.l.b16 %v2210_v47  ;;  %v10378_v25 = vld [vmem:[#allocation101_spill] sm:$0xff] }
 0x331   :  { %v1969_v61 = vadd.f32 %v1778_v7, %v1625_v20  ;;  %v2422_v21 = vpack.c.b16 %v2359_v52, %v2358_v3  ;;  %v2119_v58 = vmax.f32 %v2039_v51, 0.0  ;;  %v10380_v18 = vld [vmem:[#allocation141_spill] sm:$0xff]  ;;  %v10383_v52 = vld [vmem:[#allocation90_spill] sm:$0xff]  ;;  %v1782_v3 = vpop.permute.xlu0 %1781 }
 0x332   :  { %v1955_v8 = vadd.f32 %v6777_v42, %v1611_v26  ;;  %v1970_v5 = vadd.f32 %v1780_v49, %v1626_v53  ;;  %v2429_v24 = vpack.c.b16 %v2373_v4, %v2372_v27  ;;  %v10377_v42 = vld [vmem:[#allocation43_spill] sm:$0xff]  ;;  %v1294_v7 = vadd.f32 %v6715_v44, %v10380_v18  ;;  %v10381_v47 = vld [vmem:[#allocation41_spill] sm:$0xff]  ;;  %v10384_v4 = vld [vmem:[#allocation94_spill] sm:$0xff] }
 0x333   :  { %v2052_v55 = vadd.f32 %v6428_v0, %v1969_v61  ;;  %v1308_v34 = vadd.f32 %v10378_v25, %v10377_v42  ;;  %v2199_v31 = vpack.c.bf16 %v2119_v58, %v2119_v58  ;;  %v1307_v20 = vadd.f32 %v10382_v41, %v10381_v47  ;;  %v1784_v26 = vpop.permute.xlu1 %1783  ;;  %v10388_v18 = vld [vmem:[#allocation44_spill] sm:$0xff] }
 0x334   :  { %v2038_v6 = vadd.f32 %v6428_v0, %v1955_v8  ;;  %v2053_v15 = vadd.f32 %v6428_v0, %v1970_v5  ;;  %v1613_v53 = vadd.f32 %v6680_v1, %v1293_v40  ;;  %v1614_v8 = vadd.f32 %v10385_v29, %v1294_v7  ;;  %v10389_v7 = vld [vmem:[#allocation106_spill] sm:$0xff]  ;;  %v10391_v47 = vld [vmem:[#allocation100_spill] sm:$0xff] }
 0x335   :  { %v2132_v19 = vmax.f32 %v2052_v55, 0.0  ;;  %v1628_v11 = vadd.f32 %v10383_v52, %v1308_v34  ;;  %v1627_v61 = vadd.f32 %v10384_v4, %v1307_v20  ;;  %v2361_v27 = vunpack.c.l.b16 %v2199_v31  ;;  %v10395_v29 = vld [vmem:[#allocation28_spill] sm:$0xff] }
 0x336   :  { %v2118_v38 = vmax.f32 %v2038_v6, 0.0  ;;  %v2133_v23 = vmax.f32 %v2053_v15, 0.0  ;;  %v1957_v44 = vadd.f32 %v6809_v33, %v1613_v53  ;;  %v1958_v55 = vadd.f32 %v6807_v39, %v1614_v8  ;;  %v10387_v39 = vld [vmem:[#allocation36_spill] sm:$0xff]  ;;  %v10393_v53 = vld [vmem:[#allocation22_spill] sm:$0xff] }
 0x337   :  { %v2212_v16 = vpack.c.bf16 %v2132_v19, %v2132_v19  ;;  %v1971_v6 = vadd.f32 %v1782_v3, %v1627_v61  ;;  %v1296_v40 = vadd.f32 %v10387_v39, %v10386_v2  ;;  %v1309_v31 = vadd.f32 %v10389_v7, %v10388_v18 }
 0x338   :  { %v2198_v63 = vpack.c.bf16 %v2118_v38, %v2118_v38  ;;  %v2213_v49 = vpack.c.bf16 %v2133_v23, %v2133_v23  ;;  %v2040_v1 = vadd.f32 %v6428_v0, %v1957_v44  ;;  %v2041_v42 = vadd.f32 %v6428_v0, %v1958_v55 }
 0x339   :  { %v2374_v5 = vunpack.c.l.b16 %v2212_v16  ;;  %v2054_v25 = vadd.f32 %v6428_v0, %v1971_v6  ;;  %v10390_v16 = vld [vmem:[#allocation49_spill] sm:$0xff]  ;;  %v1788_v52 = vpop.permute.xlu0 %1787  ;;  %v1616_v8 = vadd.f32 %v10395_v29, %v1296_v40  ;;  %v10406_v29 = vld [vmem:[#allocation118_spill] sm:$0xff] }
 0x33a   :  { %v2360_v51 = vunpack.c.l.b16 %v2198_v63  ;;  %v2120_v33 = vmax.f32 %v2040_v1, 0.0  ;;  %v2121_v38 = vmax.f32 %v2041_v42, 0.0  ;;  %v1310_v41 = vadd.f32 %v10391_v47, %v10390_v16  ;;  %v10392_v63 = vld [vmem:[#allocation2_spill] sm:$0xff]  ;;  %v10400_v16 = vld [vmem:[#allocation13_spill] sm:$0xff] }
 0x33b   :  { %v2134_v23 = vmax.f32 %v2054_v25, 0.0  ;;  %v10401_v47 = vld [vmem:[#allocation46_spill] sm:$0xff] }
 0x33c   :  { %v2423_v15 = vpack.c.b16 %v2361_v27, %v2360_v51  ;;  %v2200_v20 = vpack.c.bf16 %v2120_v33, %v2120_v33  ;;  %v2201_v61 = vpack.c.bf16 %v2121_v38, %v2121_v38  ;;  %v10396_v27 = vld [vmem:[#allocation30_spill] sm:$0xff]  ;;  %v1786_v51 = vpop.permute.xlu2 %1785 }
 0x33d   :  { %v2214_v3 = vpack.c.bf16 %v2134_v23, %v2134_v23  ;;  %v10398_v23 = vld [vmem:[#allocation53_spill] sm:$0xff] }
 0x33e   :  { %v2362_v55 = vunpack.c.l.b16 %v2200_v20  ;;  %v2363_v1 = vunpack.c.l.b16 %v2201_v61  ;;  %v10402_v20 = vld [vmem:[#allocation9_spill] sm:$0xff]  ;;  %v10405_v61 = vld [vmem:[#allocation55_spill] sm:$0xff] }
 0x33f   :  { %v2376_v42 = vunpack.c.l.b16 %v2214_v3 }
 0x340   :  { %5113 = vmatmul.msk.bf16.gmra.mxu1 %vm2446_vm3, %v2422_v21  ;;  %5120 = vmatmul.msk.bf16.gmra.mxu3 %vm2446_vm3, %v2429_v24  ;;  %v1972_v21 = vadd.f32 %v1784_v26, %v1628_v11  ;;  %v2375_v24 = vunpack.c.l.b16 %v2213_v49  ;;  %v1295_v49 = vadd.f32 %v10393_v53, %v10392_v63  ;;  %v10394_v11 = vld [vmem:[#allocation109_spill] sm:$0xff]  ;;  %v2424_v25 = vpack.c.b16 %v2363_v1, %v2362_v55 }
 0x341   :  { %v1630_v4 = vadd.f32 %v10394_v11, %v1310_v41  ;;  %v1298_v41 = vadd.f32 %v10401_v47, %v10400_v16  ;;  %v10413_v16 = vld [vmem:[#allocation15_spill] sm:$0xff]  ;;  %v10414_v47 = vld [vmem:[#allocation58_spill] sm:$0xff] }
 0x342   :  { %v2055_v58 = vadd.f32 %v6428_v0, %v1972_v21  ;;  %v2430_v19 = vpack.c.b16 %v2375_v24, %v2374_v5  ;;  %v1615_v44 = vadd.f32 %v10396_v27, %v1295_v49  ;;  %v10397_v5 = vld [vmem:[#allocation105_spill] sm:$0xff]  ;;  %v1960_v24 = vadd.f32 %v6835_v56, %v1616_v8 }
 0x343   :  { %v1629_v21 = vadd.f32 %v10397_v5, %v1309_v31  ;;  %v1312_v8 = vadd.f32 %v10406_v29, %v10405_v61 }
 0x344   :  { %v2135_v34 = vmax.f32 %v2055_v58, 0.0  ;;  %v1959_v58 = vadd.f32 %v6811_v10, %v1615_v44  ;;  %v2043_v33 = vadd.f32 %v6428_v0, %v1960_v24  ;;  %v10399_v10 = vld [vmem:[#allocation117_spill] sm:$0xff]  ;;  %v10407_v44 = vld [vmem:[#allocation104_spill] sm:$0xff]  ;;  %v1792_v24 = vpop.permute.xlu2 %1791 }
 0x345   :  { %v1311_v18 = vadd.f32 %v10399_v10, %v10398_v23 }
 0x346   :  { %v2215_v26 = vpack.c.bf16 %v2135_v34, %v2135_v34  ;;  %v2042_v39 = vadd.f32 %v6428_v0, %v1959_v58  ;;  %v2123_v56 = vmax.f32 %v2043_v33, 0.0 }
 0x347   :  { %v1631_v5 = vadd.f32 %v10407_v44, %v1311_v18  ;;  %v10411_v18 = vrot.slane %v6895_v32, 1 }
 0x348   :  { %v2377_v6 = vunpack.c.l.b16 %v2215_v26  ;;  %v2122_v7 = vmax.f32 %v2042_v39, 0.0  ;;  %v10403_v26 = vld [vmem:[#allocation48_spill] sm:$0xff]  ;;  %v2203_v53 = vpack.c.bf16 %v2123_v56, %v2123_v56 }
 0x349   :  { %v1297_v63 = vadd.f32 %v10403_v26, %v10402_v20  ;;  %v10415_v26 = vld [vmem:[#allocation59_spill] sm:$0xff] }
 0x34a   :  { %v2431_v2 = vpack.c.b16 %v2377_v6, %v2376_v42  ;;  %v2202_v3 = vpack.c.bf16 %v2122_v7, %v2122_v7  ;;  %v10409_v6 = vld [vmem:[#allocation122_spill] sm:$0xff]  ;;  %v2365_v1 = vunpack.c.l.b16 %v2203_v53 }
 0x350   :  { %5114 = vmatmul.msk.bf16.gmra.mxu1 %vm2446_vm3, %v2423_v15  ;;  %5121 = vmatmul.msk.bf16.gmra.mxu3 %vm2446_vm3, %v2430_v19  ;;  %v1974_v15 = vadd.f32 %v1788_v52, %v1630_v4  ;;  %v1973_v19 = vadd.f32 %v1786_v51, %v1629_v21  ;;  %v10404_v52 = vld [vmem:[#allocation52_spill] sm:$0xff]  ;;  %v1790_v4 = vpop.permute.xlu1 %1789  ;;  %v10408_v21 = vld [vmem:[#allocation45_spill] sm:$0xff] }
 0x351   :  { %v1618_v11 = vadd.f32 %v10404_v52, %v1298_v41  ;;  %v1617_v51 = vadd.f32 %v10408_v21, %v1297_v63  ;;  %v1299_v41 = vadd.f32 %v10414_v47, %v10413_v16  ;;  %v10418_v52 = vld [vmem:[#allocation62_spill] sm:$0xff]  ;;  %v10421_v21 = vld [vmem:[#allocation56_spill] sm:$0xff] }
 0x352   :  { %v2057_v34 = vadd.f32 %v6428_v0, %v1974_v15  ;;  %v2056_v40 = vadd.f32 %v6428_v0, %v1973_v19  ;;  %v1632_v15 = vadd.f32 %v10409_v6, %v1312_v8  ;;  %v1975_v19 = vadd.f32 %v1790_v4, %v1631_v5  ;;  %v10423_v6 = vld [vmem:[#allocation113_spill] sm:$0xff] }
 0x353   :  { %v1962_v55 = vadd.f32 %v6837_v35, %v1618_v11  ;;  %v1961_v42 = vadd.f32 %v6851_v22, %v1617_v51  ;;  %v10422_v51 = vld [vmem:[#allocation110_spill] sm:$0xff] }
 0x354   :  { %v2137_v38 = vmax.f32 %v2057_v34, 0.0  ;;  %v2136_v31 = vmax.f32 %v2056_v40, 0.0  ;;  %v1976_v34 = vadd.f32 %v1792_v24, %v1632_v15  ;;  %v2058_v56 = vadd.f32 %v6428_v0, %v1975_v19 }
 0x355   :  { %v2044_v35 = vadd.f32 %v6428_v0, %v1961_v42 }
 0x356   :  { %v2217_v49 = vpack.c.bf16 %v2137_v38, %v2137_v38  ;;  %v2216_v27 = vpack.c.bf16 %v2136_v31, %v2136_v31  ;;  %v2059_v10 = vadd.f32 %v6428_v0, %v1976_v34  ;;  %v2138_v31 = vmax.f32 %v2058_v56, 0.0 }
 0x357   :  { %v2124_v20 = vmax.f32 %v2044_v35, 0.0 }
 0x358   :  { %v2379_v58 = vunpack.c.l.b16 %v2217_v49  ;;  %v2378_v33 = vunpack.c.l.b16 %v2216_v27  ;;  %v2139_v53 = vmax.f32 %v2059_v10, 0.0  ;;  %v10417_v49 = vld [vmem:[#allocation17_spill] sm:$0xff]  ;;  %v2218_v29 = vpack.c.bf16 %v2138_v31, %v2138_v31  ;;  %v10420_v27 = vld [vmem:[#allocation50_spill] sm:$0xff]  ;;  %v1796_v5 = vpop.permute.xlu1 %1795 }
 0x359   :  { %v1300_v11 = vadd.f32 %v10418_v52, %v10417_v49  ;;  %v1619_v44 = vadd.f32 %v10420_v27, %v1299_v41  ;;  %v7059_v31 = vld [vmem:[%s9809_s2] ss:$0 sm:$0xff]  ;;  %v10429_v52 = vld [vmem:[#allocation67_spill] sm:$0xff]  ;;  %s5204_s2 = smov 96  }
 0x35a   :  { %v2432_v38 = vpack.c.b16 %v2379_v58, %v2378_v33  ;;  %v2219_v24 = vpack.c.bf16 %v2139_v53, %v2139_v53  ;;  %v10425_v58 = vld [vmem:[#allocation61_spill] sm:$0xff]  ;;  %v10426_v33 = vld [vmem:[#allocation123_spill] sm:$0xff] }
 0x35b   :  { %v1620_v19 = vadd.f32 %v10425_v58, %v1300_v11  ;;  %v10430_v11 = vld [vmem:[#allocation125_spill] sm:$0xff] }
 0x35c   :  { %v2381_v10 = vunpack.c.l.b16 %v2219_v24 }
 0x35d   :  { %v1964_v35 = vadd.f32 %v6885_v37, %v1620_v19 }
 0x360   :  { %5115 = vmatmul.msk.bf16.gmra.mxu1 %vm2446_vm3, %v2424_v25  ;;  %5122 = vmatmul.msk.bf16.gmra.mxu3 %vm2446_vm3, %v2431_v2  ;;  %v2364_v25 = vunpack.c.l.b16 %v2202_v3  ;;  %v2045_v2 = vadd.f32 %v6428_v0, %v1962_v55  ;;  %v10416_v0 = vld [vmem:[#allocation126_spill] sm:$0xff]  ;;  %v2204_v3 = vpack.c.bf16 %v2124_v20, %v2124_v20  ;;  %v1313_v55 = vadd.f32 %v10422_v51, %v10421_v21 }
 0x361   :  { %v1314_v63 = vadd.f32 %v10416_v0, %v10415_v26  ;;  %v2047_v20 = vadd.f32 %v7059_v31, %v1964_v35 }
 0x362   :  { %v2425_v40 = vpack.c.b16 %v2365_v1, %v2364_v25  ;;  %v2125_v22 = vmax.f32 %v2045_v2, 0.0  ;;  %v1794_v25 = vpop.permute.xlu0 %1793  ;;  %v1633_v34 = vadd.f32 %v10426_v33, %v1313_v55  ;;  %v1963_v2 = vadd.f32 %v6872_v57, %v1619_v44  ;;  %v10434_v55 = vld [vmem:[#allocation131_spill] sm:$0xff] }
 0x363   :  { %v1634_v15 = vadd.f32 %v10423_v6, %v1314_v63  ;;  %v2127_v53 = vmax.f32 %v2047_v20, 0.0  ;;  %v10439_v20 = vld [vmem:[#allocation76_spill] sm:$0xff] }
 0x364   :  { %v2205_v4 = vpack.c.bf16 %v2125_v22, %v2125_v22  ;;  %v1977_v22 = vadd.f32 %v1794_v25, %v1633_v34  ;;  %v2046_v16 = vadd.f32 %v7059_v31, %v1963_v2 }
 0x365   :  { %v1978_v56 = vadd.f32 %v1796_v5, %v1634_v15  ;;  %v2207_v6 = vpack.c.bf16 %v2127_v53, %v2127_v53  ;;  %v1798_v15 = vpop.permute.xlu2 %1797 }
 0x366   :  { %v2367_v42 = vunpack.c.l.b16 %v2205_v4  ;;  %v2060_v37 = vadd.f32 %v7059_v31, %v1977_v22  ;;  %v2126_v0 = vmax.f32 %v2046_v16, 0.0  ;;  %v1316_v4 = vadd.f32 %v10430_v11, %v10429_v52  ;;  %v10442_v52 = vld [vmem:[#allocation78_spill] sm:$0xff] }
 0x367   :  { %v2061_v47 = vadd.f32 %v7059_v31, %v1978_v56  ;;  %v2369_v56 = vunpack.c.l.b16 %v2207_v6  ;;  %v10443_v11 = vld [vmem:[#allocation150_spill] sm:$0xff] }
 0x368   :  { %v2140_v49 = vmax.f32 %v2060_v37, 0.0  ;;  %v2206_v5 = vpack.c.bf16 %v2126_v0, %v2126_v0  ;;  %v1636_v24 = vadd.f32 %v10434_v55, %v1316_v4  ;;  %v10440_v37 = vld [vmem:[#allocation146_spill] sm:$0xff]  ;;  %v1318_v4 = vadd.f32 %v10443_v11, %v10442_v52  ;;  %v10445_v55 = vld [vmem:[#allocation149_spill] sm:$0xff] }
 0x369   :  { %v2141_v63 = vmax.f32 %v2061_v47, 0.0  ;;  %v1317_v0 = vadd.f32 %v10440_v37, %v10439_v20 }
 0x36a   :  { %v1800_v51 = vpop.permute.xlu0 %1799  ;;  %v2220_v58 = vpack.c.bf16 %v2140_v49, %v2140_v49  ;;  %v2368_v34 = vunpack.c.l.b16 %v2206_v5 }
 0x36b   :  { %v2221_v21 = vpack.c.bf16 %v2141_v63, %v2141_v63  ;;  %v1980_v33 = vadd.f32 %v1800_v51, %v1636_v24  ;;  %v1638_v24 = vadd.f32 %v10445_v55, %v1318_v4  ;;  %v10451_v4 = vld [vmem:[#allocation148_spill] sm:$0xff] }
 0x36c   :  { %v2427_v22 = vpack.c.b16 %v2369_v56, %v2368_v34 }
 0x36d   :  { %v7017_v39 = vpop.f32.mrf.mxu1  ;;  %v2383_v2 = vunpack.c.l.b16 %v2221_v21  ;;  %v2063_v35 = vadd.f32 %v7059_v31, %v1980_v33  ;;  %v1804_v21 = vpop.permute.xlu2 %1803 }
 0x36e   :  { %10410 = vst [vmem:[#allocation139_spill] sm:$0xff] %v7017_v39  ;;  %v2857_v23 = vrot.slane %v7017_v39, 1 }
 0x370   :  { %5116 = vmatmul.msk.bf16.gmra.mxu1 %vm2446_vm3, %v2425_v40  ;;  %5123 = vmatmul.msk.bf16.gmra.mxu3 %vm2446_vm3, %v2432_v38  ;;  %v7028_v7 = vsel %vm848_vm1, %v10411_v18, %v2857_v23  ;;  %v2380_v40 = vunpack.c.l.b16 %v2218_v29  ;;  %v2366_v38 = vunpack.c.l.b16 %v2204_v3  ;;  %v10431_v29 = vld [vmem:[#allocation63_spill] sm:$0xff]  ;;  %v10432_v3 = vld [vmem:[#allocation129_spill] sm:$0xff] }
 0x371   :  { %10412 = vst [vmem:[#allocation10_spill] sm:$0xff] %v7028_v7  ;;  %2958 = vrot.lane.b32.xlu1 %v7028_v7, %s5202_s17  ;;  %v1315_v27 = vadd.f32 %v10432_v3, %v10431_v29  ;;  %v1802_v29 = vpop.permute.xlu1 %1801 }
 0x372   :  { %v2433_v57 = vpack.c.b16 %v2381_v10, %v2380_v40 }
 0x375   :  { %v7038_v61 = vpop.f32.mrf.mxu1 }
 0x376   :  { %10419 = vst [vmem:[#allocation14_spill] sm:$0xff] %v7038_v61  ;;  %v2859_v8 = vrot.slane %v7038_v61, 1 }
 0x378   :  { %v7046_v1 = vsel %vm848_vm1, %v2857_v23, %v2859_v8  ;;  %v2426_v23 = vpack.c.b16 %v2367_v42, %v2366_v38  ;;  %v10436_v42 = vld [vmem:[#allocation128_spill] sm:$0xff]  ;;  %v2382_v38 = vunpack.c.l.b16 %v2220_v58 }
 0x379   :  { %10424 = vst [vmem:[#allocation11_spill] sm:$0xff] %v7046_v1  ;;  %2960 = vrot.lane.b32.xlu2 %v7046_v1, %s5202_s17  ;;  %v1635_v25 = vadd.f32 %v10436_v42, %v1315_v27  ;;  %v10444_v27 = vld [vmem:[#allocation135_spill] sm:$0xff] }
 0x37a   :  { %v2434_v16 = vpack.c.b16 %v2383_v2, %v2382_v38  ;;  %v1637_v5 = vadd.f32 %v10444_v27, %v1317_v0  ;;  %v1808_v0 = vpop.permute.xlu1 %1807 }
 0x37b   :  { %v1979_v40 = vadd.f32 %v1798_v15, %v1635_v25  ;;  %v1982_v15 = vadd.f32 %v1804_v21, %v1638_v24 }
 0x37d   :  { %v7054_v18 = vpop.f32.mrf.mxu1  ;;  %v2062_v47 = vadd.f32 %v7059_v31, %v1979_v40  ;;  %v2065_v56 = vadd.f32 %v7059_v31, %v1982_v15 }
 0x37e   :  { %10427 = vst [vmem:[#allocation19_spill] sm:$0xff] %v7054_v18  ;;  %v2861_v41 = vrot.slane %v7054_v18, 1 }
 0x37f   :  { %v2142_v63 = vmax.f32 %v2062_v47, 0.0 }
 0x380   :  { %5117 = vmatmul.msk.bf16.gmra.mxu1 %vm2446_vm3, %v2426_v23  ;;  %5124 = vmatmul.msk.bf16.gmra.mxu3 %vm2446_vm3, %v2433_v57  ;;  %v7069_v26 = vsel %vm848_vm1, %v2859_v8, %v2861_v41 }
 0x381   :  { %10428 = vst [vmem:[#allocation20_spill] sm:$0xff] %v7069_v26  ;;  %2962 = vrot.lane.b32.xlu0 %v7069_v26, %s5202_s17  ;;  %v2222_v3 = vpack.c.bf16 %v2142_v63, %v2142_v63  ;;  %v10449_v63 = vld [vmem:[#allocation84_spill] sm:$0xff] }
 0x383   :  { %v2384_v6 = vunpack.c.l.b16 %v2222_v3  ;;  %v1806_v3 = vpop.permute.xlu0 %1805 }
 0x385   :  { %v7077_v44 = vpop.f32.mrf.mxu1 }
 0x386   :  { %10433 = vst [vmem:[#allocation93_spill] sm:$0xff] %v7077_v44  ;;  %v2863_v8 = vrot.slane %v7077_v44, 1 }
 0x388   :  { %v7082_v19 = vsel %vm848_vm1, %v2861_v41, %v2863_v8  ;;  %v2143_v41 = vmax.f32 %v2063_v35, 0.0 }
 0x389   :  { %10435 = vst [vmem:[#allocation89_spill] sm:$0xff] %v7082_v19  ;;  %2964 = vrot.lane.b32.xlu1 %v7082_v19, %s5202_s17 }
 0x38a   :  { %v2223_v53 = vpack.c.bf16 %v2143_v41, %v2143_v41  ;;  %v2145_v41 = vmax.f32 %v2065_v56, 0.0 }
 0x38c   :  { %v2385_v51 = vunpack.c.l.b16 %v2223_v53  ;;  %v10450_v53 = vld [vmem:[#allocation144_spill] sm:$0xff]  ;;  %v2225_v11 = vpack.c.bf16 %v2145_v41, %v2145_v41 }
 0x38d   :  { %v7088_v10 = vpop.f32.mrf.mxu1  ;;  %v1319_v52 = vadd.f32 %v10450_v53, %v10449_v63 }
 0x38e   :  { %10437 = vst [vmem:[#allocation23_spill] sm:$0xff] %v7088_v10  ;;  %v9933_v23 = vrot.slane %v7088_v10, 1  ;;  %v2435_v25 = vpack.c.b16 %v2385_v51, %v2384_v6  ;;  %v2387_v51 = vunpack.c.l.b16 %v2225_v11 }
 0x38f   :  { %v1639_v27 = vadd.f32 %v6540_v30, %v1319_v52  ;;  %v10455_v30 = vld [vmem:[#allocation96_spill] sm:$0xff] }
 0x390   :  { %5118 = vmatmul.msk.bf16.gmra.mxu1 %vm2446_vm3, %v2427_v22  ;;  %5125 = vmatmul.msk.bf16.gmra.mxu3 %vm2446_vm3, %v2434_v16  ;;  %v7097_v57 = vsel %vm848_vm1, %v2863_v8, %v9933_v23  ;;  %v1981_v8 = vadd.f32 %v1802_v29, %v1637_v5  ;;  %v10448_v16 = vld [vmem:[#allocation88_spill] sm:$0xff] }
 0x391   :  { %10438 = vst [vmem:[#allocation114_spill] sm:$0xff] %v7097_v57  ;;  %2966 = vrot.lane.b32.xlu2 %v7097_v57, %s5202_s17  ;;  %v1320_v47 = vadd.f32 %v6568_v14, %v10448_v16  ;;  %v1812_v16 = vpop.permute.xlu0 %1811 }
 0x392   :  { %v2064_v58 = vadd.f32 %v7059_v31, %v1981_v8  ;;  %v1983_v8 = vadd.f32 %v1806_v3, %v1639_v27 }
 0x393   :  { %v1640_v29 = vadd.f32 %v10451_v4, %v1320_v47 }
 0x394   :  { %v2144_v22 = vmax.f32 %v2064_v58, 0.0  ;;  %v2066_v6 = vadd.f32 %v7059_v31, %v1983_v8 }
 0x395   :  { %v7103_v49 = vpop.f32.mrf.mxu1  ;;  %v1984_v21 = vadd.f32 %v1808_v0, %v1640_v29 }
 0x396   :  { %10441 = vst [vmem:[#allocation116_spill] sm:$0xff] %v7103_v49  ;;  %v9934_v33 = vrot.slane %v7103_v49, 1  ;;  %v9927_v34 = vrot.slane %v7103_v49, 2  ;;  %v2224_v37 = vpack.c.bf16 %v2144_v22, %v2144_v22 }
 0x397   :  { %v2067_v24 = vadd.f32 %v7059_v31, %v1984_v21  ;;  %v10459_v21 = vld [vmem:[#allocation98_spill] sm:$0xff] }
 0x398   :  { %v2386_v5 = vunpack.c.l.b16 %v2224_v37 }
 0x399   :  { %v2147_v15 = vmax.f32 %v2067_v24, 0.0 }
 0x39a   :  { %v2436_v14 = vpack.c.b16 %v2387_v51, %v2386_v5  ;;  %v10460_v51 = vld [vmem:[#allocation155_spill] sm:$0xff] }
 0x39b   :  { %v2227_v22 = vpack.c.bf16 %v2147_v15, %v2147_v15  ;;  %v1323_v8 = vadd.f32 %v10460_v51, %v10459_v21  ;;  %v10462_v15 = vld [vmem:[#allocation158_spill] sm:$0xff]  ;;  %v10469_v51 = vld [vmem:[#allocation111_spill] sm:$0xff] }
 0x39d   :  { %v2648_v42 = vpop.f32.mrf.mxu1  ;;  %v2389_v0 = vunpack.c.l.b16 %v2227_v22 }
 0x39e   :  { %v4241_v2 = vrot.slane %v2648_v42, 1  ;;  %v4449_v40 = vrot.slane %v2648_v42, 2  ;;  %v2146_v42 = vmax.f32 %v2066_v6, 0.0  ;;  %v10461_v6 = vld [vmem:[#allocation102_spill] sm:$0xff] }
 0x3a0   :  { %5126 = vmatmul.msk.bf16.gmra.mxu3 %vm2446_vm3, %v2435_v25  ;;  %v7117_v38 = vsel %vm848_vm1, %v9934_v33, %v4241_v2  ;;  %v7122_v35 = vsel %vm3124_vm4, %v9927_v34, %v4449_v40  ;;  %v1322_v2 = vadd.f32 %v6546_v60, %v10455_v30  ;;  %v10456_v40 = vld [vmem:[#allocation92_spill] sm:$0xff]  ;;  %v2226_v41 = vpack.c.bf16 %v2146_v42, %v2146_v42 }
 0x3a1   :  { %10446 = vst [vmem:[#allocation18_spill] sm:$0xff] %v7117_v38  ;;  %v1321_v56 = vadd.f32 %v6582_v62, %v10456_v40  ;;  %v1324_v42 = vadd.f32 %v10462_v15, %v10461_v6 }
 0x3a2   :  { %10447 = vst [vmem:[#allocation57_spill] sm:$0xff] %v7122_v35  ;;  %v1642_v47 = vadd.f32 %v6595_v36, %v1322_v2  ;;  %v2388_v11 = vunpack.c.l.b16 %v2226_v41 }
 0x3a3   :  { %v1641_v37 = vadd.f32 %v6580_v54, %v1321_v56  ;;  %v1814_v56 = vpop.permute.xlu1 %1813 }
 0x3a4   :  { %v1986_v63 = vadd.f32 %v1812_v16, %v1642_v47  ;;  %v2437_v62 = vpack.c.b16 %v2389_v0, %v2388_v11  ;;  %v10465_v47 = vld [vmem:[#allocation151_spill] sm:$0xff] }
 0x3a5   :  { %v2650_v20 = vpop.f32.mrf.mxu1  ;;  %v1643_v41 = vadd.f32 %v10465_v47, %v1323_v8  ;;  %v1326_v8 = vadd.f32 %v6654_v45, %v10469_v51 }
 0x3a6   :  { %v1810_v20 = vpop.permute.xlu2 %1809  ;;  %v2069_v3 = vadd.f32 %v7059_v31, %v1986_v63 }
 0x3a7   :  { %v1985_v52 = vadd.f32 %v1810_v20, %v1641_v37  ;;  %v10466_v20 = vld [vmem:[#allocation157_spill] sm:$0xff]  ;;  %v1987_v63 = vadd.f32 %v1814_v56, %v1643_v41 }
 0x3a8   :  { %v2149_v27 = vmax.f32 %v2069_v3, 0.0  ;;  %v1644_v37 = vadd.f32 %v10466_v20, %v1324_v42  ;;  %v10472_v20 = vld [vmem:[#allocation107_spill] sm:$0xff] }
 0x3a9   :  { %v2068_v54 = vadd.f32 %v7059_v31, %v1985_v52 }
 0x3aa   :  { %v2229_v2 = vpack.c.bf16 %v2149_v27, %v2149_v27 }
 0x3ab   :  { %v1820_v47 = vpop.permute.xlu1 %1819 }
 0x3ac   :  { %v2391_v0 = vunpack.c.l.b16 %v2229_v2 }
 0x3ad   :  { %v7130_v55 = vpop.f32.mrf.mxu1 }
 0x3ae   :  { %10452 = vst [vmem:[#allocation65_spill] sm:$0xff] %v7130_v55  ;;  %v1816_v16 = vpop.permute.xlu2 %1815 }
 0x3af   :  { %v1988_v52 = vadd.f32 %v1816_v16, %v1644_v37  ;;  %v10473_v37 = vld [vmem:[#allocation154_spill] sm:$0xff] }
 0x3b0   :  { %5127 = vmatmul.msk.bf16.gmra.mxu3 %vm2446_vm3, %v2436_v14  ;;  %v2148_v14 = vmax.f32 %v2068_v54, 0.0  ;;  %v2070_v54 = vadd.f32 %v7059_v31, %v1987_v63  ;;  %v10474_v63 = vld [vmem:[#allocation159_spill] sm:$0xff] }
 0x3b1   :  { %v2071_v27 = vadd.f32 %v7059_v31, %v1988_v52  ;;  %v1646_v52 = vadd.f32 %v10474_v63, %v1326_v8 }
 0x3b2   :  { %v2228_v22 = vpack.c.bf16 %v2148_v14, %v2148_v14  ;;  %v2150_v21 = vmax.f32 %v2070_v54, 0.0  ;;  %v10475_v54 = vld [vmem:[#allocation161_spill] sm:$0xff] }
 0x3b3   :  { %v7135_v58 = vpop.f32.mrf.mxu3  ;;  %v2151_v14 = vmax.f32 %v2071_v27, 0.0 }
 0x3b4   :  { %10453 = vst [vmem:[#allocation21_spill] sm:$0xff] %v7135_v58  ;;  %v9935_v4 = vrot.slane %v7135_v58, 1  ;;  %v2230_v16 = vpack.c.bf16 %v2150_v21, %v2150_v21  ;;  %v1990_v21 = vadd.f32 %v1820_v47, %v1646_v52 }
 0x3b5   :  { %v7137_v25 = vpop.f32.mrf.mxu1 }
 0x3b6   :  { %10454 = vst [vmem:[#allocation69_spill] sm:$0xff] %v7137_v25  ;;  %v2392_v51 = vunpack.c.l.b16 %v2230_v16 }
 0x3bb   :  { %v7145_v53 = vpop.f32.mrf.mxu3 }
 0x3bc   :  { %10457 = vst [vmem:[#allocation60_spill] sm:$0xff] %v7145_v53  ;;  %v2889_v60 = vrot.slane %v7145_v53, 1 }
 0x3bd   :  { %v7149_v29 = vpop.f32.mrf.mxu1 }
 0x3be   :  { %v7155_v36 = vsel %vm848_vm1, %v9935_v4, %v2889_v60  ;;  %v10499_v4 = vld [vmem:[#allocation33_spill] sm:$0xff] }
 0x3bf   :  { %10458 = vst [vmem:[#allocation127_spill] sm:$0xff] %v7155_v36  ;;  %2988 = vrot.lane.b32.xlu1 %v7155_v36, %s5202_s17 }
 0x3c0   :  { %5128 = vmatmul.msk.bf16.gmra.mxu3 %vm2446_vm3, %v2437_v62  ;;  %v2390_v62 = vunpack.c.l.b16 %v2228_v22 }
 0x3c3   :  { %v7161_v5 = vpop.f32.mrf.mxu3 }
 0x3c4   :  { %v9928_v24 = vrot.slane %v7161_v5, 1 }
 0x3c5   :  { %v7168_v30 = vpop.f32.mrf.mxu1 }
 0x3c6   :  { %10463 = vst [vmem:[#allocation27_spill] sm:$0xff] %v7168_v30  ;;  %v7173_v40 = vsel %vm848_vm1, %v2889_v60, %v9928_v24  ;;  %v2438_v60 = vpack.c.b16 %v2391_v0, %v2390_v62  ;;  %v1325_v0 = vadd.f32 %v10473_v37, %v10472_v20  ;;  %v2231_v62 = vpack.c.bf16 %v2151_v14, %v2151_v14  ;;  %v10477_v37 = vld [vmem:[#allocation136_spill] sm:$0xff] }
 0x3c7   :  { %10464 = vst [vmem:[#allocation64_spill] sm:$0xff] %v7173_v40  ;;  %2990 = vrot.lane.b32.xlu2 %v7173_v40, %s5202_s17  ;;  %v2073_v24 = vadd.f32 %v7059_v31, %v1990_v21  ;;  %v1328_v47 = vadd.f32 %v6694_v28, %v10477_v37 }
 0x3c8   :  { %v1645_v27 = vadd.f32 %v10475_v54, %v1325_v0 }
 0x3c9   :  { %v2153_v20 = vmax.f32 %v2073_v24, 0.0  ;;  %v10481_v24 = vld [vmem:[#allocation74_spill] sm:$0xff] }
 0x3cb   :  { %v7179_v11 = vpop.f32.mrf.mxu3  ;;  %v2233_v16 = vpack.c.bf16 %v2153_v20, %v2153_v20 }
 0x3cc   :  { %10467 = vst [vmem:[#allocation24_spill] sm:$0xff] %v7179_v11  ;;  %v9929_v15 = vrot.slane %v7179_v11, 1  ;;  %v9930_v42 = vrot.slane %v7179_v11, 2 }
 0x3cd   :  { %v7181_v3 = vpop.f32.mrf.mxu1  ;;  %v2395_v21 = vunpack.c.l.b16 %v2233_v16 }
 0x3ce   :  { %10468 = vst [vmem:[#allocation70_spill] sm:$0xff] %v7181_v3 }
 0x3d0   :  { %5129 = vmatmul.msk.bf16.gmra.mxu3 %vm2446_vm3, %v2438_v60  ;;  %v1818_v60 = vpop.permute.xlu0 %1817 }
 0x3d3   :  { %v2696_v6 = vpop.f32.mrf.mxu3 }
 0x3d4   :  { %v4245_v2 = vrot.slane %v2696_v6, 1  ;;  %v4453_v56 = vrot.slane %v2696_v6, 2  ;;  %v1989_v6 = vadd.f32 %v1818_v60, %v1645_v27  ;;  %v1822_v27 = vpop.permute.xlu2 %1821 }
 0x3d5   :  { %v7190_v22 = vpop.f32.mrf.mxu1 }
 0x3d6   :  { %v7195_v41 = vsel %vm848_vm1, %v9929_v15, %v4245_v2  ;;  %v7200_v45 = vsel %vm3124_vm4, %v9930_v42, %v4453_v56  ;;  %v2393_v2 = vunpack.c.l.b16 %v2231_v62  ;;  %v2072_v42 = vadd.f32 %v7059_v31, %v1989_v6  ;;  %v10480_v62 = vld [vmem:[#allocation73_spill] sm:$0xff] }
 0x3d7   :  { %10470 = vst [vmem:[#allocation72_spill] sm:$0xff] %v7195_v41  ;;  %v1648_v60 = vadd.f32 %v10480_v62, %v1328_v47 }
 0x3d8   :  { %10471 = vst [vmem:[#allocation124_spill] sm:$0xff] %v7200_v45  ;;  %v2439_v56 = vpack.c.b16 %v2393_v2, %v2392_v51  ;;  %v2152_v8 = vmax.f32 %v2072_v42, 0.0  ;;  %v1824_v52 = vpop.permute.xlu0 %1823 }
 0x3d9   :  { %v1992_v51 = vadd.f32 %v1824_v52, %v1648_v60 }
 0x3da   :  { %v2232_v54 = vpack.c.bf16 %v2152_v8, %v2152_v8 }
 0x3db   :  { %v2698_v34 = vpop.f32.mrf.mxu3 }
 0x3dc   :  { %v10479_v34 = vld [vmem:[#allocation133_spill] sm:$0xff]  ;;  %v2394_v6 = vunpack.c.l.b16 %v2232_v54 }
 0x3dd   :  { %v7207_v15 = vpop.f32.mrf.mxu1  ;;  %v1327_v63 = vadd.f32 %v6690_v9, %v10479_v34  ;;  %v2075_v9 = vadd.f32 %v7059_v31, %v1992_v51  ;;  %v10486_v51 = vld [vmem:[#allocation140_spill] sm:$0xff] }
 0x3de   :  { %v2440_v37 = vpack.c.b16 %v2395_v21, %v2394_v6 }
 0x3df   :  { %v1647_v42 = vadd.f32 %v10481_v24, %v1327_v63  ;;  %v1329_v24 = vadd.f32 %v6717_v48, %v10486_v51  ;;  %v10489_v48 = vld [vmem:[#allocation29_spill] sm:$0xff] }
 0x3e0   :  { %5130 = vmatmul.msk.bf16.gmra.mxu3 %vm2446_vm3, %v2439_v56 }
 0x3e1   :  { %v1991_v56 = vadd.f32 %v1822_v27, %v1647_v42  ;;  %v2155_v27 = vmax.f32 %v2075_v9, 0.0 }
 0x3e3   :  { %v7211_v14 = vpop.f32.mrf.mxu3  ;;  %v2074_v62 = vadd.f32 %v7059_v31, %v1991_v56 }
 0x3e4   :  { %10476 = vst [vmem:[#allocation71_spill] sm:$0xff] %v7211_v14  ;;  %v2893_v28 = vrot.slane %v7211_v14, 1 }
 0x3e5   :  { %v7215_v0 = vpop.f32.mrf.mxu1  ;;  %v2154_v42 = vmax.f32 %v2074_v62, 0.0 }
 0x3e6   :  { %10478 = vst [vmem:[#allocation31_spill] sm:$0xff] %v7215_v0  ;;  %v9932_v34 = vrot.slane %v7215_v0, 1  ;;  %v9931_v8 = vrot.slane %v7215_v0, 2 }
 0x3e7   :  { %v2234_v9 = vpack.c.bf16 %v2154_v42, %v2154_v42 }
 0x3e9   :  { %v2396_v23 = vunpack.c.l.b16 %v2234_v9 }
 0x3eb   :  { %v7221_v2 = vpop.f32.mrf.mxu3 }
 0x3ec   :  { %10482 = vst [vmem:[#allocation77_spill] sm:$0xff] %v7221_v2  ;;  %v2894_v20 = vrot.slane %v7221_v2, 1 }
 0x3ed   :  { %v2672_v47 = vpop.f32.mrf.mxu1 }
 0x3ee   :  { %v4243_v16 = vrot.slane %v2672_v47, 1  ;;  %v4451_v52 = vrot.slane %v2672_v47, 2  ;;  %v2895_v63 = vsel %vm848_vm1, %v2893_v28, %v2894_v20  ;;  %v10487_v28 = vld [vmem:[#allocation145_spill] sm:$0xff]  ;;  %v2235_v47 = vpack.c.bf16 %v2155_v27, %v2155_v27 }
 0x3ef   :  { %2992 = vrot.lane.b32.xlu0 %v2895_v63, %s5202_s17  ;;  %v1826_v63 = vpop.permute.xlu1 %1825 }
 0x3f0   :  { %5131 = vmatmul.msk.bf16.gmra.mxu3 %vm2446_vm3, %v2440_v37  ;;  %v7235_v60 = vsel %vm848_vm1, %v9932_v34, %v4243_v16  ;;  %v7240_v54 = vsel %vm3124_vm4, %v9931_v8, %v4451_v52  ;;  %v1330_v37 = vadd.f32 %v6730_v13, %v10487_v28  ;;  %v1649_v52 = vadd.f32 %v6709_v59, %v1329_v24  ;;  %v1828_v8 = vpop.permute.xlu2 %1827 }
 0x3f1   :  { %10483 = vst [vmem:[#allocation34_spill] sm:$0xff] %v7235_v60  ;;  %v2397_v51 = vunpack.c.l.b16 %v2235_v47 }
 0x3f2   :  { %10484 = vst [vmem:[#allocation82_spill] sm:$0xff] %v7240_v54  ;;  %v1650_v62 = vadd.f32 %v10489_v48, %v1330_v37  ;;  %v1993_v34 = vadd.f32 %v1826_v63, %v1649_v52  ;;  %v10493_v37 = vld [vmem:[#allocation5_spill] sm:$0xff]  ;;  %v10496_v52 = vld [vmem:[#allocation3_spill] sm:$0xff] }
 0x3f3   :  { %v7242_v21 = vpop.f32.mrf.mxu3  ;;  %v10497_v48 = vld [vmem:[#allocation25_spill] sm:$0xff] }
 0x3f4   :  { %10485 = vst [vmem:[#allocation134_spill] sm:$0xff] %v7242_v21  ;;  %v2896_v6 = vrot.slane %v7242_v21, 1  ;;  %v1994_v13 = vadd.f32 %v1828_v8, %v1650_v62  ;;  %v2076_v28 = vadd.f32 %v7059_v31, %v1993_v34  ;;  %v10494_v8 = vld [vmem:[#allocation37_spill] sm:$0xff]  ;;  %v1331_v62 = vadd.f32 %v10497_v48, %v10496_v52  ;;  %v10502_v52 = vld [vmem:[#allocation8_spill] sm:$0xff]  ;;  %v10503_v48 = vld [vmem:[#allocation35_spill] sm:$0xff] }
 0x3f5   :  { %v2674_v56 = vpop.f32.mrf.mxu1  ;;  %v1332_v47 = vadd.f32 %v10494_v8, %v10493_v37 }
 0x3f6   :  { %v7250_v16 = vsel %vm848_vm1, %v2894_v20, %v2896_v6  ;;  %v2441_v20 = vpack.c.b16 %v2397_v51, %v2396_v23  ;;  %v2077_v59 = vadd.f32 %v7059_v31, %v1994_v13  ;;  %v2156_v24 = vmax.f32 %v2076_v28, 0.0  ;;  %v10498_v13 = vld [vmem:[#allocation32_spill] sm:$0xff]  ;;  %v1830_v28 = vpop.permute.xlu0 %1829 }
 0x3f7   :  { %10488 = vst [vmem:[#allocation130_spill] sm:$0xff] %v7250_v16  ;;  %2994 = vrot.lane.b32.xlu1 %v7250_v16, %s5202_s17  ;;  %v1832_v9 = vpop.permute.xlu1 %1831  ;;  %v1651_v37 = vadd.f32 %v10499_v4, %v1331_v62  ;;  %v1334_v62 = vadd.f32 %v10503_v48, %v10502_v52 }
 0x3f8   :  { %v2157_v63 = vmax.f32 %v2077_v59, 0.0  ;;  %v2236_v34 = vpack.c.bf16 %v2156_v24, %v2156_v24 }
 0x3fa   :  { %v2237_v51 = vpack.c.bf16 %v2157_v63, %v2157_v63  ;;  %v2398_v59 = vunpack.c.l.b16 %v2236_v34 }
 0x3fb   :  { %v7256_v56 = vpop.f32.mrf.mxu3 }
 0x3fc   :  { %10490 = vst [vmem:[#allocation66_spill] sm:$0xff] %v7256_v56  ;;  %v2898_v27 = vrot.slane %v7256_v56, 1  ;;  %v2399_v24 = vunpack.c.l.b16 %v2237_v51 }
 0x3fe   :  { %v7261_v33 = vsel %vm848_vm1, %v2896_v6, %v2898_v27  ;;  %v2442_v35 = vpack.c.b16 %v2399_v24, %v2398_v59  ;;  %v1834_v59 = vpop.permute.xlu2 %1833  ;;  %v10508_v24 = vld [vmem:[#allocation40_spill] sm:$0xff] }
 0x3ff   :  { %10491 = vst [vmem:[#allocation81_spill] sm:$0xff] %v7261_v33  ;;  %2996 = vrot.lane.b32.xlu2 %v7261_v33, %s5202_s17 }
 0x400   :  { %5132 = vmatmul.msk.bf16.gmra.mxu3 %vm2446_vm3, %v2441_v20  ;;  %v1652_v20 = vadd.f32 %v10498_v13, %v1332_v47  ;;  %v10505_v13 = vld [vmem:[#allocation7_spill] sm:$0xff] }
 0x402   :  { %v1996_v8 = vadd.f32 %v1832_v9, %v1652_v20  ;;  %v10506_v20 = vld [vmem:[#allocation38_spill] sm:$0xff] }
 0x403   :  { %v7267_v42 = vpop.f32.mrf.mxu3 }
 0x404   :  { %10492 = vst [vmem:[#allocation43_spill] sm:$0xff] %v7267_v42  ;;  %v2900_v23 = vrot.slane %v7267_v42, 1  ;;  %v2079_v41 = vadd.f32 %v7059_v31, %v1996_v8 }
 0x406   :  { %v7273_v6 = vsel %vm848_vm1, %v2898_v27, %v2900_v23  ;;  %v1995_v27 = vadd.f32 %v1830_v28, %v1651_v37  ;;  %v2159_v4 = vmax.f32 %v2079_v41, 0.0  ;;  %v1333_v28 = vadd.f32 %v10506_v20, %v10505_v13  ;;  %v1836_v37 = vpop.permute.xlu0 %1835 }
 0x407   :  { %10495 = vst [vmem:[#allocation101_spill] sm:$0xff] %v7273_v6  ;;  %2998 = vrot.lane.b32.xlu0 %v7273_v6, %s5202_s17 }
 0x408   :  { %v2078_v47 = vadd.f32 %v7059_v31, %v1995_v27  ;;  %v2239_v51 = vpack.c.bf16 %v2159_v4, %v2159_v4  ;;  %v1653_v27 = vadd.f32 %v10508_v24, %v1333_v28 }
 0x40a   :  { %v2158_v34 = vmax.f32 %v2078_v47, 0.0  ;;  %v2401_v47 = vunpack.c.l.b16 %v2239_v51  ;;  %v1997_v52 = vadd.f32 %v1834_v59, %v1653_v27  ;;  %v10512_v59 = vld [vmem:[#allocation16_spill] sm:$0xff] }
 0x40b   :  { %v7281_v45 = vpop.f32.mrf.mxu3 }
 0x40c   :  { %10500 = vst [vmem:[#allocation137_spill] sm:$0xff] %v7281_v45  ;;  %v2902_v54 = vrot.slane %v7281_v45, 1  ;;  %v2238_v8 = vpack.c.bf16 %v2158_v34, %v2158_v34  ;;  %v2080_v13 = vadd.f32 %v7059_v31, %v1997_v52 }
 0x40e   :  { %v7286_v60 = vsel %vm848_vm1, %v2900_v23, %v2902_v54  ;;  %v2160_v34 = vmax.f32 %v2080_v13, 0.0 }
 0x40f   :  { %10501 = vst [vmem:[#allocation141_spill] sm:$0xff] %v7286_v60  ;;  %3000 = vrot.lane.b32.xlu1 %v7286_v60, %s5202_s17  ;;  %v10510_v60 = vld [vmem:[#allocation12_spill] sm:$0xff] }
 0x410   :  { %5133 = vmatmul.msk.bf16.gmra.mxu3 %vm2446_vm3, %v2442_v35  ;;  %v10507_v35 = vld [vmem:[#allocation42_spill] sm:$0xff] }
 0x411   :  { %v1654_v41 = vadd.f32 %v10507_v35, %v1334_v62  ;;  %v10511_v62 = vld [vmem:[#allocation47_spill] sm:$0xff] }
 0x412   :  { %v1335_v35 = vadd.f32 %v10511_v62, %v10510_v60  ;;  %v1838_v60 = vpop.permute.xlu1 %1837 }
 0x413   :  { %v7292_v63 = vpop.f32.mrf.mxu3  ;;  %v1998_v4 = vadd.f32 %v1836_v37, %v1654_v41 }
 0x414   :  { %v9936_v9 = vrot.slane %v7292_v63, 1 }
 0x415   :  { %v2081_v38 = vadd.f32 %v7059_v31, %v1998_v4  ;;  %v10516_v4 = vld [vmem:[#allocation39_spill] sm:$0xff] }
 0x416   :  { %v7300_v23 = vsel %vm848_vm1, %v2902_v54, %v9936_v9  ;;  %v2400_v54 = vunpack.c.l.b16 %v2238_v8  ;;  %v10513_v8 = vld [vmem:[#allocation54_spill] sm:$0xff]  ;;  %v1655_v52 = vadd.f32 %v10516_v4, %v1335_v35 }
 0x417   :  { %10504 = vst [vmem:[#allocation41_spill] sm:$0xff] %v7300_v23  ;;  %3002 = vrot.lane.b32.xlu2 %v7300_v23, %s5202_s17  ;;  %v2161_v20 = vmax.f32 %v2081_v38, 0.0  ;;  %v1336_v24 = vadd.f32 %v10513_v8, %v10512_v59 }
 0x418   :  { %v2443_v9 = vpack.c.b16 %v2401_v47, %v2400_v54  ;;  %v2240_v47 = vpack.c.bf16 %v2160_v34, %v2160_v34  ;;  %v1840_v54 = vpop.permute.xlu2 %1839  ;;  %v1999_v59 = vadd.f32 %v1838_v60, %v1655_v52 }
 0x419   :  { %v2241_v27 = vpack.c.bf16 %v2161_v20, %v2161_v20 }
 0x41a   :  { %v2402_v8 = vunpack.c.l.b16 %v2240_v47 }
 0x41b   :  { %v7308_v48 = vpop.f32.mrf.mxu3  ;;  %v2403_v62 = vunpack.c.l.b16 %v2241_v27 }
 0x41c   :  { %10509 = vst [vmem:[#allocation86_spill] sm:$0xff] %v7308_v48  ;;  %v9944_v51 = vrot.slane %v7308_v48, 1  ;;  %v9945_v28 = vrot.slane %v7308_v48, 2  ;;  %v10538_v48 = vld [vmem:[#allocation99_spill] sm:$0xff] }
 0x41d   :  { %v2444_v16 = vpack.c.b16 %v2403_v62, %v2402_v8 }
 0x420   :  { %5134 = vmatmul.msk.bf16.gmra.mxu3 %vm2446_vm3, %v2443_v9 }
 0x423   :  { %v2720_v23 = vpop.f32.mrf.mxu3 }
 0x424   :  { %v4247_v37 = vrot.slane %v2720_v23, 1  ;;  %v4455_v41 = vrot.slane %v2720_v23, 2  ;;  %v10517_v23 = vld [vmem:[#allocation51_spill] sm:$0xff] }
 0x425   :  { %v1656_v13 = vadd.f32 %v10517_v23, %v1336_v24 }
 0x426   :  { %v7322_v9 = vsel %vm848_vm1, %v9944_v51, %v4247_v37  ;;  %v7327_v38 = vsel %vm3124_vm4, %v9945_v28, %v4455_v41  ;;  %v2082_v37 = vadd.f32 %v7059_v31, %v1999_v59 }
 0x427   :  { %10514 = vst [vmem:[#allocation90_spill] sm:$0xff] %v7322_v9  ;;  %v2000_v6 = vadd.f32 %v1840_v54, %v1656_v13  ;;  %v2872_v9 = vrot.slane %v7168_v30, 1 }
 0x428   :  { %10515 = vst [vmem:[#allocation94_spill] sm:$0xff] %v7327_v38  ;;  %v2162_v41 = vmax.f32 %v2082_v37, 0.0 }
 0x429   :  { %v2083_v51 = vadd.f32 %v7059_v31, %v2000_v6  ;;  %v2868_v31 = vrot.slane %v7137_v25, 1  ;;  %v2867_v6 = vrot.slane %v7130_v55, 1 }
 0x42a   :  { %v2242_v35 = vpack.c.bf16 %v2162_v41, %v2162_v41 }
 0x42b   :  { %v2722_v20 = vpop.f32.mrf.mxu3  ;;  %v2163_v34 = vmax.f32 %v2083_v51, 0.0  ;;  %v2869_v23 = vsel %vm848_vm1, %v2867_v6, %v2868_v31  ;;  %v2874_v6 = vrot.slane %v7181_v3, 1 }
 0x42c   :  { %v2404_v38 = vunpack.c.l.b16 %v2242_v35  ;;  %v10527_v35 = vld [vmem:[#allocation95_spill] sm:$0xff] }
 0x42d   :  { %v2243_v4 = vpack.c.bf16 %v2163_v34, %v2163_v34 }
 0x42f   :  { %v2405_v27 = vunpack.c.l.b16 %v2243_v4  ;;  %v3126_v4 = vrot.slane %v10527_v35, 2 }
 0x430   :  { %5135 = vmatmul.msk.bf16.gmra.mxu3 %vm2446_vm3, %v2444_v16 }
 0x431   :  { %v2445_v52 = vpack.c.b16 %v2405_v27, %v2404_v38  ;;  %v2870_v38 = vrot.slane %v7149_v29, 1 }
 0x433   :  { %v7334_v28 = vpop.f32.mrf.mxu3  ;;  %v7360_v20 = vsel %vm848_vm1, %v2868_v31, %v2870_v38 }
 0x434   :  { %10518 = vst [vmem:[#allocation26_spill] sm:$0xff] %v7334_v28  ;;  %v2906_v60 = vrot.slane %v7334_v28, 1 }
 0x435   :  { %10523 = vst [vmem:[#allocation49_spill] sm:$0xff] %v7360_v20 }
 0x43b   :  { %v7336_v24 = vpop.f32.mrf.mxu3 }
 0x43c   :  { %10519 = vst [vmem:[#allocation4_spill] sm:$0xff] %v7336_v24  ;;  %v2907_v47 = vrot.slane %v7336_v24, 1 }
 0x43e   :  { %v2908_v54 = vsel %vm848_vm1, %v2906_v60, %v2907_v47  ;;  %v10529_v60 = vld [vmem:[#allocation91_spill] sm:$0xff] }
 0x43f   :  { %3004 = vrot.lane.b32.xlu0 %v2908_v54, %s5202_s17 }
 0x440   :  { %5136 = vmatmul.msk.bf16.gmra.mxu3 %vm2446_vm3, %v2445_v52 }
 0x443   :  { %v7344_v16 = vpop.f32.mrf.mxu3 }
 0x444   :  { %10520 = vst [vmem:[#allocation36_spill] sm:$0xff] %v7344_v16  ;;  %v2909_v51 = vrot.slane %v7344_v16, 1 }
 0x446   :  { %v7350_v13 = vsel %vm848_vm1, %v2907_v47, %v2909_v51  ;;  %v3125_v47 = vrot.slane %v10529_v60, 2 }
 0x447   :  { %10521 = vst [vmem:[#allocation44_spill] sm:$0xff] %v7350_v13  ;;  %2968 = vrot.lane.b32.xlu0 %v2869_v23, %s5202_s17  ;;  %3006 = vrot.lane.b32.xlu1 %v7350_v13, %s5202_s17  ;;  %v2876_v13 = vrot.slane %v7190_v22, 1 }
 0x448   :  { %v3127_v54 = vsel %vm3124_vm4, %v3125_v47, %v3126_v4  ;;  %v7396_v47 = vsel %vm848_vm1, %v2872_v9, %v2874_v6 }
 0x449   :  { %10532 = vst [vmem:[#allocation30_spill] sm:$0xff] %v7396_v47  ;;  %v7423_v33 = vsel %vm848_vm1, %v2874_v6, %v2876_v13 }
 0x44a   :  { %10540 = vst [vmem:[#allocation9_spill] sm:$0xff] %v7423_v33 }
 0x44b   :  { %v7356_v62 = vpop.f32.mrf.mxu3 }
 0x44c   :  { %10522 = vst [vmem:[#allocation106_spill] sm:$0xff] %v7356_v62  ;;  %v2911_v59 = vrot.slane %v7356_v62, 1 }
 0x44e   :  { %v7363_v8 = vsel %vm848_vm1, %v2909_v51, %v2911_v59  ;;  %v10531_v51 = vld [vmem:[#allocation97_spill] sm:$0xff] }
 0x44f   :  { %10524 = vst [vmem:[#allocation100_spill] sm:$0xff] %v7363_v8  ;;  %2970 = vrot.lane.b32.xlu1 %v7360_v20, %s5202_s17  ;;  %3008 = vrot.lane.b32.xlu2 %v7363_v8, %s5202_s17  ;;  %v3128_v23 = vrot.slane %v10531_v51, 2  ;;  %v7416_v8 = vpop.permute.xlu2 %2936 }
 0x450   :  { %10537 = vst [vmem:[#allocation13_spill] sm:$0xff] %v7416_v8  ;;  %v10542_v8 = vld [vmem:[#allocation108_spill] sm:$0xff] }
 0x453   :  { %v7369_v37 = vpop.f32.mrf.mxu3 }
 0x454   :  { %10525 = vst [vmem:[#allocation2_spill] sm:$0xff] %v7369_v37  ;;  %v2913_v41 = vrot.slane %v7369_v37, 1 }
 0x456   :  { %v7373_v34 = vsel %vm848_vm1, %v2911_v59, %v2913_v41 }
 0x457   :  { %10526 = vst [vmem:[#allocation22_spill] sm:$0xff] %v7373_v34  ;;  %3010 = vrot.lane.b32.xlu0 %v7373_v34, %s5202_s17 }
 0x45b   :  { %v7378_v27 = vpop.f32.mrf.mxu3 }
 0x45c   :  { %10528 = vst [vmem:[#allocation109_spill] sm:$0xff] %v7378_v27  ;;  %v2915_v52 = vrot.slane %v7378_v27, 1 }
 0x45e   :  { %v7384_v31 = vsel %vm848_vm1, %v2913_v41, %v2915_v52  ;;  %v7399_v41 = vsel %vm3124_vm4, %v3126_v4, %v3128_v23 }
 0x45f   :  { %10530 = vst [vmem:[#allocation28_spill] sm:$0xff] %v7384_v31  ;;  %3229 = vrot.lane.b32.xlu0 %v3127_v54, %s5201_s12  ;;  %3012 = vrot.lane.b32.xlu1 %v7384_v31, %s5202_s17  ;;  %v10535_v31 = vld [vmem:[#allocation103_spill] sm:$0xff] }
 0x460   :  { %10533 = vst [vmem:[#allocation105_spill] sm:$0xff] %v7399_v41  ;;  %v3132_v34 = vrot.slane %v10535_v31, 2 }
 0x463   :  { %v7391_v59 = vpop.f32.mrf.mxu3 }
 0x464   :  { %v9955_v60 = vrot.slane %v7391_v59, 1 }
 0x466   :  { %v7404_v54 = vsel %vm848_vm1, %v2915_v52, %v9955_v60  ;;  %v3130_v52 = vrot.slane %v10538_v48, 2 }
 0x467   :  { %10534 = vst [vmem:[#allocation53_spill] sm:$0xff] %v7404_v54  ;;  %2974 = vrot.lane.b32.xlu0 %v7396_v47, %s5202_s17  ;;  %3231 = vrot.lane.b32.xlu1 %v7399_v41, %s5201_s12  ;;  %v7430_v41 = vsel %vm848_vm1, %v2870_v38, %v2872_v9  ;;  %v7437_v47 = vpop.permute.xlu2 %2942 }
 0x468   :  { %3014 = vrot.lane.b32.xlu2 %v7404_v54, %s5202_s17  ;;  %v7420_v60 = vsel %vm3124_vm4, %v3130_v52, %v3132_v34  ;;  %10541 = vst [vmem:[#allocation48_spill] sm:$0xff] %v7430_v41  ;;  %v3134_v54 = vrot.slane %v10542_v8, 2 }
 0x469   :  { %10539 = vst [vmem:[#allocation46_spill] sm:$0xff] %v7420_v60 }
 0x46a   :  { %10543 = vst [vmem:[#allocation52_spill] sm:$0xff] %v7437_v47 }
 0x46b   :  { %v7414_v4 = vpop.f32.mrf.mxu3 }
 0x46c   :  { %10536 = vst [vmem:[#allocation117_spill] sm:$0xff] %v7414_v4  ;;  %v9975_v11 = vrot.slane %v7414_v4, 1  ;;  %v9976_v6 = vrot.slane %v7414_v4, 2 }
 0x46f   :  { %3235 = vrot.lane.b32.xlu0 %v7420_v60, %s5201_s12  ;;  %2976 = vrot.lane.b32.xlu1 %v7423_v33, %s5202_s17  ;;  %v7440_v60 = vsel %vm3124_vm4, %v3132_v34, %v3134_v54  ;;  %v10548_v34 = vld [vmem:[#allocation112_spill] sm:$0xff] }
 0x470   :  { %2972 = vrot.lane.b32.xlu2 %v7430_v41, %s5202_s17  ;;  %10544 = vst [vmem:[#allocation55_spill] sm:$0xff] %v7440_v60  ;;  %v9977_v47 = vrot.slane %v10548_v34, 2 }
 0x473   :  { %v2744_v36 = vpop.f32.mrf.mxu3 }
 0x474   :  { %v4249_v40 = vrot.slane %v2744_v36, 1  ;;  %v4457_v0 = vrot.slane %v2744_v36, 2  ;;  %v7455_v36 = vsel %vm3124_vm4, %v3128_v23, %v3130_v52  ;;  %v7471_v23 = vpop.permute.xlu1 %2934  ;;  %v9978_v52 = vrot.slane %v7207_v15, 1 }
 0x475   :  { %10547 = vst [vmem:[#allocation45_spill] sm:$0xff] %v7455_v36 }
 0x476   :  { %v7445_v9 = vsel %vm848_vm1, %v9975_v11, %v4249_v40  ;;  %v7450_v38 = vsel %vm3124_vm4, %v9976_v6, %v4457_v0  ;;  %v7463_v40 = vsel %vm3124_vm4, %v3134_v54, %v9977_v47  ;;  %v7465_v11 = vpop.permute.xlu2 %2948  ;;  %v7469_v0 = vpop.permute.xlu0 %2932  ;;  %10552 = vst [vmem:[#allocation59_spill] sm:$0xff] %v7471_v23 }
 0x477   :  { %10545 = vst [vmem:[#allocation118_spill] sm:$0xff] %v7445_v9  ;;  %3237 = vrot.lane.b32.xlu1 %v7440_v60, %s5201_s12  ;;  %v3143_v9 = vrot.slane %v6548_v46, 2 }
 0x478   :  { %10546 = vst [vmem:[#allocation104_spill] sm:$0xff] %v7450_v38  ;;  %3233 = vrot.lane.b32.xlu2 %v7455_v36, %s5201_s12  ;;  %v10562_v36 = vld [vmem:[#allocation142_spill] sm:$0xff] }
 0x479   :  { %10549 = vst [vmem:[#allocation122_spill] sm:$0xff] %v7463_v40 }
 0x47a   :  { %10550 = vst [vmem:[#allocation15_spill] sm:$0xff] %v7465_v11 }
 0x47b   :  { %v2746_v33 = vpop.f32.mrf.mxu3  ;;  %10551 = vst [vmem:[#allocation58_spill] sm:$0xff] %v7469_v0 }
 0x47c   :  { %v7479_v33 = vsel %vm848_vm1, %v2876_v13, %v9978_v52  ;;  %v7492_v11 = vpop.permute.xlu1 %2940  ;;  %v3141_v13 = vrot.slane %v6527_v12, 2 }
 0x47d   :  { %10554 = vst [vmem:[#allocation17_spill] sm:$0xff] %v7479_v33 }
 0x47e   :  { %v7483_v54 = vpop.permute.xlu2 %2954  ;;  %v7485_v47 = vpop.permute.xlu0 %2938  ;;  %10558 = vst [vmem:[#allocation110_spill] sm:$0xff] %v7492_v11  ;;  %v7497_v60 = vsel %vm3124_vm4, %v3141_v13, %v3143_v9  ;;  %v3138_v11 = vrot.slane %v10562_v36, 2 }
 0x47f   :  { %10555 = vst [vmem:[#allocation62_spill] sm:$0xff] %v7483_v54  ;;  %v3139_v54 = vrot.slane %v10343_v17, 2 }
 0x480   :  { %3239 = vrot.lane.b32.xlu2 %v7463_v40, %s5201_s12  ;;  %10556 = vst [vmem:[#allocation50_spill] sm:$0xff] %v7485_v47 }
 0x481   :  { %10559 = vst [vmem:[#allocation113_spill] sm:$0xff] %v7497_v60 }
 0x483   :  { %v7474_v6 = vpop.f32.mrf.mxu3 }
 0x484   :  { %10553 = vst [vmem:[#allocation126_spill] sm:$0xff] %v7474_v6  ;;  %v2919_v23 = vrot.slane %v7474_v6, 1 }
 0x486   :  { %v7502_v47 = vpop.permute.xlu2 %2960 }
 0x487   :  { %10560 = vst [vmem:[#allocation61_spill] sm:$0xff] %v7502_v47 }
 0x488   :  { %2978 = vrot.lane.b32.xlu2 %v7479_v33, %s5202_s17  ;;  %v7509_v33 = vpop.permute.xlu0 %2944 }
 0x489   :  { %10563 = vst [vmem:[#allocation67_spill] sm:$0xff] %v7509_v33 }
 0x48b   :  { %v7487_v38 = vpop.f32.mrf.mxu3 }
 0x48c   :  { %10557 = vst [vmem:[#allocation56_spill] sm:$0xff] %v7487_v38  ;;  %v2920_v0 = vrot.slane %v7487_v38, 1 }
 0x48e   :  { %v2921_v52 = vsel %vm848_vm1, %v2919_v23, %v2920_v0  ;;  %v3140_v23 = vsel %vm3124_vm4, %v3138_v11, %v3139_v54  ;;  %v7520_v47 = vpop.permute.xlu2 %2966 }
 0x48f   :  { %3016 = vrot.lane.b32.xlu0 %v2921_v52, %s5202_s17  ;;  %v7515_v52 = vpop.permute.xlu1 %2946  ;;  %10566 = vst [vmem:[#allocation129_spill] sm:$0xff] %v7520_v47 }
 0x490   :  { %3245 = vrot.lane.b32.xlu2 %v7497_v60, %s5201_s12  ;;  %10565 = vst [vmem:[#allocation63_spill] sm:$0xff] %v7515_v52  ;;  %v10567_v60 = vld [vmem:[#allocation152_spill] sm:$0xff] }
 0x491   :  { %v3145_v36 = vrot.slane %v10567_v60, 2 }
 0x493   :  { %v7505_v40 = vpop.f32.mrf.mxu3  ;;  %v7527_v11 = vsel %vm3124_vm4, %v3143_v9, %v3145_v36  ;;  %v7545_v9 = vpop.f32.mrf.mxu1 }
 0x494   :  { %10561 = vst [vmem:[#allocation123_spill] sm:$0xff] %v7505_v40  ;;  %v2922_v4 = vrot.slane %v7505_v40, 1  ;;  %v2880_v1 = vrot.slane %v7545_v9, 1 }
 0x495   :  { %10568 = vst [vmem:[#allocation131_spill] sm:$0xff] %v7527_v11 }
 0x496   :  { %v7513_v20 = vsel %vm848_vm1, %v2920_v0, %v2922_v4  ;;  %v7530_v0 = vsel %vm3124_vm4, %v3139_v54, %v3141_v13  ;;  %10573 = vst [vmem:[#allocation150_spill] sm:$0xff] %v7545_v9  ;;  %v7547_v54 = vpop.permute.xlu2 %2990  ;;  %v10575_v13 = vld [vmem:[#allocation153_spill] sm:$0xff] }
 0x497   :  { %10564 = vst [vmem:[#allocation125_spill] sm:$0xff] %v7513_v20  ;;  %3241 = vrot.lane.b32.xlu0 %v3140_v23, %s5201_s12  ;;  %3018 = vrot.lane.b32.xlu1 %v7513_v20, %s5202_s17  ;;  %v7535_v23 = vpop.permute.xlu0 %2950  ;;  %v7543_v47 = vpop.permute.xlu1 %2952  ;;  %v10576_v20 = vld [vmem:[#allocation156_spill] sm:$0xff] }
 0x498   :  { %10569 = vst [vmem:[#allocation128_spill] sm:$0xff] %v7530_v0  ;;  %v10008_v19 = vrot.slane %v10576_v20, 2 }
 0x499   :  { %10571 = vst [vmem:[#allocation146_spill] sm:$0xff] %v7535_v23 }
 0x49a   :  { %10572 = vst [vmem:[#allocation78_spill] sm:$0xff] %v7543_v47 }
 0x49b   :  { %v7523_v41 = vpop.f32.mrf.mxu3  ;;  %10574 = vst [vmem:[#allocation135_spill] sm:$0xff] %v7547_v54 }
 0x49c   :  { %v2924_v33 = vrot.slane %v7523_v41, 1 }
 0x49e   :  { %v7533_v52 = vsel %vm848_vm1, %v2922_v4, %v2924_v33  ;;  %v3147_v4 = vrot.slane %v10575_v13, 2 }
 0x49f   :  { %10570 = vst [vmem:[#allocation76_spill] sm:$0xff] %v7533_v52  ;;  %3247 = vrot.lane.b32.xlu0 %v7527_v11, %s5201_s12  ;;  %3243 = vrot.lane.b32.xlu1 %v7530_v0, %s5201_s12  ;;  %v7571_v47 = vpop.permute.xlu0 %2956 }
 0x4a0   :  { %3020 = vrot.lane.b32.xlu2 %v7533_v52, %s5202_s17  ;;  %v7555_v49 = vsel %vm3124_vm4, %v3145_v36, %v3147_v4  ;;  %v7565_v54 = vsel %vm3124_vm4, %v3147_v4, %v10008_v19  ;;  %10581 = vst [vmem:[#allocation148_spill] sm:$0xff] %v7571_v47  ;;  %v7573_v36 = vpop.permute.xlu1 %2958  ;;  %v7576_v52 = vpop.permute.xlu2 %2996  ;;  %v3156_v4 = vrot.slane %v7038_v61, 2  ;;  %v3151_v19 = vrot.slane %v6856_v43, 2 }
 0x4a1   :  { %10578 = vst [vmem:[#allocation88_spill] sm:$0xff] %v7555_v49 }
 0x4a2   :  { %10580 = vst [vmem:[#allocation144_spill] sm:$0xff] %v7565_v54 }
 0x4a3   :  { %v7551_v23 = vpop.f32.mrf.mxu3  ;;  %10582 = vst [vmem:[#allocation96_spill] sm:$0xff] %v7573_v36 }
 0x4a4   :  { %10577 = vst [vmem:[#allocation149_spill] sm:$0xff] %v7551_v23  ;;  %v2926_v11 = vrot.slane %v7551_v23, 1 }
 0x4a5   :  { %10583 = vst [vmem:[#allocation92_spill] sm:$0xff] %v7576_v52 }
 0x4a6   :  { %v7558_v0 = vsel %vm848_vm1, %v2924_v33, %v2926_v11  ;;  %v3152_v33 = vrot.slane %v6895_v32, 2 }
 0x4a7   :  { %10579 = vst [vmem:[#allocation84_spill] sm:$0xff] %v7558_v0  ;;  %3249 = vrot.lane.b32.xlu1 %v7555_v49, %s5201_s12  ;;  %3022 = vrot.lane.b32.xlu0 %v7558_v0, %s5202_s17  ;;  %v7578_v49 = vpop.f32.mrf.mxu1  ;;  %v7598_v52 = vpop.permute.xlu0 %2962 }
 0x4a8   :  { %3251 = vrot.lane.b32.xlu2 %v7565_v54, %s5201_s12  ;;  %10584 = vst [vmem:[#allocation98_spill] sm:$0xff] %v7578_v49  ;;  %v3154_v54 = vrot.slane %v7017_v39, 2  ;;  %v3153_v47 = vsel %vm3124_vm4, %v3151_v19, %v3152_v33  ;;  %v7600_v43 = vpop.permute.xlu1 %2964  ;;  %v2881_v19 = vrot.slane %v7578_v49, 1  ;;  %v7603_v7 = vpop.permute.xlu2 %3002 }
 0x4a9   :  { %10588 = vst [vmem:[#allocation151_spill] sm:$0xff] %v7598_v52 }
 0x4aa   :  { %v7591_v26 = vsel %vm3124_vm4, %v3154_v54, %v3156_v4  ;;  %10589 = vst [vmem:[#allocation157_spill] sm:$0xff] %v7600_v43 }
 0x4ab   :  { %v7580_v57 = vpop.f32.mrf.mxu3  ;;  %10587 = vst [vmem:[#allocation158_spill] sm:$0xff] %v7591_v26 }
 0x4ac   :  { %10585 = vst [vmem:[#allocation155_spill] sm:$0xff] %v7580_v57  ;;  %v2928_v0 = vrot.slane %v7580_v57, 1 }
 0x4ad   :  { %10590 = vst [vmem:[#allocation111_spill] sm:$0xff] %v7603_v7 }
 0x4ae   :  { %v7588_v36 = vsel %vm848_vm1, %v2926_v11, %v2928_v0 }
 0x4af   :  { %10586 = vst [vmem:[#allocation102_spill] sm:$0xff] %v7588_v36  ;;  %3253 = vrot.lane.b32.xlu0 %v3153_v47, %s5201_s12  ;;  %3024 = vrot.lane.b32.xlu1 %v7588_v36, %s5202_s17  ;;  %v7609_v50 = vpop.f32.mrf.mxu1  ;;  %v2882_v36 = vsel %vm848_vm1, %v2880_v1, %v2881_v19  ;;  %v7627_v52 = vpop.permute.xlu0 %2992 }
 0x4b0   :  { %3257 = vrot.lane.b32.xlu2 %v7591_v26, %s5201_s12  ;;  %10591 = vst [vmem:[#allocation107_spill] sm:$0xff] %v7609_v50  ;;  %v7613_v26 = vsel %vm3124_vm4, %v3152_v33, %v3154_v54  ;;  %v7625_v7 = vpop.permute.xlu1 %2988  ;;  %v7629_v1 = vpop.permute.xlu2 %3008  ;;  %v3158_v54 = vrot.slane %v7054_v18, 2  ;;  %v2883_v33 = vrot.slane %v7609_v50, 1 }
 0x4b1   :  { %10592 = vst [vmem:[#allocation154_spill] sm:$0xff] %v7613_v26 }
 0x4b2   :  { %10594 = vst [vmem:[#allocation161_spill] sm:$0xff] %v7625_v7 }
 0x4b3   :  { %v7605_v11 = vpop.f32.mrf.mxu3  ;;  %10595 = vst [vmem:[#allocation136_spill] sm:$0xff] %v7627_v52 }
 0x4b4   :  { %v10025_v47 = vrot.slane %v7605_v11, 1  ;;  %10596 = vst [vmem:[#allocation133_spill] sm:$0xff] %v7629_v1 }
 0x4b6   :  { %v7618_v43 = vsel %vm848_vm1, %v2928_v0, %v10025_v47  ;;  %v10040_v0 = vrot.slane %v7088_v10, 2 }
 0x4b7   :  { %10593 = vst [vmem:[#allocation159_spill] sm:$0xff] %v7618_v43  ;;  %2980 = vrot.lane.b32.xlu0 %v2882_v36, %s5202_s17  ;;  %3255 = vrot.lane.b32.xlu1 %v7613_v26, %s5201_s12  ;;  %v3160_v36 = vrot.slane %v7077_v44, 2  ;;  %v7638_v26 = vsel %vm3124_vm4, %v3156_v4, %v3158_v54  ;;  %v7643_v7 = vpop.f32.mrf.mxu1 }
 0x4b8   :  { %3026 = vrot.lane.b32.xlu2 %v7618_v43, %s5202_s17  ;;  %10597 = vst [vmem:[#allocation73_spill] sm:$0xff] %v7638_v26  ;;  %v7641_v43 = vsel %vm848_vm1, %v2881_v19, %v2883_v33  ;;  %v7656_v4 = vpop.permute.xlu1 %2994  ;;  %v7658_v19 = vpop.permute.xlu0 %2998  ;;  %v2885_v1 = vrot.slane %v7643_v7, 1 }
 0x4b9   :  { %10598 = vst [vmem:[#allocation74_spill] sm:$0xff] %v7641_v43  ;;  %v7652_v52 = vsel %vm3124_vm4, %v3160_v36, %v10040_v0  ;;  %v10604_v0 = vrot.slane %v7135_v58, 1 }
 0x4ba   :  { %10599 = vst [vmem:[#allocation140_spill] sm:$0xff] %v7643_v7 }
 0x4bb   :  { %v7634_v47 = vpop.f32.mrf.mxu3  ;;  %10600 = vst [vmem:[#allocation145_spill] sm:$0xff] %v7652_v52  ;;  %v7668_v39 = vsel %vm848_vm1, %v2885_v1, %v10604_v0  ;;  %v3165_v0 = vrot.slane %v7137_v25, 2 }
 0x4bc   :  { %10601 = vst [vmem:[#allocation29_spill] sm:$0xff] %v7656_v4  ;;  %v10044_v18 = vrot.slane %v7634_v47, 1  ;;  %v7671_v4 = vsel %vm3124_vm4, %v3158_v54, %v3160_v36  ;;  %v3167_v36 = vrot.slane %v7149_v29, 2 }
 0x4bd   :  { %10602 = vst [vmem:[#allocation5_spill] sm:$0xff] %v7658_v19 }
 0x4be   :  { %10605 = vst [vmem:[#allocation3_spill] sm:$0xff] %v7668_v39 }
 0x4bf   :  { %3259 = vrot.lane.b32.xlu0 %v7638_v26, %s5201_s12  ;;  %2982 = vrot.lane.b32.xlu1 %v7641_v43, %s5202_s17  ;;  %v10043_v43 = vrot.slane %v7634_v47, 2  ;;  %10606 = vst [vmem:[#allocation25_spill] sm:$0xff] %v7671_v4 }
 0x4c0   :  { %3263 = vrot.lane.b32.xlu2 %v7652_v52, %s5201_s12  ;;  %v7692_v54 = vpop.permute.xlu1 %3000 }
 0x4c1   :  { %10610 = vst [vmem:[#allocation35_spill] sm:$0xff] %v7692_v54  ;;  %v3171_v54 = vrot.slane %v7181_v3, 2 }
 0x4c2   :  { %v7661_v44 = vpop.permute.xlu2 %3014 }
 0x4c3   :  { %10603 = vst [vmem:[#allocation37_spill] sm:$0xff] %v7661_v44  ;;  %v2768_v26 = vpop.f32.mrf.mxu3 }
 0x4c4   :  { %v4251_v10 = vrot.slane %v2768_v26, 1  ;;  %v4459_v61 = vrot.slane %v2768_v26, 2  ;;  %v7688_v26 = vsel %vm848_vm1, %v2883_v33, %v2885_v1  ;;  %v7704_v33 = vsel %vm3124_vm4, %v3165_v0, %v3167_v36 }
 0x4c5   :  { %10609 = vst [vmem:[#allocation8_spill] sm:$0xff] %v7688_v26 }
 0x4c6   :  { %v7676_v19 = vsel %vm848_vm1, %v10044_v18, %v4251_v10  ;;  %v7681_v44 = vsel %vm3124_vm4, %v10043_v43, %v4459_v61  ;;  %v7694_v10 = vpop.permute.xlu0 %3004  ;;  %v3169_v18 = vrot.slane %v7168_v30, 2 }
 0x4c7   :  { %10607 = vst [vmem:[#allocation32_spill] sm:$0xff] %v7676_v19  ;;  %2986 = vrot.lane.b32.xlu0 %v7668_v39, %s5202_s17  ;;  %3261 = vrot.lane.b32.xlu1 %v7671_v4, %s5201_s12 }
 0x4c8   :  { %10608 = vst [vmem:[#allocation33_spill] sm:$0xff] %v7681_v44  ;;  %2984 = vrot.lane.b32.xlu2 %v7688_v26, %s5202_s17  ;;  %v3164_v44 = vrot.slane %v7130_v55, 2  ;;  %s5206_s17 = smov 80  }
 0x4c9   :  { %10611 = vst [vmem:[#allocation7_spill] sm:$0xff] %v7694_v10  ;;  %v7710_v10 = vsel %vm3124_vm4, %v3167_v36, %v3169_v18 }
 0x4ca   :  { %v7697_v61 = vpop.permute.xlu2 %2972  ;;  %v3166_v1 = vsel %vm3124_vm4, %v3164_v44, %v3165_v0  ;;  %10613 = vst [vmem:[#allocation42_spill] sm:$0xff] %v7710_v10  ;;  %v3173_v44 = vrot.slane %v7190_v22, 2  ;;  %v10050_v0 = vrot.slane %v7207_v15, 2 }
 0x4cb   :  { %10612 = vst [vmem:[#allocation38_spill] sm:$0xff] %v7697_v61  ;;  %v2770_v43 = vpop.f32.mrf.mxu3  ;;  %v7724_v61 = vsel %vm3124_vm4, %v3169_v18, %v3171_v54  ;;  %v3178_v18 = vrot.slane %v7578_v49, 2 }
 0x4cc   :  { %v7714_v43 = vpop.permute.xlu1 %3006  ;;  %10617 = vst [vmem:[#allocation16_spill] sm:$0xff] %v7724_v61  ;;  %v7727_v36 = vsel %vm3124_vm4, %v3171_v54, %v3173_v44  ;;  %v3182_v54 = vrot.slane %v7643_v7, 2 }
 0x4cd   :  { %10614 = vst [vmem:[#allocation40_spill] sm:$0xff] %v7714_v43  ;;  %v7736_v43 = vsel %vm3124_vm4, %v3173_v44, %v10050_v0 }
 0x4ce   :  { %v7719_v55 = vpop.permute.xlu0 %2968  ;;  %10618 = vst [vmem:[#allocation54_spill] sm:$0xff] %v7727_v36 }
 0x4cf   :  { %3265 = vrot.lane.b32.xlu0 %v3166_v1, %s5201_s12  ;;  %3267 = vrot.lane.b32.xlu1 %v7704_v33, %s5201_s12  ;;  %10615 = vst [vmem:[#allocation12_spill] sm:$0xff] %v7719_v55  ;;  %v3180_v55 = vrot.slane %v7609_v50, 2 }
 0x4d0   :  { %3269 = vrot.lane.b32.xlu2 %v7710_v10, %s5201_s12  ;;  %10619 = vst [vmem:[#allocation39_spill] sm:$0xff] %v7736_v43 }
 0x4d1   :  { %v7752_v0 = vsel %vm3124_vm4, %v3178_v18, %v3180_v55 }
 0x4d2   :  { %v7721_v1 = vpop.permute.xlu2 %3233  ;;  %10623 = vst [vmem:[#allocation99_spill] sm:$0xff] %v7752_v0 }
 0x4d3   :  { %10616 = vst [vmem:[#allocation47_spill] sm:$0xff] %v7721_v1 }
 0x4d4   :  { %v7743_v19 = vpop.permute.xlu1 %2970 }
 0x4d5   :  { %10620 = vst [vmem:[#allocation51_spill] sm:$0xff] %v7743_v19 }
 0x4d6   :  { %v7745_v1 = vpop.permute.xlu0 %3010 }
 0x4d7   :  { %3271 = vrot.lane.b32.xlu0 %v7724_v61, %s5201_s12  ;;  %3273 = vrot.lane.b32.xlu1 %v7727_v36, %s5201_s12  ;;  %10621 = vst [vmem:[#allocation97_spill] sm:$0xff] %v7745_v1  ;;  %v3177_v36 = vrot.slane %v7545_v9, 2  ;;  %v3186_v1 = vrot.slane %v7145_v53, 2  ;;  %v10059_v9 = vrot.slane %v7161_v5, 2 }
 0x4d8   :  { %3275 = vrot.lane.b32.xlu2 %v7736_v43, %s5201_s12  ;;  %v7758_v43 = vsel %vm3124_vm4, %v3180_v55, %v3182_v54 }
 0x4d9   :  { %v3179_v44 = vsel %vm3124_vm4, %v3177_v36, %v3178_v18  ;;  %10624 = vst [vmem:[#allocation108_spill] sm:$0xff] %v7758_v43  ;;  %v3184_v36 = vrot.slane %v7135_v58, 2  ;;  %v7782_v55 = vsel %vm3124_vm4, %v3186_v1, %v10059_v9 }
 0x4da   :  { %v7748_v61 = vpop.permute.xlu2 %3239  ;;  %10629 = vst [vmem:[#allocation164_spill] sm:$0xff] %v7782_v55 }
 0x4db   :  { %10622 = vst [vmem:[#allocation103_spill] sm:$0xff] %v7748_v61  ;;  %v7773_v61 = vsel %vm3124_vm4, %v3184_v36, %v3186_v1 }
 0x4dc   :  { %v7764_v19 = vpop.permute.xlu1 %3012  ;;  %10628 = vst [vmem:[#allocation156_spill] sm:$0xff] %v7773_v61 }
 0x4dd   :  { %10625 = vst [vmem:[#allocation112_spill] sm:$0xff] %v7764_v19 }
 0x4de   :  { %v7767_v18 = vpop.permute.xlu0 %3229 }
 0x4df   :  { %3277 = vrot.lane.b32.xlu0 %v3179_v44, %s5201_s12  ;;  %3279 = vrot.lane.b32.xlu1 %v7752_v0, %s5201_s12  ;;  %10626 = vst [vmem:[#allocation152_spill] sm:$0xff] %v7767_v18  ;;  %v7770_v44 = vsel %vm3124_vm4, %v3182_v54, %v3184_v36  ;;  %v3191_v54 = vrot.slane %v7221_v2, 2  ;;  %v3193_v36 = vrot.slane %v7242_v21, 2  ;;  %v3195_v18 = vrot.slane %v7256_v56, 2 }
 0x4e0   :  { %3281 = vrot.lane.b32.xlu2 %v7758_v43, %s5201_s12  ;;  %10627 = vst [vmem:[#allocation153_spill] sm:$0xff] %v7770_v44 }
 0x4e1   :  { %v7796_v1 = vsel %vm3124_vm4, %v3191_v54, %v3193_v36 }
 0x4e2   :  { %v7784_v19 = vpop.permute.xlu2 %2978  ;;  %10632 = vst [vmem:[#allocation167_spill] sm:$0xff] %v7796_v1 }
 0x4e3   :  { %10630 = vst [vmem:[#allocation165_spill] sm:$0xff] %v7784_v19  ;;  %v7804_v19 = vsel %vm3124_vm4, %v3193_v36, %v3195_v18 }
 0x4e4   :  { %v7792_v0 = vpop.permute.xlu1 %3231  ;;  %10634 = vst [vmem:[#allocation169_spill] sm:$0xff] %v7804_v19 }
 0x4e5   :  { %10631 = vst [vmem:[#allocation166_spill] sm:$0xff] %v7792_v0  ;;  %v10068_v0 = vrot.slane %v7292_v63, 2 }
 0x4e6   :  { %v7798_v9 = vpop.permute.xlu0 %2974 }
 0x4e7   :  { %3283 = vrot.lane.b32.xlu0 %v7770_v44, %s5201_s12  ;;  %3285 = vrot.lane.b32.xlu1 %v7773_v61, %s5201_s12  ;;  %v3190_v44 = vrot.slane %v7211_v14, 2  ;;  %10633 = vst [vmem:[#allocation168_spill] sm:$0xff] %v7798_v9 }
 0x4e8   :  { %3287 = vrot.lane.b32.xlu2 %v7782_v55, %s5201_s12 }
 0x4e9   :  { %v3192_v61 = vsel %vm3124_vm4, %v3190_v44, %v3191_v54  ;;  %v3197_v44 = vrot.slane %v7267_v42, 2  ;;  %v3199_v54 = vrot.slane %v7281_v45, 2 }
 0x4ea   :  { %v7808_v14 = vpop.permute.xlu2 %3245 }
 0x4eb   :  { %10635 = vst [vmem:[#allocation170_spill] sm:$0xff] %v7808_v14  ;;  %v7814_v9 = vsel %vm3124_vm4, %v3195_v18, %v3197_v44  ;;  %v7828_v36 = vsel %vm3124_vm4, %v3199_v54, %v10068_v0 }
 0x4ec   :  { %10636 = vst [vmem:[#allocation171_spill] sm:$0xff] %v7814_v9 }
 0x4ed   :  { %10639 = vst [vmem:[#allocation174_spill] sm:$0xff] %v7828_v36 }
 0x4ee   :  { %v7832_v18 = vpop.permute.xlu0 %3235 }
 0x4ef   :  { %3289 = vrot.lane.b32.xlu0 %v3192_v61, %s5201_s12  ;;  %3291 = vrot.lane.b32.xlu1 %v7796_v1, %s5201_s12  ;;  %v7817_v61 = vsel %vm3124_vm4, %v3197_v44, %v3199_v54  ;;  %v7819_v1 = vpop.permute.xlu1 %2976  ;;  %10640 = vst [vmem:[#allocation175_spill] sm:$0xff] %v7832_v18  ;;  %v3204_v44 = vrot.slane %v7336_v24, 2 }
 0x4f0   :  { %3293 = vrot.lane.b32.xlu2 %v7804_v19, %s5201_s12  ;;  %10637 = vst [vmem:[#allocation172_spill] sm:$0xff] %v7817_v61 }
 0x4f1   :  { %10638 = vst [vmem:[#allocation173_spill] sm:$0xff] %v7819_v1  ;;  %v3206_v1 = vrot.slane %v7344_v16, 2 }
 0x4f3   :  { %v7842_v54 = vsel %vm3124_vm4, %v3204_v44, %v3206_v1 }
 0x4f4   :  { %10642 = vst [vmem:[#allocation177_spill] sm:$0xff] %v7842_v54 }
 0x4f7   :  { %3295 = vrot.lane.b32.xlu0 %v7814_v9, %s5201_s12  ;;  %3297 = vrot.lane.b32.xlu1 %v7817_v61, %s5201_s12  ;;  %v3208_v9 = vrot.slane %v7356_v62, 2  ;;  %v3203_v61 = vrot.slane %v7334_v28, 2 }
 0x4f8   :  { %3299 = vrot.lane.b32.xlu2 %v7828_v36, %s5201_s12 }
 0x4f9   :  { %v3205_v19 = vsel %vm3124_vm4, %v3203_v61, %v3204_v44  ;;  %v7848_v0 = vsel %vm3124_vm4, %v3206_v1, %v3208_v9  ;;  %v3210_v61 = vrot.slane %v7369_v37, 2  ;;  %v3212_v44 = vrot.slane %v7378_v27, 2 }
 0x4fa   :  { %v7835_v14 = vpop.permute.xlu2 %3020  ;;  %10643 = vst [vmem:[#allocation178_spill] sm:$0xff] %v7848_v0 }
 0x4fb   :  { %10641 = vst [vmem:[#allocation176_spill] sm:$0xff] %v7835_v14  ;;  %v7852_v14 = vpop.permute.xlu1 %3237  ;;  %v7865_v1 = vsel %vm3124_vm4, %v3210_v61, %v3212_v44 }
 0x4fc   :  { %10644 = vst [vmem:[#allocation179_spill] sm:$0xff] %v7852_v14 }
 0x4fd   :  { %10648 = vst [vmem:[#allocation183_spill] sm:$0xff] %v7865_v1 }
 0x4ff   :  { %3301 = vrot.lane.b32.xlu0 %v3205_v19, %s5201_s12  ;;  %3303 = vrot.lane.b32.xlu1 %v7842_v54, %s5201_s12  ;;  %v10077_v19 = vrot.slane %v7391_v59, 2  ;;  %v7862_v54 = vsel %vm3124_vm4, %v3208_v9, %v3210_v61  ;;  %v3217_v61 = vrot.slane %v7487_v38, 2 }
 0x500   :  { %3305 = vrot.lane.b32.xlu2 %v7848_v0, %s5201_s12  ;;  %10647 = vst [vmem:[#allocation182_spill] sm:$0xff] %v7862_v54  ;;  %v3216_v0 = vrot.slane %v7474_v6, 2 }
 0x501   :  { %v7854_v18 = vpop.permute.xlu0 %3016 }
 0x502   :  { %10645 = vst [vmem:[#allocation180_spill] sm:$0xff] %v7854_v18  ;;  %v7856_v28 = vpop.permute.xlu2 %3251  ;;  %v7874_v18 = vsel %vm3124_vm4, %v3212_v44, %v10077_v19  ;;  %v3218_v44 = vsel %vm3124_vm4, %v3216_v0, %v3217_v61  ;;  %v3223_v0 = vrot.slane %v7551_v23, 2 }
 0x503   :  { %10646 = vst [vmem:[#allocation181_spill] sm:$0xff] %v7856_v28 }
 0x504   :  { %10649 = vst [vmem:[#allocation184_spill] sm:$0xff] %v7874_v18 }
 0x507   :  { %3307 = vrot.lane.b32.xlu0 %v7862_v54, %s5201_s12  ;;  %3309 = vrot.lane.b32.xlu1 %v7865_v1, %s5201_s12  ;;  %v3219_v54 = vrot.slane %v7505_v40, 2  ;;  %v3221_v1 = vrot.slane %v7523_v41, 2 }
 0x508   :  { %3311 = vrot.lane.b32.xlu2 %v7874_v18, %s5201_s12 }
 0x509   :  { %v7878_v14 = vpop.permute.xlu1 %3018  ;;  %v7880_v9 = vpop.permute.xlu0 %3241  ;;  %v7890_v19 = vsel %vm3124_vm4, %v3217_v61, %v3219_v54  ;;  %v3225_v61 = vrot.slane %v7580_v57, 2 }
 0x50a   :  { %10650 = vst [vmem:[#allocation185_spill] sm:$0xff] %v7878_v14  ;;  %v7883_v28 = vpop.permute.xlu2 %3257  ;;  %v7896_v14 = vsel %vm3124_vm4, %v3219_v54, %v3221_v1 }
 0x50b   :  { %10651 = vst [vmem:[#allocation186_spill] sm:$0xff] %v7880_v9  ;;  %v7913_v54 = vsel %vm3124_vm4, %v3223_v0, %v3225_v61 }
 0x50c   :  { %10652 = vst [vmem:[#allocation187_spill] sm:$0xff] %v7883_v28 }
 0x50d   :  { %10653 = vst [vmem:[#allocation188_spill] sm:$0xff] %v7890_v19 }
 0x50e   :  { %10654 = vst [vmem:[#allocation189_spill] sm:$0xff] %v7896_v14 }
 0x50f   :  { %3313 = vrot.lane.b32.xlu0 %v3218_v44, %s5201_s12  ;;  %3315 = vrot.lane.b32.xlu1 %v7890_v19, %s5201_s12  ;;  %v10080_v44 = vrot.slane %v7605_v11, 2  ;;  %v7910_v19 = vsel %vm3124_vm4, %v3221_v1, %v3223_v0  ;;  %10659 = vst [vmem:[#allocation194_spill] sm:$0xff] %v7913_v54 }
 0x510   :  { %3317 = vrot.lane.b32.xlu2 %v7896_v14, %s5201_s12  ;;  %10658 = vst [vmem:[#allocation193_spill] sm:$0xff] %v7910_v19 }
 0x511   :  { %v7900_v9 = vpop.permute.xlu1 %3243  ;;  %v7902_v28 = vpop.permute.xlu0 %3247 }
 0x512   :  { %10655 = vst [vmem:[#allocation190_spill] sm:$0xff] %v7900_v9  ;;  %v7904_v6 = vpop.permute.xlu2 %3026 }
 0x513   :  { %10656 = vst [vmem:[#allocation191_spill] sm:$0xff] %v7902_v28  ;;  %v7922_v28 = vsel %vm3124_vm4, %v3225_v61, %v10080_v44 }
 0x514   :  { %10657 = vst [vmem:[#allocation192_spill] sm:$0xff] %v7904_v6 }
 0x515   :  { %10660 = vst [vmem:[#allocation195_spill] sm:$0xff] %v7922_v28 }
 0x517   :  { %3319 = vrot.lane.b32.xlu0 %v7910_v19, %s5201_s12  ;;  %3321 = vrot.lane.b32.xlu1 %v7913_v54, %s5201_s12 }
 0x518   :  { %3323 = vrot.lane.b32.xlu2 %v7922_v28, %s5201_s12  ;;  %s5205_s12 = smov 88  }
 0x519   :  { %v7926_v9 = vpop.permute.xlu1 %3249  ;;  %v7928_v1 = vpop.permute.xlu0 %3022 }
 0x51a   :  { %10661 = vst [vmem:[#allocation196_spill] sm:$0xff] %v7926_v9  ;;  %v7930_v0 = vpop.permute.xlu2 %3263 }
 0x51b   :  { %10662 = vst [vmem:[#allocation197_spill] sm:$0xff] %v7928_v1 }
 0x51c   :  { %10663 = vst [vmem:[#allocation198_spill] sm:$0xff] %v7930_v0 }
 0x51f   :  { %3421 = vrot.lane.b32.xlu0 %v10527_v35, %s5203_s18  ;;  %3423 = vrot.lane.b32.xlu1 %v10531_v51, %s5203_s18 }
 0x520   :  { %3425 = vrot.lane.b32.xlu2 %v10538_v48, %s5203_s18 }
 0x521   :  { %v7938_v61 = vpop.permute.xlu1 %3024  ;;  %v7940_v44 = vpop.permute.xlu0 %3253 }
 0x522   :  { %10664 = vst [vmem:[#allocation199_spill] sm:$0xff] %v7938_v61  ;;  %v7942_v6 = vpop.permute.xlu2 %2984 }
 0x523   :  { %10665 = vst [vmem:[#allocation200_spill] sm:$0xff] %v7940_v44 }
 0x524   :  { %10666 = vst [vmem:[#allocation201_spill] sm:$0xff] %v7942_v6 }
 0x527   :  { %3427 = vrot.lane.b32.xlu0 %v10535_v31, %s5203_s18  ;;  %3429 = vrot.lane.b32.xlu1 %v10542_v8, %s5203_s18 }
 0x528   :  { %3431 = vrot.lane.b32.xlu2 %v10548_v34, %s5203_s18 }
 0x529   :  { %v7950_v9 = vpop.permute.xlu1 %3255  ;;  %v7952_v0 = vpop.permute.xlu0 %2980 }
 0x52a   :  { %10667 = vst [vmem:[#allocation202_spill] sm:$0xff] %v7950_v9  ;;  %v7954_v35 = vpop.permute.xlu2 %3269 }
 0x52b   :  { %10668 = vst [vmem:[#allocation203_spill] sm:$0xff] %v7952_v0 }
 0x52c   :  { %10669 = vst [vmem:[#allocation204_spill] sm:$0xff] %v7954_v35 }
 0x52f   :  { %3433 = vrot.lane.b32.xlu0 %v10343_v17, %s5203_s18  ;;  %3435 = vrot.lane.b32.xlu1 %v6527_v12, %s5203_s18 }
 0x530   :  { %3437 = vrot.lane.b32.xlu2 %v6548_v46, %s5203_s18 }
 0x531   :  { %v7962_v6 = vpop.permute.xlu1 %2982  ;;  %v7964_v44 = vpop.permute.xlu0 %3259 }
 0x532   :  { %10670 = vst [vmem:[#allocation205_spill] sm:$0xff] %v7962_v6  ;;  %v7966_v61 = vpop.permute.xlu2 %3275  ;;  %v10676_v6 = vld [vmem:[#allocation139_spill] sm:$0xff] }
 0x533   :  { %10671 = vst [vmem:[#allocation206_spill] sm:$0xff] %v7964_v44  ;;  %v10677_v44 = vld [vmem:[#allocation14_spill] sm:$0xff] }
 0x534   :  { %10672 = vst [vmem:[#allocation207_spill] sm:$0xff] %v7966_v61 }
 0x537   :  { %3439 = vrot.lane.b32.xlu0 %v10567_v60, %s5203_s18  ;;  %3441 = vrot.lane.b32.xlu1 %v10575_v13, %s5203_s18 }
 0x538   :  { %3443 = vrot.lane.b32.xlu2 %v10576_v20, %s5203_s18 }
 0x539   :  { %v7974_v0 = vpop.permute.xlu1 %3261  ;;  %v7976_v9 = vpop.permute.xlu0 %2986 }
 0x53a   :  { %10673 = vst [vmem:[#allocation208_spill] sm:$0xff] %v7974_v0  ;;  %v7978_v35 = vpop.permute.xlu2 %3281  ;;  %v10681_v0 = vld [vmem:[#allocation19_spill] sm:$0xff] }
 0x53b   :  { %10674 = vst [vmem:[#allocation209_spill] sm:$0xff] %v7976_v9  ;;  %v10682_v9 = vld [vmem:[#allocation93_spill] sm:$0xff] }
 0x53c   :  { %10675 = vst [vmem:[#allocation210_spill] sm:$0xff] %v7978_v35  ;;  %v10683_v35 = vld [vmem:[#allocation23_spill] sm:$0xff] }
 0x53f   :  { %3445 = vrot.lane.b32.xlu0 %v6895_v32, %s5203_s18  ;;  %3447 = vrot.lane.b32.xlu1 %v10676_v6, %s5203_s18 }
 0x540   :  { %3449 = vrot.lane.b32.xlu2 %v10677_v44, %s5203_s18 }
 0x541   :  { %v7986_v61 = vpop.permute.xlu1 %3267  ;;  %v7988_v17 = vpop.permute.xlu0 %3265 }
 0x542   :  { %10678 = vst [vmem:[#allocation211_spill] sm:$0xff] %v7986_v61  ;;  %v7990_v1 = vpop.permute.xlu2 %3287 }
 0x543   :  { %10679 = vst [vmem:[#allocation212_spill] sm:$0xff] %v7988_v17 }
 0x544   :  { %10680 = vst [vmem:[#allocation213_spill] sm:$0xff] %v7990_v1 }
 0x547   :  { %3451 = vrot.lane.b32.xlu0 %v10681_v0, %s5203_s18  ;;  %3453 = vrot.lane.b32.xlu1 %v10682_v9, %s5203_s18 }
 0x548   :  { %3455 = vrot.lane.b32.xlu2 %v10683_v35, %s5203_s18 }
 0x549   :  { %v7998_v32 = vpop.permute.xlu1 %3273  ;;  %v8000_v6 = vpop.permute.xlu0 %3271 }
 0x54a   :  { %10684 = vst [vmem:[#allocation93_spill] sm:$0xff] %v7998_v32  ;;  %v8002_v44 = vpop.permute.xlu2 %3293 }
 0x54b   :  { %10685 = vst [vmem:[#allocation23_spill] sm:$0xff] %v8000_v6 }
 0x54c   :  { %10686 = vst [vmem:[#allocation214_spill] sm:$0xff] %v8002_v44 }
 0x54f   :  { %3457 = vrot.lane.b32.xlu0 %v7137_v25, %s5203_s18  ;;  %3459 = vrot.lane.b32.xlu1 %v7149_v29, %s5203_s18 }
 0x550   :  { %3461 = vrot.lane.b32.xlu2 %v7168_v30, %s5203_s18 }
 0x551   :  { %v8010_v1 = vpop.permute.xlu1 %3279  ;;  %v8012_v17 = vpop.permute.xlu0 %3277 }
 0x552   :  { %10687 = vst [vmem:[#allocation215_spill] sm:$0xff] %v8010_v1  ;;  %v8014_v61 = vpop.permute.xlu2 %3299 }
 0x553   :  { %10688 = vst [vmem:[#allocation216_spill] sm:$0xff] %v8012_v17 }
 0x554   :  { %10689 = vst [vmem:[#allocation217_spill] sm:$0xff] %v8014_v61 }
 0x557   :  { %3463 = vrot.lane.b32.xlu0 %v7181_v3, %s5203_s18  ;;  %3465 = vrot.lane.b32.xlu1 %v7190_v22, %s5203_s18 }
 0x558   :  { %3467 = vrot.lane.b32.xlu2 %v7207_v15, %s5203_s18 }
 0x559   :  { %v8022_v44 = vpop.permute.xlu1 %3285  ;;  %v8024_v6 = vpop.permute.xlu0 %3283 }
 0x55a   :  { %10690 = vst [vmem:[#allocation218_spill] sm:$0xff] %v8022_v44  ;;  %v8026_v32 = vpop.permute.xlu2 %3305 }
 0x55b   :  { %10691 = vst [vmem:[#allocation219_spill] sm:$0xff] %v8024_v6 }
 0x55c   :  { %10692 = vst [vmem:[#allocation220_spill] sm:$0xff] %v8026_v32 }
 0x55f   :  { %3469 = vrot.lane.b32.xlu0 %v7578_v49, %s5203_s18  ;;  %3471 = vrot.lane.b32.xlu1 %v7609_v50, %s5203_s18 }
 0x560   :  { %3473 = vrot.lane.b32.xlu2 %v7643_v7, %s5203_s18 }
 0x561   :  { %v8034_v61 = vpop.permute.xlu1 %3291  ;;  %v8036_v17 = vpop.permute.xlu0 %3289 }
 0x562   :  { %10693 = vst [vmem:[#allocation221_spill] sm:$0xff] %v8034_v61  ;;  %v8038_v1 = vpop.permute.xlu2 %3311 }
 0x563   :  { %10694 = vst [vmem:[#allocation222_spill] sm:$0xff] %v8036_v17 }
 0x564   :  { %10695 = vst [vmem:[#allocation223_spill] sm:$0xff] %v8038_v1 }
 0x567   :  { %3475 = vrot.lane.b32.xlu0 %v7135_v58, %s5203_s18  ;;  %3477 = vrot.lane.b32.xlu1 %v7145_v53, %s5203_s18 }
 0x568   :  { %3479 = vrot.lane.b32.xlu2 %v7161_v5, %s5203_s18 }
 0x569   :  { %v8046_v32 = vpop.permute.xlu1 %3297  ;;  %v8048_v6 = vpop.permute.xlu0 %3295 }
 0x56a   :  { %10696 = vst [vmem:[#allocation224_spill] sm:$0xff] %v8046_v32  ;;  %v8050_v44 = vpop.permute.xlu2 %3317 }
 0x56b   :  { %10697 = vst [vmem:[#allocation225_spill] sm:$0xff] %v8048_v6 }
 0x56c   :  { %10698 = vst [vmem:[#allocation226_spill] sm:$0xff] %v8050_v44 }
 0x56f   :  { %3481 = vrot.lane.b32.xlu0 %v7221_v2, %s5203_s18  ;;  %3483 = vrot.lane.b32.xlu1 %v7242_v21, %s5203_s18 }
 0x570   :  { %3485 = vrot.lane.b32.xlu2 %v7256_v56, %s5203_s18 }
 0x571   :  { %v8058_v1 = vpop.permute.xlu1 %3303  ;;  %v8060_v17 = vpop.permute.xlu0 %3301 }
 0x572   :  { %10699 = vst [vmem:[#allocation227_spill] sm:$0xff] %v8058_v1  ;;  %v8062_v61 = vpop.permute.xlu2 %3323 }
 0x573   :  { %10700 = vst [vmem:[#allocation228_spill] sm:$0xff] %v8060_v17 }
 0x574   :  { %10701 = vst [vmem:[#allocation229_spill] sm:$0xff] %v8062_v61 }
 0x577   :  { %3487 = vrot.lane.b32.xlu0 %v7267_v42, %s5203_s18  ;;  %3489 = vrot.lane.b32.xlu1 %v7281_v45, %s5203_s18 }
 0x578   :  { %3491 = vrot.lane.b32.xlu2 %v7292_v63, %s5203_s18 }
 0x579   :  { %v8070_v44 = vpop.permute.xlu1 %3309  ;;  %v8072_v6 = vpop.permute.xlu0 %3307 }
 0x57a   :  { %10702 = vst [vmem:[#allocation230_spill] sm:$0xff] %v8070_v44  ;;  %v8074_v32 = vpop.permute.xlu2 %3425 }
 0x57b   :  { %10703 = vst [vmem:[#allocation231_spill] sm:$0xff] %v8072_v6 }
 0x57c   :  { %10704 = vst [vmem:[#allocation232_spill] sm:$0xff] %v8074_v32  ;;  %v10726_v32 = vrot.slane %v10548_v34, 1 }
 0x57f   :  { %3493 = vrot.lane.b32.xlu0 %v7336_v24, %s5203_s18  ;;  %3495 = vrot.lane.b32.xlu1 %v7344_v16, %s5203_s18 }
 0x580   :  { %3497 = vrot.lane.b32.xlu2 %v7356_v62, %s5203_s18 }
 0x581   :  { %v8082_v17 = vpop.permute.xlu1 %3315  ;;  %v8084_v1 = vpop.permute.xlu0 %3313 }
 0x582   :  { %10705 = vst [vmem:[#allocation233_spill] sm:$0xff] %v8082_v17  ;;  %v8086_v2 = vpop.permute.xlu2 %3431 }
 0x583   :  { %10706 = vst [vmem:[#allocation234_spill] sm:$0xff] %v8084_v1 }
 0x584   :  { %10707 = vst [vmem:[#allocation235_spill] sm:$0xff] %v8086_v2 }
 0x587   :  { %3499 = vrot.lane.b32.xlu0 %v7369_v37, %s5203_s18  ;;  %3501 = vrot.lane.b32.xlu1 %v7378_v27, %s5203_s18 }
 0x588   :  { %3503 = vrot.lane.b32.xlu2 %v7391_v59, %s5203_s18 }
 0x589   :  { %v8094_v6 = vpop.permute.xlu1 %3321  ;;  %v8096_v44 = vpop.permute.xlu0 %3319 }
 0x58a   :  { %10708 = vst [vmem:[#allocation236_spill] sm:$0xff] %v8094_v6  ;;  %v8098_v24 = vpop.permute.xlu2 %3437 }
 0x58b   :  { %10709 = vst [vmem:[#allocation237_spill] sm:$0xff] %v8096_v44 }
 0x58c   :  { %10710 = vst [vmem:[#allocation238_spill] sm:$0xff] %v8098_v24 }
 0x58f   :  { %3505 = vrot.lane.b32.xlu0 %v7487_v38, %s5203_s18  ;;  %3507 = vrot.lane.b32.xlu1 %v7505_v40, %s5203_s18  ;;  %v10814_v40 = vrot.slane %v7391_v59, 1 }
 0x590   :  { %3509 = vrot.lane.b32.xlu2 %v7523_v41, %s5203_s18 }
 0x591   :  { %v8106_v1 = vpop.permute.xlu1 %3423  ;;  %v8108_v17 = vpop.permute.xlu0 %3421 }
 0x592   :  { %10711 = vst [vmem:[#allocation239_spill] sm:$0xff] %v8106_v1  ;;  %v8110_v49 = vpop.permute.xlu2 %3443  ;;  %v10719_v1 = vld [vmem:[#allocation83_spill] sm:$0xff] }
 0x593   :  { %10712 = vst [vmem:[#allocation240_spill] sm:$0xff] %v8108_v17  ;;  %v10717_v17 = vld [vmem:[#allocation79_spill] sm:$0xff] }
 0x594   :  { %10713 = vst [vmem:[#allocation241_spill] sm:$0xff] %v8110_v49  ;;  %v10718_v49 = vld [vmem:[#allocation87_spill] sm:$0xff] }
 0x597   :  { %3511 = vrot.lane.b32.xlu0 %v7551_v23, %s5203_s18  ;;  %3513 = vrot.lane.b32.xlu1 %v7580_v57, %s5203_s18  ;;  %v10756_v57 = vrot.slane %v10683_v35, 1  ;;  %v10771_v23 = vrot.slane %v7207_v15, 1 }
 0x598   :  { %3515 = vrot.lane.b32.xlu2 %v7605_v11, %s5203_s18  ;;  %s5207_s18 = smov 72  }
 0x599   :  { %v8118_v38 = vpop.permute.xlu1 %3429  ;;  %v8120_v25 = vpop.permute.xlu0 %3427 }
 0x59a   :  { %10714 = vst [vmem:[#allocation242_spill] sm:$0xff] %v8118_v38  ;;  %v8122_v24 = vpop.permute.xlu2 %3449 }
 0x59b   :  { %10715 = vst [vmem:[#allocation243_spill] sm:$0xff] %v8120_v25  ;;  %v10723_v25 = vld [vmem:[#allocation75_spill] sm:$0xff] }
 0x59c   :  { %10716 = vst [vmem:[#allocation244_spill] sm:$0xff] %v8122_v24  ;;  %v10724_v24 = vld [vmem:[#allocation115_spill] sm:$0xff] }
 0x59d   :  { %v10725_v38 = vrot.slane %v10724_v24, 1 }
 0x59f   :  { %3639 = vrot.lane.b32.xlu1 %v10717_v17, %s5204_s2  ;;  %3637 = vrot.lane.b32.xlu0 %v10718_v49, %s5204_s2  ;;  %v8143_v61 = vsel %vm848_vm1, %v10726_v32, %v10725_v38  ;;  %v10728_v49 = vld [vmem:[#allocation143_spill] sm:$0xff]  ;;  %v10733_v17 = vld [vmem:[#allocation121_spill] sm:$0xff] }
 0x5a0   :  { %3641 = vrot.lane.b32.xlu2 %v10719_v1, %s5204_s2  ;;  %10727 = vst [vmem:[#allocation115_spill] sm:$0xff] %v8143_v61  ;;  %v10734_v32 = vld [vmem:[#allocation85_spill] sm:$0xff]  ;;  %v10741_v1 = vrot.slane %v10576_v20, 1 }
 0x5a1   :  { %v8130_v44 = vpop.permute.xlu1 %3435  ;;  %v8132_v6 = vpop.permute.xlu0 %3433 }
 0x5a2   :  { %10720 = vst [vmem:[#allocation87_spill] sm:$0xff] %v8130_v44  ;;  %v8134_v2 = vpop.permute.xlu2 %3455 }
 0x5a3   :  { %10721 = vst [vmem:[#allocation245_spill] sm:$0xff] %v8132_v6 }
 0x5a4   :  { %10722 = vst [vmem:[#allocation246_spill] sm:$0xff] %v8134_v2 }
 0x5a7   :  { %3645 = vrot.lane.b32.xlu1 %v10723_v25, %s5204_s2  ;;  %3643 = vrot.lane.b32.xlu0 %v10728_v49, %s5204_s2  ;;  %v10732_v25 = vld [vmem:[#allocation132_spill] sm:$0xff] }
 0x5a8   :  { %3647 = vrot.lane.b32.xlu2 %v8143_v61, %s5204_s2 }
 0x5a9   :  { %v8149_v44 = vpop.permute.xlu1 %3441  ;;  %v8151_v6 = vpop.permute.xlu0 %3439 }
 0x5aa   :  { %10729 = vst [vmem:[#allocation247_spill] sm:$0xff] %v8149_v44  ;;  %v8153_v2 = vpop.permute.xlu2 %3461  ;;  %v10738_v44 = vld [vmem:[#allocation80_spill] sm:$0xff] }
 0x5ab   :  { %10730 = vst [vmem:[#allocation248_spill] sm:$0xff] %v8151_v6  ;;  %v10739_v6 = vld [vmem:[#allocation160_spill] sm:$0xff] }
 0x5ac   :  { %10731 = vst [vmem:[#allocation249_spill] sm:$0xff] %v8153_v2  ;;  %v10740_v2 = vrot.slane %v10739_v6, 1 }
 0x5af   :  { %3651 = vrot.lane.b32.xlu1 %v10732_v25, %s5204_s2  ;;  %3649 = vrot.lane.b32.xlu0 %v10733_v17, %s5204_s2  ;;  %v8174_v25 = vsel %vm848_vm1, %v10741_v1, %v10740_v2  ;;  %v10743_v17 = vld [vmem:[#allocation138_spill] sm:$0xff]  ;;  %v10749_v2 = vld [vmem:[#allocation20_spill] sm:$0xff] }
 0x5b0   :  { %3653 = vrot.lane.b32.xlu2 %v10734_v32, %s5204_s2  ;;  %10742 = vst [vmem:[#allocation160_spill] sm:$0xff] %v8174_v25  ;;  %v10748_v32 = vld [vmem:[#allocation10_spill] sm:$0xff] }
 0x5b1   :  { %v8161_v38 = vpop.permute.xlu1 %3447  ;;  %v8163_v49 = vpop.permute.xlu0 %3445 }
 0x5b2   :  { %10735 = vst [vmem:[#allocation121_spill] sm:$0xff] %v8161_v38  ;;  %v8165_v61 = vpop.permute.xlu2 %3467 }
 0x5b3   :  { %10736 = vst [vmem:[#allocation250_spill] sm:$0xff] %v8163_v49 }
 0x5b4   :  { %10737 = vst [vmem:[#allocation251_spill] sm:$0xff] %v8165_v61 }
 0x5b7   :  { %3657 = vrot.lane.b32.xlu1 %v10738_v44, %s5204_s2  ;;  %3655 = vrot.lane.b32.xlu0 %v10743_v17, %s5204_s2  ;;  %v10747_v44 = vld [vmem:[#allocation11_spill] sm:$0xff] }
 0x5b8   :  { %3659 = vrot.lane.b32.xlu2 %v8174_v25, %s5204_s2 }
 0x5b9   :  { %v8180_v38 = vpop.permute.xlu1 %3453  ;;  %v8182_v49 = vpop.permute.xlu0 %3451 }
 0x5ba   :  { %10744 = vst [vmem:[#allocation252_spill] sm:$0xff] %v8180_v38  ;;  %v8184_v61 = vpop.permute.xlu2 %3473  ;;  %v10753_v38 = vld [vmem:[#allocation114_spill] sm:$0xff] }
 0x5bb   :  { %10745 = vst [vmem:[#allocation253_spill] sm:$0xff] %v8182_v49  ;;  %v10754_v49 = vld [vmem:[#allocation116_spill] sm:$0xff] }
 0x5bc   :  { %10746 = vst [vmem:[#allocation254_spill] sm:$0xff] %v8184_v61  ;;  %v10755_v61 = vrot.slane %v10754_v49, 1 }
 0x5bf   :  { %3663 = vrot.lane.b32.xlu1 %v10747_v44, %s5204_s2  ;;  %3661 = vrot.lane.b32.xlu0 %v10748_v32, %s5204_s2  ;;  %v8205_v44 = vsel %vm848_vm1, %v10756_v57, %v10755_v61  ;;  %v10758_v32 = vld [vmem:[#allocation89_spill] sm:$0xff]  ;;  %v10764_v57 = vld [vmem:[#allocation30_spill] sm:$0xff] }
 0x5c0   :  { %3665 = vrot.lane.b32.xlu2 %v10749_v2, %s5204_s2  ;;  %10757 = vst [vmem:[#allocation116_spill] sm:$0xff] %v8205_v44  ;;  %v10763_v2 = vld [vmem:[#allocation49_spill] sm:$0xff] }
 0x5c1   :  { %v8192_v1 = vpop.permute.xlu1 %3459  ;;  %v8194_v17 = vpop.permute.xlu0 %3457 }
 0x5c2   :  { %10750 = vst [vmem:[#allocation10_spill] sm:$0xff] %v8192_v1  ;;  %v8196_v25 = vpop.permute.xlu2 %3479 }
 0x5c3   :  { %10751 = vst [vmem:[#allocation255_spill] sm:$0xff] %v8194_v17 }
 0x5c4   :  { %10752 = vst [vmem:[#allocation256_spill] sm:$0xff] %v8196_v25 }
 0x5c7   :  { %3669 = vrot.lane.b32.xlu1 %v10753_v38, %s5204_s2  ;;  %3667 = vrot.lane.b32.xlu0 %v10758_v32, %s5204_s2  ;;  %v10762_v38 = vld [vmem:[#allocation48_spill] sm:$0xff] }
 0x5c8   :  { %3671 = vrot.lane.b32.xlu2 %v8205_v44, %s5204_s2 }
 0x5c9   :  { %v8211_v1 = vpop.permute.xlu1 %3465  ;;  %v8213_v17 = vpop.permute.xlu0 %3463 }
 0x5ca   :  { %10759 = vst [vmem:[#allocation257_spill] sm:$0xff] %v8211_v1  ;;  %v8215_v25 = vpop.permute.xlu2 %3485  ;;  %v10768_v1 = vld [vmem:[#allocation17_spill] sm:$0xff] }
 0x5cb   :  { %10760 = vst [vmem:[#allocation258_spill] sm:$0xff] %v8213_v17  ;;  %v10769_v17 = vld [vmem:[#allocation31_spill] sm:$0xff] }
 0x5cc   :  { %10761 = vst [vmem:[#allocation259_spill] sm:$0xff] %v8215_v25  ;;  %v10770_v25 = vrot.slane %v10769_v17, 1 }
 0x5cf   :  { %3675 = vrot.lane.b32.xlu1 %v10762_v38, %s5204_s2  ;;  %3673 = vrot.lane.b32.xlu0 %v10763_v2, %s5204_s2  ;;  %v8236_v38 = vsel %vm848_vm1, %v10771_v23, %v10770_v25  ;;  %v10773_v2 = vld [vmem:[#allocation9_spill] sm:$0xff] }
 0x5d0   :  { %3677 = vrot.lane.b32.xlu2 %v10764_v57, %s5204_s2  ;;  %10772 = vst [vmem:[#allocation31_spill] sm:$0xff] %v8236_v38  ;;  %v10799_v57 = vrot.slane %v7292_v63, 1 }
 0x5d1   :  { %v8223_v61 = vpop.permute.xlu1 %3471  ;;  %v8225_v32 = vpop.permute.xlu0 %3469 }
 0x5d2   :  { %10765 = vst [vmem:[#allocation49_spill] sm:$0xff] %v8223_v61  ;;  %v8227_v44 = vpop.permute.xlu2 %3491 }
 0x5d3   :  { %10766 = vst [vmem:[#allocation260_spill] sm:$0xff] %v8225_v32 }
 0x5d4   :  { %10767 = vst [vmem:[#allocation261_spill] sm:$0xff] %v8227_v44 }
 0x5d7   :  { %3681 = vrot.lane.b32.xlu1 %v10768_v1, %s5204_s2  ;;  %3679 = vrot.lane.b32.xlu0 %v10773_v2, %s5204_s2  ;;  %v10777_v1 = vld [vmem:[#allocation74_spill] sm:$0xff]  ;;  %v10784_v2 = vrot.slane %v7161_v5, 1 }
 0x5d8   :  { %3683 = vrot.lane.b32.xlu2 %v8236_v38, %s5204_s2 }
 0x5d9   :  { %v8242_v61 = vpop.permute.xlu1 %3477  ;;  %v8244_v32 = vpop.permute.xlu0 %3475 }
 0x5da   :  { %10774 = vst [vmem:[#allocation262_spill] sm:$0xff] %v8242_v61  ;;  %v8246_v44 = vpop.permute.xlu2 %3497  ;;  %v10781_v61 = vld [vmem:[#allocation64_spill] sm:$0xff] }
 0x5db   :  { %10775 = vst [vmem:[#allocation263_spill] sm:$0xff] %v8244_v32  ;;  %v10782_v32 = vld [vmem:[#allocation24_spill] sm:$0xff] }
 0x5dc   :  { %10776 = vst [vmem:[#allocation264_spill] sm:$0xff] %v8246_v44  ;;  %v10783_v44 = vrot.slane %v10782_v32, 1 }
 0x5df   :  { %3687 = vrot.lane.b32.xlu1 %v7688_v26, %s5204_s2  ;;  %3685 = vrot.lane.b32.xlu0 %v10777_v1, %s5204_s2  ;;  %v8267_v26 = vsel %vm848_vm1, %v10784_v2, %v10783_v44  ;;  %v10786_v1 = vld [vmem:[#allocation127_spill] sm:$0xff]  ;;  %v10792_v44 = vld [vmem:[#allocation101_spill] sm:$0xff] }
 0x5e0   :  { %3689 = vrot.lane.b32.xlu2 %v7668_v39, %s5204_s2  ;;  %10785 = vst [vmem:[#allocation24_spill] sm:$0xff] %v8267_v26  ;;  %v10791_v39 = vld [vmem:[#allocation130_spill] sm:$0xff] }
 0x5e1   :  { %v8254_v25 = vpop.permute.xlu1 %3483  ;;  %v8256_v23 = vpop.permute.xlu0 %3481 }
 0x5e2   :  { %10778 = vst [vmem:[#allocation74_spill] sm:$0xff] %v8254_v25  ;;  %v8258_v38 = vpop.permute.xlu2 %3503 }
 0x5e3   :  { %10779 = vst [vmem:[#allocation265_spill] sm:$0xff] %v8256_v23 }
 0x5e4   :  { %10780 = vst [vmem:[#allocation266_spill] sm:$0xff] %v8258_v38 }
 0x5e7   :  { %3693 = vrot.lane.b32.xlu1 %v10781_v61, %s5204_s2  ;;  %3691 = vrot.lane.b32.xlu0 %v10786_v1, %s5204_s2  ;;  %v10790_v61 = vld [vmem:[#allocation81_spill] sm:$0xff] }
 0x5e8   :  { %3695 = vrot.lane.b32.xlu2 %v8267_v26, %s5204_s2 }
 0x5e9   :  { %v8273_v25 = vpop.permute.xlu1 %3489  ;;  %v8275_v23 = vpop.permute.xlu0 %3487 }
 0x5ea   :  { %10787 = vst [vmem:[#allocation267_spill] sm:$0xff] %v8273_v25  ;;  %v8277_v38 = vpop.permute.xlu2 %3509  ;;  %v10796_v25 = vld [vmem:[#allocation41_spill] sm:$0xff] }
 0x5eb   :  { %10788 = vst [vmem:[#allocation268_spill] sm:$0xff] %v8275_v23  ;;  %v10797_v23 = vld [vmem:[#allocation86_spill] sm:$0xff] }
 0x5ec   :  { %10789 = vst [vmem:[#allocation269_spill] sm:$0xff] %v8277_v38  ;;  %v10798_v38 = vrot.slane %v10797_v23, 1 }
 0x5ef   :  { %3699 = vrot.lane.b32.xlu1 %v10790_v61, %s5204_s2  ;;  %3697 = vrot.lane.b32.xlu0 %v10791_v39, %s5204_s2  ;;  %v8298_v61 = vsel %vm848_vm1, %v10799_v57, %v10798_v38  ;;  %v10801_v39 = vld [vmem:[#allocation141_spill] sm:$0xff]  ;;  %v10807_v38 = vld [vmem:[#allocation22_spill] sm:$0xff] }
 0x5f0   :  { %3701 = vrot.lane.b32.xlu2 %v10792_v44, %s5204_s2  ;;  %10800 = vst [vmem:[#allocation86_spill] sm:$0xff] %v8298_v61 }
 0x5f1   :  { %v8285_v2 = vpop.permute.xlu1 %3495  ;;  %v8287_v1 = vpop.permute.xlu0 %3493 }
 0x5f2   :  { %10793 = vst [vmem:[#allocation130_spill] sm:$0xff] %v8285_v2  ;;  %v8289_v26 = vpop.permute.xlu2 %3515 }
 0x5f3   :  { %10794 = vst [vmem:[#allocation270_spill] sm:$0xff] %v8287_v1 }
 0x5f4   :  { %10795 = vst [vmem:[#allocation271_spill] sm:$0xff] %v8289_v26  ;;  %v10806_v26 = vld [vmem:[#allocation44_spill] sm:$0xff] }
 0x5f7   :  { %3705 = vrot.lane.b32.xlu1 %v10796_v25, %s5204_s2  ;;  %3703 = vrot.lane.b32.xlu0 %v10801_v39, %s5204_s2  ;;  %v10805_v25 = vld [vmem:[#allocation100_spill] sm:$0xff] }
 0x5f8   :  { %3707 = vrot.lane.b32.xlu2 %v8298_v61, %s5204_s2 }
 0x5f9   :  { %v8304_v2 = vpop.permute.xlu1 %3501  ;;  %v8306_v1 = vpop.permute.xlu0 %3499 }
 0x5fa   :  { %10802 = vst [vmem:[#allocation272_spill] sm:$0xff] %v8304_v2  ;;  %v8308_v44 = vpop.permute.xlu2 %3641  ;;  %v10811_v2 = vld [vmem:[#allocation53_spill] sm:$0xff] }
 0x5fb   :  { %10803 = vst [vmem:[#allocation273_spill] sm:$0xff] %v8306_v1  ;;  %v10812_v1 = vld [vmem:[#allocation117_spill] sm:$0xff] }
 0x5fc   :  { %10804 = vst [vmem:[#allocation274_spill] sm:$0xff] %v8308_v44  ;;  %v10813_v44 = vrot.slane %v10812_v1, 1 }
 0x5ff   :  { %3711 = vrot.lane.b32.xlu1 %v10805_v25, %s5204_s2  ;;  %3709 = vrot.lane.b32.xlu0 %v10806_v26, %s5204_s2  ;;  %v8329_v25 = vsel %vm848_vm1, %v10814_v40, %v10813_v44  ;;  %v10816_v26 = vld [vmem:[#allocation28_spill] sm:$0xff] }
 0x600   :  { %3713 = vrot.lane.b32.xlu2 %v10807_v38, %s5204_s2  ;;  %10815 = vst [vmem:[#allocation117_spill] sm:$0xff] %v8329_v25  ;;  %v10822_v40 = vld [vmem:[#allocation84_spill] sm:$0xff] }
 0x601   :  { %v8316_v57 = vpop.permute.xlu1 %3507  ;;  %v8318_v39 = vpop.permute.xlu0 %3505 }
 0x602   :  { %10808 = vst [vmem:[#allocation44_spill] sm:$0xff] %v8316_v57  ;;  %v8320_v61 = vpop.permute.xlu2 %3647 }
 0x603   :  { %10809 = vst [vmem:[#allocation275_spill] sm:$0xff] %v8318_v39 }
 0x604   :  { %10810 = vst [vmem:[#allocation276_spill] sm:$0xff] %v8320_v61  ;;  %v10821_v61 = vld [vmem:[#allocation125_spill] sm:$0xff] }
 0x607   :  { %3717 = vrot.lane.b32.xlu1 %v10811_v2, %s5204_s2  ;;  %3715 = vrot.lane.b32.xlu0 %v10816_v26, %s5204_s2  ;;  %v10820_v2 = vld [vmem:[#allocation76_spill] sm:$0xff] }
 0x608   :  { %3719 = vrot.lane.b32.xlu2 %v8329_v25, %s5204_s2 }
 0x609   :  { %v8335_v57 = vpop.permute.xlu1 %3513  ;;  %v8337_v39 = vpop.permute.xlu0 %3511 }
 0x60a   :  { %10817 = vst [vmem:[#allocation277_spill] sm:$0xff] %v8335_v57  ;;  %v8339_v38 = vpop.permute.xlu2 %3653  ;;  %v10826_v57 = vld [vmem:[#allocation159_spill] sm:$0xff] }
 0x60b   :  { %10818 = vst [vmem:[#allocation278_spill] sm:$0xff] %v8337_v39  ;;  %v10828_v39 = vrot.slane %v7605_v11, 1 }
 0x60c   :  { %10819 = vst [vmem:[#allocation279_spill] sm:$0xff] %v8339_v38  ;;  %v10827_v38 = vrot.slane %v7634_v47, 1 }
 0x60f   :  { %3723 = vrot.lane.b32.xlu1 %v10820_v2, %s5204_s2  ;;  %3721 = vrot.lane.b32.xlu0 %v10821_v61, %s5204_s2  ;;  %v8360_v2 = vsel %vm848_vm1, %v10828_v39, %v10827_v38  ;;  %v10830_v61 = vld [vmem:[#allocation102_spill] sm:$0xff] }
 0x610   :  { %3725 = vrot.lane.b32.xlu2 %v10822_v40, %s5204_s2  ;;  %10829 = vst [vmem:[#allocation282_spill] sm:$0xff] %v8360_v2  ;;  %v10836_v39 = vld [vmem:[#allocation46_spill] sm:$0xff] }
 0x611   :  { %v8347_v44 = vpop.permute.xlu1 %3639  ;;  %v8349_v26 = vpop.permute.xlu0 %3637 }
 0x612   :  { %10823 = vst [vmem:[#allocation125_spill] sm:$0xff] %v8347_v44  ;;  %v8351_v25 = vpop.permute.xlu2 %3659  ;;  %v10835_v44 = vld [vmem:[#allocation105_spill] sm:$0xff] }
 0x613   :  { %10824 = vst [vmem:[#allocation280_spill] sm:$0xff] %v8349_v26 }
 0x614   :  { %10825 = vst [vmem:[#allocation281_spill] sm:$0xff] %v8351_v25 }
 0x617   :  { %3729 = vrot.lane.b32.xlu1 %v10826_v57, %s5204_s2  ;;  %3727 = vrot.lane.b32.xlu0 %v10830_v61, %s5204_s2  ;;  %v10834_v57 = vld [vmem:[#allocation45_spill] sm:$0xff] }
 0x618   :  { %3731 = vrot.lane.b32.xlu2 %v8360_v2, %s5204_s2 }
 0x619   :  { %v8366_v40 = vpop.permute.xlu1 %3645  ;;  %v8368_v26 = vpop.permute.xlu0 %3643 }
 0x61a   :  { %10831 = vst [vmem:[#allocation283_spill] sm:$0xff] %v8366_v40  ;;  %v8370_v25 = vpop.permute.xlu2 %3665  ;;  %v10842_v40 = vrot.slane %v10548_v34, 2 }
 0x61b   :  { %10832 = vst [vmem:[#allocation284_spill] sm:$0xff] %v8368_v26  ;;  %v10840_v26 = vld [vmem:[#allocation122_spill] sm:$0xff] }
 0x61c   :  { %10833 = vst [vmem:[#allocation285_spill] sm:$0xff] %v8370_v25  ;;  %v10841_v25 = vrot.slane %v10724_v24, 2 }
 0x61f   :  { %3847 = vrot.lane.b32.xlu1 %v10834_v57, %s5205_s12  ;;  %3845 = vrot.lane.b32.xlu0 %v10835_v44, %s5205_s12  ;;  %v8391_v57 = vsel %vm3124_vm4, %v10842_v40, %v10841_v25  ;;  %v10844_v44 = vld [vmem:[#allocation55_spill] sm:$0xff] }
 0x620   :  { %3849 = vrot.lane.b32.xlu2 %v10836_v39, %s5205_s12  ;;  %10843 = vst [vmem:[#allocation288_spill] sm:$0xff] %v8391_v57  ;;  %v10850_v25 = vld [vmem:[#allocation131_spill] sm:$0xff] }
 0x621   :  { %v8378_v38 = vpop.permute.xlu1 %3651  ;;  %v8380_v61 = vpop.permute.xlu0 %3649 }
 0x622   :  { %10837 = vst [vmem:[#allocation105_spill] sm:$0xff] %v8378_v38  ;;  %v8382_v2 = vpop.permute.xlu2 %3671  ;;  %v10849_v38 = vld [vmem:[#allocation128_spill] sm:$0xff] }
 0x623   :  { %10838 = vst [vmem:[#allocation286_spill] sm:$0xff] %v8380_v61 }
 0x624   :  { %10839 = vst [vmem:[#allocation287_spill] sm:$0xff] %v8382_v2 }
 0x627   :  { %3853 = vrot.lane.b32.xlu1 %v10840_v26, %s5205_s12  ;;  %3851 = vrot.lane.b32.xlu0 %v10844_v44, %s5205_s12  ;;  %v10848_v26 = vld [vmem:[#allocation113_spill] sm:$0xff] }
 0x628   :  { %3855 = vrot.lane.b32.xlu2 %v8391_v57, %s5205_s12 }
 0x629   :  { %v8397_v39 = vpop.permute.xlu1 %3657  ;;  %v8399_v61 = vpop.permute.xlu0 %3655 }
 0x62a   :  { %10845 = vst [vmem:[#allocation289_spill] sm:$0xff] %v8397_v39  ;;  %v8401_v2 = vpop.permute.xlu2 %3677  ;;  %v10854_v39 = vld [vmem:[#allocation144_spill] sm:$0xff] }
 0x62b   :  { %10846 = vst [vmem:[#allocation290_spill] sm:$0xff] %v8399_v61  ;;  %v10856_v61 = vrot.slane %v10576_v20, 2 }
 0x62c   :  { %10847 = vst [vmem:[#allocation291_spill] sm:$0xff] %v8401_v2  ;;  %v10855_v2 = vrot.slane %v10739_v6, 2 }
 0x62f   :  { %3859 = vrot.lane.b32.xlu1 %v10848_v26, %s5205_s12  ;;  %3857 = vrot.lane.b32.xlu0 %v10849_v38, %s5205_s12  ;;  %v8422_v26 = vsel %vm3124_vm4, %v10856_v61, %v10855_v2  ;;  %v10858_v38 = vld [vmem:[#allocation88_spill] sm:$0xff]  ;;  %v10864_v2 = vld [vmem:[#allocation73_spill] sm:$0xff] }
 0x630   :  { %3861 = vrot.lane.b32.xlu2 %v10850_v25, %s5205_s12  ;;  %10857 = vst [vmem:[#allocation294_spill] sm:$0xff] %v8422_v26 }
 0x631   :  { %v8409_v40 = vpop.permute.xlu1 %3663  ;;  %v8411_v44 = vpop.permute.xlu0 %3661 }
 0x632   :  { %10851 = vst [vmem:[#allocation128_spill] sm:$0xff] %v8409_v40  ;;  %v8413_v57 = vpop.permute.xlu2 %3683  ;;  %v10863_v40 = vld [vmem:[#allocation154_spill] sm:$0xff] }
 0x633   :  { %10852 = vst [vmem:[#allocation292_spill] sm:$0xff] %v8411_v44 }
 0x634   :  { %10853 = vst [vmem:[#allocation293_spill] sm:$0xff] %v8413_v57 }
 0x637   :  { %3865 = vrot.lane.b32.xlu1 %v10854_v39, %s5205_s12  ;;  %3863 = vrot.lane.b32.xlu0 %v10858_v38, %s5205_s12  ;;  %v10862_v39 = vld [vmem:[#allocation158_spill] sm:$0xff] }
 0x638   :  { %3867 = vrot.lane.b32.xlu2 %v8422_v26, %s5205_s12 }
 0x639   :  { %v8428_v25 = vpop.permute.xlu1 %3669  ;;  %v8430_v44 = vpop.permute.xlu0 %3667 }
 0x63a   :  { %10859 = vst [vmem:[#allocation295_spill] sm:$0xff] %v8428_v25  ;;  %v8432_v57 = vpop.permute.xlu2 %3689 }
 0x63b   :  { %10860 = vst [vmem:[#allocation296_spill] sm:$0xff] %v8430_v44  ;;  %v10869_v44 = vrot.slane %v10683_v35, 2 }
 0x63c   :  { %10861 = vst [vmem:[#allocation297_spill] sm:$0xff] %v8432_v57  ;;  %v10868_v57 = vrot.slane %v10754_v49, 2 }
 0x63f   :  { %3871 = vrot.lane.b32.xlu1 %v10862_v39, %s5205_s12  ;;  %3869 = vrot.lane.b32.xlu0 %v10863_v40, %s5205_s12  ;;  %v8453_v39 = vsel %vm3124_vm4, %v10869_v44, %v10868_v57  ;;  %v10874_v57 = vld [vmem:[#allocation16_spill] sm:$0xff] }
 0x640   :  { %3873 = vrot.lane.b32.xlu2 %v10864_v2, %s5205_s12  ;;  %10870 = vst [vmem:[#allocation300_spill] sm:$0xff] %v8453_v39 }
 0x641   :  { %v8440_v61 = vpop.permute.xlu1 %3675  ;;  %v8442_v38 = vpop.permute.xlu0 %3673 }
 0x642   :  { %10865 = vst [vmem:[#allocation154_spill] sm:$0xff] %v8440_v61  ;;  %v8444_v26 = vpop.permute.xlu2 %3695 }
 0x643   :  { %10866 = vst [vmem:[#allocation298_spill] sm:$0xff] %v8442_v38 }
 0x644   :  { %10867 = vst [vmem:[#allocation299_spill] sm:$0xff] %v8444_v26 }
 0x647   :  { %3877 = vrot.lane.b32.xlu1 %v7652_v52, %s5205_s12  ;;  %3875 = vrot.lane.b32.xlu0 %v7671_v4, %s5205_s12 }
 0x648   :  { %3879 = vrot.lane.b32.xlu2 %v8453_v39, %s5205_s12 }
 0x649   :  { %v8459_v40 = vpop.permute.xlu1 %3681  ;;  %v8461_v2 = vpop.permute.xlu0 %3679 }
 0x64a   :  { %10871 = vst [vmem:[#allocation301_spill] sm:$0xff] %v8459_v40  ;;  %v8463_v26 = vpop.permute.xlu2 %3701  ;;  %v10878_v40 = vld [vmem:[#allocation39_spill] sm:$0xff] }
 0x64b   :  { %10872 = vst [vmem:[#allocation302_spill] sm:$0xff] %v8461_v2  ;;  %v10880_v2 = vrot.slane %v7207_v15, 2 }
 0x64c   :  { %10873 = vst [vmem:[#allocation303_spill] sm:$0xff] %v8463_v26  ;;  %v10879_v26 = vrot.slane %v10769_v17, 2 }
 0x64f   :  { %3883 = vrot.lane.b32.xlu1 %v7710_v10, %s5205_s12  ;;  %3881 = vrot.lane.b32.xlu0 %v7704_v33, %s5205_s12  ;;  %v8484_v10 = vsel %vm3124_vm4, %v10880_v2, %v10879_v26  ;;  %v10882_v33 = vld [vmem:[#allocation54_spill] sm:$0xff]  ;;  %v10887_v26 = vld [vmem:[#allocation153_spill] sm:$0xff] }
 0x650   :  { %3885 = vrot.lane.b32.xlu2 %v10874_v57, %s5205_s12  ;;  %10881 = vst [vmem:[#allocation307_spill] sm:$0xff] %v8484_v10 }
 0x651   :  { %v8471_v44 = vpop.permute.xlu1 %3687  ;;  %v8473_v52 = vpop.permute.xlu0 %3685 }
 0x652   :  { %10875 = vst [vmem:[#allocation304_spill] sm:$0xff] %v8471_v44  ;;  %v8475_v39 = vpop.permute.xlu2 %3707 }
 0x653   :  { %10876 = vst [vmem:[#allocation305_spill] sm:$0xff] %v8473_v52 }
 0x654   :  { %10877 = vst [vmem:[#allocation306_spill] sm:$0xff] %v8475_v39 }
 0x657   :  { %3889 = vrot.lane.b32.xlu1 %v10878_v40, %s5205_s12  ;;  %3887 = vrot.lane.b32.xlu0 %v10882_v33, %s5205_s12  ;;  %v10886_v40 = vld [vmem:[#allocation99_spill] sm:$0xff] }
 0x658   :  { %3891 = vrot.lane.b32.xlu2 %v8484_v10, %s5205_s12 }
 0x659   :  { %v8490_v57 = vpop.permute.xlu1 %3693  ;;  %v8492_v52 = vpop.permute.xlu0 %3691 }
 0x65a   :  { %10883 = vst [vmem:[#allocation308_spill] sm:$0xff] %v8490_v57  ;;  %v8494_v39 = vpop.permute.xlu2 %3713  ;;  %v10920_v57 = vrot.slane %v7605_v11, 2 }
 0x65b   :  { %10884 = vst [vmem:[#allocation309_spill] sm:$0xff] %v8492_v52  ;;  %v10892_v52 = vrot.slane %v7161_v5, 2 }
 0x65c   :  { %10885 = vst [vmem:[#allocation310_spill] sm:$0xff] %v8494_v39  ;;  %v10891_v39 = vrot.slane %v10782_v32, 2 }
 0x65f   :  { %3895 = vrot.lane.b32.xlu1 %v7758_v43, %s5205_s12  ;;  %3893 = vrot.lane.b32.xlu0 %v10886_v40, %s5205_s12  ;;  %v8515_v43 = vsel %vm3124_vm4, %v10892_v52, %v10891_v39  ;;  %v10894_v40 = vld [vmem:[#allocation156_spill] sm:$0xff]  ;;  %v10900_v52 = vld [vmem:[#allocation171_spill] sm:$0xff] }
 0x660   :  { %3897 = vrot.lane.b32.xlu2 %v10887_v26, %s5205_s12  ;;  %10893 = vst [vmem:[#allocation313_spill] sm:$0xff] %v8515_v43 }
 0x661   :  { %v8502_v2 = vpop.permute.xlu1 %3699  ;;  %v8504_v33 = vpop.permute.xlu0 %3697 }
 0x662   :  { %10888 = vst [vmem:[#allocation99_spill] sm:$0xff] %v8502_v2  ;;  %v8506_v10 = vpop.permute.xlu2 %3719  ;;  %v10899_v2 = vld [vmem:[#allocation167_spill] sm:$0xff] }
 0x663   :  { %10889 = vst [vmem:[#allocation311_spill] sm:$0xff] %v8504_v33 }
 0x664   :  { %10890 = vst [vmem:[#allocation312_spill] sm:$0xff] %v8506_v10 }
 0x667   :  { %3901 = vrot.lane.b32.xlu1 %v7782_v55, %s5205_s12  ;;  %3899 = vrot.lane.b32.xlu0 %v10894_v40, %s5205_s12  ;;  %v10898_v55 = vld [vmem:[#allocation169_spill] sm:$0xff] }
 0x668   :  { %3903 = vrot.lane.b32.xlu2 %v8515_v43, %s5205_s12 }
 0x669   :  { %v8521_v26 = vpop.permute.xlu1 %3705  ;;  %v8523_v33 = vpop.permute.xlu0 %3703 }
 0x66a   :  { %10895 = vst [vmem:[#allocation314_spill] sm:$0xff] %v8521_v26  ;;  %v8525_v10 = vpop.permute.xlu2 %3725  ;;  %v10910_v26 = vld [vmem:[#allocation177_spill] sm:$0xff] }
 0x66b   :  { %10896 = vst [vmem:[#allocation315_spill] sm:$0xff] %v8523_v33  ;;  %v10904_v33 = vrot.slane %v7292_v63, 2 }
 0x66c   :  { %10897 = vst [vmem:[#allocation316_spill] sm:$0xff] %v8525_v10  ;;  %v10903_v10 = vrot.slane %v10797_v23, 2 }
 0x66f   :  { %3907 = vrot.lane.b32.xlu1 %v10898_v55, %s5205_s12  ;;  %3905 = vrot.lane.b32.xlu0 %v10899_v2, %s5205_s12  ;;  %v8546_v55 = vsel %vm3124_vm4, %v10904_v33, %v10903_v10  ;;  %v10906_v2 = vld [vmem:[#allocation172_spill] sm:$0xff]  ;;  %v10911_v10 = vld [vmem:[#allocation182_spill] sm:$0xff] }
 0x670   :  { %3909 = vrot.lane.b32.xlu2 %v10900_v52, %s5205_s12  ;;  %10905 = vst [vmem:[#allocation318_spill] sm:$0xff] %v8546_v55 }
 0x671   :  { %v8533_v39 = vpop.permute.xlu1 %3711  ;;  %v8535_v40 = vpop.permute.xlu0 %3709 }
 0x672   :  { %10901 = vst [vmem:[#allocation167_spill] sm:$0xff] %v8533_v39  ;;  %v8537_v43 = vpop.permute.xlu2 %3731 }
 0x673   :  { %10902 = vst [vmem:[#allocation317_spill] sm:$0xff] %v8535_v40 }
 0x677   :  { %3913 = vrot.lane.b32.xlu1 %v7828_v36, %s5205_s12  ;;  %3911 = vrot.lane.b32.xlu0 %v10906_v2, %s5205_s12  ;;  %v10909_v36 = vld [vmem:[#allocation178_spill] sm:$0xff] }
 0x678   :  { %3915 = vrot.lane.b32.xlu2 %v8546_v55, %s5205_s12 }
 0x679   :  { %v8552_v52 = vpop.permute.xlu1 %3717  ;;  %v8554_v40 = vpop.permute.xlu0 %3715 }
 0x67a   :  { %10907 = vst [vmem:[#allocation319_spill] sm:$0xff] %v8552_v52  ;;  %v8556_v39 = vpop.permute.xlu2 %3849  ;;  %v10915_v52 = vrot.slane %v7391_v59, 2 }
 0x67b   :  { %10908 = vst [vmem:[#allocation320_spill] sm:$0xff] %v8554_v40  ;;  %v10914_v40 = vrot.slane %v10812_v1, 2 }
 0x67f   :  { %3919 = vrot.lane.b32.xlu1 %v10909_v36, %s5205_s12  ;;  %3917 = vrot.lane.b32.xlu0 %v10910_v26, %s5205_s12  ;;  %v8577_v36 = vsel %vm3124_vm4, %v10915_v52, %v10914_v40  ;;  %v10917_v26 = vld [vmem:[#allocation183_spill] sm:$0xff] }
 0x680   :  { %3921 = vrot.lane.b32.xlu2 %v10911_v10, %s5205_s12  ;;  %10916 = vst [vmem:[#allocation322_spill] sm:$0xff] %v8577_v36 }
 0x681   :  { %v8564_v33 = vpop.permute.xlu1 %3723  ;;  %v8566_v2 = vpop.permute.xlu0 %3721 }
 0x682   :  { %10912 = vst [vmem:[#allocation177_spill] sm:$0xff] %v8564_v33  ;;  %v8568_v55 = vpop.permute.xlu2 %3855 }
 0x683   :  { %10913 = vst [vmem:[#allocation321_spill] sm:$0xff] %v8566_v2 }
 0x687   :  { %3925 = vrot.lane.b32.xlu1 %v7874_v18, %s5205_s12  ;;  %3923 = vrot.lane.b32.xlu0 %v10917_v26, %s5205_s12  ;;  %v10918_v18 = vld [vmem:[#allocation188_spill] sm:$0xff]  ;;  %v10919_v26 = vrot.slane %v7634_v47, 2 }
 0x688   :  { %3927 = vrot.lane.b32.xlu2 %v8577_v36, %s5205_s12 }
 0x689   :  { %v8583_v10 = vpop.permute.xlu1 %3729  ;;  %v8585_v2 = vpop.permute.xlu0 %3727 }
 0x68a   :  { %v8587_v33 = vpop.permute.xlu2 %3861 }
 0x68f   :  { %3931 = vrot.lane.b32.xlu1 %v7896_v14, %s5205_s12  ;;  %3929 = vrot.lane.b32.xlu0 %v10918_v18, %s5205_s12  ;;  %v8608_v14 = vsel %vm3124_vm4, %v10920_v57, %v10919_v26 }
 0x690   :  { %3933 = vrot.lane.b32.xlu2 %v7910_v19, %s5205_s12  ;;  %10921 = vst [vmem:[#allocation188_spill] sm:$0xff] %v8608_v14 }
 0x691   :  { %v8595_v40 = vpop.permute.xlu1 %3847  ;;  %v8597_v52 = vpop.permute.xlu0 %3845 }
 0x692   :  { %v8599_v36 = vpop.permute.xlu2 %3867 }
 0x697   :  { %3937 = vrot.lane.b32.xlu1 %v7922_v28, %s5205_s12  ;;  %3935 = vrot.lane.b32.xlu0 %v7913_v54, %s5205_s12 }
 0x698   :  { %3939 = vrot.lane.b32.xlu2 %v8608_v14, %s5205_s12 }
 0x699   :  { %v8614_v18 = vpop.permute.xlu1 %3853  ;;  %v8616_v19 = vpop.permute.xlu0 %3851 }
 0x69a   :  { %v8618_v44 = vpop.permute.xlu2 %3873 }
 0x69f   :  { %4039 = vrot.lane.b32.xlu1 %v10538_v48, %s5206_s17  ;;  %4037 = vrot.lane.b32.xlu0 %v10531_v51, %s5206_s17 }
 0x6a0   :  { %4041 = vrot.lane.b32.xlu2 %v10535_v31, %s5206_s17 }
 0x6a1   :  { %v8626_v57 = vpop.permute.xlu1 %3859  ;;  %v8628_v26 = vpop.permute.xlu0 %3857 }
 0x6a2   :  { %v8630_v28 = vpop.permute.xlu2 %3879 }
 0x6a7   :  { %4045 = vrot.lane.b32.xlu1 %v10548_v34, %s5206_s17  ;;  %4043 = vrot.lane.b32.xlu0 %v10542_v8, %s5206_s17 }
 0x6a8   :  { %4047 = vrot.lane.b32.xlu2 %v10724_v24, %s5206_s17 }
 0x6a9   :  { %v8638_v14 = vpop.permute.xlu1 %3865  ;;  %v8640_v54 = vpop.permute.xlu0 %3863 }
 0x6aa   :  { %v8642_v4 = vpop.permute.xlu2 %3885 }
 0x6ab   :  { %10922 = vst [vmem:[#allocation323_spill] sm:$0xff] %v8642_v4 }
 0x6af   :  { %4051 = vrot.lane.b32.xlu1 %v6548_v46, %s5206_s17  ;;  %4049 = vrot.lane.b32.xlu0 %v6527_v12, %s5206_s17 }
 0x6b0   :  { %4053 = vrot.lane.b32.xlu2 %v10567_v60, %s5206_s17 }
 0x6b1   :  { %v8650_v34 = vpop.permute.xlu1 %3871  ;;  %v8652_v38 = vpop.permute.xlu0 %3869 }
 0x6b2   :  { %10923 = vst [vmem:[#allocation324_spill] sm:$0xff] %v8650_v34  ;;  %v8654_v24 = vpop.permute.xlu2 %3891  ;;  %v10929_v34 = vld [vmem:[#allocation14_spill] sm:$0xff] }
 0x6b3   :  { %10924 = vst [vmem:[#allocation325_spill] sm:$0xff] %v8652_v38 }
 0x6b4   :  { %10925 = vst [vmem:[#allocation326_spill] sm:$0xff] %v8654_v24  ;;  %v10930_v24 = vld [vmem:[#allocation139_spill] sm:$0xff] }
 0x6b7   :  { %4057 = vrot.lane.b32.xlu1 %v10576_v20, %s5206_s17  ;;  %4055 = vrot.lane.b32.xlu0 %v10575_v13, %s5206_s17 }
 0x6b8   :  { %4059 = vrot.lane.b32.xlu2 %v10739_v6, %s5206_s17 }
 0x6b9   :  { %v8662_v61 = vpop.permute.xlu1 %3877  ;;  %v8664_v25 = vpop.permute.xlu0 %3875 }
 0x6ba   :  { %10926 = vst [vmem:[#allocation327_spill] sm:$0xff] %v8662_v61  ;;  %v8666_v4 = vpop.permute.xlu2 %3897 }
 0x6bb   :  { %10927 = vst [vmem:[#allocation328_spill] sm:$0xff] %v8664_v25 }
 0x6bc   :  { %10928 = vst [vmem:[#allocation329_spill] sm:$0xff] %v8666_v4 }
 0x6bf   :  { %4063 = vrot.lane.b32.xlu1 %v10929_v34, %s5206_s17  ;;  %4061 = vrot.lane.b32.xlu0 %v10930_v24, %s5206_s17 }
 0x6c0   :  { %4065 = vrot.lane.b32.xlu2 %v10681_v0, %s5206_s17 }
 0x6c1   :  { %v8674_v20 = vpop.permute.xlu1 %3883  ;;  %v8676_v38 = vpop.permute.xlu0 %3881 }
 0x6c2   :  { %10931 = vst [vmem:[#allocation14_spill] sm:$0xff] %v8674_v20  ;;  %v8678_v6 = vpop.permute.xlu2 %3903  ;;  %v10971_v20 = vld [vmem:[#allocation80_spill] sm:$0xff] }
 0x6c3   :  { %10932 = vst [vmem:[#allocation139_spill] sm:$0xff] %v8676_v38  ;;  %v10970_v38 = vld [vmem:[#allocation160_spill] sm:$0xff] }
 0x6c4   :  { %10933 = vst [vmem:[#allocation330_spill] sm:$0xff] %v8678_v6 }
 0x6c7   :  { %4069 = vrot.lane.b32.xlu1 %v10683_v35, %s5206_s17  ;;  %4067 = vrot.lane.b32.xlu0 %v10682_v9, %s5206_s17 }
 0x6c8   :  { %4071 = vrot.lane.b32.xlu2 %v10754_v49, %s5206_s17 }
 0x6c9   :  { %v8686_v4 = vpop.permute.xlu1 %3889  ;;  %v8688_v25 = vpop.permute.xlu0 %3887 }
 0x6ca   :  { %10934 = vst [vmem:[#allocation331_spill] sm:$0xff] %v8686_v4  ;;  %v8690_v61 = vpop.permute.xlu2 %3909 }
 0x6cb   :  { %10935 = vst [vmem:[#allocation332_spill] sm:$0xff] %v8688_v25 }
 0x6cc   :  { %10936 = vst [vmem:[#allocation333_spill] sm:$0xff] %v8690_v61 }
 0x6cf   :  { %4075 = vrot.lane.b32.xlu1 %v7168_v30, %s5206_s17  ;;  %4073 = vrot.lane.b32.xlu0 %v7149_v29, %s5206_s17  ;;  %v10976_v30 = vld [vmem:[#allocation20_spill] sm:$0xff] }
 0x6d0   :  { %4077 = vrot.lane.b32.xlu2 %v7181_v3, %s5206_s17 }
 0x6d1   :  { %v8698_v35 = vpop.permute.xlu1 %3895  ;;  %v8700_v6 = vpop.permute.xlu0 %3893 }
 0x6d2   :  { %10937 = vst [vmem:[#allocation334_spill] sm:$0xff] %v8698_v35  ;;  %v8702_v49 = vpop.permute.xlu2 %3915  ;;  %v10962_v35 = vld [vmem:[#allocation75_spill] sm:$0xff] }
 0x6d3   :  { %10938 = vst [vmem:[#allocation335_spill] sm:$0xff] %v8700_v6  ;;  %v10961_v6 = vld [vmem:[#allocation115_spill] sm:$0xff] }
 0x6d4   :  { %10939 = vst [vmem:[#allocation336_spill] sm:$0xff] %v8702_v49 }
 0x6d7   :  { %4081 = vrot.lane.b32.xlu1 %v7207_v15, %s5206_s17  ;;  %4079 = vrot.lane.b32.xlu0 %v7190_v22, %s5206_s17 }
 0x6d8   :  { %4083 = vrot.lane.b32.xlu2 %v10769_v17, %s5206_s17 }
 0x6d9   :  { %v8710_v61 = vpop.permute.xlu1 %3901  ;;  %v8712_v25 = vpop.permute.xlu0 %3899 }
 0x6da   :  { %10940 = vst [vmem:[#allocation337_spill] sm:$0xff] %v8710_v61  ;;  %v8714_v4 = vpop.permute.xlu2 %3921 }
 0x6db   :  { %10941 = vst [vmem:[#allocation338_spill] sm:$0xff] %v8712_v25 }
 0x6dc   :  { %10942 = vst [vmem:[#allocation339_spill] sm:$0xff] %v8714_v4 }
 0x6df   :  { %4087 = vrot.lane.b32.xlu1 %v7643_v7, %s5206_s17  ;;  %4085 = vrot.lane.b32.xlu0 %v7609_v50, %s5206_s17 }
 0x6e0   :  { %4089 = vrot.lane.b32.xlu2 %v7135_v58, %s5206_s17  ;;  %v10964_v58 = vld [vmem:[#allocation85_spill] sm:$0xff] }
 0x6e1   :  { %v8722_v15 = vpop.permute.xlu1 %3907  ;;  %v8724_v49 = vpop.permute.xlu0 %3905 }
 0x6e2   :  { %10943 = vst [vmem:[#allocation340_spill] sm:$0xff] %v8722_v15  ;;  %v8726_v17 = vpop.permute.xlu2 %3927 }
 0x6e3   :  { %10944 = vst [vmem:[#allocation341_spill] sm:$0xff] %v8724_v49 }
 0x6e4   :  { %10945 = vst [vmem:[#allocation342_spill] sm:$0xff] %v8726_v17 }
 0x6e7   :  { %4093 = vrot.lane.b32.xlu1 %v7161_v5, %s5206_s17  ;;  %4091 = vrot.lane.b32.xlu0 %v7145_v53, %s5206_s17  ;;  %v10977_v53 = vld [vmem:[#allocation11_spill] sm:$0xff] }
 0x6e8   :  { %4095 = vrot.lane.b32.xlu2 %v10782_v32, %s5206_s17 }
 0x6e9   :  { %v8734_v4 = vpop.permute.xlu1 %3913  ;;  %v8736_v25 = vpop.permute.xlu0 %3911 }
 0x6ea   :  { %10946 = vst [vmem:[#allocation343_spill] sm:$0xff] %v8734_v4  ;;  %v8738_v61 = vpop.permute.xlu2 %3933 }
 0x6eb   :  { %10947 = vst [vmem:[#allocation344_spill] sm:$0xff] %v8736_v25 }
 0x6ec   :  { %10948 = vst [vmem:[#allocation345_spill] sm:$0xff] %v8738_v61 }
 0x6ef   :  { %4099 = vrot.lane.b32.xlu1 %v7256_v56, %s5206_s17  ;;  %4097 = vrot.lane.b32.xlu0 %v7242_v21, %s5206_s17  ;;  %v10959_v56 = vld [vmem:[#allocation79_spill] sm:$0xff] }
 0x6f0   :  { %4101 = vrot.lane.b32.xlu2 %v7267_v42, %s5206_s17  ;;  %v10958_v42 = vld [vmem:[#allocation83_spill] sm:$0xff] }
 0x6f1   :  { %v8746_v5 = vpop.permute.xlu1 %3919  ;;  %v8748_v17 = vpop.permute.xlu0 %3917 }
 0x6f2   :  { %10949 = vst [vmem:[#allocation346_spill] sm:$0xff] %v8746_v5  ;;  %v8750_v32 = vpop.permute.xlu2 %3939 }
 0x6f3   :  { %10950 = vst [vmem:[#allocation347_spill] sm:$0xff] %v8748_v17 }
 0x6f7   :  { %4105 = vrot.lane.b32.xlu1 %v7292_v63, %s5206_s17  ;;  %4103 = vrot.lane.b32.xlu0 %v7281_v45, %s5206_s17  ;;  %v10965_v45 = vld [vmem:[#allocation132_spill] sm:$0xff] }
 0x6f8   :  { %4107 = vrot.lane.b32.xlu2 %v10797_v23, %s5206_s17 }
 0x6f9   :  { %v8758_v61 = vpop.permute.xlu1 %3925  ;;  %v8760_v25 = vpop.permute.xlu0 %3923 }
 0x6fa   :  { %10951 = vst [vmem:[#allocation348_spill] sm:$0xff] %v8758_v61  ;;  %v8762_v4 = vpop.permute.xlu2 %4041 }
 0x6fb   :  { %10952 = vst [vmem:[#allocation349_spill] sm:$0xff] %v8760_v25 }
 0x6ff   :  { %4111 = vrot.lane.b32.xlu1 %v7356_v62, %s5206_s17  ;;  %4109 = vrot.lane.b32.xlu0 %v7344_v16, %s5206_s17  ;;  %v10957_v62 = vld [vmem:[#allocation155_spill] sm:$0xff] }
 0x700   :  { %4113 = vrot.lane.b32.xlu2 %v7369_v37, %s5206_s17 }
 0x701   :  { %v8770_v63 = vpop.permute.xlu1 %3931  ;;  %v8772_v17 = vpop.permute.xlu0 %3929 }
 0x702   :  { %10953 = vst [vmem:[#allocation350_spill] sm:$0xff] %v8770_v63  ;;  %v8774_v23 = vpop.permute.xlu2 %4047 }
 0x703   :  { %10954 = vst [vmem:[#allocation351_spill] sm:$0xff] %v8772_v17  ;;  %v10955_v17 = vld [vmem:[#allocation123_spill] sm:$0xff] }
 0x707   :  { %4117 = vrot.lane.b32.xlu1 %v7391_v59, %s5206_s17  ;;  %4115 = vrot.lane.b32.xlu0 %v7378_v27, %s5206_s17  ;;  %v10956_v59 = vld [vmem:[#allocation149_spill] sm:$0xff] }
 0x708   :  { %4119 = vrot.lane.b32.xlu2 %v10812_v1, %s5206_s17 }
 0x709   :  { %v8782_v25 = vpop.permute.xlu1 %3937  ;;  %v8784_v61 = vpop.permute.xlu0 %3935 }
 0x70a   :  { %v8786_v5 = vpop.permute.xlu2 %4053 }
 0x70f   :  { %4123 = vrot.lane.b32.xlu1 %v7523_v41, %s5206_s17  ;;  %4121 = vrot.lane.b32.xlu0 %v10955_v17, %s5206_s17 }
 0x710   :  { %4125 = vrot.lane.b32.xlu2 %v10956_v59, %s5206_s17 }
 0x711   :  { %v8794_v63 = vpop.permute.xlu1 %4039  ;;  %v8796_v37 = vpop.permute.xlu0 %4037 }
 0x712   :  { %v8798_v1 = vpop.permute.xlu2 %4059 }
 0x717   :  { %4129 = vrot.lane.b32.xlu1 %v7605_v11, %s5206_s17  ;;  %4127 = vrot.lane.b32.xlu0 %v10957_v62, %s5206_s17  ;;  %v10960_v11 = vld [vmem:[#allocation143_spill] sm:$0xff] }
 0x718   :  { %4131 = vrot.lane.b32.xlu2 %v7634_v47, %s5206_s17 }
 0x719   :  { %v8806_v49 = vpop.permute.xlu1 %4045  ;;  %v8808_v17 = vpop.permute.xlu0 %4043 }
 0x71a   :  { %v8810_v15 = vpop.permute.xlu2 %4065 }
 0x71f   :  { %4255 = vrot.lane.b32.xlu1 %v10958_v42, %s5207_s18  ;;  %4253 = vrot.lane.b32.xlu0 %v10959_v56, %s5207_s18  ;;  %v10963_v42 = vld [vmem:[#allocation119_spill] sm:$0xff] }
 0x720   :  { %4257 = vrot.lane.b32.xlu2 %v10960_v11, %s5207_s18 }
 0x721   :  { %v8818_v27 = vpop.permute.xlu1 %4051  ;;  %v8820_v16 = vpop.permute.xlu0 %4049 }
 0x722   :  { %v8822_v47 = vpop.permute.xlu2 %4071 }
 0x727   :  { %4261 = vrot.lane.b32.xlu1 %v10961_v6, %s5207_s18  ;;  %4259 = vrot.lane.b32.xlu0 %v10962_v35, %s5207_s18  ;;  %v10966_v6 = vld [vmem:[#allocation138_spill] sm:$0xff] }
 0x728   :  { %4263 = vrot.lane.b32.xlu2 %v10963_v42, %s5207_s18 }
 0x729   :  { %v8830_v7 = vpop.permute.xlu1 %4057  ;;  %v8832_v56 = vpop.permute.xlu0 %4055 }
 0x72a   :  { %v8834_v11 = vpop.permute.xlu2 %4077 }
 0x72f   :  { %4267 = vrot.lane.b32.xlu1 %v10964_v58, %s5207_s18  ;;  %4265 = vrot.lane.b32.xlu0 %v10965_v45, %s5207_s18  ;;  %v10972_v58 = vld [vmem:[#allocation162_spill] sm:$0xff] }
 0x730   :  { %4269 = vrot.lane.b32.xlu2 %v10966_v6, %s5207_s18 }
 0x731   :  { %v8842_v21 = vpop.permute.xlu1 %4063  ;;  %v8844_v35 = vpop.permute.xlu0 %4061 }
 0x732   :  { %10967 = vst [vmem:[#allocation149_spill] sm:$0xff] %v8842_v21  ;;  %v8846_v42 = vpop.permute.xlu2 %4083  ;;  %v11014_v21 = vld [vmem:[#allocation271_spill] sm:$0xff] }
 0x733   :  { %10968 = vst [vmem:[#allocation155_spill] sm:$0xff] %v8844_v35 }
 0x734   :  { %10969 = vst [vmem:[#allocation83_spill] sm:$0xff] %v8846_v42 }
 0x737   :  { %4273 = vrot.lane.b32.xlu1 %v10970_v38, %s5207_s18  ;;  %4271 = vrot.lane.b32.xlu0 %v10971_v20, %s5207_s18  ;;  %v10978_v38 = vld [vmem:[#allocation89_spill] sm:$0xff] }
 0x738   :  { %4275 = vrot.lane.b32.xlu2 %v10972_v58, %s5207_s18 }
 0x739   :  { %v8854_v3 = vpop.permute.xlu1 %4069  ;;  %v8856_v45 = vpop.permute.xlu0 %4067 }
 0x73a   :  { %10973 = vst [vmem:[#allocation79_spill] sm:$0xff] %v8854_v3  ;;  %v8858_v6 = vpop.permute.xlu2 %4089  ;;  %v10982_v3 = vld [vmem:[#allocation116_spill] sm:$0xff] }
 0x73b   :  { %10974 = vst [vmem:[#allocation143_spill] sm:$0xff] %v8856_v45 }
 0x73c   :  { %10975 = vst [vmem:[#allocation115_spill] sm:$0xff] %v8858_v6  ;;  %v10983_v6 = vld [vmem:[#allocation114_spill] sm:$0xff] }
 0x73f   :  { %4279 = vrot.lane.b32.xlu1 %v10976_v30, %s5207_s18  ;;  %4277 = vrot.lane.b32.xlu0 %v10977_v53, %s5207_s18  ;;  %v10984_v30 = vld [vmem:[#allocation18_spill] sm:$0xff] }
 0x740   :  { %4281 = vrot.lane.b32.xlu2 %v10978_v38, %s5207_s18 }
 0x741   :  { %v8866_v42 = vpop.permute.xlu1 %4075  ;;  %v8868_v20 = vpop.permute.xlu0 %4073 }
 0x742   :  { %10979 = vst [vmem:[#allocation75_spill] sm:$0xff] %v8866_v42  ;;  %v8870_v58 = vpop.permute.xlu2 %4095  ;;  %v10988_v42 = vld [vmem:[#allocation30_spill] sm:$0xff] }
 0x743   :  { %10980 = vst [vmem:[#allocation119_spill] sm:$0xff] %v8868_v20 }
 0x744   :  { %10981 = vst [vmem:[#allocation85_spill] sm:$0xff] %v8870_v58  ;;  %v10989_v58 = vld [vmem:[#allocation48_spill] sm:$0xff] }
 0x747   :  { %4285 = vrot.lane.b32.xlu1 %v10982_v3, %s5207_s18  ;;  %4283 = vrot.lane.b32.xlu0 %v10983_v6, %s5207_s18  ;;  %v10990_v3 = vld [vmem:[#allocation9_spill] sm:$0xff] }
 0x748   :  { %4287 = vrot.lane.b32.xlu2 %v10984_v30, %s5207_s18 }
 0x749   :  { %v8878_v45 = vpop.permute.xlu1 %4081  ;;  %v8880_v53 = vpop.permute.xlu0 %4079 }
 0x74a   :  { %10985 = vst [vmem:[#allocation132_spill] sm:$0xff] %v8878_v45  ;;  %v8882_v38 = vpop.permute.xlu2 %4101  ;;  %v10994_v45 = vld [vmem:[#allocation31_spill] sm:$0xff] }
 0x74b   :  { %10986 = vst [vmem:[#allocation138_spill] sm:$0xff] %v8880_v53 }
 0x74c   :  { %10987 = vst [vmem:[#allocation160_spill] sm:$0xff] %v8882_v38  ;;  %v10995_v38 = vld [vmem:[#allocation17_spill] sm:$0xff] }
 0x74f   :  { %4291 = vrot.lane.b32.xlu1 %v10988_v42, %s5207_s18  ;;  %4289 = vrot.lane.b32.xlu0 %v10989_v58, %s5207_s18  ;;  %v10996_v42 = vld [vmem:[#allocation34_spill] sm:$0xff] }
 0x750   :  { %4293 = vrot.lane.b32.xlu2 %v10990_v3, %s5207_s18 }
 0x751   :  { %v8890_v20 = vpop.permute.xlu1 %4087  ;;  %v8892_v6 = vpop.permute.xlu0 %4085 }
 0x752   :  { %10991 = vst [vmem:[#allocation80_spill] sm:$0xff] %v8890_v20  ;;  %v8894_v30 = vpop.permute.xlu2 %4107  ;;  %v11000_v20 = vld [vmem:[#allocation3_spill] sm:$0xff] }
 0x753   :  { %10992 = vst [vmem:[#allocation162_spill] sm:$0xff] %v8892_v6 }
 0x754   :  { %10993 = vst [vmem:[#allocation20_spill] sm:$0xff] %v8894_v30  ;;  %v11001_v30 = vld [vmem:[#allocation8_spill] sm:$0xff] }
 0x757   :  { %4297 = vrot.lane.b32.xlu1 %v10994_v45, %s5207_s18  ;;  %4295 = vrot.lane.b32.xlu0 %v10995_v38, %s5207_s18  ;;  %v11002_v45 = vld [vmem:[#allocation127_spill] sm:$0xff] }
 0x758   :  { %4299 = vrot.lane.b32.xlu2 %v10996_v42, %s5207_s18 }
 0x759   :  { %v8902_v53 = vpop.permute.xlu1 %4093  ;;  %v8904_v58 = vpop.permute.xlu0 %4091 }
 0x75a   :  { %10997 = vst [vmem:[#allocation11_spill] sm:$0xff] %v8902_v53  ;;  %v8906_v3 = vpop.permute.xlu2 %4113  ;;  %v11006_v53 = vld [vmem:[#allocation24_spill] sm:$0xff] }
 0x75b   :  { %10998 = vst [vmem:[#allocation89_spill] sm:$0xff] %v8904_v58 }
 0x75c   :  { %10999 = vst [vmem:[#allocation116_spill] sm:$0xff] %v8906_v3  ;;  %v11007_v3 = vld [vmem:[#allocation64_spill] sm:$0xff] }
 0x75f   :  { %4303 = vrot.lane.b32.xlu1 %v11000_v20, %s5207_s18  ;;  %4301 = vrot.lane.b32.xlu0 %v11001_v30, %s5207_s18  ;;  %v11008_v20 = vld [vmem:[#allocation72_spill] sm:$0xff] }
 0x760   :  { %4305 = vrot.lane.b32.xlu2 %v11002_v45, %s5207_s18  ;;  %v11009_v30 = vld [vmem:[#allocation192_spill] sm:$0xff] }
 0x761   :  { %v8914_v6 = vpop.permute.xlu1 %4099  ;;  %v8916_v38 = vpop.permute.xlu0 %4097  ;;  %v3123_v58 = vadd.f32 %v11009_v30, %v10957_v62  ;;  %v11017_v62 = vld [vmem:[#allocation81_spill] sm:$0xff] }
 0x762   :  { %11003 = vst [vmem:[#allocation114_spill] sm:$0xff] %v8914_v6  ;;  %v8918_v42 = vpop.permute.xlu2 %4119  ;;  %v11018_v30 = vld [vmem:[#allocation141_spill] sm:$0xff] }
 0x763   :  { %11004 = vst [vmem:[#allocation18_spill] sm:$0xff] %v8916_v38  ;;  %v11013_v38 = vld [vmem:[#allocation229_spill] sm:$0xff] }
 0x764   :  { %11005 = vst [vmem:[#allocation30_spill] sm:$0xff] %v8918_v42  ;;  %v3420_v42 = vadd.f32 %v11013_v38, %v3123_v58 }
 0x766   :  { %v3612_v50 = vadd.f32 %v11014_v21, %v3420_v42  ;;  %v11021_v42 = vld [vmem:[#allocation232_spill] sm:$0xff] }
 0x767   :  { %4309 = vrot.lane.b32.xlu1 %v11006_v53, %s5207_s18  ;;  %4307 = vrot.lane.b32.xlu0 %v11007_v3, %s5207_s18  ;;  %v11015_v53 = vld [vmem:[#allocation13_spill] sm:$0xff] }
 0x768   :  { %4311 = vrot.lane.b32.xlu2 %v11008_v20, %s5207_s18  ;;  %v3078_v0 = vadd.f32 %v11015_v53, %v10531_v51  ;;  %v3828_v3 = vadd.f32 %v8537_v43, %v3612_v50  ;;  %v11016_v20 = vld [vmem:[#allocation101_spill] sm:$0xff]  ;;  %v11023_v53 = vld [vmem:[#allocation274_spill] sm:$0xff] }
 0x769   :  { %v8928_v35 = vpop.permute.xlu1 %4105  ;;  %v8930_v45 = vpop.permute.xlu0 %4103 }
 0x76a   :  { %11010 = vst [vmem:[#allocation48_spill] sm:$0xff] %v8928_v35  ;;  %v8932_v6 = vpop.permute.xlu2 %4125  ;;  %v4036_v58 = vadd.f32 %v8750_v32, %v3828_v3  ;;  %v11026_v32 = vld [vmem:[#allocation41_spill] sm:$0xff]  ;;  %v11028_v3 = vld [vmem:[#allocation103_spill] sm:$0xff] }
 0x76b   :  { %11011 = vst [vmem:[#allocation9_spill] sm:$0xff] %v8930_v45  ;;  %v11019_v45 = vld [vmem:[#allocation47_spill] sm:$0xff] }
 0x76c   :  { %11012 = vst [vmem:[#allocation31_spill] sm:$0xff] %v8932_v6  ;;  %v3375_v6 = vadd.f32 %v11019_v45, %v3078_v0  ;;  %v11025_v0 = vld [vmem:[#allocation86_spill] sm:$0xff] }
 0x76d   :  { %v11027_v45 = vld [vmem:[#allocation90_spill] sm:$0xff] }
 0x76e   :  { %v3567_v50 = vadd.f32 %v11021_v42, %v3375_v6 }
 0x76f   :  { %4315 = vrot.lane.b32.xlu1 %v11016_v20, %s5207_s18  ;;  %4313 = vrot.lane.b32.xlu0 %v11017_v62, %s5207_s18  ;;  %v11024_v62 = vld [vmem:[#allocation52_spill] sm:$0xff] }
 0x770   :  { %4317 = vrot.lane.b32.xlu2 %v11018_v30, %s5207_s18  ;;  %v3783_v20 = vadd.f32 %v11023_v53, %v3567_v50  ;;  %v3081_v35 = vadd.f32 %v11024_v62, %v10542_v8  ;;  %v11031_v50 = vld [vmem:[#allocation235_spill] sm:$0xff] }
 0x771   :  { %v8947_v38 = vpop.permute.xlu1 %4111  ;;  %v8949_v21 = vpop.permute.xlu0 %4109 }
 0x772   :  { %11020 = vst [vmem:[#allocation17_spill] sm:$0xff] %v8949_v21  ;;  %v4132_v51 = vpop.permute.xlu2 %4131  ;;  %v3991_v30 = vadd.f32 %v8556_v39, %v3783_v20  ;;  %v3378_v6 = vadd.f32 %v11028_v3, %v3081_v35  ;;  %v11033_v20 = vld [vmem:[#allocation276_spill] sm:$0xff]  ;;  %v11035_v35 = vld [vmem:[#allocation22_spill] sm:$0xff] }
 0x773   :  { %v8952_v43 = vadd.f32 %v4132_v51, %v4036_v58 }
 0x774   :  { %v4183_v58 = vadd.f32 %v8762_v4, %v3991_v30  ;;  %v3570_v39 = vadd.f32 %v11031_v50, %v3378_v6  ;;  %v11036_v4 = vld [vmem:[#allocation100_spill] sm:$0xff]  ;;  %v11037_v30 = vld [vmem:[#allocation197_spill] sm:$0xff]  ;;  %v11038_v6 = vld [vmem:[#allocation199_spill] sm:$0xff] }
 0x775   :  { %11022 = vst [vmem:[#allocation34_spill] sm:$0xff] %v8952_v43  ;;  %v3121_v3 = vadd.f32 %v11037_v30, %v7523_v41  ;;  %v11040_v50 = vld [vmem:[#allocation170_spill] sm:$0xff]  ;;  %v11051_v43 = vld [vmem:[#allocation95_spill] sm:$0xff] }
 0x776   :  { %v3786_v62 = vadd.f32 %v11033_v20, %v3570_v39  ;;  %v11045_v41 = vld [vmem:[#allocation238_spill] sm:$0xff] }
 0x777   :  { %4321 = vrot.lane.b32.xlu1 %v11025_v0, %s5207_s18  ;;  %4319 = vrot.lane.b32.xlu0 %v11026_v32, %s5207_s18  ;;  %v11034_v0 = vld [vmem:[#allocation15_spill] sm:$0xff] }
 0x778   :  { %4323 = vrot.lane.b32.xlu2 %v11027_v45, %s5207_s18  ;;  %v3084_v32 = vadd.f32 %v11034_v0, %v6527_v12  ;;  %v3994_v45 = vadd.f32 %v8568_v55, %v3786_v62  ;;  %v11043_v62 = vld [vmem:[#allocation236_spill] sm:$0xff] }
 0x779   :  { %v8966_v51 = vpop.permute.xlu1 %4117  ;;  %v8968_v42 = vpop.permute.xlu0 %4115 }
 0x77a   :  { %11029 = vst [vmem:[#allocation3_spill] sm:$0xff] %v8966_v51  ;;  %v4258_v8 = vpop.permute.xlu2 %4257  ;;  %v3381_v39 = vadd.f32 %v11040_v50, %v3084_v32  ;;  %v4186_v12 = vadd.f32 %v8774_v23, %v3994_v45  ;;  %v11048_v32 = vld [vmem:[#allocation279_spill] sm:$0xff]  ;;  %v11050_v45 = vld [vmem:[#allocation58_spill] sm:$0xff] }
 0x77b   :  { %11030 = vst [vmem:[#allocation8_spill] sm:$0xff] %v8968_v42  ;;  %v8971_v53 = vadd.f32 %v4258_v8, %v4183_v58  ;;  %v3122_v58 = vadd.f32 %v11038_v6, %v10956_v59  ;;  %v11039_v8 = vld [vmem:[#allocation28_spill] sm:$0xff]  ;;  %v11046_v59 = vld [vmem:[#allocation277_spill] sm:$0xff]  ;;  %v11049_v23 = vld [vmem:[#allocation91_spill] sm:$0xff] }
 0x77c   :  { %v3573_v30 = vadd.f32 %v11045_v41, %v3381_v39  ;;  %v11053_v39 = vld [vmem:[#allocation62_spill] sm:$0xff] }
 0x77d   :  { %11032 = vst [vmem:[#allocation127_spill] sm:$0xff] %v8971_v53  ;;  %v3419_v0 = vadd.f32 %v11043_v62, %v3122_v58  ;;  %v11054_v62 = vld [vmem:[#allocation117_spill] sm:$0xff]  ;;  %v11057_v41 = vld [vmem:[#allocation166_spill] sm:$0xff] }
 0x77e   :  { %v3789_v50 = vadd.f32 %v11048_v32, %v3573_v30  ;;  %v11061_v32 = vld [vmem:[#allocation240_spill] sm:$0xff] }
 0x77f   :  { %4327 = vrot.lane.b32.xlu1 %v11035_v35, %s5207_s18  ;;  %4325 = vrot.lane.b32.xlu0 %v11036_v4, %s5207_s18  ;;  %v11044_v35 = vld [vmem:[#allocation237_spill] sm:$0xff]  ;;  %v3611_v6 = vadd.f32 %v11046_v59, %v3419_v0 }
 0x780   :  { %4329 = vrot.lane.b32.xlu2 %v11039_v8, %s5207_s18  ;;  %v3418_v4 = vadd.f32 %v11044_v35, %v3121_v3  ;;  %v11047_v8 = vld [vmem:[#allocation278_spill] sm:$0xff]  ;;  %v11055_v0 = vld [vmem:[#allocation53_spill] sm:$0xff]  ;;  %v11056_v35 = vld [vmem:[#allocation152_spill] sm:$0xff] }
 0x781   :  { %v8989_v55 = vpop.permute.xlu1 %4123  ;;  %v8991_v20 = vpop.permute.xlu0 %4121  ;;  %v3827_v58 = vadd.f32 %v8583_v10, %v3611_v6  ;;  %v11060_v6 = vld [vmem:[#allocation239_spill] sm:$0xff] }
 0x782   :  { %11041 = vst [vmem:[#allocation24_spill] sm:$0xff] %v8989_v55  ;;  %v4264_v53 = vpop.permute.xlu2 %4263  ;;  %v3610_v51 = vadd.f32 %v11047_v8, %v3418_v4  ;;  %v3076_v55 = vadd.f32 %v11050_v45, %v11049_v23 }
 0x783   :  { %11042 = vst [vmem:[#allocation64_spill] sm:$0xff] %v8991_v20  ;;  %v8996_v42 = vadd.f32 %v4264_v53, %v4186_v12  ;;  %v11052_v20 = vld [vmem:[#allocation59_spill] sm:$0xff]  ;;  %v3087_v53 = vadd.f32 %v11053_v39, %v10575_v13  ;;  %v3997_v12 = vadd.f32 %v8587_v33, %v3789_v50  ;;  %v11059_v13 = vld [vmem:[#allocation181_spill] sm:$0xff]  ;;  %v11064_v39 = vld [vmem:[#allocation280_spill] sm:$0xff] }
 0x784   :  { %v3077_v21 = vadd.f32 %v11052_v20, %v11051_v43  ;;  %v3826_v3 = vadd.f32 %v8585_v2, %v3610_v51  ;;  %v3373_v4 = vadd.f32 %v11056_v35, %v3076_v55  ;;  %v4035_v43 = vadd.f32 %v8782_v25, %v3827_v58  ;;  %v11058_v2 = vld [vmem:[#allocation118_spill] sm:$0xff]  ;;  %v11062_v25 = vld [vmem:[#allocation241_spill] sm:$0xff] }
 0x785   :  { %v3384_v51 = vadd.f32 %v11059_v13, %v3087_v53  ;;  %v4189_v33 = vadd.f32 %v8786_v5, %v3997_v12  ;;  %v11063_v58 = vld [vmem:[#allocation125_spill] sm:$0xff]  ;;  %v11067_v35 = vld [vmem:[#allocation110_spill] sm:$0xff]  ;;  %v11069_v13 = vld [vmem:[#allocation84_spill] sm:$0xff] }
 0x786   :  { %v3374_v30 = vadd.f32 %v11057_v41, %v3077_v21  ;;  %v4034_v10 = vadd.f32 %v8784_v61, %v3826_v3  ;;  %v3565_v50 = vadd.f32 %v11061_v32, %v3373_v4  ;;  %v11065_v5 = vld [vmem:[#allocation281_spill] sm:$0xff]  ;;  %v3080_v4 = vadd.f32 %v11067_v35, %v10535_v31 }
 0x787   :  { %4333 = vrot.lane.b32.xlu1 %v11054_v62, %s5207_s18  ;;  %4331 = vrot.lane.b32.xlu0 %v11055_v0, %s5207_s18  ;;  %v3576_v61 = vadd.f32 %v11062_v25, %v3384_v51  ;;  %v11066_v62 = vld [vmem:[#allocation50_spill] sm:$0xff]  ;;  %v11070_v51 = vld [vmem:[#allocation76_spill] sm:$0xff]  ;;  %v11076_v25 = vld [vmem:[#allocation243_spill] sm:$0xff] }
 0x788   :  { %4335 = vrot.lane.b32.xlu2 %v11058_v2, %s5207_s18  ;;  %v3566_v8 = vadd.f32 %v11060_v6, %v3374_v30  ;;  %v3781_v53 = vadd.f32 %v11064_v39, %v3565_v50  ;;  %v3079_v0 = vadd.f32 %v11066_v62, %v10538_v48  ;;  %v11075_v50 = vld [vmem:[#allocation242_spill] sm:$0xff]  ;;  %v11079_v62 = vld [vmem:[#allocation284_spill] sm:$0xff] }
 0x789   :  { %v4130_v20 = vpop.permute.xlu1 %4129  ;;  %v4128_v59 = vpop.permute.xlu0 %4127  ;;  %v3792_v12 = vadd.f32 %v11065_v5, %v3576_v61  ;;  %v11078_v5 = vld [vmem:[#allocation283_spill] sm:$0xff] }
 0x78a   :  { %v9024_v55 = vadd.f32 %v4130_v20, %v4035_v43  ;;  %v4270_v21 = vpop.permute.xlu2 %4269  ;;  %v9026_v23 = vadd.f32 %v4128_v59, %v4034_v10  ;;  %v3782_v3 = vadd.f32 %v11063_v58, %v3566_v8  ;;  %v3989_v30 = vadd.f32 %v8597_v52, %v3781_v53  ;;  %v11068_v43 = vld [vmem:[#allocation61_spill] sm:$0xff]  ;;  %v11072_v20 = vld [vmem:[#allocation179_spill] sm:$0xff]  ;;  %v11073_v52 = vld [vmem:[#allocation102_spill] sm:$0xff] }
 0x78b   :  { %v9029_v45 = vadd.f32 %v4270_v21, %v4189_v33  ;;  %v3090_v10 = vadd.f32 %v11068_v43, %v10930_v24  ;;  %v4000_v2 = vadd.f32 %v8599_v36, %v3792_v12  ;;  %v11071_v33 = vld [vmem:[#allocation175_spill] sm:$0xff]  ;;  %v3377_v59 = vadd.f32 %v11072_v20, %v3080_v4  ;;  %v11081_v4 = vld [vmem:[#allocation142_spill] sm:$0xff] }
 0x78c   :  { %v3990_v41 = vadd.f32 %v8595_v40, %v3782_v3  ;;  %v3376_v48 = vadd.f32 %v11071_v33, %v3079_v0  ;;  %v4181_v40 = vadd.f32 %v8796_v37, %v3989_v30  ;;  %v11074_v24 = vld [vmem:[#allocation187_spill] sm:$0xff]  ;;  %v11085_v33 = vld [vmem:[#allocation129_spill] sm:$0xff] }
 0x78d   :  { %v3387_v6 = vadd.f32 %v11074_v24, %v3090_v10  ;;  %v4192_v36 = vadd.f32 %v8798_v1, %v4000_v2  ;;  %v3569_v21 = vadd.f32 %v11075_v50, %v3377_v59  ;;  %v11080_v1 = vld [vmem:[#allocation285_spill] sm:$0xff]  ;;  %v11083_v43 = vld [vmem:[#allocation147_spill] sm:$0xff]  ;;  %v11086_v59 = vld [vmem:[#allocation282_spill] sm:$0xff] }
 0x78e   :  { %v4182_v31 = vadd.f32 %v8794_v63, %v3990_v41  ;;  %v3568_v61 = vadd.f32 %v11076_v25, %v3376_v48  ;;  %v11077_v63 = vld [vmem:[#allocation244_spill] sm:$0xff]  ;;  %v11082_v41 = vld [vmem:[#allocation67_spill] sm:$0xff]  ;;  %v3093_v48 = vadd.f32 %v11085_v33, %v10682_v9  ;;  %v11089_v24 = vld [vmem:[#allocation190_spill] sm:$0xff] }
 0x78f   :  { %4339 = vrot.lane.b32.xlu1 %v11069_v13, %s5207_s18  ;;  %4337 = vrot.lane.b32.xlu0 %v11070_v51, %s5207_s18  ;;  %v3579_v37 = vadd.f32 %v11077_v63, %v3387_v6  ;;  %v3785_v12 = vadd.f32 %v11078_v5, %v3569_v21  ;;  %v3082_v30 = vadd.f32 %v11082_v41, %v11081_v4  ;;  %v11084_v10 = vld [vmem:[#allocation63_spill] sm:$0xff]  ;;  %v11091_v9 = vld [vmem:[#allocation198_spill] sm:$0xff] }
 0x790   :  { %4341 = vrot.lane.b32.xlu2 %v11073_v52, %s5207_s18  ;;  %v3784_v0 = vadd.f32 %v11079_v62, %v3568_v61  ;;  %v3083_v2 = vadd.f32 %v11084_v10, %v11083_v43  ;;  %v11092_v21 = vld [vmem:[#allocation87_spill] sm:$0xff]  ;;  %v11093_v61 = vld [vmem:[#allocation245_spill] sm:$0xff]  ;;  %v11098_v41 = vld [vmem:[#allocation146_spill] sm:$0xff] }
 0x791   :  { %v4256_v8 = vpop.permute.xlu1 %4255  ;;  %v4254_v32 = vpop.permute.xlu0 %4253  ;;  %v3795_v35 = vadd.f32 %v11080_v1, %v3579_v37  ;;  %v3993_v13 = vadd.f32 %v8614_v18, %v3785_v12  ;;  %v11095_v62 = vld [vmem:[#allocation105_spill] sm:$0xff]  ;;  %v11096_v1 = vld [vmem:[#allocation286_spill] sm:$0xff] }
 0x792   :  { %v9057_v58 = vadd.f32 %v4256_v8, %v4182_v31  ;;  %v4276_v3 = vpop.permute.xlu2 %4275  ;;  %v9059_v39 = vadd.f32 %v4254_v32, %v4181_v40  ;;  %v3992_v51 = vadd.f32 %v8616_v19, %v3784_v0  ;;  %v11087_v31 = vld [vmem:[#allocation159_spill] sm:$0xff]  ;;  %v11088_v40 = vld [vmem:[#allocation186_spill] sm:$0xff]  ;;  %v3380_v6 = vadd.f32 %v11089_v24, %v3083_v2  ;;  %v11090_v19 = vld [vmem:[#allocation32_spill] sm:$0xff] }
 0x793   :  { %v9062_v53 = vadd.f32 %v4276_v3, %v4192_v36  ;;  %v4003_v20 = vadd.f32 %v8618_v44, %v3795_v35  ;;  %v3379_v52 = vadd.f32 %v11088_v40, %v3082_v30  ;;  %v4185_v36 = vadd.f32 %v8806_v49, %v3993_v13  ;;  %v11094_v49 = vld [vmem:[#allocation246_spill] sm:$0xff]  ;;  %v11104_v40 = vld [vmem:[#allocation196_spill] sm:$0xff] }
 0x794   :  { %v4184_v18 = vadd.f32 %v8808_v17, %v3992_v51  ;;  %v3390_v8 = vadd.f32 %v11091_v9, %v3093_v48  ;;  %v3572_v25 = vadd.f32 %v11092_v21, %v3380_v6  ;;  %v3085_v30 = vadd.f32 %v11098_v41, %v6548_v46  ;;  %v11099_v43 = vld [vmem:[#allocation78_spill] sm:$0xff]  ;;  %v11103_v46 = vld [vmem:[#allocation191_spill] sm:$0xff]  ;;  %v11108_v9 = vld [vmem:[#allocation248_spill] sm:$0xff] }
 0x795   :  { %v4195_v44 = vadd.f32 %v8810_v15, %v4003_v20  ;;  %v3571_v3 = vadd.f32 %v11093_v61, %v3379_v52  ;;  %v11097_v15 = vld [vmem:[#allocation287_spill] sm:$0xff]  ;;  %v3086_v10 = vadd.f32 %v11099_v43, %v10567_v60  ;;  %v11100_v51 = vld [vmem:[#allocation38_spill] sm:$0xff] }
 0x796   :  { %v3582_v17 = vadd.f32 %v11094_v49, %v3390_v8  ;;  %v3788_v0 = vadd.f32 %v11095_v62, %v3572_v25  ;;  %v3096_v33 = vadd.f32 %v11100_v51, %v7149_v29  ;;  %v11101_v20 = vld [vmem:[#allocation46_spill] sm:$0xff]  ;;  %v11105_v52 = vld [vmem:[#allocation55_spill] sm:$0xff]  ;;  %v11106_v29 = vld [vmem:[#allocation204_spill] sm:$0xff] }
 0x797   :  { %4345 = vrot.lane.b32.xlu1 %v11086_v59, %s5207_s18  ;;  %4343 = vrot.lane.b32.xlu0 %v11087_v31, %s5207_s18  ;;  %v3787_v35 = vadd.f32 %v11096_v1, %v3571_v3  ;;  %v11102_v59 = vld [vmem:[#allocation45_spill] sm:$0xff]  ;;  %v3382_v31 = vadd.f32 %v11103_v46, %v3085_v30  ;;  %v3383_v60 = vadd.f32 %v11104_v40, %v3086_v10  ;;  %v11111_v3 = vld [vmem:[#allocation290_spill] sm:$0xff]  ;;  %v11114_v62 = vld [vmem:[#allocation148_spill] sm:$0xff] }
 0x798   :  { %4347 = vrot.lane.b32.xlu2 %v11090_v19, %s5207_s18  ;;  %v3798_v4 = vadd.f32 %v11097_v15, %v3582_v17  ;;  %v3996_v2 = vadd.f32 %v8626_v57, %v3788_v0  ;;  %v11110_v25 = vld [vmem:[#allocation289_spill] sm:$0xff]  ;;  %v11113_v17 = vld [vmem:[#allocation68_spill] sm:$0xff]  ;;  %v11115_v1 = vld [vmem:[#allocation6_spill] sm:$0xff] }
 0x799   :  { %v4262_v32 = vpop.permute.xlu1 %4261  ;;  %v4260_v50 = vpop.permute.xlu0 %4259  ;;  %v3995_v13 = vadd.f32 %v8628_v26, %v3787_v35  ;;  %v3574_v8 = vadd.f32 %v11108_v9, %v3382_v31  ;;  %v3088_v0 = vadd.f32 %v11114_v62, %v11113_v17  ;;  %v11116_v35 = vld [vmem:[#allocation96_spill] sm:$0xff]  ;;  %v11117_v30 = vld [vmem:[#allocation165_spill] sm:$0xff]  ;;  %v11118_v10 = vld [vmem:[#allocation323_spill] sm:$0xff] }
 0x79a   :  { %v9090_v63 = vadd.f32 %v4262_v32, %v4185_v36  ;;  %v4282_v37 = vpop.permute.xlu2 %4281  ;;  %v9092_v5 = vadd.f32 %v4260_v50, %v4184_v18  ;;  %v4006_v48 = vadd.f32 %v8630_v28, %v3798_v4  ;;  %v4188_v57 = vadd.f32 %v8818_v27, %v3996_v2  ;;  %v11107_v18 = vld [vmem:[#allocation247_spill] sm:$0xff]  ;;  %v11109_v27 = vld [vmem:[#allocation249_spill] sm:$0xff]  ;;  %v11120_v51 = vld [vmem:[#allocation122_spill] sm:$0xff] }
 0x79b   :  { %v9095_v12 = vadd.f32 %v4282_v37, %v4195_v44  ;;  %v4187_v26 = vadd.f32 %v8820_v16, %v3995_v13  ;;  %v3393_v28 = vadd.f32 %v11106_v29, %v3096_v33  ;;  %v3575_v19 = vadd.f32 %v11107_v18, %v3383_v60  ;;  %v11119_v13 = vld [vmem:[#allocation288_spill] sm:$0xff]  ;;  %v11126_v29 = vld [vmem:[#allocation250_spill] sm:$0xff]  ;;  %v11135_v17 = vld [vmem:[#allocation325_spill] sm:$0xff] }
 0x79c   :  { %v4198_v24 = vadd.f32 %v8822_v47, %v4006_v48  ;;  %v3790_v37 = vadd.f32 %v11111_v3, %v3574_v8  ;;  %v11112_v47 = vld [vmem:[#allocation291_spill] sm:$0xff]  ;;  %v3089_v15 = vadd.f32 %v11116_v35, %v11115_v1  ;;  %v3099_v43 = vadd.f32 %v11117_v30, %v7190_v22  ;;  %v11121_v33 = vld [vmem:[#allocation200_spill] sm:$0xff]  ;;  %v11133_v3 = vld [vmem:[#allocation157_spill] sm:$0xff] }
 0x79d   :  { %v3585_v16 = vadd.f32 %v11109_v27, %v3393_v28  ;;  %v3791_v61 = vadd.f32 %v11110_v25, %v3575_v19  ;;  %v3385_v48 = vadd.f32 %v11121_v33, %v3088_v0  ;;  %v11124_v22 = vld [vmem:[#allocation207_spill] sm:$0xff]  ;;  %v11128_v19 = vld [vmem:[#allocation128_spill] sm:$0xff]  ;;  %v11137_v1 = vld [vmem:[#allocation201_spill] sm:$0xff] }
 0x79e   :  { %v3998_v41 = vadd.f32 %v8640_v54, %v3790_v37  ;;  %v11123_v54 = vld [vmem:[#allocation120_spill] sm:$0xff]  ;;  %v3396_v31 = vadd.f32 %v11124_v22, %v3099_v43  ;;  %v11136_v0 = vld [vmem:[#allocation107_spill] sm:$0xff]  ;;  %v11140_v30 = vld [vmem:[#allocation113_spill] sm:$0xff] }
 0x79f   :  { %4463 = vrot.lane.b32.xlu1 %v11101_v20, %s5208_s1  ;;  %4461 = vrot.lane.b32.xlu0 %v11102_v59, %s5208_s1  ;;  %v3801_v49 = vadd.f32 %v11112_v47, %v3585_v16  ;;  %v3999_v4 = vadd.f32 %v8638_v14, %v3791_v61  ;;  %v11122_v20 = vld [vmem:[#allocation202_spill] sm:$0xff]  ;;  %v3577_v28 = vadd.f32 %v11126_v29, %v3385_v48  ;;  %v11129_v8 = vld [vmem:[#allocation292_spill] sm:$0xff]  ;;  %v11131_v16 = vld [vmem:[#allocation151_spill] sm:$0xff] }
 0x7a0   :  { %4465 = vrot.lane.b32.xlu2 %v11105_v52, %s5208_s1  ;;  %v3386_v59 = vadd.f32 %v11122_v20, %v3089_v15  ;;  %v4190_v14 = vadd.f32 %v8832_v56, %v3998_v41  ;;  %v3091_v25 = vadd.f32 %v11131_v16, %v10929_v34  ;;  %v11132_v61 = vld [vmem:[#allocation19_spill] sm:$0xff]  ;;  %v11134_v47 = vld [vmem:[#allocation324_spill] sm:$0xff]  ;;  %v3102_v35 = vadd.f32 %v11137_v1, %v11136_v0  ;;  %v11138_v15 = vld [vmem:[#allocation326_spill] sm:$0xff] }
 0x7a1   :  { %v4268_v6 = vpop.permute.xlu1 %4267  ;;  %v4266_v36 = vpop.permute.xlu0 %4265  ;;  %v4009_v2 = vadd.f32 %v11118_v10, %v3801_v49  ;;  %v4191_v46 = vadd.f32 %v8830_v7, %v3999_v4  ;;  %v11127_v7 = vld [vmem:[#allocation251_spill] sm:$0xff]  ;;  %v3092_v37 = vadd.f32 %v11133_v3, %v11132_v61  ;;  %v11141_v43 = vld [vmem:[#allocation206_spill] sm:$0xff]  ;;  %v11142_v10 = vld [vmem:[#allocation208_spill] sm:$0xff] }
 0x7a2   :  { %v9123_v44 = vadd.f32 %v4268_v6, %v4188_v57  ;;  %v4288_v32 = vpop.permute.xlu2 %4287  ;;  %v9125_v50 = vadd.f32 %v4266_v36, %v4187_v26  ;;  %v11125_v26 = vld [vmem:[#allocation121_spill] sm:$0xff]  ;;  %v3588_v56 = vadd.f32 %v11127_v7, %v3396_v31  ;;  %v11139_v41 = vld [vmem:[#allocation131_spill] sm:$0xff]  ;;  %v3388_v34 = vadd.f32 %v11141_v43, %v3091_v25  ;;  %v11145_v20 = vld [vmem:[#allocation88_spill] sm:$0xff] }
 0x7a3   :  { %v9128_v21 = vadd.f32 %v4288_v32, %v4198_v24  ;;  %v4201_v40 = vadd.f32 %v8834_v11, %v4009_v2  ;;  %v3578_v52 = vadd.f32 %v11125_v26, %v3386_v59  ;;  %v3793_v32 = vadd.f32 %v11129_v8, %v3577_v28  ;;  %v11130_v11 = vld [vmem:[#allocation293_spill] sm:$0xff]  ;;  %v11144_v33 = vld [vmem:[#allocation155_spill] sm:$0xff]  ;;  %v11146_v59 = vld [vmem:[#allocation210_spill] sm:$0xff] }
 0x7a4   :  { %v3804_v27 = vadd.f32 %v11130_v11, %v3588_v56  ;;  %v3389_v2 = vadd.f32 %v11142_v10, %v3092_v37  ;;  %v11152_v8 = vld [vmem:[#allocation296_spill] sm:$0xff]  ;;  %v11153_v11 = vld [vmem:[#allocation297_spill] sm:$0xff]  ;;  %v11157_v37 = vld [vmem:[#allocation51_spill] sm:$0xff] }
 0x7a5   :  { %v3794_v9 = vadd.f32 %v11128_v19, %v3578_v52  ;;  %v4001_v62 = vadd.f32 %v11135_v17, %v3793_v32  ;;  %v11151_v19 = vld [vmem:[#allocation295_spill] sm:$0xff]  ;;  %v11154_v16 = vld [vmem:[#allocation65_spill] sm:$0xff]  ;;  %v11155_v25 = vld [vmem:[#allocation12_spill] sm:$0xff] }
 0x7a6   :  { %v4012_v4 = vadd.f32 %v11138_v15, %v3804_v27  ;;  %v3094_v61 = vadd.f32 %v11155_v25, %v11154_v16  ;;  %v11156_v3 = vld [vmem:[#allocation69_spill] sm:$0xff]  ;;  %v11160_v1 = vld [vmem:[#allocation60_spill] sm:$0xff]  ;;  %v11176_v16 = vld [vmem:[#allocation298_spill] sm:$0xff] }
 0x7a7   :  { %4469 = vrot.lane.b32.xlu1 %v11119_v13, %s5208_s1  ;;  %4467 = vrot.lane.b32.xlu0 %v11120_v51, %s5208_s1  ;;  %v4002_v49 = vadd.f32 %v11134_v47, %v3794_v9  ;;  %v11143_v13 = vld [vmem:[#allocation149_spill] sm:$0xff]  ;;  %v4193_v48 = vadd.f32 %v11144_v33, %v4001_v62  ;;  %v3095_v47 = vadd.f32 %v11157_v37, %v11156_v3  ;;  %v11159_v62 = vld [vmem:[#allocation328_spill] sm:$0xff]  ;;  %v11178_v37 = vld [vmem:[#allocation27_spill] sm:$0xff] }
 0x7a8   :  { %4471 = vrot.lane.b32.xlu2 %v11123_v54, %s5208_s1  ;;  %v11164_v43 = vld [vmem:[#allocation144_spill] sm:$0xff] }
 0x7a9   :  { %v4274_v60 = vpop.permute.xlu1 %4273  ;;  %v4272_v57 = vpop.permute.xlu0 %4271  ;;  %v4194_v51 = vadd.f32 %v11143_v13, %v4002_v49  ;;  %v11158_v49 = vld [vmem:[#allocation327_spill] sm:$0xff] }
 0x7aa   :  { %v9156_v24 = vadd.f32 %v4274_v60, %v4191_v46  ;;  %v4294_v6 = vpop.permute.xlu2 %4293  ;;  %v9158_v36 = vadd.f32 %v4272_v57, %v4190_v14  ;;  %v3399_v46 = vadd.f32 %v11146_v59, %v3102_v35  ;;  %v11147_v14 = vld [vmem:[#allocation83_spill] sm:$0xff]  ;;  %v11149_v57 = vld [vmem:[#allocation253_spill] sm:$0xff] }
 0x7ab   :  { %v9161_v18 = vadd.f32 %v4294_v6, %v4201_v40  ;;  %v4204_v54 = vadd.f32 %v11147_v14, %v4012_v4  ;;  %v11148_v40 = vld [vmem:[#allocation252_spill] sm:$0xff]  ;;  %v3580_v26 = vadd.f32 %v11149_v57, %v3388_v34  ;;  %v11150_v6 = vld [vmem:[#allocation254_spill] sm:$0xff]  ;;  %v11161_v35 = vld [vmem:[#allocation135_spill] sm:$0xff] }
 0x7ac   :  { %v3581_v60 = vadd.f32 %v11148_v40, %v3389_v2  ;;  %v3591_v7 = vadd.f32 %v11150_v6, %v3399_v46  ;;  %v3105_v15 = vadd.f32 %v11161_v35, %v11160_v1  ;;  %v11162_v4 = vld [vmem:[#allocation329_spill] sm:$0xff]  ;;  %v11165_v34 = vld [vmem:[#allocation211_spill] sm:$0xff]  ;;  %v11166_v2 = vld [vmem:[#allocation212_spill] sm:$0xff] }
 0x7ad   :  { %v3796_v32 = vadd.f32 %v11152_v8, %v3580_v26  ;;  %v3392_v10 = vadd.f32 %v11165_v34, %v3095_v47  ;;  %v3391_v13 = vadd.f32 %v11166_v2, %v3094_v61  ;;  %v11169_v59 = vld [vmem:[#allocation163_spill] sm:$0xff]  ;;  %v11170_v46 = vld [vmem:[#allocation213_spill] sm:$0xff]  ;;  %v11179_v47 = vld [vmem:[#allocation168_spill] sm:$0xff] }
 0x7ae   :  { %v3797_v9 = vadd.f32 %v11151_v19, %v3581_v60  ;;  %v3807_v27 = vadd.f32 %v11153_v11, %v3591_v7  ;;  %v3402_v14 = vadd.f32 %v11170_v46, %v3105_v15  ;;  %v11172_v60 = vld [vmem:[#allocation10_spill] sm:$0xff]  ;;  %v11173_v26 = vld [vmem:[#allocation255_spill] sm:$0xff]  ;;  %v11187_v2 = vld [vmem:[#allocation73_spill] sm:$0xff] }
 0x7af   :  { %4475 = vrot.lane.b32.xlu1 %v11139_v41, %s5208_s1  ;;  %4473 = vrot.lane.b32.xlu0 %v11140_v30, %s5208_s1  ;;  %v4004_v0 = vadd.f32 %v11159_v62, %v3796_v32  ;;  %v11163_v30 = vld [vmem:[#allocation294_spill] sm:$0xff]  ;;  %v3584_v57 = vadd.f32 %v11172_v60, %v3392_v10  ;;  %v11177_v61 = vld [vmem:[#allocation299_spill] sm:$0xff]  ;;  %v11181_v62 = vld [vmem:[#allocation173_spill] sm:$0xff] }
 0x7b0   :  { %4477 = vrot.lane.b32.xlu2 %v11145_v20, %s5208_s1  ;;  %v4005_v17 = vadd.f32 %v11158_v49, %v3797_v9  ;;  %v4015_v41 = vadd.f32 %v11162_v4, %v3807_v27  ;;  %v11174_v9 = vld [vmem:[#allocation256_spill] sm:$0xff]  ;;  %v11175_v11 = vld [vmem:[#allocation154_spill] sm:$0xff]  ;;  %v3097_v49 = vadd.f32 %v11179_v47, %v11178_v37  ;;  %v11183_v15 = vld [vmem:[#allocation139_spill] sm:$0xff] }
 0x7b1   :  { %v4280_v22 = vpop.permute.xlu1 %4279  ;;  %v4278_v31 = vpop.permute.xlu0 %4277  ;;  %v3594_v8 = vadd.f32 %v11174_v9, %v3402_v14  ;;  %v3800_v27 = vadd.f32 %v11175_v11, %v3584_v57  ;;  %v11182_v1 = vld [vmem:[#allocation14_spill] sm:$0xff]  ;;  %v11192_v14 = vld [vmem:[#allocation119_spill] sm:$0xff]  ;;  %v11195_v60 = vld [vmem:[#allocation85_spill] sm:$0xff] }
 0x7b2   :  { %v9189_v52 = vadd.f32 %v4280_v22, %v4194_v51  ;;  %v4300_v29 = vpop.permute.xlu2 %4299  ;;  %v9191_v28 = vadd.f32 %v4278_v31, %v4193_v48  ;;  %v11167_v51 = vld [vmem:[#allocation79_spill] sm:$0xff]  ;;  %v11186_v34 = vld [vmem:[#allocation330_spill] sm:$0xff]  ;;  %v11199_v47 = vld [vmem:[#allocation301_spill] sm:$0xff] }
 0x7b3   :  { %v9194_v56 = vadd.f32 %v4300_v29, %v4204_v54  ;;  %v4197_v33 = vadd.f32 %v11167_v51, %v4005_v17  ;;  %v11168_v48 = vld [vmem:[#allocation143_spill] sm:$0xff]  ;;  %v3583_v29 = vadd.f32 %v11173_v26, %v3391_v13  ;;  %v3810_v3 = vadd.f32 %v11177_v61, %v3594_v8  ;;  %v11180_v17 = vld [vmem:[#allocation70_spill] sm:$0xff]  ;;  %v11189_v51 = vld [vmem:[#allocation93_spill] sm:$0xff] }
 0x7b4   :  { %v4196_v20 = vadd.f32 %v11168_v48, %v4004_v0  ;;  %v11171_v54 = vld [vmem:[#allocation115_spill] sm:$0xff]  ;;  %v3098_v0 = vadd.f32 %v11181_v62, %v11180_v17  ;;  %v4008_v35 = vadd.f32 %v11182_v1, %v3800_v27  ;;  %v11188_v13 = vld [vmem:[#allocation158_spill] sm:$0xff] }
 0x7b5   :  { %v4207_v22 = vadd.f32 %v11171_v54, %v4015_v41  ;;  %v3799_v25 = vadd.f32 %v11176_v16, %v3583_v29  ;;  %v11184_v41 = vld [vmem:[#allocation134_spill] sm:$0xff]  ;;  %v4018_v10 = vadd.f32 %v11186_v34, %v3810_v3  ;;  %v11190_v48 = vld [vmem:[#allocation23_spill] sm:$0xff] }
 0x7b6   :  { %v11197_v8 = vld [vmem:[#allocation258_spill] sm:$0xff]  ;;  %v11198_v61 = vld [vmem:[#allocation259_spill] sm:$0xff] }
 0x7b7   :  { %4481 = vrot.lane.b32.xlu1 %v11163_v30, %s5208_s1  ;;  %4479 = vrot.lane.b32.xlu0 %v11164_v43, %s5208_s1  ;;  %v4007_v4 = vadd.f32 %v11183_v15, %v3799_v25  ;;  %v11185_v30 = vld [vmem:[#allocation92_spill] sm:$0xff]  ;;  %v4210_v57 = vadd.f32 %v11195_v60, %v4018_v10  ;;  %v11200_v17 = vld [vmem:[#allocation302_spill] sm:$0xff]  ;;  %v11203_v15 = vld [vmem:[#allocation203_spill] sm:$0xff] }
 0x7b8   :  { %4483 = vrot.lane.b32.xlu2 %v11169_v59, %s5208_s1  ;;  %v3108_v43 = vadd.f32 %v11185_v30, %v11184_v41  ;;  %v11191_v59 = vld [vmem:[#allocation75_spill] sm:$0xff]  ;;  %v11204_v41 = vld [vmem:[#allocation98_spill] sm:$0xff]  ;;  %v11205_v30 = vld [vmem:[#allocation205_spill] sm:$0xff] }
 0x7b9   :  { %v4286_v31 = vpop.permute.xlu1 %4285  ;;  %v4284_v40 = vpop.permute.xlu0 %4283  ;;  %v4200_v46 = vadd.f32 %v11191_v59, %v4008_v35  ;;  %v4199_v54 = vadd.f32 %v11192_v14, %v4007_v4  ;;  %v11202_v35 = vld [vmem:[#allocation150_spill] sm:$0xff]  ;;  %v11206_v34 = vld [vmem:[#allocation331_spill] sm:$0xff]  ;;  %v11212_v14 = vld [vmem:[#allocation145_spill] sm:$0xff] }
 0x7ba   :  { %v9222_v6 = vadd.f32 %v4286_v31, %v4197_v33  ;;  %v4306_v7 = vpop.permute.xlu2 %4305  ;;  %v9224_v19 = vadd.f32 %v4284_v40, %v4196_v20  ;;  %v3395_v33 = vadd.f32 %v11189_v51, %v3098_v0  ;;  %v3394_v20 = vadd.f32 %v11190_v48, %v3097_v49  ;;  %v11194_v31 = vld [vmem:[#allocation214_spill] sm:$0xff]  ;;  %v11201_v0 = vld [vmem:[#allocation303_spill] sm:$0xff]  ;;  %v11208_v51 = vld [vmem:[#allocation137_spill] sm:$0xff] }
 0x7bb   :  { %v9227_v32 = vadd.f32 %v4306_v7, %v4207_v22  ;;  %v11193_v22 = vld [vmem:[#allocation25_spill] sm:$0xff]  ;;  %v3405_v40 = vadd.f32 %v11194_v31, %v3108_v43  ;;  %v3100_v4 = vadd.f32 %v11203_v15, %v11202_v35  ;;  %v3101_v43 = vadd.f32 %v11205_v30, %v11204_v41  ;;  %v11214_v31 = vld [vmem:[#allocation216_spill] sm:$0xff] }
 0x7bc   :  { %v11196_v7 = vld [vmem:[#allocation257_spill] sm:$0xff]  ;;  %v3586_v11 = vadd.f32 %v11197_v8, %v3394_v20  ;;  %v11215_v60 = vld [vmem:[#allocation132_spill] sm:$0xff] }
 0x7bd   :  { %v3587_v9 = vadd.f32 %v11196_v7, %v3395_v33  ;;  %v3597_v3 = vadd.f32 %v11198_v61, %v3405_v40  ;;  %v11209_v33 = vld [vmem:[#allocation111_spill] sm:$0xff]  ;;  %v11210_v20 = vld [vmem:[#allocation333_spill] sm:$0xff]  ;;  %v3397_v40 = vadd.f32 %v11214_v31, %v3100_v4  ;;  %v11223_v30 = vld [vmem:[#allocation304_spill] sm:$0xff] }
 0x7be   :  { %v3802_v62 = vadd.f32 %v11200_v17, %v3586_v11  ;;  %v3111_v48 = vadd.f32 %v11209_v33, %v11208_v51  ;;  %v11217_v7 = vld [vmem:[#allocation57_spill] sm:$0xff]  ;;  %v11219_v11 = vld [vmem:[#allocation160_spill] sm:$0xff] }
 0x7bf   :  { %4487 = vrot.lane.b32.xlu1 %v11187_v2, %s5208_s1  ;;  %4485 = vrot.lane.b32.xlu0 %v11188_v13, %s5208_s1  ;;  %v3803_v49 = vadd.f32 %v11199_v47, %v3587_v9  ;;  %v3813_v1 = vadd.f32 %v11201_v0, %v3597_v3  ;;  %v11207_v2 = vld [vmem:[#allocation332_spill] sm:$0xff]  ;;  %v11218_v9 = vld [vmem:[#allocation217_spill] sm:$0xff] }
 0x7c0   :  { %4489 = vrot.lane.b32.xlu2 %v11193_v22, %s5208_s1  ;;  %v4010_v13 = vadd.f32 %v11207_v2, %v3802_v62  ;;  %v3408_v8 = vadd.f32 %v11218_v9, %v3111_v48  ;;  %v11220_v47 = vld [vmem:[#allocation49_spill] sm:$0xff]  ;;  %v11221_v17 = vld [vmem:[#allocation260_spill] sm:$0xff]  ;;  %v11225_v2 = vld [vmem:[#allocation306_spill] sm:$0xff] }
 0x7c1   :  { %v4292_v26 = vpop.permute.xlu1 %4291  ;;  %v4290_v29 = vpop.permute.xlu0 %4289  ;;  %v4011_v10 = vadd.f32 %v11206_v34, %v3803_v49  ;;  %v4021_v59 = vadd.f32 %v11210_v20, %v3813_v1  ;;  %v3589_v62 = vadd.f32 %v11221_v17, %v3397_v40  ;;  %v11222_v15 = vld [vmem:[#allocation261_spill] sm:$0xff]  ;;  %v11228_v20 = vld [vmem:[#allocation140_spill] sm:$0xff]  ;;  %v11236_v9 = vld [vmem:[#allocation42_spill] sm:$0xff] }
 0x7c2   :  { %v9255_v27 = vadd.f32 %v4292_v26, %v4200_v46  ;;  %v4312_v16 = vpop.permute.xlu2 %4311  ;;  %v9257_v25 = vadd.f32 %v4290_v29, %v4199_v54  ;;  %v11211_v46 = vld [vmem:[#allocation300_spill] sm:$0xff]  ;;  %v11213_v54 = vld [vmem:[#allocation215_spill] sm:$0xff]  ;;  %v11216_v26 = vld [vmem:[#allocation138_spill] sm:$0xff]  ;;  %v3600_v4 = vadd.f32 %v11222_v15, %v3408_v8 }
 0x7c3   :  { %v9260_v37 = vadd.f32 %v4312_v16, %v4210_v57  ;;  %v3398_v22 = vadd.f32 %v11213_v54, %v3101_v43  ;;  %v4203_v57 = vadd.f32 %v11215_v60, %v4011_v10  ;;  %v4202_v29 = vadd.f32 %v11216_v26, %v4010_v13  ;;  %v11224_v34 = vld [vmem:[#allocation305_spill] sm:$0xff]  ;;  %v11232_v40 = vld [vmem:[#allocation36_spill] sm:$0xff]  ;;  %v11237_v8 = vld [vmem:[#allocation218_spill] sm:$0xff] }
 0x7c4   :  { %v4213_v16 = vadd.f32 %v11219_v11, %v4021_v59  ;;  %v3805_v10 = vadd.f32 %v11224_v34, %v3589_v62  ;;  %v3816_v13 = vadd.f32 %v11225_v2, %v3600_v4  ;;  %v11226_v51 = vld [vmem:[#allocation21_spill] sm:$0xff]  ;;  %v11234_v26 = vld [vmem:[#allocation336_spill] sm:$0xff]  ;;  %v11241_v62 = vld [vmem:[#allocation54_spill] sm:$0xff] }
 0x7c5   :  { %v3590_v49 = vadd.f32 %v11220_v47, %v3398_v22  ;;  %v11227_v33 = vld [vmem:[#allocation161_spill] sm:$0xff]  ;;  %v11231_v22 = vld [vmem:[#allocation335_spill] sm:$0xff]  ;;  %v11243_v4 = vld [vmem:[#allocation20_spill] sm:$0xff] }
 0x7c6   :  { %v3104_v48 = vadd.f32 %v11227_v33, %v11226_v51  ;;  %v11229_v59 = vld [vmem:[#allocation209_spill] sm:$0xff]  ;;  %v4013_v31 = vadd.f32 %v11231_v22, %v3805_v10  ;;  %v11244_v10 = vld [vmem:[#allocation262_spill] sm:$0xff] }
 0x7c7   :  { %4493 = vrot.lane.b32.xlu1 %v11211_v46, %s5208_s1  ;;  %4491 = vrot.lane.b32.xlu0 %v11212_v14, %s5208_s1  ;;  %v3806_v43 = vadd.f32 %v11223_v30, %v3590_v49  ;;  %v3103_v46 = vadd.f32 %v11229_v59, %v11228_v20  ;;  %v11230_v14 = vld [vmem:[#allocation334_spill] sm:$0xff]  ;;  %v11233_v60 = vld [vmem:[#allocation133_spill] sm:$0xff]  ;;  %v11246_v59 = vld [vmem:[#allocation264_spill] sm:$0xff] }
 0x7c8   :  { %4495 = vrot.lane.b32.xlu2 %v11217_v7, %s5208_s1  ;;  %v11235_v7 = vld [vmem:[#allocation16_spill] sm:$0xff]  ;;  %v3401_v11 = vadd.f32 %v11237_v8, %v3104_v48  ;;  %v11240_v49 = vld [vmem:[#allocation162_spill] sm:$0xff]  ;;  %v11253_v8 = vld [vmem:[#allocation29_spill] sm:$0xff] }
 0x7c9   :  { %v4298_v61 = vpop.permute.xlu1 %4297  ;;  %v4296_v3 = vpop.permute.xlu0 %4295  ;;  %v4014_v54 = vadd.f32 %v11230_v14, %v3806_v43  ;;  %v4205_v17 = vadd.f32 %v11240_v49, %v4013_v31  ;;  %v11248_v31 = vld [vmem:[#allocation309_spill] sm:$0xff] }
 0x7ca   :  { %v9288_v0 = vadd.f32 %v4298_v61, %v4203_v57  ;;  %v4318_v1 = vpop.permute.xlu2 %4317  ;;  %v9290_v35 = vadd.f32 %v4296_v3, %v4202_v29  ;;  %v3114_v57 = vadd.f32 %v11233_v60, %v11232_v40  ;;  %v4024_v29 = vadd.f32 %v11234_v26, %v3816_v13  ;;  %v11239_v3 = vld [vmem:[#allocation80_spill] sm:$0xff]  ;;  %v11245_v13 = vld [vmem:[#allocation263_spill] sm:$0xff]  ;;  %v11249_v60 = vld [vmem:[#allocation310_spill] sm:$0xff] }
 0x7cb   :  { %v9293_v41 = vadd.f32 %v4318_v1, %v4213_v16  ;;  %v11238_v16 = vld [vmem:[#allocation219_spill] sm:$0xff]  ;;  %v4206_v47 = vadd.f32 %v11239_v3, %v4014_v54  ;;  %v11242_v1 = vld [vmem:[#allocation220_spill] sm:$0xff]  ;;  %v3593_v2 = vadd.f32 %v11244_v10, %v3401_v11  ;;  %v11255_v3 = vld [vmem:[#allocation338_spill] sm:$0xff] }
 0x7cc   :  { %v3400_v61 = vadd.f32 %v11238_v16, %v3103_v46  ;;  %v3411_v15 = vadd.f32 %v11242_v1, %v3114_v57  ;;  %v4216_v30 = vadd.f32 %v11243_v4, %v4024_v29  ;;  %v11247_v54 = vld [vmem:[#allocation308_spill] sm:$0xff]  ;;  %v11250_v26 = vld [vmem:[#allocation71_spill] sm:$0xff]  ;;  %v11254_v16 = vld [vmem:[#allocation337_spill] sm:$0xff] }
 0x7cd   :  { %v3809_v22 = vadd.f32 %v11247_v54, %v3593_v2  ;;  %v11251_v29 = vld [vmem:[#allocation136_spill] sm:$0xff]  ;;  %v11256_v49 = vld [vmem:[#allocation109_spill] sm:$0xff]  ;;  %v11258_v1 = vld [vmem:[#allocation339_spill] sm:$0xff] }
 0x7ce   :  { %v3592_v51 = vadd.f32 %v11245_v13, %v3400_v61  ;;  %v3603_v46 = vadd.f32 %v11246_v59, %v3411_v15  ;;  %v11259_v4 = vld [vmem:[#allocation307_spill] sm:$0xff]  ;;  %v11262_v10 = vld [vmem:[#allocation222_spill] sm:$0xff] }
 0x7cf   :  { %4499 = vrot.lane.b32.xlu1 %v11235_v7, %s5208_s1  ;;  %4497 = vrot.lane.b32.xlu0 %v11236_v9, %s5208_s1  ;;  %v3106_v7 = vadd.f32 %v11251_v29, %v11250_v26  ;;  %v11252_v9 = vld [vmem:[#allocation77_spill] sm:$0xff]  ;;  %v4017_v61 = vadd.f32 %v11254_v16, %v3809_v22  ;;  %v11263_v13 = vld [vmem:[#allocation11_spill] sm:$0xff]  ;;  %v11268_v26 = vld [vmem:[#allocation74_spill] sm:$0xff] }
 0x7d0   :  { %4501 = vrot.lane.b32.xlu2 %v11241_v62, %s5208_s1  ;;  %v3808_v40 = vadd.f32 %v11248_v31, %v3592_v51  ;;  %v3819_v57 = vadd.f32 %v11249_v60, %v3603_v46  ;;  %v3107_v11 = vadd.f32 %v11253_v8, %v11252_v9  ;;  %v11265_v46 = vld [vmem:[#allocation82_spill] sm:$0xff]  ;;  %v11266_v54 = vld [vmem:[#allocation223_spill] sm:$0xff]  ;;  %v11267_v31 = vld [vmem:[#allocation116_spill] sm:$0xff] }
 0x7d1   :  { %v4304_v43 = vpop.permute.xlu1 %4303  ;;  %v4302_v34 = vpop.permute.xlu0 %4301  ;;  %v3403_v2 = vadd.f32 %v11262_v10, %v3106_v7  ;;  %v4209_v51 = vadd.f32 %v11263_v13, %v4017_v61  ;;  %v11269_v9 = vld [vmem:[#allocation265_spill] sm:$0xff]  ;;  %v11270_v61 = vld [vmem:[#allocation266_spill] sm:$0xff]  ;;  %v11276_v10 = vld [vmem:[#allocation43_spill] sm:$0xff] }
 0x7d2   :  { %v9321_v33 = vadd.f32 %v4304_v43, %v4206_v47  ;;  %v4324_v48 = vpop.permute.xlu2 %4323  ;;  %v9323_v20 = vadd.f32 %v4302_v34, %v4205_v17  ;;  %v4016_v47 = vadd.f32 %v11255_v3, %v3808_v40  ;;  %v11257_v17 = vld [vmem:[#allocation37_spill] sm:$0xff]  ;;  %v4027_v15 = vadd.f32 %v11258_v1, %v3819_v57 }
 0x7d3   :  { %v9326_v14 = vadd.f32 %v4324_v48, %v4216_v30  ;;  %v3117_v62 = vadd.f32 %v11257_v17, %v11256_v49  ;;  %v11260_v30 = vld [vmem:[#allocation39_spill] sm:$0xff]  ;;  %v11261_v43 = vld [vmem:[#allocation221_spill] sm:$0xff]  ;;  %v3595_v8 = vadd.f32 %v11269_v9, %v3403_v2 }
 0x7d4   :  { %v3404_v34 = vadd.f32 %v11261_v43, %v3107_v11  ;;  %v11264_v48 = vld [vmem:[#allocation89_spill] sm:$0xff]  ;;  %v4219_v40 = vadd.f32 %v11267_v31, %v4027_v15  ;;  %v11271_v49 = vld [vmem:[#allocation99_spill] sm:$0xff]  ;;  %v11273_v15 = vld [vmem:[#allocation312_spill] sm:$0xff] }
 0x7d5   :  { %v4208_v59 = vadd.f32 %v11264_v48, %v4016_v47  ;;  %v3414_v22 = vadd.f32 %v11266_v54, %v3117_v62  ;;  %v11272_v62 = vld [vmem:[#allocation311_spill] sm:$0xff]  ;;  %v11275_v43 = vld [vmem:[#allocation5_spill] sm:$0xff] }
 0x7d6   :  { %v3596_v29 = vadd.f32 %v11268_v26, %v3404_v34  ;;  %v3811_v1 = vadd.f32 %v11272_v62, %v3595_v8  ;;  %v11277_v2 = vld [vmem:[#allocation35_spill] sm:$0xff]  ;;  %v11284_v26 = vld [vmem:[#allocation108_spill] sm:$0xff]  ;;  %v11286_v8 = vld [vmem:[#allocation225_spill] sm:$0xff] }
 0x7d7   :  { %4505 = vrot.lane.b32.xlu1 %v11259_v4, %s5208_s1  ;;  %4503 = vrot.lane.b32.xlu0 %v11260_v30, %s5208_s1  ;;  %v3606_v3 = vadd.f32 %v11270_v61, %v3414_v22  ;;  %v11274_v30 = vld [vmem:[#allocation66_spill] sm:$0xff]  ;;  %v3110_v13 = vadd.f32 %v11277_v2, %v11276_v10  ;;  %v11280_v54 = vld [vmem:[#allocation123_spill] sm:$0xff]  ;;  %v11281_v22 = vld [vmem:[#allocation176_spill] sm:$0xff] }
 0x7d8   :  { %4507 = vrot.lane.b32.xlu2 %v11265_v46, %s5208_s1  ;;  %v3812_v17 = vadd.f32 %v11271_v49, %v3596_v29  ;;  %v3109_v34 = vadd.f32 %v11275_v43, %v11274_v30  ;;  %v3120_v31 = vadd.f32 %v11281_v22, %v11280_v54  ;;  %v11285_v29 = vld [vmem:[#allocation224_spill] sm:$0xff]  ;;  %v11287_v61 = vld [vmem:[#allocation114_spill] sm:$0xff]  ;;  %v11292_v2 = vld [vmem:[#allocation267_spill] sm:$0xff] }
 0x7d9   :  { %v4310_v60 = vpop.permute.xlu1 %4309  ;;  %v4308_v57 = vpop.permute.xlu0 %4307  ;;  %v3822_v4 = vadd.f32 %v11273_v15, %v3606_v3  ;;  %v3407_v9 = vadd.f32 %v11285_v29, %v3110_v13  ;;  %v11288_v49 = vld [vmem:[#allocation18_spill] sm:$0xff]  ;;  %v11289_v62 = vld [vmem:[#allocation156_spill] sm:$0xff] }
 0x7da   :  { %v9354_v11 = vadd.f32 %v4310_v60, %v4209_v51  ;;  %v4330_v7 = vpop.permute.xlu2 %4329  ;;  %v9356_v16 = vadd.f32 %v4308_v57, %v4208_v59  ;;  %v11278_v51 = vld [vmem:[#allocation340_spill] sm:$0xff]  ;;  %v11279_v59 = vld [vmem:[#allocation341_spill] sm:$0xff] }
 0x7db   :  { %v9359_v47 = vadd.f32 %v4330_v7, %v4219_v40  ;;  %v4020_v48 = vadd.f32 %v11278_v51, %v3812_v17  ;;  %v4019_v46 = vadd.f32 %v11279_v59, %v3811_v1  ;;  %v11282_v40 = vld [vmem:[#allocation342_spill] sm:$0xff]  ;;  %v11283_v57 = vld [vmem:[#allocation153_spill] sm:$0xff]  ;;  %v3406_v7 = vadd.f32 %v11286_v8, %v3109_v34  ;;  %v11293_v59 = vld [vmem:[#allocation268_spill] sm:$0xff] }
 0x7dc   :  { %v4030_v60 = vadd.f32 %v11282_v40, %v3822_v4  ;;  %v11290_v1 = vld [vmem:[#allocation226_spill] sm:$0xff]  ;;  %v3599_v51 = vadd.f32 %v11292_v2, %v3407_v9  ;;  %v11306_v2 = vld [vmem:[#allocation164_spill] sm:$0xff] }
 0x7dd   :  { %v4212_v3 = vadd.f32 %v11287_v61, %v4020_v48  ;;  %v4211_v17 = vadd.f32 %v11288_v49, %v4019_v46  ;;  %v3417_v15 = vadd.f32 %v11290_v1, %v3120_v31  ;;  %v11291_v4 = vld [vmem:[#allocation30_spill] sm:$0xff]  ;;  %v3598_v54 = vadd.f32 %v11293_v59, %v3406_v7  ;;  %v11294_v48 = vld [vmem:[#allocation269_spill] sm:$0xff]  ;;  %v11296_v31 = vld [vmem:[#allocation315_spill] sm:$0xff] }
 0x7de   :  { %v4222_v30 = vadd.f32 %v11291_v4, %v4030_v60  ;;  %v11297_v60 = vld [vmem:[#allocation316_spill] sm:$0xff]  ;;  %v11298_v61 = vld [vmem:[#allocation26_spill] sm:$0xff]  ;;  %v11299_v49 = vld [vmem:[#allocation7_spill] sm:$0xff] }
 0x7df   :  { %4511 = vrot.lane.b32.xlu1 %v11283_v57, %s5208_s1  ;;  %4509 = vrot.lane.b32.xlu0 %v11284_v26, %s5208_s1  ;;  %v3609_v46 = vadd.f32 %v11294_v48, %v3417_v15  ;;  %v11295_v57 = vld [vmem:[#allocation314_spill] sm:$0xff]  ;;  %v3814_v29 = vadd.f32 %v11296_v31, %v3598_v54  ;;  %v3112_v9 = vadd.f32 %v11299_v49, %v11298_v61  ;;  %v11301_v7 = vld [vmem:[#allocation40_spill] sm:$0xff]  ;;  %v11302_v1 = vld [vmem:[#allocation343_spill] sm:$0xff] }
 0x7e0   :  { %4513 = vrot.lane.b32.xlu2 %v11289_v62, %s5208_s1  ;;  %v3815_v26 = vadd.f32 %v11295_v57, %v3599_v51  ;;  %v11300_v62 = vld [vmem:[#allocation4_spill] sm:$0xff]  ;;  %v11307_v51 = vld [vmem:[#allocation227_spill] sm:$0xff]  ;;  %v11310_v57 = vld [vmem:[#allocation9_spill] sm:$0xff] }
 0x7e1   :  { %v4316_v43 = vpop.permute.xlu1 %4315  ;;  %v4314_v10 = vpop.permute.xlu0 %4313  ;;  %v3825_v8 = vadd.f32 %v11297_v60, %v3609_v46  ;;  %v11308_v54 = vld [vmem:[#allocation228_spill] sm:$0xff]  ;;  %v11313_v49 = vld [vmem:[#allocation130_spill] sm:$0xff] }
 0x7e2   :  { %v9387_v13 = vadd.f32 %v4316_v43, %v4212_v3  ;;  %v4336_v34 = vpop.permute.xlu2 %4335  ;;  %v9389_v22 = vadd.f32 %v4314_v10, %v4211_v17  ;;  %v3113_v3 = vadd.f32 %v11301_v7, %v11300_v62  ;;  %v4023_v4 = vadd.f32 %v11302_v1, %v3815_v26  ;;  %v11303_v17 = vld [vmem:[#allocation344_spill] sm:$0xff]  ;;  %v11304_v10 = vld [vmem:[#allocation345_spill] sm:$0xff]  ;;  %v11314_v7 = vld [vmem:[#allocation270_spill] sm:$0xff] }
 0x7e3   :  { %v9392_v40 = vadd.f32 %v4336_v34, %v4222_v30  ;;  %v4022_v43 = vadd.f32 %v11303_v17, %v3814_v29  ;;  %v4033_v15 = vadd.f32 %v11304_v10, %v3825_v8  ;;  %v11305_v30 = vld [vmem:[#allocation313_spill] sm:$0xff]  ;;  %v3409_v34 = vadd.f32 %v11308_v54, %v3112_v9  ;;  %v11309_v48 = vld [vmem:[#allocation48_spill] sm:$0xff]  ;;  %v11312_v29 = vld [vmem:[#allocation31_spill] sm:$0xff] }
 0x7e4   :  { %v3410_v59 = vadd.f32 %v11307_v51, %v3113_v3  ;;  %v4215_v46 = vadd.f32 %v11309_v48, %v4023_v4  ;;  %v11311_v26 = vld [vmem:[#allocation124_spill] sm:$0xff]  ;;  %v11316_v4 = vld [vmem:[#allocation167_spill] sm:$0xff]  ;;  %v11318_v51 = vld [vmem:[#allocation106_spill] sm:$0xff] }
 0x7e5   :  { %v4214_v31 = vadd.f32 %v11310_v57, %v4022_v43  ;;  %v4225_v60 = vadd.f32 %v11312_v29, %v4033_v15  ;;  %v3601_v1 = vadd.f32 %v11314_v7, %v3409_v34  ;;  %v11319_v54 = vld [vmem:[#allocation97_spill] sm:$0xff]  ;;  %v11320_v48 = vld [vmem:[#allocation2_spill] sm:$0xff]  ;;  %v11321_v57 = vld [vmem:[#allocation112_spill] sm:$0xff] }
 0x7e6   :  { %v3602_v62 = vadd.f32 %v11313_v49, %v3410_v59  ;;  %v3115_v15 = vadd.f32 %v11319_v54, %v11318_v51  ;;  %v11322_v59 = vld [vmem:[#allocation346_spill] sm:$0xff]  ;;  %v11323_v34 = vld [vmem:[#allocation347_spill] sm:$0xff]  ;;  %v11331_v54 = vld [vmem:[#allocation273_spill] sm:$0xff] }
 0x7e7   :  { %4517 = vrot.lane.b32.xlu1 %v11305_v30, %s5208_s1  ;;  %4515 = vrot.lane.b32.xlu0 %v11306_v2, %s5208_s1  ;;  %v11317_v30 = vld [vmem:[#allocation317_spill] sm:$0xff]  ;;  %v11327_v49 = vld [vmem:[#allocation231_spill] sm:$0xff] }
 0x7e8   :  { %4519 = vrot.lane.b32.xlu2 %v11311_v26, %s5208_s1  ;;  %v3818_v43 = vadd.f32 %v11316_v4, %v3602_v62  ;;  %v3817_v2 = vadd.f32 %v11317_v30, %v3601_v1  ;;  %v3116_v26 = vadd.f32 %v11321_v57, %v11320_v48  ;;  %v3412_v62 = vadd.f32 %v11327_v49, %v3115_v15  ;;  %v11328_v1 = vld [vmem:[#allocation17_spill] sm:$0xff]  ;;  %v11329_v4 = vld [vmem:[#allocation172_spill] sm:$0xff] }
 0x7e9   :  { %v4322_v8 = vpop.permute.xlu1 %4321  ;;  %v4320_v61 = vpop.permute.xlu0 %4319 }
 0x7ea   :  { %v9417_v17 = vadd.f32 %v4322_v8, %v4215_v46  ;;  %v4342_v3 = vpop.permute.xlu2 %4341  ;;  %v9419_v10 = vadd.f32 %v4320_v61, %v4214_v31  ;;  %v4026_v29 = vadd.f32 %v11322_v59, %v3818_v43  ;;  %v4025_v46 = vadd.f32 %v11323_v34, %v3817_v2  ;;  %v11324_v8 = vld [vmem:[#allocation171_spill] sm:$0xff]  ;;  %v11325_v31 = vld [vmem:[#allocation169_spill] sm:$0xff]  ;;  %v11330_v2 = vld [vmem:[#allocation272_spill] sm:$0xff] }
 0x7eb   :  { %v9421_v9 = vadd.f32 %v4342_v3, %v4225_v60  ;;  %v11326_v60 = vld [vmem:[#allocation230_spill] sm:$0xff]  ;;  %v3604_v48 = vadd.f32 %v11331_v54, %v3412_v62  ;;  %v11346_v54 = vld [vmem:[#allocation233_spill] sm:$0xff] }
 0x7ec   :  { %v3413_v61 = vadd.f32 %v11326_v60, %v3116_v26  ;;  %v4218_v7 = vadd.f32 %v8947_v38, %v4026_v29  ;;  %v4217_v3 = vadd.f32 %v11328_v1, %v4025_v46  ;;  %v11334_v26 = vld [vmem:[#allocation34_spill] sm:$0xff]  ;;  %v11336_v38 = vld [vmem:[#allocation319_spill] sm:$0xff]  ;;  %v11337_v46 = vld [vmem:[#allocation320_spill] sm:$0xff] }
 0x7ed   :  { %11315 = vst [vmem:[#allocation72_spill] sm:$0xff] %v9421_v9  ;;  %v11339_v60 = vld [vmem:[#allocation180_spill] sm:$0xff] }
 0x7ee   :  { %v3605_v51 = vadd.f32 %v11330_v2, %v3413_v61  ;;  %v11340_v1 = vld [vmem:[#allocation56_spill] sm:$0xff] }
 0x7ef   :  { %4523 = vrot.lane.b32.xlu1 %v11324_v8, %s5208_s1  ;;  %4521 = vrot.lane.b32.xlu0 %v11325_v31, %s5208_s1  ;;  %v3820_v8 = vadd.f32 %v11337_v46, %v3604_v48  ;;  %v11338_v31 = vld [vmem:[#allocation126_spill] sm:$0xff]  ;;  %v11342_v2 = vld [vmem:[#allocation348_spill] sm:$0xff] }
 0x7f0   :  { %4525 = vrot.lane.b32.xlu2 %v11329_v4, %s5208_s1  ;;  %v3821_v29 = vadd.f32 %v11336_v38, %v3605_v51  ;;  %v3118_v49 = vadd.f32 %v11339_v60, %v11338_v31  ;;  %v11341_v4 = vld [vmem:[#allocation185_spill] sm:$0xff]  ;;  %v11349_v46 = vld [vmem:[#allocation8_spill] sm:$0xff]  ;;  %v11350_v60 = vld [vmem:[#allocation94_spill] sm:$0xff] }
 0x7f1   :  { %v4328_v43 = vpop.permute.xlu1 %4327  ;;  %v4326_v30 = vpop.permute.xlu0 %4325  ;;  %v3119_v61 = vadd.f32 %v11341_v4, %v11340_v1  ;;  %v11351_v4 = vld [vmem:[#allocation44_spill] sm:$0xff] }
 0x7f2   :  { %v9443_v57 = vadd.f32 %v4328_v43, %v4218_v7  ;;  %v4348_v59 = vpop.permute.xlu2 %4347  ;;  %v9445_v34 = vadd.f32 %v4326_v30, %v4217_v3  ;;  %v4029_v62 = vadd.f32 %v11342_v2, %v3821_v29  ;;  %v11343_v7 = vld [vmem:[#allocation349_spill] sm:$0xff]  ;;  %v11344_v3 = vld [vmem:[#allocation318_spill] sm:$0xff] }
 0x7f3   :  { %v9448_v15 = vadd.f32 %v4348_v59, %v11334_v26  ;;  %v4028_v43 = vadd.f32 %v11343_v7, %v3820_v8  ;;  %v11345_v30 = vld [vmem:[#allocation174_spill] sm:$0xff]  ;;  %v3416_v51 = vadd.f32 %v11346_v54, %v3119_v61  ;;  %v11348_v26 = vld [vmem:[#allocation3_spill] sm:$0xff]  ;;  %v11354_v54 = vld [vmem:[#allocation177_spill] sm:$0xff] }
 0x7f4   :  { %11332 = vst [vmem:[#allocation192_spill] sm:$0xff] %v9443_v57  ;;  %v11347_v59 = vld [vmem:[#allocation234_spill] sm:$0xff]  ;;  %v4221_v38 = vadd.f32 %v11348_v26, %v4029_v62  ;;  %v11352_v7 = vld [vmem:[#allocation275_spill] sm:$0xff]  ;;  %v11355_v26 = vld [vmem:[#allocation321_spill] sm:$0xff] }
 0x7f5   :  { %11333 = vst [vmem:[#allocation229_spill] sm:$0xff] %v9445_v34  ;;  %v3415_v48 = vadd.f32 %v11347_v59, %v3118_v49  ;;  %v4220_v31 = vadd.f32 %v11349_v46, %v4028_v43  ;;  %v9471_v8 = vld [vmem:[%s9811_s4] ss:$0 sm:$0xff]  ;;  %v3608_v2 = vadd.f32 %v11351_v4, %v3416_v51  ;;  %v11353_v43 = vld [vmem:[#allocation127_spill] sm:$0xff] }
 0x7f6   :  { %11335 = vst [vmem:[#allocation271_spill] sm:$0xff] %v9448_v15  ;;  %v11356_v15 = vld [vmem:[#allocation350_spill] sm:$0xff]  ;;  %v11357_v57 = vld [vmem:[#allocation351_spill] sm:$0xff] }
 0x7f7   :  { %4529 = vrot.lane.b32.xlu1 %v11344_v3, %s5208_s1  ;;  %4527 = vrot.lane.b32.xlu0 %v11345_v30, %s5208_s1  ;;  %v3607_v61 = vadd.f32 %v11352_v7, %v3415_v48  ;;  %v3824_v59 = vadd.f32 %v11354_v54, %v3608_v2  ;;  %v11358_v48 = vld [vmem:[#allocation182_spill] sm:$0xff]  ;;  %v11362_v2 = vld [vmem:[#allocation183_spill] sm:$0xff] }
 0x7f8   :  { %4531 = vrot.lane.b32.xlu2 %v11350_v60, %s5208_s1  ;;  %v11363_v54 = vld [vmem:[#allocation322_spill] sm:$0xff] }
 0x7f9   :  { %v4334_v29 = vpop.permute.xlu1 %4333  ;;  %v4332_v1 = vpop.permute.xlu0 %4331  ;;  %v3823_v46 = vadd.f32 %v11355_v26, %v3607_v61  ;;  %v4032_v34 = vadd.f32 %v11356_v15, %v3824_v59  ;;  %v11364_v59 = vld [vmem:[#allocation184_spill] sm:$0xff] }
 0x7fa   :  { %v9475_v3 = vadd.f32 %v4334_v29, %v4221_v38  ;;  %v4466_v49 = vpop.permute.xlu2 %4465  ;;  %v9477_v62 = vadd.f32 %v4332_v1, %v4220_v31  ;;  %v11359_v38 = vld [vmem:[#allocation178_spill] sm:$0xff]  ;;  %v11360_v31 = vld [vmem:[#allocation24_spill] sm:$0xff] }
 0x7fb   :  { %v4607_v30 = vadd.f32 %v4466_v49, %v11353_v43  ;;  %v4031_v9 = vadd.f32 %v11357_v57, %v3823_v46  ;;  %v4224_v29 = vadd.f32 %v11360_v31, %v4032_v34  ;;  %v11361_v1 = vld [vmem:[#allocation64_spill] sm:$0xff] }
 0x7fc   :  { %v11365_v26 = vld [vmem:[#allocation104_spill] sm:$0xff] }
 0x7fd   :  { %v4658_v60 = vadd.f32 %v9471_v8, %v4607_v30  ;;  %v4223_v4 = vadd.f32 %v11361_v1, %v4031_v9 }
 0x7ff   :  { %v4706_v51 = vmax.f32 %v4658_v60, 0.0  ;;  %4535 = vrot.lane.b32.xlu1 %v11358_v48, %s5208_s1  ;;  %4533 = vrot.lane.b32.xlu0 %v11359_v38, %s5208_s1 }
 0x800   :  { %4537 = vrot.lane.b32.xlu2 %v11362_v2, %s5208_s1  ;;  %v11368_v2 = vld [vmem:[#allocation194_spill] sm:$0xff] }
 0x801   :  { %v4754_v7 = vpack.c.bf16 %v4706_v51, %v4706_v51  ;;  %v4340_v61 = vpop.permute.xlu1 %4339  ;;  %v4338_v15 = vpop.permute.xlu0 %4337 }
 0x802   :  { %v9493_v49 = vadd.f32 %v4340_v61, %v4224_v29  ;;  %v4472_v57 = vpop.permute.xlu2 %4471  ;;  %v9495_v43 = vadd.f32 %v4338_v15, %v4223_v4  ;;  %v11366_v4 = vld [vmem:[#allocation193_spill] sm:$0xff] }
 0x803   :  { %4803 = vst.msk [vmem:[%s9812_s5 + $0x8] sm:$0xf] %vm4800_vm5, %v4754_v7  ;;  %v4610_v34 = vadd.f32 %v4472_v57, %v8996_v42 }
 0x805   :  { %v4661_v9 = vadd.f32 %v9471_v8, %v4610_v34 }
 0x807   :  { %v4709_v30 = vmax.f32 %v4661_v9, 0.0  ;;  %4541 = vrot.lane.b32.xlu1 %v11363_v54, %s5208_s1  ;;  %4539 = vrot.lane.b32.xlu0 %v11364_v59, %s5208_s1 }
 0x808   :  { %4543 = vrot.lane.b32.xlu2 %v11365_v26, %s5208_s1 }
 0x809   :  { %v4757_v46 = vpack.c.bf16 %v4709_v30, %v4709_v30  ;;  %v4346_v60 = vpop.permute.xlu1 %4345  ;;  %v4344_v51 = vpop.permute.xlu0 %4343 }
 0x80a   :  { %v9510_v48 = vadd.f32 %v4346_v60, %v9024_v55  ;;  %v4478_v38 = vpop.permute.xlu2 %4477  ;;  %v9513_v42 = vadd.f32 %v4344_v51, %v9026_v23  ;;  %v11367_v55 = vld [vmem:[#allocation189_spill] sm:$0xff] }
 0x80b   :  { %4806 = vst.msk [vmem:[%s9812_s5 + $0x14] sm:$0xf] %vm4800_vm5, %v4757_v46  ;;  %v4613_v31 = vadd.f32 %v4478_v38, %v9029_v45  ;;  %v11371_v38 = vld [vmem:[#allocation33_spill] sm:$0xff] }
 0x80d   :  { %v4664_v29 = vadd.f32 %v9471_v8, %v4613_v31 }
 0x80f   :  { %v4712_v1 = vmax.f32 %v4664_v29, 0.0  ;;  %4547 = vrot.lane.b32.xlu1 %v11366_v4, %s5208_s1  ;;  %4545 = vrot.lane.b32.xlu0 %v11367_v55, %s5208_s1 }
 0x810   :  { %4549 = vrot.lane.b32.xlu2 %v11368_v2, %s5208_s1 }
 0x811   :  { %v4760_v23 = vpack.c.bf16 %v4712_v1, %v4712_v1  ;;  %v4464_v7 = vpop.permute.xlu1 %4463  ;;  %v4462_v61 = vpop.permute.xlu0 %4461 }
 0x812   :  { %v4606_v15 = vadd.f32 %v4464_v7, %v9057_v58  ;;  %v4484_v57 = vpop.permute.xlu2 %4483  ;;  %v4605_v45 = vadd.f32 %v4462_v61, %v9059_v39  ;;  %v11369_v58 = vld [vmem:[#allocation188_spill] sm:$0xff]  ;;  %v11370_v39 = vld [vmem:[#allocation195_spill] sm:$0xff] }
 0x813   :  { %4809 = vst.msk [vmem:[%s9812_s5 + $0x20] sm:$0xf] %vm4800_vm5, %v4760_v23  ;;  %v4616_v34 = vadd.f32 %v4484_v57, %v9062_v53 }
 0x814   :  { %v4657_v9 = vadd.f32 %v9471_v8, %v4606_v15  ;;  %v4656_v30 = vadd.f32 %v9471_v8, %v4605_v45 }
 0x815   :  { %v4667_v54 = vadd.f32 %v9471_v8, %v4616_v34 }
 0x816   :  { %v4705_v59 = vmax.f32 %v4657_v9, 0.0  ;;  %v4704_v26 = vmax.f32 %v4656_v30, 0.0 }
 0x817   :  { %v4715_v46 = vmax.f32 %v4667_v54, 0.0  ;;  %4553 = vrot.lane.b32.xlu1 %v11369_v58, %s5208_s1  ;;  %4551 = vrot.lane.b32.xlu0 %v11370_v39, %s5208_s1 }
 0x818   :  { %v4753_v60 = vpack.c.bf16 %v4705_v59, %v4705_v59  ;;  %v4752_v51 = vpack.c.bf16 %v4704_v26, %v4704_v26  ;;  %4555 = vrot.lane.b32.xlu2 %v11371_v38, %s5208_s1 }
 0x819   :  { %v4763_v53 = vpack.c.bf16 %v4715_v46, %v4715_v46  ;;  %v4470_v31 = vpop.permute.xlu1 %4469  ;;  %v4468_v29 = vpop.permute.xlu0 %4467 }
 0x81a   :  { %4802 = vst.msk [vmem:[%s9812_s5 + $0x4] sm:$0xf] %vm4800_vm5, %v4753_v60  ;;  %v4609_v1 = vadd.f32 %v4470_v31, %v9090_v63  ;;  %v4490_v4 = vpop.permute.xlu2 %4489  ;;  %v4608_v55 = vadd.f32 %v4468_v29, %v9092_v5 }
 0x81b   :  { %4812 = vst.msk [vmem:[%s9812_s5 + $0x2c] sm:$0xf] %vm4800_vm5, %v4763_v53  ;;  %v4619_v2 = vadd.f32 %v4490_v4, %v9095_v12 }
 0x81c   :  { %4801 = vst.msk [vmem:[%s9812_s5] sm:$0xf] %vm4800_vm5, %v4752_v51  ;;  %v4660_v23 = vadd.f32 %v9471_v8, %v4609_v1  ;;  %v4659_v7 = vadd.f32 %v9471_v8, %v4608_v55 }
 0x81d   :  { %v4670_v63 = vadd.f32 %v9471_v8, %v4619_v2 }
 0x81e   :  { %v4708_v61 = vmax.f32 %v4660_v23, 0.0  ;;  %v4707_v5 = vmax.f32 %v4659_v7, 0.0 }
 0x81f   :  { %v4718_v15 = vmax.f32 %v4670_v63, 0.0 }
 0x820   :  { %v4756_v57 = vpack.c.bf16 %v4708_v61, %v4708_v61  ;;  %v4755_v45 = vpack.c.bf16 %v4707_v5, %v4707_v5 }
 0x821   :  { %v4766_v34 = vpack.c.bf16 %v4718_v15, %v4718_v15  ;;  %v4476_v9 = vpop.permute.xlu1 %4475  ;;  %v4474_v30 = vpop.permute.xlu0 %4473 }
 0x822   :  { %4805 = vst.msk [vmem:[%s9812_s5 + $0x10] sm:$0xf] %vm4800_vm5, %v4756_v57  ;;  %v4612_v12 = vadd.f32 %v4476_v9, %v9123_v44  ;;  %v4496_v54 = vpop.permute.xlu2 %4495  ;;  %v4611_v59 = vadd.f32 %v4474_v30, %v9125_v50 }
 0x823   :  { %4815 = vst.msk [vmem:[%s9812_s5 + $0x38] sm:$0xf] %vm4800_vm5, %v4766_v34  ;;  %v4622_v26 = vadd.f32 %v4496_v54, %v9128_v21 }
 0x824   :  { %4804 = vst.msk [vmem:[%s9812_s5 + $0xc] sm:$0xf] %vm4800_vm5, %v4755_v45  ;;  %v4663_v46 = vadd.f32 %v9471_v8, %v4612_v12  ;;  %v4662_v58 = vadd.f32 %v9471_v8, %v4611_v59 }
 0x825   :  { %v4673_v44 = vadd.f32 %v9471_v8, %v4622_v26 }
 0x826   :  { %v4711_v39 = vmax.f32 %v4663_v46, 0.0  ;;  %v4710_v50 = vmax.f32 %v4662_v58, 0.0 }
 0x827   :  { %v4721_v60 = vmax.f32 %v4673_v44, 0.0 }
 0x828   :  { %v4759_v51 = vpack.c.bf16 %v4711_v39, %v4711_v39  ;;  %v4758_v38 = vpack.c.bf16 %v4710_v50, %v4710_v50 }
 0x829   :  { %v4769_v53 = vpack.c.bf16 %v4721_v60, %v4721_v60  ;;  %v4482_v31 = vpop.permute.xlu1 %4481  ;;  %v4480_v29 = vpop.permute.xlu0 %4479 }
 0x82a   :  { %4808 = vst.msk [vmem:[%s9812_s5 + $0x1c] sm:$0xf] %vm4800_vm5, %v4759_v51  ;;  %v4615_v21 = vadd.f32 %v4482_v31, %v9156_v24  ;;  %v4502_v1 = vpop.permute.xlu2 %4501  ;;  %v4614_v4 = vadd.f32 %v4480_v29, %v9158_v36 }
 0x82b   :  { %4818 = vst.msk [vmem:[%s9812_s5 + $0x44] sm:$0xf] %vm4800_vm5, %v4769_v53  ;;  %v4625_v55 = vadd.f32 %v4502_v1, %v9161_v18 }
 0x82c   :  { %4807 = vst.msk [vmem:[%s9812_s5 + $0x18] sm:$0xf] %vm4800_vm5, %v4758_v38  ;;  %v4666_v2 = vadd.f32 %v9471_v8, %v4615_v21  ;;  %v4665_v23 = vadd.f32 %v9471_v8, %v4614_v4 }
 0x82d   :  { %v4676_v24 = vadd.f32 %v9471_v8, %v4625_v55 }
 0x82e   :  { %v4714_v7 = vmax.f32 %v4666_v2, 0.0  ;;  %v4713_v36 = vmax.f32 %v4665_v23, 0.0 }
 0x82f   :  { %v4724_v63 = vmax.f32 %v4676_v24, 0.0 }
 0x830   :  { %v4762_v61 = vpack.c.bf16 %v4714_v7, %v4714_v7  ;;  %v4761_v5 = vpack.c.bf16 %v4713_v36, %v4713_v36 }
 0x831   :  { %v4772_v15 = vpack.c.bf16 %v4724_v63, %v4724_v63  ;;  %v4488_v57 = vpop.permute.xlu1 %4487  ;;  %v4486_v45 = vpop.permute.xlu0 %4485 }
 0x832   :  { %4811 = vst.msk [vmem:[%s9812_s5 + $0x28] sm:$0xf] %vm4800_vm5, %v4762_v61  ;;  %v4618_v18 = vadd.f32 %v4488_v57, %v9189_v52  ;;  %v4508_v34 = vpop.permute.xlu2 %4507  ;;  %v4617_v9 = vadd.f32 %v4486_v45, %v9191_v28 }
 0x833   :  { %4821 = vst.msk [vmem:[%s9812_s5 + $0x50] sm:$0xf] %vm4800_vm5, %v4772_v15  ;;  %v4628_v30 = vadd.f32 %v4508_v34, %v9194_v56 }
 0x834   :  { %4810 = vst.msk [vmem:[%s9812_s5 + $0x24] sm:$0xf] %vm4800_vm5, %v4761_v5  ;;  %v4669_v12 = vadd.f32 %v9471_v8, %v4618_v18  ;;  %v4668_v54 = vadd.f32 %v9471_v8, %v4617_v9 }
 0x835   :  { %v4679_v52 = vadd.f32 %v9471_v8, %v4628_v30 }
 0x836   :  { %v4717_v59 = vmax.f32 %v4669_v12, 0.0  ;;  %v4716_v28 = vmax.f32 %v4668_v54, 0.0 }
 0x837   :  { %v4727_v26 = vmax.f32 %v4679_v52, 0.0 }
 0x838   :  { %v4765_v46 = vpack.c.bf16 %v4717_v59, %v4717_v59  ;;  %v4764_v58 = vpack.c.bf16 %v4716_v28, %v4716_v28 }
 0x839   :  { %v4775_v44 = vpack.c.bf16 %v4727_v26, %v4727_v26  ;;  %v4494_v39 = vpop.permute.xlu1 %4493  ;;  %v4492_v50 = vpop.permute.xlu0 %4491 }
 0x83a   :  { %4814 = vst.msk [vmem:[%s9812_s5 + $0x34] sm:$0xf] %vm4800_vm5, %v4765_v46  ;;  %v4621_v56 = vadd.f32 %v4494_v39, %v9222_v6  ;;  %v4514_v60 = vpop.permute.xlu2 %4513  ;;  %v4620_v51 = vadd.f32 %v4492_v50, %v9224_v19 }
 0x83b   :  { %4824 = vst.msk [vmem:[%s9812_s5 + $0x5c] sm:$0xf] %vm4800_vm5, %v4775_v44  ;;  %v4631_v38 = vadd.f32 %v4514_v60, %v9227_v32 }
 0x83c   :  { %4813 = vst.msk [vmem:[%s9812_s5 + $0x30] sm:$0xf] %vm4800_vm5, %v4764_v58  ;;  %v4672_v53 = vadd.f32 %v9471_v8, %v4621_v56  ;;  %v4671_v31 = vadd.f32 %v9471_v8, %v4620_v51 }
 0x83d   :  { %v4682_v6 = vadd.f32 %v9471_v8, %v4631_v38 }
 0x83e   :  { %v4720_v29 = vmax.f32 %v4672_v53, 0.0  ;;  %v4719_v19 = vmax.f32 %v4671_v31, 0.0 }
 0x83f   :  { %v4730_v21 = vmax.f32 %v4682_v6, 0.0 }
 0x840   :  { %v4768_v1 = vpack.c.bf16 %v4720_v29, %v4720_v29  ;;  %v4767_v4 = vpack.c.bf16 %v4719_v19, %v4719_v19 }
 0x841   :  { %v4778_v55 = vpack.c.bf16 %v4730_v21, %v4730_v21  ;;  %v4500_v2 = vpop.permute.xlu1 %4499  ;;  %v4498_v23 = vpop.permute.xlu0 %4497 }
 0x842   :  { %4817 = vst.msk [vmem:[%s9812_s5 + $0x40] sm:$0xf] %vm4800_vm5, %v4768_v1  ;;  %v4624_v32 = vadd.f32 %v4500_v2, %v9255_v27  ;;  %v4520_v24 = vpop.permute.xlu2 %4519  ;;  %v4623_v7 = vadd.f32 %v4498_v23, %v9257_v25 }
 0x843   :  { %4827 = vst.msk [vmem:[%s9812_s5 + $0x68] sm:$0xf] %vm4800_vm5, %v4778_v55  ;;  %v4634_v36 = vadd.f32 %v4520_v24, %v9260_v37 }
 0x844   :  { %4816 = vst.msk [vmem:[%s9812_s5 + $0x3c] sm:$0xf] %vm4800_vm5, %v4767_v4  ;;  %v4675_v63 = vadd.f32 %v9471_v8, %v4624_v32  ;;  %v4674_v61 = vadd.f32 %v9471_v8, %v4623_v7 }
 0x845   :  { %v4685_v27 = vadd.f32 %v9471_v8, %v4634_v36 }
 0x846   :  { %v4723_v5 = vmax.f32 %v4675_v63, 0.0  ;;  %v4722_v25 = vmax.f32 %v4674_v61, 0.0 }
 0x847   :  { %v4733_v15 = vmax.f32 %v4685_v27, 0.0 }
 0x848   :  { %v4771_v57 = vpack.c.bf16 %v4723_v5, %v4723_v5  ;;  %v4770_v45 = vpack.c.bf16 %v4722_v25, %v4722_v25 }
 0x849   :  { %v4781_v18 = vpack.c.bf16 %v4733_v15, %v4733_v15  ;;  %v4506_v34 = vpop.permute.xlu1 %4505  ;;  %v4504_v9 = vpop.permute.xlu0 %4503 }
 0x84a   :  { %4820 = vst.msk [vmem:[%s9812_s5 + $0x4c] sm:$0xf] %vm4800_vm5, %v4771_v57  ;;  %v4627_v37 = vadd.f32 %v4506_v34, %v9288_v0  ;;  %v4526_v30 = vpop.permute.xlu2 %4525  ;;  %v4626_v12 = vadd.f32 %v4504_v9, %v9290_v35 }
 0x84b   :  { %4830 = vst.msk [vmem:[%s9812_s5 + $0x74] sm:$0xf] %vm4800_vm5, %v4781_v18  ;;  %v4637_v54 = vadd.f32 %v4526_v30, %v9293_v41 }
 0x84c   :  { %4819 = vst.msk [vmem:[%s9812_s5 + $0x48] sm:$0xf] %vm4800_vm5, %v4770_v45  ;;  %v4678_v52 = vadd.f32 %v9471_v8, %v4627_v37  ;;  %v4677_v59 = vadd.f32 %v9471_v8, %v4626_v12 }
 0x84d   :  { %v4688_v0 = vadd.f32 %v9471_v8, %v4637_v54 }
 0x84e   :  { %v4726_v28 = vmax.f32 %v4678_v52, 0.0  ;;  %v4725_v35 = vmax.f32 %v4677_v59, 0.0 }
 0x84f   :  { %v4736_v26 = vmax.f32 %v4688_v0, 0.0 }
 0x850   :  { %v4774_v46 = vpack.c.bf16 %v4726_v28, %v4726_v28  ;;  %v4773_v58 = vpack.c.bf16 %v4725_v35, %v4725_v35  ;;  %v11372_v35 = vld [vmem:[#allocation72_spill] sm:$0xff] }
 0x851   :  { %v4784_v44 = vpack.c.bf16 %v4736_v26, %v4736_v26  ;;  %v4512_v39 = vpop.permute.xlu1 %4511  ;;  %v4510_v50 = vpop.permute.xlu0 %4509 }
 0x852   :  { %4823 = vst.msk [vmem:[%s9812_s5 + $0x58] sm:$0xf] %vm4800_vm5, %v4774_v46  ;;  %v4630_v41 = vadd.f32 %v4512_v39, %v9321_v33  ;;  %v4532_v56 = vpop.permute.xlu2 %4531  ;;  %v4629_v60 = vadd.f32 %v4510_v50, %v9323_v20 }
 0x853   :  { %4833 = vst.msk [vmem:[%s9812_s5 + $0x80] sm:$0xf] %vm4800_vm5, %v4784_v44  ;;  %v4640_v51 = vadd.f32 %v4532_v56, %v9326_v14 }
 0x854   :  { %4822 = vst.msk [vmem:[%s9812_s5 + $0x54] sm:$0xf] %vm4800_vm5, %v4773_v58  ;;  %v4681_v38 = vadd.f32 %v9471_v8, %v4630_v41  ;;  %v4680_v53 = vadd.f32 %v9471_v8, %v4629_v60 }
 0x855   :  { %v4691_v33 = vadd.f32 %v9471_v8, %v4640_v51 }
 0x856   :  { %v4729_v31 = vmax.f32 %v4681_v38, 0.0  ;;  %v4728_v20 = vmax.f32 %v4680_v53, 0.0  ;;  %v11373_v38 = vld [vmem:[#allocation192_spill] sm:$0xff] }
 0x857   :  { %v4739_v6 = vmax.f32 %v4691_v33, 0.0 }
 0x858   :  { %v4777_v29 = vpack.c.bf16 %v4729_v31, %v4729_v31  ;;  %v4776_v19 = vpack.c.bf16 %v4728_v20, %v4728_v20  ;;  %v11374_v31 = vld [vmem:[#allocation229_spill] sm:$0xff] }
 0x859   :  { %v4787_v21 = vpack.c.bf16 %v4739_v6, %v4739_v6  ;;  %v4518_v1 = vpop.permute.xlu1 %4517  ;;  %v4516_v4 = vpop.permute.xlu0 %4515  ;;  %v11375_v6 = vld [vmem:[#allocation271_spill] sm:$0xff] }
 0x85a   :  { %4826 = vst.msk [vmem:[%s9812_s5 + $0x64] sm:$0xf] %vm4800_vm5, %v4777_v29  ;;  %v4633_v14 = vadd.f32 %v4518_v1, %v9354_v11  ;;  %v4538_v55 = vpop.permute.xlu2 %4537  ;;  %v4632_v2 = vadd.f32 %v4516_v4, %v9356_v16 }
 0x85b   :  { %4836 = vst.msk [vmem:[%s9812_s5 + $0x8c] sm:$0xf] %vm4800_vm5, %v4787_v21  ;;  %v4643_v23 = vadd.f32 %v4538_v55, %v9359_v47 }
 0x85c   :  { %4825 = vst.msk [vmem:[%s9812_s5 + $0x60] sm:$0xf] %vm4800_vm5, %v4776_v19  ;;  %v4684_v32 = vadd.f32 %v9471_v8, %v4633_v14  ;;  %v4683_v24 = vadd.f32 %v9471_v8, %v4632_v2 }
 0x85d   :  { %v4694_v11 = vadd.f32 %v9471_v8, %v4643_v23 }
 0x85e   :  { %v4732_v7 = vmax.f32 %v4684_v32, 0.0  ;;  %v4731_v16 = vmax.f32 %v4683_v24, 0.0 }
 0x85f   :  { %v4742_v36 = vmax.f32 %v4694_v11, 0.0 }
 0x860   :  { %v4780_v63 = vpack.c.bf16 %v4732_v7, %v4732_v7  ;;  %v4779_v61 = vpack.c.bf16 %v4731_v16, %v4731_v16 }
 0x861   :  { %v4790_v27 = vpack.c.bf16 %v4742_v36, %v4742_v36  ;;  %v4524_v5 = vpop.permute.xlu1 %4523  ;;  %v4522_v25 = vpop.permute.xlu0 %4521 }
 0x862   :  { %4829 = vst.msk [vmem:[%s9812_s5 + $0x70] sm:$0xf] %vm4800_vm5, %v4780_v63  ;;  %v4636_v47 = vadd.f32 %v4524_v5, %v9387_v13  ;;  %v4544_v15 = vpop.permute.xlu2 %4543  ;;  %v4635_v57 = vadd.f32 %v4522_v25, %v9389_v22 }
 0x863   :  { %4839 = vst.msk [vmem:[%s9812_s5 + $0x98] sm:$0xf] %vm4800_vm5, %v4790_v27  ;;  %v4646_v45 = vadd.f32 %v4544_v15, %v9392_v40 }
 0x864   :  { %4828 = vst.msk [vmem:[%s9812_s5 + $0x6c] sm:$0xf] %vm4800_vm5, %v4779_v61  ;;  %v4687_v18 = vadd.f32 %v9471_v8, %v4636_v47  ;;  %v4686_v34 = vadd.f32 %v9471_v8, %v4635_v57 }
 0x865   :  { %v4697_v13 = vadd.f32 %v9471_v8, %v4646_v45 }
 0x866   :  { %v4735_v9 = vmax.f32 %v4687_v18, 0.0  ;;  %v4734_v22 = vmax.f32 %v4686_v34, 0.0 }
 0x867   :  { %v4745_v37 = vmax.f32 %v4697_v13, 0.0 }
 0x868   :  { %v4783_v30 = vpack.c.bf16 %v4735_v9, %v4735_v9  ;;  %v4782_v12 = vpack.c.bf16 %v4734_v22, %v4734_v22 }
 0x869   :  { %v4793_v54 = vpack.c.bf16 %v4745_v37, %v4745_v37  ;;  %v4530_v52 = vpop.permute.xlu1 %4529  ;;  %v4528_v59 = vpop.permute.xlu0 %4527 }
 0x86a   :  { %4832 = vst.msk [vmem:[%s9812_s5 + $0x7c] sm:$0xf] %vm4800_vm5, %v4783_v30  ;;  %v4639_v40 = vadd.f32 %v4530_v52, %v9417_v17  ;;  %v4550_v0 = vpop.permute.xlu2 %4549  ;;  %v4638_v28 = vadd.f32 %v4528_v59, %v9419_v10 }
 0x86b   :  { %4842 = vst.msk [vmem:[%s9812_s5 + $0xa4] sm:$0xf] %vm4800_vm5, %v4793_v54  ;;  %v4649_v26 = vadd.f32 %v4550_v0, %v11372_v35 }
 0x86c   :  { %4831 = vst.msk [vmem:[%s9812_s5 + $0x78] sm:$0xf] %vm4800_vm5, %v4782_v12  ;;  %v4690_v46 = vadd.f32 %v9471_v8, %v4639_v40  ;;  %v4689_v58 = vadd.f32 %v9471_v8, %v4638_v28 }
 0x86d   :  { %v4700_v17 = vadd.f32 %v9471_v8, %v4649_v26 }
 0x86e   :  { %v4738_v44 = vmax.f32 %v4690_v46, 0.0  ;;  %v4737_v10 = vmax.f32 %v4689_v58, 0.0 }
 0x86f   :  { %v4748_v39 = vmax.f32 %v4700_v17, 0.0 }
 0x870   :  { %v4786_v50 = vpack.c.bf16 %v4738_v44, %v4738_v44  ;;  %v4785_v41 = vpack.c.bf16 %v4737_v10, %v4737_v10 }
 0x871   :  { %v4796_v56 = vpack.c.bf16 %v4748_v39, %v4748_v39  ;;  %v4536_v60 = vpop.permute.xlu1 %4535  ;;  %v4534_v51 = vpop.permute.xlu0 %4533 }
 0x872   :  { %4835 = vst.msk [vmem:[%s9812_s5 + $0x88] sm:$0xf] %vm4800_vm5, %v4786_v50  ;;  %v4642_v53 = vadd.f32 %v4536_v60, %v11373_v38  ;;  %v4556_v33 = vpop.permute.xlu2 %4555  ;;  %v4641_v20 = vadd.f32 %v4534_v51, %v11374_v31 }
 0x873   :  { %4845 = vst.msk [vmem:[%s9812_s5 + $0xb0] sm:$0xf] %vm4800_vm5, %v4796_v56  ;;  %v4652_v29 = vadd.f32 %v4556_v33, %v11375_v6 }
 0x874   :  { %4834 = vst.msk [vmem:[%s9812_s5 + $0x84] sm:$0xf] %vm4800_vm5, %v4785_v41  ;;  %v4693_v19 = vadd.f32 %v9471_v8, %v4642_v53  ;;  %v4692_v21 = vadd.f32 %v9471_v8, %v4641_v20 }
 0x875   :  { %v4703_v1 = vadd.f32 %v9471_v8, %v4652_v29 }
 0x876   :  { %v4741_v4 = vmax.f32 %v4693_v19, 0.0  ;;  %v4740_v14 = vmax.f32 %v4692_v21, 0.0 }
 0x877   :  { %v4751_v55 = vmax.f32 %v4703_v1, 0.0 }
 0x878   :  { %v4789_v2 = vpack.c.bf16 %v4741_v4, %v4741_v4  ;;  %v4788_v23 = vpack.c.bf16 %v4740_v14, %v4740_v14 }
 0x879   :  { %v4799_v32 = vpack.c.bf16 %v4751_v55, %v4751_v55  ;;  %v4542_v24 = vpop.permute.xlu1 %4541  ;;  %v4540_v11 = vpop.permute.xlu0 %4539 }
 0x87a   :  { %4838 = vst.msk [vmem:[%s9812_s5 + $0x94] sm:$0xf] %vm4800_vm5, %v4789_v2  ;;  %v4645_v7 = vadd.f32 %v4542_v24, %v9475_v3  ;;  %v4644_v16 = vadd.f32 %v4540_v11, %v9477_v62 }
 0x87b   :  { %4848 = vst.msk [vmem:[%s9812_s5 + $0xbc] sm:$0xf] %vm4800_vm5, %v4799_v32 }
 0x87c   :  { %4837 = vst.msk [vmem:[%s9812_s5 + $0x90] sm:$0xf] %vm4800_vm5, %v4788_v23  ;;  %v4696_v36 = vadd.f32 %v9471_v8, %v4645_v7  ;;  %v4695_v63 = vadd.f32 %v9471_v8, %v4644_v16 }
 0x87e   :  { %v4744_v61 = vmax.f32 %v4696_v36, 0.0  ;;  %v4743_v27 = vmax.f32 %v4695_v63, 0.0 }
 0x880   :  { %v4792_v5 = vpack.c.bf16 %v4744_v61, %v4744_v61  ;;  %v4791_v3 = vpack.c.bf16 %v4743_v27, %v4743_v27 }
 0x881   :  { %v4548_v25 = vpop.permute.xlu1 %4547  ;;  %v4546_v62 = vpop.permute.xlu0 %4545 }
 0x882   :  { %4841 = vst.msk [vmem:[%s9812_s5 + $0xa0] sm:$0xf] %vm4800_vm5, %v4792_v5  ;;  %v4648_v47 = vadd.f32 %v4548_v25, %v9493_v49  ;;  %v4647_v15 = vadd.f32 %v4546_v62, %v9495_v43 }
 0x883   :  { %4840 = vst.msk [vmem:[%s9812_s5 + $0x9c] sm:$0xf] %vm4800_vm5, %v4791_v3 }
 0x884   :  { %v4699_v57 = vadd.f32 %v9471_v8, %v4648_v47  ;;  %v4698_v45 = vadd.f32 %v9471_v8, %v4647_v15 }
 0x886   :  { %v4747_v18 = vmax.f32 %v4699_v57, 0.0  ;;  %v4746_v34 = vmax.f32 %v4698_v45, 0.0 }
 0x888   :  { %v4795_v13 = vpack.c.bf16 %v4747_v18, %v4747_v18  ;;  %v4794_v9 = vpack.c.bf16 %v4746_v34, %v4746_v34 }
 0x889   :  { %v4554_v22 = vpop.permute.xlu1 %4553  ;;  %v4552_v37 = vpop.permute.xlu0 %4551 }
 0x88a   :  { %4844 = vst.msk [vmem:[%s9812_s5 + $0xac] sm:$0xf] %vm4800_vm5, %v4795_v13  ;;  %v4651_v49 = vadd.f32 %v4554_v22, %v9510_v48  ;;  %v4650_v43 = vadd.f32 %v4552_v37, %v9513_v42 }
 0x88b   :  { %4843 = vst.msk [vmem:[%s9812_s5 + $0xa8] sm:$0xf] %vm4800_vm5, %v4794_v9 }
 0x88c   :  { %v4702_v30 = vadd.f32 %v9471_v8, %v4651_v49  ;;  %v4701_v12 = vadd.f32 %v9471_v8, %v4650_v43 }
 0x88e   :  { %v4750_v54 = vmax.f32 %v4702_v30, 0.0  ;;  %v4749_v52 = vmax.f32 %v4701_v12, 0.0 }
 0x890   :  { %v4798_v59 = vpack.c.bf16 %v4750_v54, %v4750_v54  ;;  %v4797_v40 = vpack.c.bf16 %v4749_v52, %v4749_v52 }
 0x892   :  { %4847 = vst.msk [vmem:[%s9812_s5 + $0xb8] sm:$0xf] %vm4800_vm5, %v4798_v59 }
 0x893   :  { %4846 = vst.msk [vmem:[%s9812_s5 + $0xb4] sm:$0xf] %vm4800_vm5, %v4797_v40 }

</bundles_post_ra>
